<compile_context>
chip_gen: v5e
topology: v5e:2x2
jax: 0.10.0
libtpu: 0.0.40
codegen_flags: <defaults>
</compile_context>

<pallas_src>
import functools
import math

import jax
import jax.numpy as jnp
from jax.experimental import pallas as pl
from jax.experimental.pallas import tpu as pltpu


def _length_kernel(x_ref, o_ref, *, eps):
    # x_ref: (blk, 128, D) tile of capsules; o_ref: (blk, 128) lane-dense out.
    x = x_ref[...].astype(jnp.float32)          # accumulate in f32
    sq_sum = jnp.sum(x * x, axis=-1)            # reduce capsule dim -> (blk, 128)
    o_ref[...] = jnp.sqrt(sq_sum + eps).astype(o_ref.dtype)


def _round_up(n: int, m: int) -> int:
    return ((n + m - 1) // m) * m


def length(x, eps=1e-20):
    """Pallas port of Length.forward: sqrt(sum(x^2, -1) + eps)."""
    *lead, D = x.shape
    caps = math.prod(lead) if lead else 1
    out_shape = tuple(lead)

    # ---- tiling: big row tiles, sized for ~4 MiB per input buffer ----------
    lane_bytes = _round_up(max(D, 1), 128) * 4          # padded f32 bytes / capsule
    target = max(2048, (4 * 1024 * 1024 // lane_bytes) // 2048 * 2048)
    cap_block = min(target, _round_up(caps, 2048))      # capsules per grid step
    caps_pad = _round_up(caps, cap_block)
    grid = (caps_pad // cap_block,)
    blk = cap_block // 128                               # output rows per step

    # ---- flatten + zero-pad so every step sees a full tile ------------------
    x2 = x.reshape(caps, D)
    if caps_pad != caps:
        x2 = jnp.pad(x2, ((0, caps_pad - caps), (0, 0)))
    x3 = x2.reshape(caps_pad // 128, 128, D)

    tile_f32_bytes = cap_block * _round_up(max(D, 1), 128) * 4
    vmem_limit = int(min(64 * 1024 * 1024, max(32 * 1024 * 1024, 4 * tile_f32_bytes)))

    kernel = functools.partial(_length_kernel, eps=float(eps))
    out = pl.pallas_call(
        kernel,
        out_shape=jax.ShapeDtypeStruct((caps_pad // 128, 128), x.dtype),
        grid_spec=pltpu.PrefetchScalarGridSpec(
            num_scalar_prefetch=0,
            grid=grid,
            in_specs=[pl.BlockSpec((blk, 128, D), lambda i: (i, 0, 0))],
            out_specs=pl.BlockSpec((blk, 128), lambda i: (i, 0)),
        ),
        compiler_params=pltpu.CompilerParams(
            dimension_semantics=("parallel",),
            vmem_limit_bytes=vmem_limit,
        ),
    )(x3)

    return out.reshape(caps_pad)[:caps].reshape(out_shape)


if __name__ == "__main__":
    key = jax.random.PRNGKey(0)

    # small capsule-style input: batch=2, num_caps=8, caps_dim=16
    x = jax.random.normal(key, (2, 8, 16), dtype=jnp.float32)
    out = jax.block_until_ready(length(x))
    ref = jnp.sqrt(jnp.sum(jnp.square(x), axis=-1) + 1e-20)
    assert out.shape == ref.shape == (2, 8)
    assert jnp.allclose(out, ref, atol=1e-5, rtol=1e-5)

    # a slightly larger case that exercises the multi-step grid + padding path
    x_big = jax.random.normal(jax.random.PRNGKey(1), (8, 2048, 16), dtype=jnp.float32)
    out_big = jax.block_until_ready(length(x_big))
    ref_big = jnp.sqrt(jnp.sum(jnp.square(x_big), axis=-1) + 1e-20)
    assert out_big.shape == ref_big.shape == (8, 2048)
    assert jnp.allclose(out_big, ref_big, atol=1e-5, rtol=1e-5)

    print("KERNEL_OK")
</pallas_src>

<mosaic_0001>
module attributes {stable_mosaic.version = 11 : i64} {
  func.func @_length_kernel(%arg0: i32, %arg1: memref<16x128x16xf32, #tpu.memory_space<vmem>>, %arg2: memref<16x128xf32, #tpu.memory_space<vmem>>) attributes {dimension_semantics = [#tpu.dimension_semantics<parallel>], iteration_bounds = array<i64: 1>, scalar_prefetch = 0 : i64, scratch_operands = 0 : i64, tpu.core_type = #tpu.core_type<tc>, window_params = [{transform_indices = @transform_0, window_bounds = array<i64: 16, 128, 16>}, {transform_indices = @transform_1, window_bounds = array<i64: 16, 128>}]} {
    %c0 = arith.constant 0 : index
    %c0_0 = arith.constant 0 : index
    %c0_1 = arith.constant 0 : index
    %0 = vector.load %arg1[%c0, %c0_0, %c0_1] : memref<16x128x16xf32, #tpu.memory_space<vmem>>, vector<16x128x16xf32>
    %1 = arith.mulf %0, %0 : vector<16x128x16xf32>
    %cst = arith.constant dense<0.000000e+00> : vector<16x128xf32>
    %2 = vector.multi_reduction <add>, %1, %cst [2] : vector<16x128x16xf32> to vector<16x128xf32>
    %cst_2 = arith.constant 9.99999968E-21 : f32
    %3 = vector.broadcast %cst_2 : f32 to vector<16x128xf32>
    %4 = arith.addf %2, %3 : vector<16x128xf32>
    %5 = math.sqrt %4 : vector<16x128xf32>
    %c0_3 = arith.constant 0 : index
    %c0_4 = arith.constant 0 : index
    %6 = vector.load %arg2[%c0_3, %c0_4] : memref<16x128xf32, #tpu.memory_space<vmem>>, vector<16x128xf32>
    tpu.vector_store %arg2[%c0_3, %c0_4], %5 {strides = array<i32>} : memref<16x128xf32, #tpu.memory_space<vmem>>, vector<16x128xf32>,
    return
  }
  func.func @transform_0(%arg0: i32) -> (i32, i32, i32) {
    %c0_i32 = arith.constant 0 : i32
    %c0_i32_0 = arith.constant 0 : i32
    %c0_i32_1 = arith.constant 0 : i32
    return %arg0, %c0_i32, %c0_i32_0 : i32, i32, i32
  }
  func.func @transform_1(%arg0: i32) -> (i32, i32) {
    %c0_i32 = arith.constant 0 : i32
    %c0_i32_0 = arith.constant 0 : i32
    return %arg0, %c0_i32 : i32, i32
  }
}

</mosaic_0001>

<bundles_post_ra>
// kernel: tpu_custom_call.1
= control target key start
LH: loop header
LB: loop body
LE: loop exit
PB: predicated region body
PF: predicated region fallthrough
CT: control target
= control target key end

     0   :  { %vm521_vm0 = vcmask 130048   ;;  %s12692_s0 = inlined_call_operand.vmem [shape: f32[16,128,16], index: 0, kind: input, shape index: {}]   ;;  %s12693_s1 = inlined_call_operand.hbm [shape: f32[16,128], index: 1, kind: output, shape index: {}]  }
   0x1   :  { %v13_v0 = vld [vmem:[%s12692_s0 + $0x20] sm:$0xff]  ;;  %v11_v1 = vld [vmem:[%s12692_s0 + $0x10] sm:$0xff]  ;;  %v14_v6 = vld [vmem:[%s12692_s0 + $0x28] sm:$0xff] }
   0x2   :  { %v9_v2 = vld [vmem:[%s12692_s0] sm:$0xff]  ;;  %v269_v3 = vmul.f32 %v13_v0, %v13_v0  ;;  %v267_v4 = vmul.f32 %v11_v1, %v11_v1  ;;  %v12_v7 = vld [vmem:[%s12692_s0 + $0x18] sm:$0xff]  ;;  %v10_v11 = vld [vmem:[%s12692_s0 + $0x8] sm:$0xff]  ;;  %v270_v12 = vmul.f32 %v14_v6, %v14_v6 }
   0x3   :  { %v265_v5 = vmul.f32 %v9_v2, %v9_v2  ;;  %v268_v13 = vmul.f32 %v12_v7, %v12_v7 }
   0x4   :  { %v534_v8 = vsel %vm521_vm0, %v269_v3, 0.0  ;;  %v528_v9 = vsel %vm521_vm0, %v267_v4, 0.0 }
   0x5   :  { %v522_v10 = vsel %vm521_vm0, %v265_v5, 0.0  ;;  %535 = vadd.xlane.f32.xlu2 %v534_v8  ;;  %529 = vadd.xlane.f32.xlu1 %v528_v9 }
   0x6   :  { %523 = vadd.xlane.f32.xlu0 %v522_v10 }
   0x7   :  { %6 = vsyncpa [#allocation3], 0  ;;  %v266_v14 = vmul.f32 %v10_v11, %v10_v11  ;;  %v537_v15 = vsel %vm521_vm0, %v270_v12, 0.0  ;;  %v531_v16 = vsel %vm521_vm0, %v268_v13, 0.0  ;;  %v17_v18 = vld [vmem:[%s12692_s0 + $0x40] sm:$0xff]  ;;  %v16_v19 = vld [vmem:[%s12692_s0 + $0x38] sm:$0xff] }
   0x8   :  { %v15_v20 = vld [vmem:[%s12692_s0 + $0x30] sm:$0xff]  ;;  %v273_v21 = vmul.f32 %v17_v18, %v17_v18  ;;  %v272_v22 = vmul.f32 %v16_v19, %v16_v19  ;;  %v20_v27 = vld [vmem:[%s12692_s0 + $0x58] sm:$0xff]  ;;  %v18_v29 = vld [vmem:[%s12692_s0 + $0x48] sm:$0xff]  ;;  %vm4879_vm7 = vcmask 130112   ;;  %vm4883_vm13 = vcmask 195712   ;;  %s5433_s28 = sshll.u32 %s12693_s1, 4  ;;  %s5434_s28 = int_to_ptr.hbm [resolvable:$true] %s5433_s28 }
   0x9   :  { %v525_v17 = vsel %vm521_vm0, %v266_v14, 0.0  ;;  %v271_v23 = vmul.f32 %v15_v20, %v15_v20  ;;  %v19_v28 = vld [vmem:[%s12692_s0 + $0x50] sm:$0xff]  ;;  %v276_v30 = vmul.f32 %v20_v27, %v20_v27  ;;  %v274_v32 = vmul.f32 %v18_v29, %v18_v29  ;;  %v22_v37 = vld [vmem:[%s12692_s0 + $0x68] sm:$0xff]  ;;  %v21_v38 = vld [vmem:[%s12692_s0 + $0x60] sm:$0xff]  ;;  %s5987_s1 = smov 128   ;;  %s5988_s29 = smov 8  }
   0xa   :  { %v546_v24 = vsel %vm521_vm0, %v273_v21, 0.0  ;;  %v543_v25 = vsel %vm521_vm0, %v272_v22, 0.0  ;;  %v275_v31 = vmul.f32 %v19_v28, %v19_v28  ;;  %v23_v36 = vld [vmem:[%s12692_s0 + $0x70] sm:$0xff]  ;;  %v278_v40 = vmul.f32 %v22_v37, %v22_v37  ;;  %v26_v45 = vld [vmem:[%s12692_s0 + $0x88] sm:$0xff]  ;;  %v25_v46 = vld [vmem:[%s12692_s0 + $0x80] sm:$0xff] }
   0xb   :  { %v540_v26 = vsel %vm521_vm0, %v271_v23, 0.0  ;;  %v555_v33 = vsel %vm521_vm0, %v276_v30, 0.0  ;;  %v549_v35 = vsel %vm521_vm0, %v274_v32, 0.0  ;;  %v279_v39 = vmul.f32 %v23_v36, %v23_v36  ;;  %v24_v47 = vld [vmem:[%s12692_s0 + $0x78] sm:$0xff]  ;;  %v29_v54 = vld [vmem:[%s12692_s0 + $0xa0] sm:$0xff]  ;;  %v27_v56 = vld [vmem:[%s12692_s0 + $0x90] sm:$0xff] }
   0xc   :  { %v552_v34 = vsel %vm521_vm0, %v275_v31, 0.0  ;;  %v277_v41 = vmul.f32 %v21_v38, %v21_v38  ;;  %v561_v43 = vsel %vm521_vm0, %v278_v40, 0.0  ;;  %v282_v48 = vmul.f32 %v26_v45, %v26_v45  ;;  %v28_v55 = vld [vmem:[%s12692_s0 + $0x98] sm:$0xff]  ;;  %v31_v0 = vld [vmem:[%s12692_s0 + $0xb0] sm:$0xff]  ;;  %v30_v1 = vld [vmem:[%s12692_s0 + $0xa8] sm:$0xff] }
   0xd   :  { %538 = vadd.xlane.f32.xlu2 %v537_v15  ;;  %532 = vadd.xlane.f32.xlu1 %v531_v16  ;;  %v564_v42 = vsel %vm521_vm0, %v279_v39, 0.0  ;;  %v281_v49 = vmul.f32 %v25_v46, %v25_v46  ;;  %v280_v50 = vmul.f32 %v24_v47, %v24_v47  ;;  %v285_v57 = vmul.f32 %v29_v54, %v29_v54  ;;  %v32_v63 = vld [vmem:[%s12692_s0 + $0xb8] sm:$0xff]  ;;  %v35_v8 = vld [vmem:[%s12692_s0 + $0xd0] sm:$0xff]  ;;  %v34_v9 = vld [vmem:[%s12692_s0 + $0xc8] sm:$0xff] }
   0xe   :  { %526 = vadd.xlane.f32.xlu0 %v525_v17  ;;  %v558_v44 = vsel %vm521_vm0, %v277_v41, 0.0  ;;  %v573_v51 = vsel %vm521_vm0, %v282_v48, 0.0  ;;  %v284_v58 = vmul.f32 %v28_v55, %v28_v55  ;;  %v283_v59 = vmul.f32 %v27_v56, %v27_v56  ;;  %v33_v10 = vld [vmem:[%s12692_s0 + $0xc0] sm:$0xff]  ;;  %v38_v17 = vld [vmem:[%s12692_s0 + $0xe8] sm:$0xff]  ;;  %v36_v19 = vld [vmem:[%s12692_s0 + $0xd8] sm:$0xff] }
   0xf   :  { %v570_v52 = vsel %vm521_vm0, %v281_v49, 0.0  ;;  %v567_v53 = vsel %vm521_vm0, %v280_v50, 0.0  ;;  %v582_v60 = vsel %vm521_vm0, %v285_v57, 0.0  ;;  %v288_v2 = vmul.f32 %v32_v63, %v32_v63  ;;  %v37_v18 = vld [vmem:[%s12692_s0 + $0xe0] sm:$0xff]  ;;  %v40_v27 = vld [vmem:[%s12692_s0 + $0xf8] sm:$0xff]  ;;  %v39_v28 = vld [vmem:[%s12692_s0 + $0xf0] sm:$0xff] }
  0x10   :  { %v579_v61 = vsel %vm521_vm0, %v284_v58, 0.0  ;;  %v576_v62 = vsel %vm521_vm0, %v283_v59, 0.0  ;;  %v287_v3 = vmul.f32 %v31_v0, %v31_v0  ;;  %v286_v4 = vmul.f32 %v30_v1, %v30_v1  ;;  %v43_v36 = vld [vmem:[%s12692_s0 + $0x110] sm:$0xff]  ;;  %v42_v37 = vld [vmem:[%s12692_s0 + $0x108] sm:$0xff]  ;;  %v45_v46 = vld [vmem:[%s12692_s0 + $0x120] sm:$0xff] }
  0x11   :  { %v591_v5 = vsel %vm521_vm0, %v288_v2, 0.0  ;;  %v291_v11 = vmul.f32 %v35_v8, %v35_v8  ;;  %v290_v12 = vmul.f32 %v34_v9, %v34_v9  ;;  %v289_v13 = vmul.f32 %v33_v10, %v33_v10  ;;  %v46_v45 = vld [vmem:[%s12692_s0 + $0x128] sm:$0xff]  ;;  %v49_v54 = vld [vmem:[%s12692_s0 + $0x140] sm:$0xff]  ;;  %v48_v55 = vld [vmem:[%s12692_s0 + $0x138] sm:$0xff] }
  0x12   :  { %v588_v6 = vsel %vm521_vm0, %v287_v3, 0.0  ;;  %v585_v7 = vsel %vm521_vm0, %v286_v4, 0.0  ;;  %v294_v20 = vmul.f32 %v38_v17, %v38_v17  ;;  %v293_v21 = vmul.f32 %v37_v18, %v37_v18  ;;  %v52_v63 = vld [vmem:[%s12692_s0 + $0x158] sm:$0xff]  ;;  %v51_v0 = vld [vmem:[%s12692_s0 + $0x150] sm:$0xff]  ;;  %v54_v9 = vld [vmem:[%s12692_s0 + $0x168] sm:$0xff] }
  0x13   :  { %v600_v14 = vsel %vm521_vm0, %v291_v11, 0.0  ;;  %v597_v15 = vsel %vm521_vm0, %v290_v12, 0.0  ;;  %v594_v16 = vsel %vm521_vm0, %v289_v13, 0.0  ;;  %v292_v22 = vmul.f32 %v36_v19, %v36_v19  ;;  %v55_v8 = vld [vmem:[%s12692_s0 + $0x170] sm:$0xff]  ;;  %v58_v17 = vld [vmem:[%s12692_s0 + $0x188] sm:$0xff]  ;;  %v57_v18 = vld [vmem:[%s12692_s0 + $0x180] sm:$0xff] }
  0x14   :  { %v609_v23 = vsel %vm521_vm0, %v294_v20, 0.0  ;;  %v296_v30 = vmul.f32 %v40_v27, %v40_v27  ;;  %v295_v31 = vmul.f32 %v39_v28, %v39_v28  ;;  %v299_v39 = vmul.f32 %v43_v36, %v43_v36  ;;  %v60_v27 = vld [vmem:[%s12692_s0 + $0x198] sm:$0xff] }
  0x15   :  { %547 = vadd.xlane.f32.xlu2 %v546_v24  ;;  %544 = vadd.xlane.f32.xlu1 %v543_v25  ;;  %v606_v24 = vsel %vm521_vm0, %v293_v21, 0.0  ;;  %v603_v25 = vsel %vm521_vm0, %v292_v22, 0.0  ;;  %v298_v40 = vmul.f32 %v42_v37, %v42_v37  ;;  %v302_v48 = vmul.f32 %v46_v45, %v46_v45 }
  0x16   :  { %541 = vadd.xlane.f32.xlu0 %v540_v26  ;;  %v41_v26 = vld [vmem:[%s12692_s0 + $0x100] sm:$0xff]  ;;  %v301_v49 = vmul.f32 %v45_v46, %v45_v46  ;;  %v305_v57 = vmul.f32 %v49_v54, %v49_v54  ;;  %v304_v58 = vmul.f32 %v48_v55, %v48_v55  ;;  %v308_v2 = vmul.f32 %v52_v63, %v52_v63  ;;  %v67_v54 = vld [vmem:[%s12692_s0 + $0x1d0] sm:$0xff]  ;;  %v66_v55 = vld [vmem:[%s12692_s0 + $0x1c8] sm:$0xff] }
  0x17   :  { %v297_v29 = vmul.f32 %v41_v26, %v41_v26  ;;  %v307_v3 = vmul.f32 %v51_v0, %v51_v0  ;;  %v311_v11 = vmul.f32 %v55_v8, %v55_v8  ;;  %v310_v12 = vmul.f32 %v54_v9, %v54_v9  ;;  %v61_v26 = vld [vmem:[%s12692_s0 + $0x1a0] sm:$0xff]  ;;  %v70_v8 = vld [vmem:[%s12692_s0 + $0x1e8] sm:$0xff] }
  0x18   :  { %v314_v20 = vmul.f32 %v58_v17, %v58_v17  ;;  %v313_v21 = vmul.f32 %v57_v18, %v57_v18  ;;  %vm4887_vm15 = vcmask 261312  }
  0x19   :  { %v618_v32 = vsel %vm521_vm0, %v297_v29, 0.0  ;;  %v317_v29 = vmul.f32 %v61_v26, %v61_v26 }
  0x1d   :  { %556 = vadd.xlane.f32.xlu2 %v555_v33  ;;  %553 = vadd.xlane.f32.xlu1 %v552_v34  ;;  %v615_v33 = vsel %vm521_vm0, %v296_v30, 0.0  ;;  %v612_v34 = vsel %vm521_vm0, %v295_v31, 0.0  ;;  %v316_v30 = vmul.f32 %v60_v27, %v60_v27 }
  0x1e   :  { %550 = vadd.xlane.f32.xlu0 %v549_v35  ;;  %v44_v35 = vld [vmem:[%s12692_s0 + $0x118] sm:$0xff] }
  0x1f   :  { %v300_v38 = vmul.f32 %v44_v35, %v44_v35  ;;  %v64_v35 = vld [vmem:[%s12692_s0 + $0x1b8] sm:$0xff] }
  0x21   :  { %v627_v41 = vsel %vm521_vm0, %v300_v38, 0.0  ;;  %v320_v38 = vmul.f32 %v64_v35, %v64_v35 }
  0x25   :  { %565 = vadd.xlane.f32.xlu2 %v564_v42  ;;  %562 = vadd.xlane.f32.xlu1 %v561_v43  ;;  %v624_v42 = vsel %vm521_vm0, %v299_v39, 0.0  ;;  %v621_v43 = vsel %vm521_vm0, %v298_v40, 0.0 }
  0x26   :  { %559 = vadd.xlane.f32.xlu0 %v558_v44  ;;  %v47_v44 = vld [vmem:[%s12692_s0 + $0x130] sm:$0xff] }
  0x27   :  { %v303_v47 = vmul.f32 %v47_v44, %v47_v44 }
  0x29   :  { %v636_v50 = vsel %vm521_vm0, %v303_v47, 0.0 }
  0x2d   :  { %574 = vadd.xlane.f32.xlu2 %v573_v51  ;;  %571 = vadd.xlane.f32.xlu1 %v570_v52  ;;  %v633_v51 = vsel %vm521_vm0, %v302_v48, 0.0  ;;  %v630_v52 = vsel %vm521_vm0, %v301_v49, 0.0  ;;  %v68_v49 = vld [vmem:[%s12692_s0 + $0x1d8] sm:$0xff] }
  0x2e   :  { %568 = vadd.xlane.f32.xlu0 %v567_v53  ;;  %v50_v53 = vld [vmem:[%s12692_s0 + $0x148] sm:$0xff] }
  0x2f   :  { %v306_v56 = vmul.f32 %v50_v53, %v50_v53  ;;  %v324_v53 = vmul.f32 %v68_v49, %v68_v49 }
  0x31   :  { %v645_v59 = vsel %vm521_vm0, %v306_v56, 0.0 }
  0x35   :  { %583 = vadd.xlane.f32.xlu2 %v582_v60  ;;  %580 = vadd.xlane.f32.xlu1 %v579_v61  ;;  %v642_v60 = vsel %vm521_vm0, %v305_v57, 0.0  ;;  %v639_v61 = vsel %vm521_vm0, %v304_v58, 0.0  ;;  %v699_v58 = vsel %vm521_vm0, %v324_v53, 0.0  ;;  %v73_v53 = vld [vmem:[%s12692_s0 + $0x200] sm:$0xff] }
  0x36   :  { %577 = vadd.xlane.f32.xlu0 %v576_v62  ;;  %v53_v62 = vld [vmem:[%s12692_s0 + $0x160] sm:$0xff] }
  0x37   :  { %v309_v1 = vmul.f32 %v53_v62, %v53_v62 }
  0x39   :  { %v654_v4 = vsel %vm521_vm0, %v309_v1, 0.0 }
  0x3d   :  { %592 = vadd.xlane.f32.xlu2 %v591_v5  ;;  %589 = vadd.xlane.f32.xlu1 %v588_v6  ;;  %v651_v5 = vsel %vm521_vm0, %v308_v2, 0.0  ;;  %v648_v6 = vsel %vm521_vm0, %v307_v3, 0.0 }
  0x3e   :  { %586 = vadd.xlane.f32.xlu0 %v585_v7  ;;  %v56_v7 = vld [vmem:[%s12692_s0 + $0x178] sm:$0xff] }
  0x3f   :  { %v312_v10 = vmul.f32 %v56_v7, %v56_v7 }
  0x41   :  { %v663_v13 = vsel %vm521_vm0, %v312_v10, 0.0 }
  0x45   :  { %601 = vadd.xlane.f32.xlu2 %v600_v14  ;;  %598 = vadd.xlane.f32.xlu1 %v597_v15  ;;  %v660_v14 = vsel %vm521_vm0, %v311_v11, 0.0  ;;  %v657_v15 = vsel %vm521_vm0, %v310_v12, 0.0 }
  0x46   :  { %595 = vadd.xlane.f32.xlu0 %v594_v16  ;;  %v59_v16 = vld [vmem:[%s12692_s0 + $0x190] sm:$0xff] }
  0x47   :  { %v315_v19 = vmul.f32 %v59_v16, %v59_v16  ;;  %v326_v16 = vmul.f32 %v70_v8, %v70_v8 }
  0x49   :  { %v672_v22 = vsel %vm521_vm0, %v315_v19, 0.0 }
  0x4d   :  { %610 = vadd.xlane.f32.xlu2 %v609_v23  ;;  %607 = vadd.xlane.f32.xlu1 %v606_v24  ;;  %v669_v23 = vsel %vm521_vm0, %v314_v20, 0.0  ;;  %v666_v24 = vsel %vm521_vm0, %v313_v21, 0.0  ;;  %v69_v21 = vld [vmem:[%s12692_s0 + $0x1e0] sm:$0xff] }
  0x4e   :  { %604 = vadd.xlane.f32.xlu0 %v603_v25  ;;  %v62_v25 = vld [vmem:[%s12692_s0 + $0x1a8] sm:$0xff] }
  0x4f   :  { %v318_v28 = vmul.f32 %v62_v25, %v62_v25 }
  0x51   :  { %v681_v31 = vsel %vm521_vm0, %v318_v28, 0.0 }
  0x55   :  { %619 = vadd.xlane.f32.xlu2 %v618_v32  ;;  %616 = vadd.xlane.f32.xlu1 %v615_v33  ;;  %v678_v32 = vsel %vm521_vm0, %v317_v29, 0.0  ;;  %v675_v33 = vsel %vm521_vm0, %v316_v30, 0.0  ;;  %v705_v30 = vsel %vm521_vm0, %v326_v16, 0.0 }
  0x56   :  { %613 = vadd.xlane.f32.xlu0 %v612_v34  ;;  %v65_v34 = vld [vmem:[%s12692_s0 + $0x1c0] sm:$0xff] }
  0x57   :  { %v321_v37 = vmul.f32 %v65_v34, %v65_v34 }
  0x59   :  { %v690_v40 = vsel %vm521_vm0, %v321_v37, 0.0 }
  0x5d   :  { %628 = vadd.xlane.f32.xlu2 %v627_v41  ;;  %625 = vadd.xlane.f32.xlu1 %v624_v42  ;;  %v63_v41 = vld [vmem:[%s12692_s0 + $0x1b0] sm:$0xff]  ;;  %v687_v42 = vsel %vm521_vm0, %v320_v38, 0.0 }
  0x5e   :  { %622 = vadd.xlane.f32.xlu0 %v621_v43  ;;  %v319_v44 = vmul.f32 %v63_v41, %v63_v41 }
  0x60   :  { %v684_v45 = vsel %vm521_vm0, %v319_v44, 0.0 }
  0x65   :  { %637 = vadd.xlane.f32.xlu2 %v636_v50  ;;  %634 = vadd.xlane.f32.xlu1 %v633_v51 }
  0x66   :  { %631 = vadd.xlane.f32.xlu0 %v630_v52 }
  0x6d   :  { %646 = vadd.xlane.f32.xlu2 %v645_v59  ;;  %643 = vadd.xlane.f32.xlu1 %v642_v60  ;;  %v323_v59 = vmul.f32 %v67_v54, %v67_v54  ;;  %v322_v60 = vmul.f32 %v66_v55, %v66_v55 }
  0x6e   :  { %640 = vadd.xlane.f32.xlu0 %v639_v61 }
  0x6f   :  { %v696_v63 = vsel %vm521_vm0, %v323_v59, 0.0  ;;  %v693_v0 = vsel %vm521_vm0, %v322_v60, 0.0 }
  0x75   :  { %655 = vadd.xlane.f32.xlu2 %v654_v4  ;;  %652 = vadd.xlane.f32.xlu1 %v651_v5 }
  0x76   :  { %649 = vadd.xlane.f32.xlu0 %v648_v6  ;;  %v71_v6 = vld [vmem:[%s12692_s0 + $0x1f0] sm:$0xff] }
  0x78   :  { %v530_v39 = vpop.xlane.xlu1 %529  ;;  %v536_v43 = vpop.xlane.xlu2 %535 }
  0x79   :  { %v524_v36 = vpop.xlane.xlu0 %523  ;;  %v6227_v47 = vadd.f32 1e-20, %v536_v43  ;;  %v6237_v52 = vadd.f32 1e-20, %v530_v39  ;;  %v74_v43 = vld [vmem:[%s12692_s0 + $0x208] sm:$0xff] }
  0x7a   :  { %v6229_v48 = vadd.f32 1e-20, %v524_v36  ;;  %v330_v8 = vmul.f32 %v74_v43, %v74_v43  ;;  %v76_v43 = vld [vmem:[%s12692_s0 + $0x218] sm:$0xff] }
  0x7b   :  { %5448 = vrsqrt.f32 %v6227_v47  ;;  %v1604_v55 = vand.u32 2147483648, %v6227_v47  ;;  %vm1601_vm1 = vcmp.eq.f32.partialorder %v6227_v47, inf  ;;  %vm1603_vm3 = vcmp.eq.f32.partialorder %v6227_v47, 0.0 }
  0x7c   :  { %5450 = vrsqrt.f32 %v6229_v48  ;;  %vm1553_vm2 = vcmp.eq.f32.partialorder %v6229_v48, inf  ;;  %vm1577_vm4 = vcmp.eq.f32.partialorder %v6237_v52, inf  ;;  %vm1555_vm5 = vcmp.eq.f32.partialorder %v6229_v48, 0.0 }
  0x7d   :  { %664 = vadd.xlane.f32.xlu2 %v663_v13  ;;  %661 = vadd.xlane.f32.xlu1 %v660_v14  ;;  %v327_v14 = vmul.f32 %v71_v6, %v71_v6  ;;  %vm1579_vm9 = vcmp.eq.f32.partialorder %v6237_v52, 0.0 }
  0x7e   :  { %658 = vadd.xlane.f32.xlu0 %v657_v15 }
  0x7f   :  { %v708_v27 = vsel %vm521_vm0, %v327_v14, 0.0 }
  0x80   :  { %v533_v51 = vpop.xlane.xlu1 %532  ;;  %v539_v56 = vpop.xlane.xlu2 %538 }
  0x81   :  { %v527_v46 = vpop.xlane.xlu0 %526  ;;  %v6246_v57 = vadd.f32 1e-20, %v533_v51  ;;  %v6251_v61 = vadd.f32 1e-20, %v539_v56  ;;  %v6253_v62 = vpop.eup %5448 }
  0x82   :  { %v6234_v50 = vadd.f32 1e-20, %v527_v46  ;;  %v6258_v1 = vpop.eup %5450  ;;  %v1595_v3 = vmul.f32 %v6253_v62, %v6227_v47 }
  0x83   :  { %v1547_v5 = vmul.f32 %v6258_v1, %v6229_v48  ;;  %vm1589_vm6 = vcmp.eq.f32.partialorder %v6246_v57, inf  ;;  %vm1613_vm10 = vcmp.eq.f32.partialorder %v6251_v61, inf  ;;  %vm1591_vm11 = vcmp.eq.f32.partialorder %v6246_v57, 0.0 }
  0x84   :  { %5452 = vrsqrt.f32 %v6234_v50  ;;  %v1596_v11 = vmul.f32 %v6253_v62, %v1595_v3  ;;  %vm1565_vm8 = vcmp.eq.f32.partialorder %v6234_v50, inf  ;;  %vm1567_vm12 = vcmp.eq.f32.partialorder %v6234_v50, 0.0 }
  0x85   :  { %673 = vadd.xlane.f32.xlu2 %v672_v22  ;;  %670 = vadd.xlane.f32.xlu1 %v669_v23  ;;  %5454 = vrsqrt.f32 %v6237_v52  ;;  %v1548_v15 = vmul.f32 %v6258_v1, %v1547_v5  ;;  %v4874_v22 = vlaneseq  ;;  %vm1615_vm14 = vcmp.eq.f32.partialorder %v6251_v61, 0.0 }
  0x86   :  { %667 = vadd.xlane.f32.xlu0 %v666_v24  ;;  %5456 = vrsqrt.f32 %v6246_v57  ;;  %v1597_v25 = vmul.f32 0.5, %v1596_v11 }
  0x87   :  { %5458 = vrsqrt.f32 %v6251_v61  ;;  %v1549_v28 = vmul.f32 0.5, %v1548_v15  ;;  %v6304_v35 = vand.u32 127, %v4874_v22 }
  0x88   :  { %v548_v10 = vpop.xlane.xlu2 %547  ;;  %v545_v13 = vpop.xlane.xlu1 %544  ;;  %v1598_v38 = vsub.f32 1.5, %v1597_v25 }
  0x89   :  { %v6288_v20 = vadd.f32 1e-20, %v548_v10  ;;  %v6293_v23 = vadd.f32 1e-20, %v545_v13  ;;  %v542_v24 = vpop.xlane.xlu0 %541  ;;  %v1550_v39 = vsub.f32 1.5, %v1549_v28  ;;  %v6314_v44 = vadd.s32 4294967264, %v6304_v35 }
  0x8a   :  { %v6260_v2 = vpop.eup %5452  ;;  %v6302_v34 = vadd.f32 1e-20, %v542_v24  ;;  %v6320_v46 = vadd.s32 4294967256, %v6304_v35  ;;  %v6323_v49 = vadd.s32 4294967272, %v6304_v35  ;;  %v6333_v59 = vadd.s32 4294967288, %v6304_v35 }
  0x8b   :  { %v6265_v4 = vpop.eup %5454  ;;  %v1559_v7 = vmul.f32 %v6260_v2, %v6234_v50  ;;  %5460 = vrsqrt.f32 %v6288_v20  ;;  %v1599_v3 = vmul.f32 %v6253_v62, %v1598_v38  ;;  %v1551_v5 = vmul.f32 %v6258_v1, %v1550_v39  ;;  %v77_v38 = vld [vmem:[%s12692_s0 + $0x220] sm:$0xff] }
  0x8c   :  { %v6277_v9 = vpop.eup %5456  ;;  %v1571_v12 = vmul.f32 %v6265_v4, %v6237_v52  ;;  %5462 = vrsqrt.f32 %v6293_v23  ;;  %v329_v13 = vmul.f32 %v73_v53, %v73_v53  ;;  %v717_v62 = vsel %vm521_vm0, %v330_v8, 0.0 }
  0x8d   :  { %682 = vadd.xlane.f32.xlu2 %v681_v31  ;;  %679 = vadd.xlane.f32.xlu1 %v678_v32  ;;  %v6283_v17 = vpop.eup %5458  ;;  %v1583_v18 = vmul.f32 %v6277_v9, %v6246_v57  ;;  %v1560_v19 = vmul.f32 %v6260_v2, %v1559_v7  ;;  %v325_v31 = vmul.f32 %v69_v21, %v69_v21  ;;  %5464 = vrsqrt.f32 %v6302_v34 }
  0x8e   :  { %676 = vadd.xlane.f32.xlu0 %v675_v33  ;;  %v1572_v26 = vmul.f32 %v6265_v4, %v1571_v12  ;;  %v1607_v29 = vmul.f32 %v6283_v17, %v6251_v61  ;;  %v1600_v22 = vmul.f32 %v1599_v3, %v6227_v47  ;;  %v1552_v25 = vmul.f32 %v1551_v5, %v6229_v48 }
  0x8f   :  { %v1584_v32 = vmul.f32 %v6277_v9, %v1583_v18  ;;  %v1561_v33 = vmul.f32 0.5, %v1560_v19  ;;  %v702_v36 = vsel %vm521_vm0, %v325_v31, 0.0  ;;  %v1556_v18 = vand.u32 2147483648, %v6229_v48 }
  0x90   :  { %v1573_v37 = vmul.f32 0.5, %v1572_v26  ;;  %v557_v51 = vpop.xlane.xlu2 %556  ;;  %v554_v60 = vpop.xlane.xlu1 %553  ;;  %v6356_v19 = vadd.s32 4294967232, %v6304_v35  ;;  %v714_v26 = vsel %vm521_vm0, %v329_v13, 0.0  ;;  %v1602_v39 = vsel %vm1601_vm1, %v6227_v47, %v1600_v22  ;;  %v75_v22 = vld [vmem:[%s12692_s0 + $0x210] sm:$0xff] }
  0x91   :  { %v1585_v41 = vmul.f32 0.5, %v1584_v32  ;;  %v6328_v54 = vpop.eup %5460  ;;  %v551_v7 = vpop.xlane.xlu0 %550  ;;  %v6345_v12 = vadd.f32 1e-20, %v557_v51  ;;  %v6349_v15 = vadd.f32 1e-20, %v554_v60  ;;  %v6378_v32 = vadd.s32 4294967240, %v6304_v35 }
  0x92   :  { %v1574_v56 = vsub.f32 1.5, %v1573_v37  ;;  %v1643_v14 = vmul.f32 %v6328_v54, %v6288_v20  ;;  %v6360_v21 = vadd.f32 1e-20, %v551_v7  ;;  %v1568_v37 = vand.u32 2147483648, %v6234_v50 }
  0x93   :  { %v1586_v10 = vsub.f32 1.5, %v1585_v41  ;;  %5466 = vrsqrt.f32 %v6345_v12  ;;  %12792 = vst [vmem:[#allocation5_spill] sm:$0xff] %v6378_v32  ;;  %v1554_v41 = vsel %vm1553_vm2, %v6229_v48, %v1552_v25  ;;  %v1592_v8 = vand.u32 2147483648, %v6246_v57 }
  0x94   :  { %v1575_v24 = vmul.f32 %v6265_v4, %v1574_v56  ;;  %5468 = vrsqrt.f32 %v6349_v15  ;;  %vm1649_vm1 = vcmp.eq.f32.partialorder %v6288_v20, inf  ;;  %vm1637_vm2 = vcmp.eq.f32.partialorder %v6293_v23, inf }
  0x95   :  { %691 = vadd.xlane.f32.xlu2 %v690_v40  ;;  %688 = vadd.xlane.f32.xlu1 %v687_v42  ;;  %v1608_v40 = vmul.f32 %v6283_v17, %v1607_v29  ;;  %v1562_v42 = vsub.f32 1.5, %v1561_v33  ;;  %v1587_v28 = vmul.f32 %v6277_v9, %v1586_v10  ;;  %v6382_v9 = vadd.s32 4294967248, %v6304_v35 }
  0x96   :  { %685 = vadd.xlane.f32.xlu0 %v684_v45  ;;  %v6317_v45 = vadd.s32 4294967280, %v6304_v35  ;;  %5470 = vrsqrt.f32 %v6360_v21  ;;  %v1652_v10 = vand.u32 2147483648, %v6288_v20 }
  0x97   :  { %v1609_v6 = vmul.f32 0.5, %v1608_v40  ;;  %v1563_v11 = vmul.f32 %v6260_v2, %v1562_v42  ;;  %v1576_v40 = vmul.f32 %v1575_v24, %v6237_v52  ;;  %v1588_v53 = vmul.f32 %v1587_v28, %v6246_v57 }
  0x99   :  { %v1564_v29 = vmul.f32 %v1563_v11, %v6234_v50  ;;  %v332_v11 = vmul.f32 %v76_v43, %v76_v43 }
  0x9b   :  { %v1566_v42 = vsel %vm1565_vm8, %v6234_v50, %v1564_v29  ;;  %v1578_v50 = vsel %vm1577_vm4, %v6237_v52, %v1576_v40  ;;  %vm1651_vm4 = vcmp.eq.f32.partialorder %v6288_v20, 0.0  ;;  %vm4895_vm8 = vcmask 392512  }
  0x9d   :  { %700 = vadd.xlane.f32.xlu2 %v699_v58  ;;  %697 = vadd.xlane.f32.xlu1 %v696_v63  ;;  %v1580_v58 = vand.u32 2147483648, %v6237_v52  ;;  %v72_v63 = vld [vmem:[%s12692_s0 + $0x1f8] sm:$0xff] }
  0x9e   :  { %694 = vadd.xlane.f32.xlu0 %v693_v0  ;;  %v6338_v0 = vpop.eup %5462  ;;  %v328_v16 = vmul.f32 %v72_v63, %v72_v63  ;;  %v566_v63 = vpop.xlane.xlu2 %565 }
  0x9f   :  { %v6352_v1 = vpop.eup %5464  ;;  %v1631_v2 = vmul.f32 %v6338_v0, %v6293_v23 }
  0xa0   :  { %v1619_v4 = vmul.f32 %v6352_v1, %v6302_v34  ;;  %v711_v31 = vsel %vm521_vm0, %v328_v16, 0.0  ;;  %v6408_v3 = vpop.eup %5466  ;;  %v6430_v16 = vadd.f32 1e-20, %v566_v63 }
  0xa1   :  { %v1632_v33 = vmul.f32 %v6338_v0, %v1631_v2  ;;  %v6412_v7 = vpop.eup %5468  ;;  %v563_v2 = vpop.xlane.xlu1 %562 }
  0xa2   :  { %v1620_v60 = vmul.f32 %v6352_v1, %v1619_v4  ;;  %v6416_v13 = vpop.eup %5470  ;;  %v1667_v29 = vmul.f32 %v6412_v7, %v6349_v15  ;;  %v723_v4 = vsel %vm521_vm0, %v332_v11, 0.0  ;;  %5472 = vrsqrt.f32 %v6430_v16  ;;  %v79_v11 = vld [vmem:[%s12692_s0 + $0x230] sm:$0xff] }
  0xa3   :  { %v1633_v5 = vmul.f32 0.5, %v1632_v33  ;;  %v6471_v63 = vadd.f32 1e-20, %v563_v2 }
  0xa4   :  { %v1621_v25 = vmul.f32 0.5, %v1620_v60 }
  0xa5   :  { %709 = vadd.xlane.f32.xlu2 %v708_v27  ;;  %706 = vadd.xlane.f32.xlu1 %v705_v30  ;;  %v1610_v27 = vsub.f32 1.5, %v1609_v6  ;;  %v1644_v30 = vmul.f32 %v6328_v54, %v1643_v14  ;;  %v333_v6 = vmul.f32 %v77_v38, %v77_v38  ;;  %v6422_v14 = vsel %vm1603_vm3, %v1604_v55, %v1602_v39 }
  0xa6   :  { %703 = vadd.xlane.f32.xlu0 %v702_v36  ;;  %v1616_v36 = vand.u32 2147483648, %v6251_v61  ;;  %v1590_v55 = vsel %vm1589_vm6, %v6246_v57, %v1588_v53  ;;  %v4890_v33 = vperm.slane %v6422_v14, %v6314_v44  ;;  %v1581_v39 = vsel %vm1579_vm9, %v1580_v58, %v1578_v50  ;;  %v83_v14 = vld [vmem:[%s12692_s0 + $0x250] sm:$0xff] }
  0xa7   :  { %v1611_v51 = vmul.f32 %v6283_v17, %v1610_v27  ;;  %v1645_v56 = vmul.f32 0.5, %v1644_v30  ;;  %v1569_v17 = vsel %vm1567_vm12, %v1568_v37, %v1566_v42  ;;  %v1679_v27 = vmul.f32 %v6408_v3, %v6345_v12 }
  0xa8   :  { %v4878_v48 = vperm.slane %v1569_v17, %v6333_v59  ;;  %v726_v28 = vsel %vm521_vm0, %v333_v6, 0.0  ;;  %v1655_v30 = vmul.f32 %v6416_v13, %v6360_v21  ;;  %v1593_v43 = vsel %vm1591_vm11, %v1592_v8, %v1590_v55  ;;  %v575_v8 = vpop.xlane.xlu2 %574  ;;  %v80_v17 = vld [vmem:[%s12692_s0 + $0x238] sm:$0xff] }
  0xa9   :  { %v1612_v47 = vmul.f32 %v1611_v51, %v6251_v61  ;;  %v1646_v24 = vsub.f32 1.5, %v1645_v56  ;;  %v1680_v52 = vmul.f32 %v6408_v3, %v1679_v27  ;;  %v1668_v58 = vmul.f32 %v6412_v7, %v1667_v29 }
  0xaa   :  { %v1656_v60 = vmul.f32 %v6416_v13, %v1655_v30  ;;  %v1640_v57 = vand.u32 2147483648, %v6293_v23  ;;  %vm4891_vm3 = vcmask 326912   ;;  %v1628_v6 = vand.u32 2147483648, %v6302_v34 }
  0xab   :  { %v1614_v40 = vsel %vm1613_vm10, %v6251_v61, %v1612_v47  ;;  %v1647_v53 = vmul.f32 %v6328_v54, %v1646_v24  ;;  %v78_v61 = vld [vmem:[%s12692_s0 + $0x228] sm:$0xff]  ;;  %vm1639_vm6 = vcmp.eq.f32.partialorder %v6293_v23, 0.0  ;;  %vm1627_vm9 = vcmp.eq.f32.partialorder %v6302_v34, 0.0 }
  0xac   :  { %v6481_v54 = vsel %vm1615_vm14, %v1616_v36, %v1614_v40  ;;  %v6496_v36 = vpop.eup %5472  ;;  %v1681_v47 = vmul.f32 0.5, %v1680_v52  ;;  %v1669_v55 = vmul.f32 0.5, %v1668_v58  ;;  %v1657_v24 = vmul.f32 0.5, %v1656_v60 }
  0xad   :  { %718 = vadd.xlane.f32.xlu2 %v717_v62  ;;  %715 = vadd.xlane.f32.xlu1 %v714_v26  ;;  %v1557_v62 = vsel %vm1555_vm5, %v1556_v18, %v1554_v41  ;;  %v560_v26 = vpop.xlane.xlu0 %559  ;;  %v1634_v18 = vsub.f32 1.5, %v1633_v5  ;;  %v1622_v41 = vsub.f32 1.5, %v1621_v25  ;;  %v4882_v5 = vperm.slane %v1581_v39, %v6317_v45 }
  0xae   :  { %712 = vadd.xlane.f32.xlu0 %v711_v31  ;;  %v331_v31 = vmul.f32 %v75_v22, %v75_v22  ;;  %v4876_v37 = vperm.slane %v1557_v62, %v6304_v35  ;;  %v6452_v38 = vadd.f32 1e-20, %v560_v26  ;;  %vm1625_vm5 = vcmp.eq.f32.partialorder %v6302_v34, inf  ;;  %v572_v22 = vpop.xlane.xlu1 %571 }
  0xaf   :  { %v1635_v56 = vmul.f32 %v6338_v0, %v1634_v18  ;;  %v1623_v0 = vmul.f32 %v6352_v1, %v1622_v41  ;;  %v4886_v1 = vperm.slane %v1593_v43, %v6323_v49  ;;  %v1648_v62 = vmul.f32 %v1647_v53, %v6288_v20 }
  0xb0   :  { %v720_v42 = vsel %vm521_vm0, %v331_v31, 0.0  ;;  %v4880_v51 = vsel %vm4879_vm7, %v4878_v48, %v4876_v37  ;;  %5474 = vrsqrt.f32 %v6452_v38  ;;  %v6505_v25 = vadd.f32 1e-20, %v575_v8 }
  0xb1   :  { %v4884_v50 = vsel %vm4883_vm13, %v4882_v5, %v4880_v51  ;;  %v1636_v2 = vmul.f32 %v1635_v56, %v6293_v23  ;;  %5476 = vrsqrt.f32 %v6471_v63  ;;  %v336_v48 = vmul.f32 %v80_v17, %v80_v17 }
  0xb2   :  { %v335_v18 = vmul.f32 %v79_v11, %v79_v11  ;;  %v334_v27 = vmul.f32 %v78_v61, %v78_v61  ;;  %v6509_v29 = vadd.s32 4294967208, %v6304_v35  ;;  %v1715_v30 = vmul.f32 %v6496_v36, %v6430_v16 }
  0xb3   :  { %v4894_v37 = vperm.slane %v6481_v54, %v6320_v46  ;;  %v4888_v39 = vsel %vm4887_vm15, %v4886_v1, %v4884_v50  ;;  %v1650_v40 = vsel %vm1649_vm1, %v6288_v20, %v1648_v62  ;;  %v6524_v41 = vadd.s32 4294967216, %v6304_v35 }
  0xb4   :  { %v1682_v43 = vsub.f32 1.5, %v1681_v47  ;;  %v1670_v51 = vsub.f32 1.5, %v1669_v55  ;;  %v1658_v53 = vsub.f32 1.5, %v1657_v24  ;;  %vm12737_vm10 = vcmask 458112  }
  0xb5   :  { %727 = vadd.xlane.f32.xlu2 %v726_v28  ;;  %724 = vadd.xlane.f32.xlu1 %v723_v4  ;;  %v569_v26 = vpop.xlane.xlu0 %568  ;;  %v1624_v28 = vmul.f32 %v1623_v0, %v6302_v34  ;;  %v6513_v4 = vadd.f32 1e-20, %v572_v22  ;;  %5478 = vrsqrt.f32 %v6505_v25  ;;  %v735_v56 = vsel %vm521_vm0, %v336_v48, 0.0  ;;  %v584_v22 = vpop.xlane.xlu2 %583 }
  0xb6   :  { %721 = vadd.xlane.f32.xlu0 %v720_v42  ;;  %v6515_v31 = vpop.eup %5474  ;;  %v1638_v42 = vsel %vm1637_vm2, %v6293_v23, %v1636_v2  ;;  %v732_v52 = vsel %vm521_vm0, %v335_v18, 0.0  ;;  %v729_v58 = vsel %vm521_vm0, %v334_v27, 0.0  ;;  %v1716_v54 = vmul.f32 %v6496_v36, %v1715_v30  ;;  %v581_v48 = vpop.xlane.xlu1 %580 }
  0xb7   :  { %v6533_v60 = vpop.eup %5476  ;;  %v1626_v5 = vsel %vm1625_vm5, %v6302_v34, %v1624_v28  ;;  %v1691_v0 = vmul.f32 %v6515_v31, %v6452_v38  ;;  %5480 = vrsqrt.f32 %v6513_v4  ;;  %v6546_v8 = vsel %vm1651_vm4, %v1652_v10, %v1650_v40 }
  0xb8   :  { %vm1685_vm11 = vcmp.eq.f32.partialorder %v6345_v12, inf  ;;  %v1688_v17 = vand.u32 2147483648, %v6345_v12  ;;  %v6551_v11 = vadd.s32 4294967224, %v6304_v35  ;;  %v6555_v61 = vsel %vm1639_vm6, %v1640_v57, %v1638_v42 }
  0xb9   :  { %v4892_v1 = vsel %vm4891_vm3, %v4890_v33, %v4888_v39  ;;  %v1683_v20 = vmul.f32 %v6408_v3, %v1682_v43  ;;  %vm1673_vm12 = vcmp.eq.f32.partialorder %v6349_v15, inf  ;;  %v1629_v10 = vsel %vm1627_vm9, %v1628_v6, %v1626_v5  ;;  %v82_v43 = vld [vmem:[%s12692_s0 + $0x248] sm:$0xff] }
  0xba   :  { %12793 = vst [vmem:[#allocation6_spill] sm:$0xff] %v6551_v11  ;;  %v1671_v50 = vmul.f32 %v6412_v7, %v1670_v51  ;;  %v1659_v62 = vmul.f32 %v6416_v13, %v1658_v53  ;;  %v1703_v23 = vmul.f32 %v6533_v60, %v6471_v63  ;;  %v4906_v33 = vperm.slane %v6546_v8, %v6356_v19 }
  0xbb   :  { %vm12697_vm14 = vcmask 523712   ;;  %v1717_v3 = vmul.f32 0.5, %v1716_v54  ;;  %v1692_v57 = vmul.f32 %v6515_v31, %v1691_v0  ;;  %v6575_v34 = vadd.f32 1e-20, %v569_v26  ;;  %v6577_v6 = vpop.eup %5478 }
  0xbc   :  { %v4902_v7 = vperm.slane %v6555_v61, %v6378_v32  ;;  %v4896_v13 = vsel %vm4895_vm8, %v4894_v37, %v4892_v1  ;;  %v1676_v2 = vand.u32 2147483648, %v6349_v15  ;;  %vm1661_vm1 = vcmp.eq.f32.partialorder %v6360_v21, inf }
  0xbd   :  { %736 = vadd.xlane.f32.xlu2 %v735_v56  ;;  %733 = vadd.xlane.f32.xlu1 %v732_v52  ;;  %v578_v47 = vpop.xlane.xlu0 %577  ;;  %v6584_v55 = vpop.eup %5480  ;;  %v4898_v24 = vperm.slane %v1629_v10, %v6382_v9  ;;  %v1684_v26 = vmul.f32 %v1683_v20, %v6345_v12  ;;  %vm1663_vm2 = vcmp.eq.f32.partialorder %v6360_v21, 0.0  ;;  %v339_v18 = vmul.f32 %v83_v14, %v83_v14 }
  0xbe   :  { %730 = vadd.xlane.f32.xlu0 %v729_v58  ;;  %vm1687_vm4 = vcmp.eq.f32.partialorder %v6345_v12, 0.0  ;;  %v1672_v27 = vmul.f32 %v1671_v50, %v6349_v15  ;;  %vm1675_vm5 = vcmp.eq.f32.partialorder %v6349_v15, 0.0  ;;  %vm12694_vm6 = vcmask 589312   ;;  %v81_v58 = vld [vmem:[%s12692_s0 + $0x240] sm:$0xff] }
  0xbf   :  { %v1660_v28 = vmul.f32 %v1659_v62, %v6360_v21  ;;  %v1664_v30 = vand.u32 2147483648, %v6360_v21  ;;  %v1704_v37 = vmul.f32 %v6533_v60, %v1703_v23  ;;  %v1718_v39 = vsub.f32 1.5, %v1717_v3 }
  0xc0   :  { %v1693_v40 = vmul.f32 0.5, %v1692_v57  ;;  %5482 = vrsqrt.f32 %v6575_v34  ;;  %v6596_v42 = vadd.f32 1e-20, %v584_v22  ;;  %v6602_v51 = vadd.s32 4294967184, %v6304_v35 }
  0xc1   :  { %v1751_v53 = vmul.f32 %v6577_v6, %v6505_v25  ;;  %v1739_v56 = vmul.f32 %v6584_v55, %v6513_v4  ;;  %v6608_v52 = vadd.f32 1e-20, %v581_v48  ;;  %v4900_v5 = vsel %vm12737_vm10, %v4898_v24, %v4896_v13 }
  0xc2   :  { %12794 = vst [vmem:[#allocation7_spill] sm:$0xff] %v6602_v51  ;;  %v1686_v54 = vsel %vm1685_vm11, %v6345_v12, %v1684_v26  ;;  %v6617_v0 = vadd.f32 1e-20, %v578_v47  ;;  %v744_v61 = vsel %vm521_vm0, %v339_v18, 0.0  ;;  %v1674_v1 = vsel %vm1673_vm12, %v6349_v15, %v1672_v27 }
  0xc3   :  { %vm12695_vm9 = vcmask 654912   ;;  %v1662_v20 = vsel %vm1661_vm1, %v6360_v21, %v1660_v28  ;;  %v1705_v10 = vmul.f32 0.5, %v1704_v37  ;;  %v338_v50 = vmul.f32 %v82_v43, %v82_v43 }
  0xc4   :  { %v1719_v62 = vmul.f32 %v6496_v36, %v1718_v39  ;;  %v1694_v23 = vsub.f32 1.5, %v1693_v40  ;;  %5484 = vrsqrt.f32 %v6596_v42  ;;  %v337_v14 = vmul.f32 %v81_v58, %v81_v58  ;;  %v593_v58 = vpop.xlane.xlu2 %592 }
  0xc5   :  { %745 = vadd.xlane.f32.xlu2 %v744_v61  ;;  %v1752_v3 = vmul.f32 %v6577_v6, %v1751_v53  ;;  %v1740_v57 = vmul.f32 %v6584_v55, %v1739_v56  ;;  %5486 = vrsqrt.f32 %v6608_v52  ;;  %v741_v13 = vsel %vm521_vm0, %v338_v50, 0.0  ;;  %v587_v27 = vpop.xlane.xlu0 %586 }
  0xc6   :  { %v6632_v22 = vpop.eup %5482  ;;  %vm1721_vm11 = vcmp.eq.f32.partialorder %v6430_v16, inf  ;;  %v6636_v47 = vadd.s32 4294967192, %v6304_v35  ;;  %5488 = vrsqrt.f32 %v6617_v0  ;;  %742 = vadd.xlane.f32.xlu1 %v741_v13  ;;  %v738_v36 = vsel %vm521_vm0, %v337_v14, 0.0 }
  0xc7   :  { %v4904_v24 = vsel %vm12697_vm14, %v4902_v7, %v4900_v5  ;;  %v1665_v26 = vsel %vm1663_vm2, %v1664_v30, %v1662_v20  ;;  %vm1723_vm12 = vcmp.eq.f32.partialorder %v6430_v16, 0.0  ;;  %v1724_v48 = vand.u32 2147483648, %v6430_v16  ;;  %739 = vadd.xlane.f32.xlu0 %v738_v36  ;;  %v86_v30 = vld [vmem:[%s12692_s0 + $0x268] sm:$0xff] }
  0xc8   :  { %12795 = vst [vmem:[#allocation8_spill] sm:$0xff] %v6636_v47  ;;  %v1706_v18 = vsub.f32 1.5, %v1705_v10  ;;  %v6649_v28 = vsel %vm1687_vm4, %v1688_v17, %v1686_v54  ;;  %v6653_v37 = vsel %vm1675_vm5, %v1676_v2, %v1674_v1  ;;  %v1720_v21 = vmul.f32 %v1719_v62, %v6430_v16  ;;  %v590_v17 = vpop.xlane.xlu1 %589 }
  0xc9   :  { %v1712_v7 = vand.u32 2147483648, %v6471_v63  ;;  %vm12696_vm1 = vcmask 720512   ;;  %v1695_v39 = vmul.f32 %v6515_v31, %v1694_v23  ;;  %v1753_v40 = vmul.f32 0.5, %v1752_v3  ;;  %v85_v3 = vld [vmem:[%s12692_s0 + $0x260] sm:$0xff] }
  0xca   :  { %v1741_v43 = vmul.f32 0.5, %v1740_v57  ;;  %v1727_v12 = vmul.f32 %v6632_v22, %v6575_v34  ;;  %v6663_v15 = vpop.eup %5484  ;;  %v4908_v2 = vsel %vm12694_vm6, %v4906_v33, %v4904_v24  ;;  %v4910_v53 = vperm.slane %v1665_v26, %v6551_v11  ;;  %v84_v57 = vld [vmem:[%s12692_s0 + $0x258] sm:$0xff] }
  0xcb   :  { %v6671_v56 = vadd.s32 4294967200, %v6304_v35  ;;  %v6673_v31 = vadd.f32 1e-20, %v587_v27  ;;  %v6675_v5 = vpop.eup %5486  ;;  %v4918_v54 = vperm.slane %v6649_v28, %v6509_v29  ;;  %v1707_v61 = vmul.f32 %v6533_v60, %v1706_v18 }
  0xcc   :  { %vm1697_vm2 = vcmp.eq.f32.partialorder %v6452_v38, inf  ;;  %v342_v8 = vmul.f32 %v86_v30, %v86_v30  ;;  %v6681_v1 = vpop.eup %5488  ;;  %v4914_v33 = vperm.slane %v6653_v37, %v6524_v41  ;;  %v1722_v20 = vsel %vm1721_vm11, %v6430_v16, %v1720_v21 }
  0xcd   :  { %vm1709_vm4 = vcmp.eq.f32.partialorder %v6471_v63, inf  ;;  %vm12699_vm5 = vcmask 786112   ;;  %vm1699_vm6 = vcmp.eq.f32.partialorder %v6452_v38, 0.0  ;;  %v1700_v10 = vand.u32 2147483648, %v6452_v38 }
  0xce   :  { %v6691_v60 = vadd.f32 1e-20, %v590_v17  ;;  %v1696_v50 = vmul.f32 %v1695_v39, %v6452_v38  ;;  %v1754_v62 = vsub.f32 1.5, %v1753_v40  ;;  %v1742_v23 = vsub.f32 1.5, %v1741_v43 }
  0xcf   :  { %v1728_v14 = vmul.f32 %v6632_v22, %v1727_v12  ;;  %v4912_v13 = vsel %vm12695_vm9, %v4910_v53, %v4908_v2  ;;  %v1787_v36 = vmul.f32 %v6663_v15, %v6596_v42  ;;  %v6704_v24 = vadd.f32 1e-20, %v593_v58 }
  0xd0   :  { %5490 = vrsqrt.f32 %v6673_v31  ;;  %v1708_v26 = vmul.f32 %v1707_v61, %v6471_v63  ;;  %vm1711_vm11 = vcmp.eq.f32.partialorder %v6471_v63, 0.0  ;;  %v1775_v18 = vmul.f32 %v6675_v5, %v6608_v52 }
  0xd1   :  { %v1763_v27 = vmul.f32 %v6681_v1, %v6617_v0  ;;  %v753_v37 = vsel %vm521_vm0, %v342_v8, 0.0  ;;  %v6716_v21 = vsel %vm1723_vm12, %v1724_v48, %v1722_v20  ;;  %5492 = vrsqrt.f32 %v6691_v60 }
  0xd2   :  { %12796 = vst [vmem:[#allocation9_spill] sm:$0xff] %v6716_v21  ;;  %754 = vadd.xlane.f32.xlu2 %v753_v37  ;;  %v341_v30 = vmul.f32 %v85_v3, %v85_v3  ;;  %v340_v39 = vmul.f32 %v84_v57, %v84_v57  ;;  %v1698_v40 = vsel %vm1697_vm2, %v6452_v38, %v1696_v50  ;;  %v1729_v17 = vmul.f32 0.5, %v1728_v14 }
  0xd3   :  { %v1755_v43 = vmul.f32 %v6577_v6, %v1754_v62  ;;  %v1743_v12 = vmul.f32 %v6584_v55, %v1742_v23  ;;  %v1788_v2 = vmul.f32 %v6663_v15, %v1787_v36  ;;  %5494 = vrsqrt.f32 %v6704_v24  ;;  %v596_v55 = vpop.xlane.xlu0 %595  ;;  %v602_v62 = vpop.xlane.xlu2 %601  ;;  %v88_v36 = vld [vmem:[%s12692_s0 + $0x278] sm:$0xff] }
  0xd4   :  { %v750_v16 = vsel %vm521_vm0, %v341_v30, 0.0  ;;  %v747_v48 = vsel %vm521_vm0, %v340_v39, 0.0  ;;  %vm12698_vm12 = vcmask 851712   ;;  %vm1757_vm9 = vcmp.eq.f32.partialorder %v6505_v25, inf }
  0xd5   :  { %v6730_v53 = vadd.s32 4294967176, %v6304_v35  ;;  %v1776_v58 = vmul.f32 %v6675_v5, %v1775_v18  ;;  %v1764_v6 = vmul.f32 %v6681_v1, %v1763_v27  ;;  %751 = vadd.xlane.f32.xlu1 %v750_v16  ;;  %748 = vadd.xlane.f32.xlu0 %v747_v48  ;;  %v4916_v8 = vsel %vm12696_vm1, %v4914_v33, %v4912_v13  ;;  %v599_v33 = vpop.xlane.xlu1 %598  ;;  %v89_v13 = vld [vmem:[%s12692_s0 + $0x280] sm:$0xff] }
  0xd6   :  { %v6734_v61 = vpop.eup %5490  ;;  %v1760_v20 = vand.u32 2147483648, %v6505_v25  ;;  %vm1745_vm2 = vcmp.eq.f32.partialorder %v6513_v4, inf  ;;  %v1748_v50 = vand.u32 2147483648, %v6513_v4  ;;  %v1710_v14 = vsel %vm1709_vm4, %v6471_v63, %v1708_v26 }
  0xd7   :  { %12797 = vst [vmem:[#allocation10_spill] sm:$0xff] %v6730_v53  ;;  %v1701_v3 = vsel %vm1699_vm6, %v1700_v10, %v1698_v40  ;;  %v1756_v57 = vmul.f32 %v1755_v43, %v6505_v25  ;;  %vm1759_vm1 = vcmp.eq.f32.partialorder %v6505_v25, 0.0  ;;  %vm1747_vm14 = vcmp.eq.f32.partialorder %v6513_v4, 0.0  ;;  %v6756_v18 = vpop.eup %5492 }
  0xd8   :  { %v1744_v38 = vmul.f32 %v1743_v12, %v6513_v4  ;;  %v1730_v10 = vsub.f32 1.5, %v1729_v17  ;;  %v1789_v26 = vmul.f32 0.5, %v1788_v2  ;;  %v6759_v27 = vadd.f32 1e-20, %v596_v55  ;;  %v87_v55 = vld [vmem:[%s12692_s0 + $0x270] sm:$0xff] }
  0xd9   :  { %v4920_v37 = vsel %vm12699_vm5, %v4918_v54, %v4916_v8  ;;  %v1777_v30 = vmul.f32 0.5, %v1776_v58  ;;  %v1765_v39 = vmul.f32 0.5, %v1764_v6  ;;  %v1799_v40 = vmul.f32 %v6734_v61, %v6673_v31  ;;  %v6767_v43 = vpop.eup %5494 }
  0xda   :  { %v6773_v12 = vsel %vm1711_vm11, %v1712_v7, %v1710_v14  ;;  %v6775_v17 = vadd.f32 1e-20, %v599_v33  ;;  %v345_v2 = vmul.f32 %v89_v13, %v89_v13  ;;  %v344_v16 = vmul.f32 %v88_v36, %v88_v36 }
  0xdb   :  { %12798 = vst [vmem:[#allocation11_spill] sm:$0xff] %v6773_v12  ;;  %v4922_v28 = vperm.slane %v1701_v3, %v6671_v56  ;;  %v1758_v54 = vsel %vm1757_vm9, %v6505_v25, %v1756_v57  ;;  %v1736_v48 = vand.u32 2147483648, %v6575_v34  ;;  %v1811_v58 = vmul.f32 %v6756_v18, %v6691_v60 }
  0xdc   :  { %v1746_v63 = vsel %vm1745_vm2, %v6513_v4, %v1744_v38  ;;  %v1731_v7 = vmul.f32 %v6632_v22, %v1730_v10  ;;  %v1790_v6 = vsub.f32 1.5, %v1789_v26  ;;  %5496 = vrsqrt.f32 %v6759_v27 }
  0xdd   :  { %vm1733_vm6 = vcmp.eq.f32.partialorder %v6575_v34, inf  ;;  %v1778_v8 = vsub.f32 1.5, %v1777_v30  ;;  %v1766_v14 = vsub.f32 1.5, %v1765_v39  ;;  %v1823_v3 = vmul.f32 %v6767_v43, %v6704_v24 }
  0xde   :  { %v1800_v57 = vmul.f32 %v6734_v61, %v1799_v40  ;;  %v6796_v33 = vadd.f32 1e-20, %v602_v62  ;;  %5498 = vrsqrt.f32 %v6775_v17  ;;  %v762_v22 = vsel %vm521_vm0, %v345_v2, 0.0  ;;  %v611_v2 = vpop.xlane.xlu2 %610 }
  0xdf   :  { %v759_v13 = vsel %vm521_vm0, %v344_v16, 0.0  ;;  %v1796_v38 = vand.u32 2147483648, %v6596_v42  ;;  %v1812_v10 = vmul.f32 %v6756_v18, %v1811_v58  ;;  %763 = vadd.xlane.f32.xlu2 %v762_v22  ;;  %v343_v26 = vmul.f32 %v87_v55, %v87_v55  ;;  %v92_v16 = vld [vmem:[%s12692_s0 + $0x298] sm:$0xff]  ;;  %v605_v55 = vpop.xlane.xlu0 %604 }
  0xe0   :  { %760 = vadd.xlane.f32.xlu1 %v759_v13  ;;  %v6806_v30 = vsel %vm12698_vm12, %v4922_v28, %v4920_v37  ;;  %v1761_v62 = vsel %vm1759_vm1, %v1760_v20, %v1758_v54  ;;  %v1749_v39 = vsel %vm1747_vm14, %v1748_v50, %v1746_v63  ;;  %v1784_v40 = vand.u32 2147483648, %v6608_v52  ;;  %v608_v13 = vpop.xlane.xlu1 %607 }
  0xe1   :  { %12799 = vst [vmem:[#allocation12_spill] sm:$0xff] %v6806_v30  ;;  %v1732_v58 = vmul.f32 %v1731_v7, %v6575_v34  ;;  %vm1735_vm9 = vcmp.eq.f32.partialorder %v6575_v34, 0.0  ;;  %v1767_v37 = vmul.f32 %v6681_v1, %v1766_v14  ;;  %v1801_v28 = vmul.f32 0.5, %v1800_v57 }
  0xe2   :  { %v756_v25 = vsel %vm521_vm0, %v343_v26, 0.0  ;;  %v6820_v20 = vpop.eup %5496  ;;  %v1791_v4 = vmul.f32 %v6663_v15, %v1790_v6  ;;  %vm1793_vm14 = vcmp.eq.f32.partialorder %v6596_v42, inf  ;;  %v1779_v50 = vmul.f32 %v6675_v5, %v1778_v8  ;;  %v90_v26 = vld [vmem:[%s12692_s0 + $0x288] sm:$0xff] }
  0xe3   :  { %v1824_v54 = vmul.f32 %v6767_v43, %v1823_v3  ;;  %5500 = vrsqrt.f32 %v6796_v33  ;;  %757 = vadd.xlane.f32.xlu0 %v756_v25  ;;  %vm1781_vm1 = vcmp.eq.f32.partialorder %v6608_v52, inf  ;;  %vm1769_vm4 = vcmp.eq.f32.partialorder %v6617_v0, inf }
  0xe4   :  { %v1813_v1 = vmul.f32 0.5, %v1812_v10  ;;  %v6829_v63 = vadd.f32 1e-20, %v611_v2  ;;  %v348_v7 = vmul.f32 %v92_v16, %v92_v16  ;;  %v6831_v14 = vpop.eup %5498  ;;  %v4938_v15 = vperm.slane %v1761_v62, %v6333_v59  ;;  %v91_v10 = vld [vmem:[%s12692_s0 + $0x290] sm:$0xff] }
  0xe5   :  { %vm1771_vm11 = vcmp.eq.f32.partialorder %v6617_v0, 0.0  ;;  %v1772_v5 = vand.u32 2147483648, %v6617_v0  ;;  %v6836_v6 = vadd.f32 1e-20, %v605_v55  ;;  %v4937_v8 = vperm.slane %v1749_v39, %v6304_v35 }
  0xe6   :  { %vm1795_vm2 = vcmp.eq.f32.partialorder %v6596_v42, 0.0  ;;  %v1768_v3 = vmul.f32 %v1767_v37, %v6617_v0  ;;  %v1802_v57 = vsub.f32 1.5, %v1801_v28  ;;  %v1835_v22 = vmul.f32 %v6820_v20, %v6759_v27 }
  0xe7   :  { %v1734_v62 = vsel %vm1733_vm6, %v6575_v34, %v1732_v58  ;;  %v1792_v39 = vmul.f32 %v1791_v4, %v6596_v42  ;;  %v1780_v2 = vmul.f32 %v1779_v50, %v6608_v52  ;;  %vm1783_vm12 = vcmp.eq.f32.partialorder %v6608_v52, 0.0 }
  0xe8   :  { %v1825_v16 = vmul.f32 0.5, %v1824_v54  ;;  %v1814_v37 = vsub.f32 1.5, %v1813_v1  ;;  %v1847_v28 = vmul.f32 %v6831_v14, %v6775_v17  ;;  %5502 = vrsqrt.f32 %v6829_v63 }
  0xe9   :  { %v771_v55 = vsel %vm521_vm0, %v348_v7, 0.0  ;;  %v6859_v25 = vpop.eup %5500  ;;  %v6861_v23 = vadd.f32 1e-20, %v608_v13  ;;  %5504 = vrsqrt.f32 %v6836_v6  ;;  %v347_v58 = vmul.f32 %v91_v10, %v91_v10 }
  0xea   :  { %772 = vadd.xlane.f32.xlu2 %v771_v55  ;;  %v346_v4 = vmul.f32 %v90_v26, %v90_v26  ;;  %v4939_v50 = vsel %vm4879_vm7, %v4938_v15, %v4937_v8  ;;  %v1770_v54 = vsel %vm1769_vm4, %v6617_v0, %v1768_v3  ;;  %v1803_v1 = vmul.f32 %v6734_v61, %v1802_v57 }
  0xeb   :  { %v1836_v36 = vmul.f32 %v6820_v20, %v1835_v22  ;;  %v6874_v7 = vsel %vm1735_vm9, %v1736_v48, %v1734_v62  ;;  %v1826_v13 = vsub.f32 1.5, %v1825_v16  ;;  %v768_v10 = vsel %vm521_vm0, %v347_v58, 0.0 }
  0xec   :  { %12800 = vst [vmem:[#allocation13_spill] sm:$0xff] %v6874_v7  ;;  %v765_v26 = vsel %vm521_vm0, %v346_v4, 0.0  ;;  %v1794_v15 = vsel %vm1793_vm14, %v6596_v42, %v1792_v39  ;;  %v1832_v8 = vand.u32 2147483648, %v6704_v24  ;;  %v1815_v61 = vmul.f32 %v6756_v18, %v1814_v37  ;;  %769 = vadd.xlane.f32.xlu1 %v768_v10 }
  0xed   :  { %v1859_v3 = vmul.f32 %v6859_v25, %v6796_v33  ;;  %v1782_v34 = vsel %vm1781_vm1, %v6608_v52, %v1780_v2  ;;  %v1773_v48 = vsel %vm1771_vm11, %v1772_v5, %v1770_v54  ;;  %v1848_v57 = vmul.f32 %v6831_v14, %v1847_v28  ;;  %766 = vadd.xlane.f32.xlu0 %v765_v26  ;;  %v614_v2 = vpop.xlane.xlu0 %613  ;;  %v620_v28 = vpop.xlane.xlu2 %619 }
  0xee   :  { %5506 = vrsqrt.f32 %v6861_v23  ;;  %v6892_v22 = vpop.eup %5502  ;;  %vm1829_vm6 = vcmp.eq.f32.partialorder %v6704_v24, inf  ;;  %vm1817_vm9 = vcmp.eq.f32.partialorder %v6691_v60, inf  ;;  %v1804_v62 = vmul.f32 %v1803_v1, %v6673_v31 }
  0xef   :  { %v1837_v39 = vmul.f32 0.5, %v1836_v36  ;;  %v6899_v0 = vpop.eup %5504  ;;  %v1797_v5 = vsel %vm1795_vm2, %v1796_v38, %v1794_v15  ;;  %v1827_v16 = vmul.f32 %v6767_v43, %v1826_v13  ;;  %vm1819_vm14 = vcmp.eq.f32.partialorder %v6691_v60, 0.0  ;;  %v617_v38 = vpop.xlane.xlu1 %616  ;;  %v95_v13 = vld [vmem:[%s12692_s0 + $0x2b0] sm:$0xff] }
  0xf0   :  { %v1820_v37 = vand.u32 2147483648, %v6691_v60  ;;  %v1785_v36 = vsel %vm1783_vm12, %v1784_v40, %v1782_v34  ;;  %v4940_v55 = vperm.slane %v1773_v48, %v6317_v45  ;;  %v1816_v58 = vmul.f32 %v1815_v61, %v6691_v60 }
  0xf1   :  { %v1860_v4 = vmul.f32 %v6859_v25, %v1859_v3  ;;  %vm1805_vm1 = vcmp.eq.f32.partialorder %v6673_v31, inf  ;;  %vm1807_vm4 = vcmp.eq.f32.partialorder %v6673_v31, 0.0  ;;  %v1849_v42 = vmul.f32 0.5, %v1848_v57 }
  0xf2   :  { %v1895_v43 = vmul.f32 %v6892_v22, %v6829_v63  ;;  %v1806_v54 = vsel %vm1805_vm1, %v6673_v31, %v1804_v62  ;;  %v1838_v1 = vsub.f32 1.5, %v1837_v39  ;;  %v1871_v52 = vmul.f32 %v6899_v0, %v6836_v6 }
  0xf3   :  { %v6922_v40 = vadd.f32 1e-20, %v620_v28  ;;  %v4944_v26 = vperm.slane %v1797_v5, %v6314_v44  ;;  %v4942_v15 = vperm.slane %v1785_v36, %v6323_v49  ;;  %v1828_v61 = vmul.f32 %v1827_v16, %v6704_v24  ;;  %v94_v36 = vld [vmem:[%s12692_s0 + $0x2a8] sm:$0xff] }
  0xf4   :  { %v6927_v10 = vpop.eup %5506  ;;  %vm1831_vm12 = vcmp.eq.f32.partialorder %v6704_v24, 0.0  ;;  %v1808_v3 = vand.u32 2147483648, %v6673_v31  ;;  %v4941_v34 = vsel %vm4883_vm13, %v4940_v55, %v4939_v50  ;;  %v1818_v48 = vsel %vm1817_vm9, %v6691_v60, %v1816_v58  ;;  %v93_v31 = vld [vmem:[%s12692_s0 + $0x2a0] sm:$0xff] }
  0xf5   :  { %v1861_v57 = vmul.f32 0.5, %v1860_v4  ;;  %v1868_v62 = vand.u32 2147483648, %v6796_v33  ;;  %v1850_v5 = vsub.f32 1.5, %v1849_v42  ;;  %v1896_v28 = vmul.f32 %v6892_v22, %v1895_v43 }
  0xf6   :  { %v1809_v39 = vsel %vm1807_vm4, %v1808_v3, %v1806_v54  ;;  %v351_v16 = vmul.f32 %v95_v13, %v95_v13  ;;  %v1839_v50 = vmul.f32 %v6820_v20, %v1838_v1  ;;  %v1883_v55 = vmul.f32 %v6927_v10, %v6861_v23  ;;  %v623_v13 = vpop.xlane.xlu0 %622 }
  0xf7   :  { %v1872_v58 = vmul.f32 %v6899_v0, %v1871_v52  ;;  %5508 = vrsqrt.f32 %v6922_v40  ;;  %v4943_v4 = vsel %vm4887_vm15, %v4942_v15, %v4941_v34  ;;  %v1830_v42 = vsel %vm1829_vm6, %v6704_v24, %v1828_v61 }
  0xf8   :  { %v6957_v43 = vadd.f32 1e-20, %v617_v38  ;;  %v780_v20 = vsel %vm521_vm0, %v351_v16, 0.0  ;;  %v1821_v54 = vsel %vm1819_vm14, %v1820_v37, %v1818_v48  ;;  %v4946_v1 = vperm.slane %v1809_v39, %v6320_v46 }
  0xf9   :  { %v1862_v52 = vsub.f32 1.5, %v1861_v57  ;;  %vm1853_vm11 = vcmp.eq.f32.partialorder %v6775_v17, inf  ;;  %781 = vadd.xlane.f32.xlu2 %v780_v20  ;;  %v350_v3 = vmul.f32 %v94_v36, %v94_v36  ;;  %v1851_v15 = vmul.f32 %v6831_v14, %v1850_v5  ;;  %v626_v57 = vpop.xlane.xlu1 %625 }
  0xfa   :  { %v1897_v34 = vmul.f32 0.5, %v1896_v28  ;;  %v6965_v18 = vadd.f32 1e-20, %v614_v2  ;;  %v349_v38 = vmul.f32 %v93_v31, %v93_v31  ;;  %v1840_v61 = vmul.f32 %v1839_v50, %v6759_v27 }
  0xfb   :  { %v1884_v16 = vmul.f32 %v6927_v10, %v1883_v55  ;;  %v1873_v60 = vmul.f32 0.5, %v1872_v58  ;;  %v777_v37 = vsel %vm521_vm0, %v350_v3, 0.0  ;;  %v4945_v48 = vsel %vm4891_vm3, %v4944_v26, %v4943_v4  ;;  %v629_v26 = vpop.xlane.xlu2 %628  ;;  %v97_v3 = vld [vmem:[%s12692_s0 + $0x2c0] sm:$0xff] }
  0xfc   :  { %5510 = vrsqrt.f32 %v6957_v43  ;;  %v6972_v39 = vadd.f32 1e-20, %v623_v13  ;;  %778 = vadd.xlane.f32.xlu1 %v777_v37  ;;  %v774_v14 = vsel %vm521_vm0, %v349_v38, 0.0  ;;  %v1833_v5 = vsel %vm1831_vm12, %v1832_v8, %v1830_v42 }
  0xfd   :  { %v6975_v2 = vpop.eup %5508  ;;  %v4948_v28 = vperm.slane %v1821_v54, %v6382_v9  ;;  %v1863_v36 = vmul.f32 %v6859_v25, %v1862_v52  ;;  %vm1865_vm2 = vcmp.eq.f32.partialorder %v6796_v33, inf  ;;  %vm1855_vm6 = vcmp.eq.f32.partialorder %v6775_v17, 0.0  ;;  %775 = vadd.xlane.f32.xlu0 %v774_v14  ;;  %v98_v54 = vld [vmem:[%s12692_s0 + $0x2c8] sm:$0xff] }
  0xfe   :  { %vm1841_vm9 = vcmp.eq.f32.partialorder %v6759_v27, inf  ;;  %v4947_v50 = vsel %vm4895_vm8, %v4946_v1, %v4945_v48  ;;  %v1852_v55 = vmul.f32 %v1851_v15, %v6775_v17  ;;  %v1898_v58 = vsub.f32 1.5, %v1897_v34  ;;  %v96_v15 = vld [vmem:[%s12692_s0 + $0x2b8] sm:$0xff] }
  0xff   :  { %5512 = vrsqrt.f32 %v6965_v18  ;;  %v1842_v24 = vsel %vm1841_vm9, %v6759_v27, %v1840_v61  ;;  %v1885_v8 = vmul.f32 0.5, %v1884_v16  ;;  %v1874_v31 = vsub.f32 1.5, %v1873_v60 }
 0x100   :  { %v6990_v25 = vadd.f32 1e-20, %v626_v57  ;;  %vm1867_vm14 = vcmp.eq.f32.partialorder %v6796_v33, 0.0  ;;  %v1844_v4 = vand.u32 2147483648, %v6759_v27  ;;  %v1931_v42 = vmul.f32 %v6975_v2, %v6922_v40 }
 0x101   :  { %v6996_v20 = vadd.f32 1e-20, %v629_v26  ;;  %5514 = vrsqrt.f32 %v6972_v39  ;;  %v4950_v1 = vperm.slane %v1833_v5, %v6378_v32  ;;  %v4949_v52 = vsel %vm12737_vm10, %v4948_v28, %v4947_v50  ;;  %v632_v26 = vpop.xlane.xlu0 %631 }
 0x102   :  { %v1856_v13 = vand.u32 2147483648, %v6775_v17  ;;  %vm1843_vm1 = vcmp.eq.f32.partialorder %v6759_v27, 0.0  ;;  %v7012_v34 = vpop.eup %5510  ;;  %v1864_v38 = vmul.f32 %v1863_v36, %v6796_v33  ;;  %v1854_v61 = vsel %vm1853_vm11, %v6775_v17, %v1852_v55 }
 0x103   :  { %v1845_v16 = vsel %vm1843_vm1, %v1844_v4, %v1842_v24  ;;  %v1899_v60 = vmul.f32 %v6892_v22, %v1898_v58  ;;  %vm1901_vm4 = vcmp.eq.f32.partialorder %v6829_v63, inf  ;;  %v1886_v27 = vsub.f32 1.5, %v1885_v8 }
 0x104   :  { %v1875_v37 = vmul.f32 %v6899_v0, %v1874_v31  ;;  %5516 = vrsqrt.f32 %v6990_v25  ;;  %v354_v48 = vmul.f32 %v98_v54, %v98_v54  ;;  %v1932_v14 = vmul.f32 %v6975_v2, %v1931_v42  ;;  %v635_v54 = vpop.xlane.xlu1 %634 }
 0x105   :  { %v7022_v57 = vpop.eup %5512  ;;  %5518 = vrsqrt.f32 %v6996_v20  ;;  %v353_v5 = vmul.f32 %v97_v3, %v97_v3  ;;  %v352_v28 = vmul.f32 %v96_v15, %v96_v15  ;;  %vm12801_vm12 = vcmask 523712  }
 0x106   :  { %v4951_v36 = vsel %vm12801_vm12, %v4950_v1, %v4949_v52  ;;  %vm1903_vm11 = vcmp.eq.f32.partialorder %v6829_v63, 0.0  ;;  %v1904_v22 = vand.u32 2147483648, %v6829_v63  ;;  %v1919_v0 = vmul.f32 %v7012_v34, %v6957_v43 }
 0x107   :  { %v7031_v50 = vpop.eup %5514  ;;  %v1866_v55 = vsel %vm1865_vm2, %v6796_v33, %v1864_v38  ;;  %v1857_v58 = vsel %vm1855_vm6, %v1856_v13, %v1854_v61  ;;  %v4952_v24 = vperm.slane %v1845_v16, %v6356_v19  ;;  %vm1889_vm9 = vcmp.eq.f32.partialorder %v6861_v23, inf  ;;  %v638_v33 = vpop.xlane.xlu2 %637 }
 0x108   :  { %v1900_v31 = vmul.f32 %v1899_v60, %v6829_v63  ;;  %v1887_v4 = vmul.f32 %v6927_v10, %v1886_v27  ;;  %v1907_v42 = vmul.f32 %v7022_v57, %v6965_v18  ;;  %v789_v1 = vsel %vm521_vm0, %v354_v48, 0.0 }
 0x109   :  { %v1876_v52 = vmul.f32 %v1875_v37, %v6836_v6  ;;  %v1933_v17 = vmul.f32 0.5, %v1932_v14  ;;  %790 = vadd.xlane.f32.xlu2 %v789_v1  ;;  %v786_v13 = vsel %vm521_vm0, %v353_v5, 0.0  ;;  %v783_v3 = vsel %vm521_vm0, %v352_v28, 0.0  ;;  %v101_v37 = vld [vmem:[%s12692_s0 + $0x2e0] sm:$0xff] }
 0x10a   :  { %v7049_v15 = vpop.eup %5516  ;;  %v7055_v10 = vsel %vm1867_vm14, %v1868_v62, %v1866_v55  ;;  %vm1877_vm2 = vcmp.eq.f32.partialorder %v6836_v6, inf  ;;  %v1920_v38 = vmul.f32 %v7012_v34, %v1919_v0  ;;  %v1943_v61 = vmul.f32 %v7031_v50, %v6972_v39  ;;  %787 = vadd.xlane.f32.xlu1 %v786_v13  ;;  %784 = vadd.xlane.f32.xlu0 %v783_v3 }
 0x10b   :  { %v7061_v16 = vpop.eup %5518  ;;  %v4954_v60 = vperm.slane %v1857_v58, %v6551_v11  ;;  %vm12802_vm6 = vcmask 589312   ;;  %vm1879_vm1 = vcmp.eq.f32.partialorder %v6836_v6, 0.0  ;;  %v7066_v62 = vadd.f32 1e-20, %v632_v26 }
 0x10c   :  { %v4953_v27 = vsel %vm12802_vm6, %v4952_v24, %v4951_v36  ;;  %v1902_v48 = vsel %vm1901_vm4, %v6829_v63, %v1900_v31  ;;  %v1888_v14 = vmul.f32 %v1887_v4, %v6861_v23  ;;  %v1908_v5 = vmul.f32 %v7022_v57, %v1907_v42  ;;  %v100_v42 = vld [vmem:[%s12692_s0 + $0x2d8] sm:$0xff] }
 0x10d   :  { %v7076_v28 = vadd.f32 1e-20, %v635_v54  ;;  %vm1891_vm14 = vcmp.eq.f32.partialorder %v6861_v23, 0.0  ;;  %v1878_v36 = vsel %vm1877_vm2, %v6836_v6, %v1876_v52  ;;  %v1880_v0 = vand.u32 2147483648, %v6836_v6  ;;  %v99_v54 = vld [vmem:[%s12692_s0 + $0x2d0] sm:$0xff] }
 0x10e   :  { %v1934_v26 = vsub.f32 1.5, %v1933_v17  ;;  %v1955_v55 = vmul.f32 %v7049_v15, %v6990_v25  ;;  %v1921_v58 = vmul.f32 0.5, %v1920_v38  ;;  %v1967_v24 = vmul.f32 %v7061_v16, %v6996_v20 }
 0x10f   :  { %v1944_v31 = vmul.f32 %v7031_v50, %v1943_v61  ;;  %v357_v4 = vmul.f32 %v101_v37, %v101_v37  ;;  %vm12803_vm4 = vcmask 654912   ;;  %v7097_v52 = vsel %vm1903_vm11, %v1904_v22, %v1902_v48  ;;  %v641_v61 = vpop.xlane.xlu0 %640 }
 0x110   :  { %v4955_v1 = vsel %vm12803_vm4, %v4954_v60, %v4953_v27  ;;  %12804 = vst [vmem:[#allocation14_spill] sm:$0xff] %v7097_v52  ;;  %v7099_v17 = vadd.f32 1e-20, %v638_v33  ;;  %5520 = vrsqrt.f32 %v7066_v62  ;;  %v1890_v13 = vsel %vm1889_vm9, %v6861_v23, %v1888_v14  ;;  %v644_v14 = vpop.xlane.xlu1 %643 }
 0x111   :  { %v1881_v3 = vsel %vm1879_vm1, %v1880_v0, %v1878_v36  ;;  %v1909_v38 = vmul.f32 0.5, %v1908_v5  ;;  %5522 = vrsqrt.f32 %v7076_v28  ;;  %v1956_v60 = vmul.f32 %v7049_v15, %v1955_v55 }
 0x112   :  { %v798_v63 = vsel %vm521_vm0, %v357_v4, 0.0  ;;  %v356_v22 = vmul.f32 %v100_v42, %v100_v42  ;;  %v355_v27 = vmul.f32 %v99_v54, %v99_v54  ;;  %v1935_v33 = vmul.f32 %v6975_v2, %v1934_v26  ;;  %v647_v4 = vpop.xlane.xlu2 %646 }
 0x113   :  { %v1922_v37 = vsub.f32 1.5, %v1921_v58  ;;  %v1968_v48 = vmul.f32 %v7061_v16, %v1967_v24  ;;  %v1945_v8 = vmul.f32 0.5, %v1944_v31  ;;  %799 = vadd.xlane.f32.xlu2 %v798_v63  ;;  %5524 = vrsqrt.f32 %v7099_v17 }
 0x114   :  { %v7113_v6 = vadd.f32 1e-20, %v641_v61  ;;  %v795_v5 = vsel %vm521_vm0, %v356_v22, 0.0  ;;  %v792_v36 = vsel %vm521_vm0, %v355_v27, 0.0  ;;  %v4956_v0 = vperm.slane %v7055_v10, %v6524_v41 }
 0x115   :  { %vm1937_vm12 = vcmp.eq.f32.partialorder %v6922_v40, inf  ;;  %v1940_v2 = vand.u32 2147483648, %v6922_v40  ;;  %v1910_v26 = vsub.f32 1.5, %v1909_v38  ;;  %796 = vadd.xlane.f32.xlu1 %v795_v5  ;;  %793 = vadd.xlane.f32.xlu0 %v792_v36  ;;  %vm1939_vm11 = vcmp.eq.f32.partialorder %v6922_v40, 0.0 }
 0x116   :  { %v7121_v55 = vpop.eup %5520  ;;  %v1928_v24 = vand.u32 2147483648, %v6957_v43  ;;  %v1957_v31 = vmul.f32 0.5, %v1956_v60  ;;  %v7127_v42 = vadd.f32 1e-20, %v644_v14  ;;  %v12805_v54 = vand.u32 2147483648, %v6861_v23 }
 0x117   :  { %v7129_v10 = vpop.eup %5522  ;;  %vm12807_vm9 = vcmask 720512   ;;  %v4958_v63 = vperm.slane %v1881_v3, %v6509_v29  ;;  %vm1925_vm2 = vcmp.eq.f32.partialorder %v6957_v43, inf  ;;  %v1946_v22 = vsub.f32 1.5, %v1945_v8  ;;  %v104_v8 = vld [vmem:[%s12692_s0 + $0x2f8] sm:$0xff] }
 0x118   :  { %v7135_v38 = vsel %vm1891_vm14, %v12805_v54, %v1890_v13  ;;  %v4957_v61 = vsel %vm12807_vm9, %v4956_v0, %v4955_v1  ;;  %v1936_v60 = vmul.f32 %v1935_v33, %v6922_v40  ;;  %v1923_v27 = vmul.f32 %v7012_v34, %v1922_v37  ;;  %v103_v0 = vld [vmem:[%s12692_s0 + $0x2f0] sm:$0xff] }
 0x119   :  { %12806 = vst [vmem:[#allocation15_spill] sm:$0xff] %v7135_v38  ;;  %v1969_v14 = vmul.f32 0.5, %v1968_v48  ;;  %5526 = vrsqrt.f32 %v7113_v6  ;;  %v1911_v5 = vmul.f32 %v7022_v57, %v1910_v26  ;;  %vm1913_vm6 = vcmp.eq.f32.partialorder %v6965_v18, inf  ;;  %v7151_v13 = vpop.eup %5524 }
 0x11a   :  { %v1979_v1 = vmul.f32 %v7121_v55, %v7066_v62  ;;  %vm1927_vm1 = vcmp.eq.f32.partialorder %v6957_v43, 0.0  ;;  %v1958_v34 = vsub.f32 1.5, %v1957_v31  ;;  %v1991_v3 = vmul.f32 %v7129_v10, %v7076_v28 }
 0x11b   :  { %v7156_v57 = vadd.f32 1e-20, %v647_v4  ;;  %5528 = vrsqrt.f32 %v7127_v42  ;;  %v7162_v37 = vsel %vm12699_vm5, %v4958_v63, %v4957_v61  ;;  %v1947_v36 = vmul.f32 %v7031_v50, %v1946_v22 }
 0x11c   :  { %12808 = vst [vmem:[#allocation16_spill] sm:$0xff] %v7162_v37  ;;  %v1938_v26 = vsel %vm1937_vm12, %v6922_v40, %v1936_v60  ;;  %v1924_v31 = vmul.f32 %v1923_v27, %v6957_v43  ;;  %vm1915_vm14 = vcmp.eq.f32.partialorder %v6965_v18, 0.0  ;;  %v1970_v4 = vsub.f32 1.5, %v1969_v14 }
 0x11d   :  { %v360_v54 = vmul.f32 %v104_v8, %v104_v8  ;;  %v1912_v61 = vmul.f32 %v1911_v5, %v6965_v18  ;;  %vm1961_vm4 = vcmp.eq.f32.partialorder %v6990_v25, inf  ;;  %v2003_v50 = vmul.f32 %v7151_v13, %v7099_v17 }
 0x11e   :  { %v1980_v63 = vmul.f32 %v7121_v55, %v1979_v1  ;;  %v1959_v58 = vmul.f32 %v7049_v15, %v1958_v34  ;;  %v1992_v60 = vmul.f32 %v7129_v10, %v1991_v3  ;;  %5530 = vrsqrt.f32 %v7156_v57  ;;  %v102_v15 = vld [vmem:[%s12692_s0 + $0x2e8] sm:$0xff]  ;;  %v656_v34 = vpop.xlane.xlu2 %655 }
 0x11f   :  { %v7179_v22 = vpop.eup %5526  ;;  %v359_v27 = vmul.f32 %v103_v0, %v103_v0  ;;  %v7186_v14 = vsel %vm1939_vm11, %v1940_v2, %v1938_v26  ;;  %vm1973_vm12 = vcmp.eq.f32.partialorder %v6996_v20, inf  ;;  %v1964_v5 = vand.u32 2147483648, %v6990_v25 }
 0x120   :  { %v1948_v8 = vmul.f32 %v1947_v36, %v6972_v39  ;;  %vm1949_vm9 = vcmp.eq.f32.partialorder %v6972_v39, inf  ;;  %v1926_v40 = vsel %vm1925_vm2, %v6957_v43, %v1924_v31  ;;  %v1971_v2 = vmul.f32 %v7061_v16, %v1970_v4  ;;  %v650_v4 = vpop.xlane.xlu0 %649 }
 0x121   :  { %v7195_v1 = vpop.eup %5528  ;;  %vm1963_vm11 = vcmp.eq.f32.partialorder %v6990_v25, 0.0  ;;  %vm1951_vm5 = vcmp.eq.f32.partialorder %v6972_v39, 0.0  ;;  %v807_v3 = vsel %vm521_vm0, %v360_v54, 0.0  ;;  %v1914_v36 = vsel %vm1913_vm6, %v6965_v18, %v1912_v61 }
 0x122   :  { %v2004_v0 = vmul.f32 %v7151_v13, %v2003_v50  ;;  %v1981_v26 = vmul.f32 0.5, %v1980_v63  ;;  %v2015_v33 = vmul.f32 %v7179_v22, %v7113_v6  ;;  %808 = vadd.xlane.f32.xlu2 %v807_v3  ;;  %v1960_v16 = vmul.f32 %v1959_v58, %v6990_v25  ;;  %v653_v58 = vpop.xlane.xlu1 %652 }
 0x123   :  { %v1993_v31 = vmul.f32 0.5, %v1992_v60  ;;  %v804_v48 = vsel %vm521_vm0, %v359_v27, 0.0  ;;  %v358_v23 = vmul.f32 %v102_v15, %v102_v15  ;;  %v7216_v54 = vsel %vm1927_vm1, %v1928_v24, %v1926_v40 }
 0x124   :  { %12809 = vst [vmem:[#allocation17_spill] sm:$0xff] %v7216_v54  ;;  %v1950_v61 = vsel %vm1949_vm9, %v6972_v39, %v1948_v8  ;;  %v2027_v50 = vmul.f32 %v7195_v1, %v7127_v42  ;;  %v7223_v63 = vadd.f32 1e-20, %v656_v34  ;;  %805 = vadd.xlane.f32.xlu1 %v804_v48  ;;  %v7225_v60 = vpop.eup %5530  ;;  %v4968_v27 = vperm.slane %v7186_v14, %v6304_v35 }
 0x125   :  { %v1972_v43 = vmul.f32 %v1971_v2, %v6996_v20  ;;  %vm1975_vm2 = vcmp.eq.f32.partialorder %v6996_v20, 0.0  ;;  %v1952_v24 = vand.u32 2147483648, %v6972_v39  ;;  %v801_v8 = vsel %vm521_vm0, %v358_v23, 0.0  ;;  %v105_v39 = vld [vmem:[%s12692_s0 + $0x300] sm:$0xff] }
 0x126   :  { %v12810_v15 = vand.u32 2147483648, %v6965_v18  ;;  %v2005_v48 = vmul.f32 0.5, %v2004_v0  ;;  %v1982_v34 = vsub.f32 1.5, %v1981_v26  ;;  %v2016_v3 = vmul.f32 %v7179_v22, %v2015_v33  ;;  %802 = vadd.xlane.f32.xlu0 %v801_v8  ;;  %v107_v0 = vld [vmem:[%s12692_s0 + $0x310] sm:$0xff]  ;;  %v106_v26 = vld [vmem:[%s12692_s0 + $0x308] sm:$0xff] }
 0x127   :  { %v1962_v2 = vsel %vm1961_vm4, %v6990_v25, %v1960_v16  ;;  %v1953_v23 = vsel %vm1951_vm5, %v1952_v24, %v1950_v61  ;;  %v1994_v7 = vsub.f32 1.5, %v1993_v31  ;;  %v2039_v18 = vmul.f32 %v7225_v60, %v7156_v57  ;;  %v665_v25 = vpop.xlane.xlu2 %664 }
 0x128   :  { %v7237_v40 = vsel %vm1915_vm14, %v12810_v15, %v1914_v36  ;;  %v2028_v36 = vmul.f32 %v7195_v1, %v2027_v50  ;;  %5532 = vrsqrt.f32 %v7223_v63  ;;  %v7251_v33 = vadd.f32 1e-20, %v653_v58 }
 0x129   :  { %12811 = vst [vmem:[#allocation18_spill] sm:$0xff] %v7237_v40  ;;  %v1974_v31 = vsel %vm1973_vm12, %v6996_v20, %v1972_v43  ;;  %v7268_v50 = vadd.f32 1e-20, %v650_v4  ;;  %v1965_v58 = vsel %vm1963_vm11, %v1964_v5, %v1962_v2  ;;  %v2006_v24 = vsub.f32 1.5, %v2005_v48  ;;  %v659_v5 = vpop.xlane.xlu0 %658 }
 0x12a   :  { %v1983_v8 = vmul.f32 %v7121_v55, %v1982_v34  ;;  %v2017_v15 = vmul.f32 0.5, %v2016_v3  ;;  %v4969_v14 = vperm.slane %v1953_v23, %v6333_v59  ;;  %vm1997_vm5 = vcmp.eq.f32.partialorder %v7076_v28, inf }
 0x12b   :  { %v363_v16 = vmul.f32 %v107_v0, %v107_v0  ;;  %v362_v54 = vmul.f32 %v106_v26, %v106_v26  ;;  %v361_v21 = vmul.f32 %v105_v39, %v105_v39  ;;  %v1995_v43 = vmul.f32 %v7129_v10, %v1994_v7 }
 0x12c   :  { %v2040_v61 = vmul.f32 %v7225_v60, %v2039_v18  ;;  %v2029_v4 = vmul.f32 0.5, %v2028_v36  ;;  %5534 = vrsqrt.f32 %v7251_v33  ;;  %v12812_v2 = vand.u32 2147483648, %v6996_v20  ;;  %v662_v18 = vpop.xlane.xlu1 %661 }
 0x12d   :  { %5536 = vrsqrt.f32 %v7268_v50  ;;  %v816_v55 = vsel %vm521_vm0, %v363_v16, 0.0  ;;  %v813_v48 = vsel %vm521_vm0, %v362_v54, 0.0  ;;  %v810_v34 = vsel %vm521_vm0, %v361_v21, 0.0 }
 0x12e   :  { %v7282_v3 = vpop.eup %5532  ;;  %v1977_v7 = vsel %vm1975_vm2, %v12812_v2, %v1974_v31  ;;  %vm2009_vm6 = vcmp.eq.f32.partialorder %v7099_v17, inf  ;;  %vm1999_vm1 = vcmp.eq.f32.partialorder %v7076_v28, 0.0  ;;  %v1984_v10 = vmul.f32 %v1983_v8, %v7066_v62  ;;  %817 = vadd.xlane.f32.xlu2 %v816_v55  ;;  %814 = vadd.xlane.f32.xlu1 %v813_v48 }
 0x12f   :  { %v2018_v23 = vsub.f32 1.5, %v2017_v15  ;;  %v4971_v54 = vperm.slane %v1965_v58, %v6317_v45  ;;  %v4970_v21 = vsel %vm4879_vm7, %v4969_v14, %v4968_v27  ;;  %v2007_v36 = vmul.f32 %v7151_v13, %v2006_v24  ;;  %811 = vadd.xlane.f32.xlu0 %v810_v34 }
 0x130   :  { %v2000_v0 = vand.u32 2147483648, %v7076_v28  ;;  %v1996_v20 = vmul.f32 %v1995_v43, %v7076_v28  ;;  %v2041_v26 = vmul.f32 0.5, %v2040_v61  ;;  %v2030_v39 = vsub.f32 1.5, %v2029_v4 }
 0x131   :  { %v7296_v16 = vadd.f32 1e-20, %v665_v25  ;;  %vm2011_vm14 = vcmp.eq.f32.partialorder %v7099_v17, 0.0  ;;  %vm1985_vm4 = vcmp.eq.f32.partialorder %v7066_v62, inf  ;;  %vm1987_vm12 = vcmp.eq.f32.partialorder %v7066_v62, 0.0 }
 0x132   :  { %v2075_v27 = vmul.f32 %v7282_v3, %v7223_v63  ;;  %v7303_v13 = vadd.f32 1e-20, %v662_v18  ;;  %v7305_v14 = vpop.eup %5534  ;;  %v4973_v31 = vperm.slane %v1977_v7, %v6323_v49  ;;  %v1986_v61 = vsel %vm1985_vm4, %v7066_v62, %v1984_v10  ;;  %v110_v7 = vld [vmem:[%s12692_s0 + $0x328] sm:$0xff]  ;;  %v108_v18 = vld [vmem:[%s12692_s0 + $0x318] sm:$0xff] }
 0x133   :  { %v1988_v58 = vand.u32 2147483648, %v7066_v62  ;;  %v2019_v24 = vmul.f32 %v7179_v22, %v2018_v23  ;;  %v7311_v8 = vpop.eup %5536  ;;  %v4972_v15 = vsel %vm4883_vm13, %v4971_v54, %v4970_v21  ;;  %v2008_v43 = vmul.f32 %v2007_v36, %v7099_v17  ;;  %v109_v23 = vld [vmem:[%s12692_s0 + $0x320] sm:$0xff] }
 0x134   :  { %vm2033_vm9 = vcmp.eq.f32.partialorder %v7127_v42, inf  ;;  %v2036_v4 = vand.u32 2147483648, %v7127_v42  ;;  %v1998_v25 = vsel %vm1997_vm5, %v7076_v28, %v1996_v20  ;;  %v2042_v55 = vsub.f32 1.5, %v2041_v26  ;;  %v668_v20 = vpop.xlane.xlu0 %667 }
 0x135   :  { %v2031_v48 = vmul.f32 %v7195_v1, %v2030_v39  ;;  %5538 = vrsqrt.f32 %v7296_v16  ;;  %v1989_v22 = vsel %vm1987_vm12, %v1988_v58, %v1986_v61  ;;  %v2076_v34 = vmul.f32 %v7282_v3, %v2075_v27 }
 0x136   :  { %v2063_v2 = vmul.f32 %v7305_v14, %v7251_v33  ;;  %5540 = vrsqrt.f32 %v7303_v13  ;;  %v2020_v10 = vmul.f32 %v2019_v24, %v7113_v6  ;;  %vm2021_vm11 = vcmp.eq.f32.partialorder %v7113_v6, inf }
 0x137   :  { %v2051_v1 = vmul.f32 %v7311_v8, %v7268_v50  ;;  %v7335_v62 = vadd.f32 1e-20, %v659_v5  ;;  %v2010_v54 = vsel %vm2009_vm6, %v7099_v17, %v2008_v43  ;;  %v2001_v21 = vsel %vm1999_vm1, %v2000_v0, %v1998_v25 }
 0x138   :  { %v4974_v36 = vsel %vm4887_vm15, %v4973_v31, %v4972_v15  ;;  %vm2045_vm2 = vcmp.eq.f32.partialorder %v7156_v57, inf  ;;  %v2024_v5 = vand.u32 2147483648, %v7113_v6  ;;  %v4975_v26 = vperm.slane %v1989_v22, %v6314_v44 }
 0x139   :  { %v2043_v39 = vmul.f32 %v7225_v60, %v2042_v55  ;;  %v2032_v27 = vmul.f32 %v2031_v48, %v7127_v42  ;;  %v366_v61 = vmul.f32 %v110_v7, %v110_v7  ;;  %v2077_v58 = vmul.f32 0.5, %v2076_v34  ;;  %v674_v55 = vpop.xlane.xlu2 %673  ;;  %v671_v34 = vpop.xlane.xlu1 %670 }
 0x13a   :  { %v2064_v24 = vmul.f32 %v7305_v14, %v2063_v2  ;;  %v365_v43 = vmul.f32 %v109_v23, %v109_v23  ;;  %v364_v28 = vmul.f32 %v108_v18, %v108_v18  ;;  %v12813_v31 = vand.u32 2147483648, %v7099_v17 }
 0x13b   :  { %v7355_v0 = vpop.eup %5538  ;;  %v2022_v25 = vsel %vm2021_vm11, %v7113_v6, %v2020_v10  ;;  %v2052_v60 = vmul.f32 %v7311_v8, %v2051_v1  ;;  %5542 = vrsqrt.f32 %v7335_v62  ;;  %v4977_v22 = vperm.slane %v2001_v21, %v6320_v46 }
 0x13c   :  { %v2013_v15 = vsel %vm2011_vm14, %v12813_v31, %v2010_v54  ;;  %v7366_v48 = vpop.eup %5540  ;;  %v825_v2 = vsel %vm521_vm0, %v366_v61, 0.0  ;;  %v822_v7 = vsel %vm521_vm0, %v365_v43, 0.0  ;;  %v819_v17 = vsel %vm521_vm0, %v364_v28, 0.0 }
 0x13d   :  { %v4976_v23 = vsel %vm4891_vm3, %v4975_v26, %v4974_v36  ;;  %v2044_v10 = vmul.f32 %v2043_v39, %v7156_v57  ;;  %v2034_v1 = vsel %vm2033_vm9, %v7127_v42, %v2032_v27  ;;  %vm2023_vm5 = vcmp.eq.f32.partialorder %v7113_v6, 0.0  ;;  %826 = vadd.xlane.f32.xlu2 %v825_v2  ;;  %823 = vadd.xlane.f32.xlu1 %v822_v7 }
 0x13e   :  { %v2025_v18 = vsel %vm2023_vm5, %v2024_v5, %v2022_v25  ;;  %v2078_v54 = vsub.f32 1.5, %v2077_v58  ;;  %v2065_v21 = vmul.f32 0.5, %v2064_v24  ;;  %v7378_v61 = vadd.f32 1e-20, %v674_v55  ;;  %820 = vadd.xlane.f32.xlu0 %v819_v17 }
 0x13f   :  { %v2053_v43 = vmul.f32 0.5, %v2052_v60  ;;  %v2111_v36 = vmul.f32 %v7355_v0, %v7296_v16  ;;  %v2099_v26 = vmul.f32 %v7366_v48, %v7303_v13  ;;  %v7384_v39 = vadd.f32 1e-20, %v671_v34 }
 0x140   :  { %vm2047_vm6 = vcmp.eq.f32.partialorder %v7156_v57, 0.0  ;;  %v2048_v6 = vand.u32 2147483648, %v7156_v57  ;;  %vm2035_vm1 = vcmp.eq.f32.partialorder %v7127_v42, 0.0  ;;  %v7389_v5 = vadd.f32 1e-20, %v668_v20  ;;  %v677_v20 = vpop.xlane.xlu0 %676 }
 0x141   :  { %v7391_v27 = vpop.eup %5542  ;;  %v4979_v58 = vperm.slane %v2013_v15, %v6382_v9  ;;  %v4978_v24 = vsel %vm4895_vm8, %v4977_v22, %v4976_v23  ;;  %v2046_v28 = vsel %vm2045_vm2, %v7156_v57, %v2044_v10  ;;  %v2037_v31 = vsel %vm2035_vm1, %v2036_v4, %v2034_v1  ;;  %v113_v15 = vld [vmem:[%s12692_s0 + $0x340] sm:$0xff]  ;;  %v112_v22 = vld [vmem:[%s12692_s0 + $0x338] sm:$0xff]  ;;  %v683_v23 = vpop.xlane.xlu2 %682 }
 0x142   :  { %v4981_v25 = vperm.slane %v2025_v18, %v6378_v32  ;;  %v2079_v60 = vmul.f32 %v7282_v3, %v2078_v54  ;;  %v2066_v55 = vsub.f32 1.5, %v2065_v21  ;;  %5544 = vrsqrt.f32 %v7378_v61  ;;  %v111_v18 = vld [vmem:[%s12692_s0 + $0x330] sm:$0xff] }
 0x143   :  { %v2054_v34 = vsub.f32 1.5, %v2053_v43  ;;  %v2112_v42 = vmul.f32 %v7355_v0, %v2111_v36  ;;  %v2100_v4 = vmul.f32 %v7366_v48, %v2099_v26  ;;  %5546 = vrsqrt.f32 %v7384_v39  ;;  %v680_v36 = vpop.xlane.xlu1 %679 }
 0x144   :  { %vm2081_vm14 = vcmp.eq.f32.partialorder %v7223_v63, inf  ;;  %v2084_v3 = vand.u32 2147483648, %v7223_v63  ;;  %v2087_v2 = vmul.f32 %v7391_v27, %v7335_v62  ;;  %5548 = vrsqrt.f32 %v7389_v5 }
 0x145   :  { %v2049_v7 = vsel %vm2047_vm6, %v2048_v6, %v2046_v28  ;;  %v4980_v17 = vsel %vm12737_vm10, %v4979_v58, %v4978_v24  ;;  %v369_v10 = vmul.f32 %v113_v15, %v113_v15  ;;  %v368_v1 = vmul.f32 %v112_v22, %v112_v22 }
 0x146   :  { %v4983_v54 = vperm.slane %v2037_v31, %v6356_v19  ;;  %vm12814_vm4 = vcmask 523712   ;;  %v2080_v43 = vmul.f32 %v2079_v60, %v7223_v63  ;;  %vm2083_vm12 = vcmp.eq.f32.partialorder %v7223_v63, 0.0 }
 0x147   :  { %v4982_v21 = vsel %vm12814_vm4, %v4981_v25, %v4980_v17  ;;  %v2067_v57 = vmul.f32 %v7305_v14, %v2066_v55  ;;  %v2055_v26 = vmul.f32 %v7311_v8, %v2054_v34  ;;  %v2113_v6 = vmul.f32 0.5, %v2112_v42 }
 0x148   :  { %v2101_v58 = vmul.f32 0.5, %v2100_v4  ;;  %v834_v24 = vsel %vm521_vm0, %v369_v10, 0.0  ;;  %v7430_v28 = vpop.eup %5544  ;;  %v2088_v15 = vmul.f32 %v7391_v27, %v2087_v2  ;;  %v7433_v31 = vadd.f32 1e-20, %v683_v23 }
 0x149   :  { %835 = vadd.xlane.f32.xlu2 %v834_v24  ;;  %v831_v25 = vsel %vm521_vm0, %v368_v1, 0.0  ;;  %v367_v60 = vmul.f32 %v111_v18, %v111_v18  ;;  %v7436_v22 = vpop.eup %5546  ;;  %v4985_v14 = vperm.slane %v2049_v7, %v6551_v11  ;;  %vm2069_vm9 = vcmp.eq.f32.partialorder %v7251_v33, inf  ;;  %v686_v18 = vpop.xlane.xlu0 %685 }
 0x14a   :  { %v7441_v55 = vadd.f32 1e-20, %v677_v20  ;;  %832 = vadd.xlane.f32.xlu1 %v831_v25  ;;  %v7443_v34 = vpop.eup %5548  ;;  %vm12815_vm11 = vcmask 589312   ;;  %vm2057_vm2 = vcmp.eq.f32.partialorder %v7268_v50, inf  ;;  %vm2059_vm5 = vcmp.eq.f32.partialorder %v7268_v50, 0.0 }
 0x14b   :  { %v4984_v42 = vsel %vm12815_vm11, %v4983_v54, %v4982_v21  ;;  %v828_v4 = vsel %vm521_vm0, %v367_v60, 0.0  ;;  %v2082_v2 = vsel %vm2081_vm14, %v7223_v63, %v2080_v43  ;;  %v2068_v7 = vmul.f32 %v2067_v57, %v7251_v33  ;;  %v116_v60 = vld [vmem:[%s12692_s0 + $0x358] sm:$0xff]  ;;  %v115_v63 = vld [vmem:[%s12692_s0 + $0x350] sm:$0xff] }
 0x14c   :  { %v2056_v20 = vmul.f32 %v2055_v26, %v7268_v50  ;;  %v2114_v17 = vsub.f32 1.5, %v2113_v6  ;;  %829 = vadd.xlane.f32.xlu0 %v828_v4  ;;  %vm2071_vm6 = vcmp.eq.f32.partialorder %v7251_v33, 0.0  ;;  %v2102_v23 = vsub.f32 1.5, %v2101_v58 }
 0x14d   :  { %v2089_v10 = vmul.f32 0.5, %v2088_v15  ;;  %v2135_v1 = vmul.f32 %v7436_v22, %v7384_v39  ;;  %5550 = vrsqrt.f32 %v7433_v31  ;;  %v2147_v54 = vmul.f32 %v7430_v28, %v7378_v61  ;;  %v692_v15 = vpop.xlane.xlu2 %691 }
 0x14e   :  { %v2123_v21 = vmul.f32 %v7443_v34, %v7389_v5  ;;  %v7462_v43 = vadd.f32 1e-20, %v680_v36  ;;  %5552 = vrsqrt.f32 %v7441_v55  ;;  %v2060_v57 = vand.u32 2147483648, %v7268_v50 }
 0x14f   :  { %vm2117_vm1 = vcmp.eq.f32.partialorder %v7296_v16, inf  ;;  %v7471_v58 = vsel %vm2083_vm12, %v2084_v3, %v2082_v2  ;;  %vm12817_vm14 = vcmask 654912   ;;  %v2115_v36 = vmul.f32 %v7355_v0, %v2114_v17  ;;  %v114_v3 = vld [vmem:[%s12692_s0 + $0x348] sm:$0xff]  ;;  %v689_v2 = vpop.xlane.xlu1 %688 }
 0x150   :  { %12816 = vst [vmem:[#allocation19_spill] sm:$0xff] %v7471_v58  ;;  %v7474_v24 = vsel %vm12817_vm14, %v4985_v14, %v4984_v42  ;;  %vm2105_vm4 = vcmp.eq.f32.partialorder %v7303_v13, inf  ;;  %v7478_v25 = vadd.f32 1e-20, %v686_v18  ;;  %v2058_v0 = vsel %vm2057_vm2, %v7268_v50, %v2056_v20 }
 0x151   :  { %v2103_v14 = vmul.f32 %v7366_v48, %v2102_v23  ;;  %v2090_v42 = vsub.f32 1.5, %v2089_v10  ;;  %v2136_v4 = vmul.f32 %v7436_v22, %v2135_v1  ;;  %v2070_v17 = vsel %vm2069_vm9, %v7251_v33, %v2068_v7 }
 0x152   :  { %vm2119_vm12 = vcmp.eq.f32.partialorder %v7296_v16, 0.0  ;;  %v2148_v18 = vmul.f32 %v7430_v28, %v2147_v54  ;;  %v2124_v6 = vmul.f32 %v7443_v34, %v2123_v21  ;;  %5554 = vrsqrt.f32 %v7462_v43 }
 0x153   :  { %v7501_v26 = vpop.eup %5550  ;;  %vm2107_vm11 = vcmp.eq.f32.partialorder %v7303_v13, 0.0  ;;  %v7504_v48 = vadd.f32 1e-20, %v692_v15  ;;  %v372_v20 = vmul.f32 %v116_v60, %v116_v60  ;;  %v371_v23 = vmul.f32 %v115_v63, %v115_v63 }
 0x154   :  { %v370_v10 = vmul.f32 %v114_v3, %v114_v3  ;;  %v7506_v1 = vpop.eup %5552  ;;  %v2061_v7 = vsel %vm2059_vm5, %v2060_v57, %v2058_v0  ;;  %v2116_v54 = vmul.f32 %v2115_v36, %v7296_v16  ;;  %vm2093_vm9 = vcmp.eq.f32.partialorder %v7335_v62, inf }
 0x155   :  { %v7512_v21 = vadd.f32 1e-20, %v689_v2  ;;  %5556 = vrsqrt.f32 %v7478_v25  ;;  %v2104_v8 = vmul.f32 %v2103_v14, %v7303_v13  ;;  %v2091_v15 = vmul.f32 %v7391_v27, %v2090_v42 }
 0x156   :  { %v2137_v60 = vmul.f32 0.5, %v2136_v4  ;;  %v843_v63 = vsel %vm521_vm0, %v372_v20, 0.0  ;;  %v12818_v3 = vand.u32 2147483648, %v7251_v33  ;;  %v2149_v57 = vmul.f32 0.5, %v2148_v18 }
 0x157   :  { %v2125_v36 = vmul.f32 0.5, %v2124_v6  ;;  %844 = vadd.xlane.f32.xlu2 %v843_v63  ;;  %v840_v0 = vsel %vm521_vm0, %v371_v23, 0.0  ;;  %vm2095_vm2 = vcmp.eq.f32.partialorder %v7335_v62, 0.0  ;;  %v2183_v14 = vmul.f32 %v7501_v26, %v7433_v31  ;;  %v698_v63 = vpop.xlane.xlu1 %697 }
 0x158   :  { %v7522_v50 = vsel %vm2071_vm6, %v12818_v3, %v2070_v17  ;;  %v2159_v27 = vmul.f32 %v7506_v1, %v7441_v55  ;;  %5558 = vrsqrt.f32 %v7504_v48  ;;  %841 = vadd.xlane.f32.xlu1 %v840_v0  ;;  %v837_v33 = vsel %vm521_vm0, %v370_v10, 0.0  ;;  %v7532_v42 = vpop.eup %5554 }
 0x159   :  { %12819 = vst [vmem:[#allocation20_spill] sm:$0xff] %v7522_v50  ;;  %v4987_v6 = vperm.slane %v2061_v7, %v6524_v41  ;;  %v2118_v4 = vsel %vm2117_vm1, %v7296_v16, %v2116_v54  ;;  %v2096_v2 = vand.u32 2147483648, %v7335_v62  ;;  %5560 = vrsqrt.f32 %v7512_v21  ;;  %838 = vadd.xlane.f32.xlu0 %v837_v33  ;;  %v118_v7 = vld [vmem:[%s12692_s0 + $0x368] sm:$0xff] }
 0x15a   :  { %v2106_v18 = vsel %vm2105_vm4, %v7303_v13, %v2104_v8  ;;  %v2092_v20 = vmul.f32 %v2091_v15, %v7335_v62  ;;  %v2138_v23 = vsub.f32 1.5, %v2137_v60  ;;  %v2150_v54 = vsub.f32 1.5, %v2149_v57 }
 0x15b   :  { %v7546_v10 = vpop.eup %5556  ;;  %v2126_v3 = vsub.f32 1.5, %v2125_v36  ;;  %v12820_v0 = vand.u32 2147483648, %v7296_v16  ;;  %v2184_v8 = vmul.f32 %v7501_v26, %v2183_v14  ;;  %v2171_v15 = vmul.f32 %v7532_v42, %v7462_v43 }
 0x15c   :  { %v2160_v60 = vmul.f32 %v7506_v1, %v2159_v27  ;;  %vm12822_vm5 = vcmask 720512   ;;  %v12824_v57 = vand.u32 2147483648, %v7303_v13  ;;  %vm2141_vm6 = vcmp.eq.f32.partialorder %v7384_v39, inf  ;;  %v701_v13 = vpop.xlane.xlu2 %700 }
 0x15d   :  { %v7555_v33 = vsel %vm2119_vm12, %v12820_v0, %v2118_v4  ;;  %v7563_v17 = vsel %vm12822_vm5, %v4987_v6, %v7474_v24  ;;  %v2094_v27 = vsel %vm2093_vm9, %v7335_v62, %v2092_v20  ;;  %v2139_v4 = vmul.f32 %v7436_v22, %v2138_v23  ;;  %v695_v6 = vpop.xlane.xlu0 %694 }
 0x15e   :  { %12821 = vst [vmem:[#allocation21_spill] sm:$0xff] %v7555_v33  ;;  %v7569_v36 = vsel %vm2107_vm11, %v12824_v57, %v2106_v18  ;;  %v7573_v14 = vpop.eup %5558  ;;  %vm2129_vm1 = vcmp.eq.f32.partialorder %v7389_v5, inf  ;;  %v2195_v24 = vmul.f32 %v7546_v10, %v7478_v25  ;;  %v119_v18 = vld [vmem:[%s12692_s0 + $0x370] sm:$0xff]  ;;  %v2151_v20 = vmul.f32 %v7430_v28, %v2150_v54  ;;  %v117_v28 = vld [vmem:[%s12692_s0 + $0x360] sm:$0xff] }
 0x15f   :  { %12823 = vst [vmem:[#allocation22_spill] sm:$0xff] %v7563_v17  ;;  %v7585_v0 = vpop.eup %5560  ;;  %vm2153_vm14 = vcmp.eq.f32.partialorder %v7378_v61, inf  ;;  %v2127_v22 = vmul.f32 %v7443_v34, %v2126_v3  ;;  %v2132_v23 = vand.u32 2147483648, %v7389_v5  ;;  %vm2143_vm4 = vcmp.eq.f32.partialorder %v7384_v39, 0.0 }
 0x160   :  { %12825 = vst [vmem:[#allocation23_spill] sm:$0xff] %v7569_v36  ;;  %v2185_v16 = vmul.f32 0.5, %v2184_v8  ;;  %v2172_v57 = vmul.f32 %v7532_v42, %v2171_v15  ;;  %v2161_v33 = vmul.f32 0.5, %v2160_v60  ;;  %v7605_v34 = vsel %vm2095_vm2, %v2096_v2, %v2094_v27 }
 0x161   :  { %12826 = vst [vmem:[#allocation24_spill] sm:$0xff] %v7605_v34  ;;  %vm2131_vm12 = vcmp.eq.f32.partialorder %v7389_v5, 0.0  ;;  %v2219_v54 = vmul.f32 %v7573_v14, %v7504_v48  ;;  %v7610_v3 = vadd.f32 1e-20, %v701_v13  ;;  %v375_v8 = vmul.f32 %v119_v18, %v119_v18 }
 0x162   :  { %v2140_v15 = vmul.f32 %v2139_v4, %v7384_v39  ;;  %v2207_v60 = vmul.f32 %v7585_v0, %v7512_v21  ;;  %v2196_v36 = vmul.f32 %v7546_v10, %v2195_v24  ;;  %v374_v58 = vmul.f32 %v118_v7, %v118_v7 }
 0x163   :  { %v2152_v62 = vmul.f32 %v2151_v20, %v7378_v61  ;;  %vm2155_vm11 = vcmp.eq.f32.partialorder %v7378_v61, 0.0  ;;  %v2128_v2 = vmul.f32 %v2127_v22, %v7389_v5  ;;  %v852_v27 = vsel %vm521_vm0, %v375_v8, 0.0 }
 0x164   :  { %v373_v13 = vmul.f32 %v117_v28, %v117_v28  ;;  %v2186_v50 = vsub.f32 1.5, %v2185_v16  ;;  %v2173_v17 = vmul.f32 0.5, %v2172_v57  ;;  %v2162_v18 = vsub.f32 1.5, %v2161_v33  ;;  %853 = vadd.xlane.f32.xlu2 %v852_v27  ;;  %v120_v27 = vld [vmem:[%s12692_s0 + $0x378] sm:$0xff] }
 0x165   :  { %v849_v4 = vsel %vm521_vm0, %v374_v58, 0.0  ;;  %v2220_v40 = vmul.f32 %v7573_v14, %v2219_v54  ;;  %5562 = vrsqrt.f32 %v7610_v3  ;;  %v7623_v7 = vadd.f32 1e-20, %v698_v63 }
 0x166   :  { %850 = vadd.xlane.f32.xlu1 %v849_v4  ;;  %v846_v24 = vsel %vm521_vm0, %v373_v13, 0.0  ;;  %v2142_v20 = vsel %vm2141_vm6, %v7384_v39, %v2140_v15  ;;  %v2208_v16 = vmul.f32 %v7585_v0, %v2207_v60  ;;  %v2197_v57 = vmul.f32 0.5, %v2196_v36  ;;  %v704_v15 = vpop.xlane.xlu0 %703  ;;  %v122_v60 = vld [vmem:[%s12692_s0 + $0x388] sm:$0xff] }
 0x167   :  { %v7630_v33 = vadd.f32 1e-20, %v695_v6  ;;  %847 = vadd.xlane.f32.xlu0 %v846_v24  ;;  %v2130_v63 = vsel %vm2129_vm1, %v7389_v5, %v2128_v2  ;;  %v2192_v22 = vand.u32 2147483648, %v7433_v31  ;;  %v2180_v28 = vand.u32 2147483648, %v7462_v43  ;;  %v710_v6 = vpop.xlane.xlu2 %709  ;;  %v121_v2 = vld [vmem:[%s12692_s0 + $0x380] sm:$0xff] }
 0x168   :  { %v2154_v54 = vsel %vm2153_vm14, %v7378_v61, %v2152_v62  ;;  %v2174_v8 = vsub.f32 1.5, %v2173_v17  ;;  %v2163_v36 = vmul.f32 %v7506_v1, %v2162_v18  ;;  %vm2165_vm9 = vcmp.eq.f32.partialorder %v7441_v55, inf }
 0x169   :  { %v12827_v17 = vand.u32 2147483648, %v7384_v39  ;;  %v2187_v62 = vmul.f32 %v7501_v26, %v2186_v50  ;;  %vm2189_vm2 = vcmp.eq.f32.partialorder %v7433_v31, inf  ;;  %v2221_v13 = vmul.f32 0.5, %v2220_v40 }
 0x16a   :  { %5564 = vrsqrt.f32 %v7623_v7  ;;  %v2133_v18 = vsel %vm2131_vm12, %v2132_v23, %v2130_v63  ;;  %v2209_v4 = vmul.f32 0.5, %v2208_v16  ;;  %v2198_v24 = vsub.f32 1.5, %v2197_v57 }
 0x16b   :  { %v2145_v1 = vsel %vm2143_vm4, %v12827_v17, %v2142_v20  ;;  %5566 = vrsqrt.f32 %v7630_v33  ;;  %v7663_v58 = vpop.eup %5562  ;;  %vm2177_vm5 = vcmp.eq.f32.partialorder %v7462_v43, inf  ;;  %v7666_v39 = vadd.f32 1e-20, %v710_v6  ;;  %v707_v20 = vpop.xlane.xlu1 %706 }
 0x16c   :  { %v378_v26 = vmul.f32 %v122_v60, %v122_v60  ;;  %v377_v50 = vmul.f32 %v121_v2, %v121_v2  ;;  %v376_v17 = vmul.f32 %v120_v27, %v120_v27  ;;  %v12828_v40 = vand.u32 2147483648, %v7378_v61 }
 0x16d   :  { %v2175_v23 = vmul.f32 %v7532_v42, %v2174_v8  ;;  %v2164_v16 = vmul.f32 %v2163_v36, %v7441_v55  ;;  %vm2167_vm6 = vcmp.eq.f32.partialorder %v7441_v55, 0.0  ;;  %v5000_v57 = vperm.slane %v2145_v1, %v6333_v59 }
 0x16e   :  { %v2157_v5 = vsel %vm2155_vm11, %v12828_v40, %v2154_v54  ;;  %v4999_v63 = vperm.slane %v2133_v18, %v6304_v35  ;;  %v2188_v6 = vmul.f32 %v2187_v62, %v7433_v31  ;;  %v2222_v60 = vsub.f32 1.5, %v2221_v13  ;;  %v7710_v40 = vpop.xlane.xlu0 %712 }
 0x16f   :  { %vm2191_vm1 = vcmp.eq.f32.partialorder %v7433_v31, 0.0  ;;  %vm2179_vm14 = vcmp.eq.f32.partialorder %v7462_v43, 0.0  ;;  %v2210_v2 = vsub.f32 1.5, %v2209_v4  ;;  %v2199_v61 = vmul.f32 %v7546_v10, %v2198_v24 }
 0x170   :  { %v2255_v42 = vmul.f32 %v7663_v58, %v7610_v3  ;;  %v7683_v54 = vadd.f32 1e-20, %v707_v20  ;;  %v7685_v8 = vpop.eup %5564  ;;  %5568 = vrsqrt.f32 %v7666_v39  ;;  %v861_v36 = vsel %vm521_vm0, %v378_v26, 0.0 }
 0x171   :  { %v858_v27 = vsel %vm521_vm0, %v377_v50, 0.0  ;;  %v855_v1 = vsel %vm521_vm0, %v376_v17, 0.0  ;;  %v7691_v62 = vpop.eup %5566  ;;  %v2176_v13 = vmul.f32 %v2175_v23, %v7462_v43  ;;  %v2166_v10 = vsel %vm2165_vm9, %v7441_v55, %v2164_v16  ;;  %862 = vadd.xlane.f32.xlu2 %v861_v36 }
 0x172   :  { %v2168_v18 = vand.u32 2147483648, %v7441_v55  ;;  %v7698_v4 = vadd.f32 1e-20, %v704_v15  ;;  %v5002_v24 = vperm.slane %v2157_v5, %v6317_v45  ;;  %vm2225_vm4 = vcmp.eq.f32.partialorder %v7504_v48, inf  ;;  %859 = vadd.xlane.f32.xlu1 %v858_v27  ;;  %856 = vadd.xlane.f32.xlu0 %v855_v1  ;;  %v125_v5 = vld [vmem:[%s12692_s0 + $0x3a0] sm:$0xff] }
 0x173   :  { %vm2213_vm12 = vcmp.eq.f32.partialorder %v7512_v21, inf  ;;  %v5001_v26 = vsel %vm4879_vm7, %v5000_v57, %v4999_v63  ;;  %v2190_v50 = vsel %vm2189_vm2, %v7433_v31, %v2188_v6  ;;  %v2223_v15 = vmul.f32 %v7573_v14, %v2222_v60  ;;  %v719_v60 = vpop.xlane.xlu2 %718 }
 0x174   :  { %v2211_v17 = vmul.f32 %v7585_v0, %v2210_v2  ;;  %v2169_v23 = vsel %vm2167_vm6, %v2168_v18, %v2166_v10  ;;  %v2200_v16 = vmul.f32 %v2199_v61, %v7478_v25  ;;  %v2256_v57 = vmul.f32 %v7663_v58, %v2255_v42  ;;  %v716_v2 = vpop.xlane.xlu1 %715  ;;  %v123_v10 = vld [vmem:[%s12692_s0 + $0x390] sm:$0xff] }
 0x175   :  { %5570 = vrsqrt.f32 %v7683_v54  ;;  %v2178_v14 = vsel %vm2177_vm5, %v7462_v43, %v2176_v13  ;;  %v2243_v0 = vmul.f32 %v7685_v8, %v7623_v7  ;;  %v2231_v63 = vmul.f32 %v7691_v62, %v7630_v33  ;;  %v124_v13 = vld [vmem:[%s12692_s0 + $0x398] sm:$0xff] }
 0x176   :  { %5572 = vrsqrt.f32 %v7698_v4  ;;  %v7728_v55 = vpop.eup %5568  ;;  %v5003_v6 = vsel %vm4883_vm13, %v5002_v24, %v5001_v26  ;;  %vm2201_vm11 = vcmp.eq.f32.partialorder %v7478_v25, inf  ;;  %vm2203_vm9 = vcmp.eq.f32.partialorder %v7478_v25, 0.0 }
 0x177   :  { %v381_v61 = vmul.f32 %v125_v5, %v125_v5  ;;  %v5004_v42 = vperm.slane %v2169_v23, %v6323_v49  ;;  %v2224_v36 = vmul.f32 %v2223_v15, %v7504_v48  ;;  %v2212_v27 = vmul.f32 %v2211_v17, %v7512_v21 }
 0x178   :  { %v2204_v1 = vand.u32 2147483648, %v7478_v25  ;;  %v2193_v18 = vsel %vm2191_vm1, %v2192_v22, %v2190_v50  ;;  %v2181_v24 = vsel %vm2179_vm14, %v2180_v28, %v2178_v14  ;;  %v2202_v26 = vsel %vm2201_vm11, %v7478_v25, %v2200_v16 }
 0x179   :  { %v2257_v15 = vmul.f32 0.5, %v2256_v57  ;;  %v2244_v17 = vmul.f32 %v7685_v8, %v2243_v0  ;;  %v2232_v5 = vmul.f32 %v7691_v62, %v2231_v63  ;;  %v2291_v23 = vmul.f32 %v7728_v55, %v7666_v39 }
 0x17a   :  { %v7756_v20 = vadd.f32 1e-20, %v719_v60  ;;  %v7760_v31 = vadd.f32 1e-20, %v716_v2  ;;  %v870_v22 = vsel %vm521_vm0, %v381_v61, 0.0  ;;  %v380_v43 = vmul.f32 %v124_v13, %v124_v13 }
 0x17b   :  { %v7758_v34 = vpop.eup %5570  ;;  %v379_v28 = vmul.f32 %v123_v10, %v123_v10  ;;  %v5006_v16 = vperm.slane %v2181_v24, %v6314_v44  ;;  %v5005_v57 = vsel %vm4887_vm15, %v5004_v42, %v5003_v6  ;;  %v2226_v14 = vsel %vm2225_vm4, %v7504_v48, %v2224_v36  ;;  %871 = vadd.xlane.f32.xlu2 %v870_v22  ;;  %v722_v42 = vpop.xlane.xlu0 %721 }
 0x17c   :  { %v7763_v50 = vpop.eup %5572  ;;  %v2214_v0 = vsel %vm2213_vm12, %v7512_v21, %v2212_v27  ;;  %v2205_v63 = vsel %vm2203_vm9, %v2204_v1, %v2202_v26  ;;  %v2258_v60 = vsub.f32 1.5, %v2257_v15  ;;  %v867_v2 = vsel %vm521_vm0, %v380_v43, 0.0 }
 0x17d   :  { %v864_v61 = vsel %vm521_vm0, %v379_v28, 0.0  ;;  %v2245_v13 = vmul.f32 0.5, %v2244_v17  ;;  %v2233_v10 = vmul.f32 0.5, %v2232_v5  ;;  %v2292_v6 = vmul.f32 %v7728_v55, %v2291_v23  ;;  %868 = vadd.xlane.f32.xlu1 %v867_v2  ;;  %v725_v23 = vpop.xlane.xlu1 %724 }
 0x17e   :  { %5574 = vrsqrt.f32 %v7756_v20  ;;  %865 = vadd.xlane.f32.xlu0 %v864_v61  ;;  %v2216_v36 = vand.u32 2147483648, %v7512_v21  ;;  %v2279_v25 = vmul.f32 %v7758_v34, %v7683_v54  ;;  %v2267_v27 = vmul.f32 %v7763_v50, %v7698_v4 }
 0x17f   :  { %5576 = vrsqrt.f32 %v7760_v31  ;;  %v5008_v1 = vperm.slane %v2193_v18, %v6320_v46  ;;  %v5007_v24 = vsel %vm4891_vm3, %v5006_v16, %v5005_v57  ;;  %vm2227_vm2 = vcmp.eq.f32.partialorder %v7504_v48, 0.0 }
 0x180   :  { %vm2215_vm5 = vcmp.eq.f32.partialorder %v7512_v21, 0.0  ;;  %v12829_v26 = vand.u32 2147483648, %v7504_v48  ;;  %v5010_v5 = vperm.slane %v2205_v63, %v6382_v9  ;;  %vm2261_vm6 = vcmp.eq.f32.partialorder %v7610_v3, inf  ;;  %v128_v21 = vld [vmem:[%s12692_s0 + $0x3b8] sm:$0xff]  ;;  %v728_v63 = vpop.xlane.xlu2 %727 }
 0x181   :  { %v2217_v17 = vsel %vm2215_vm5, %v2216_v36, %v2214_v0  ;;  %v7795_v22 = vadd.f32 1e-20, %v722_v42  ;;  %v2259_v18 = vmul.f32 %v7663_v58, %v2258_v60  ;;  %v2246_v43 = vsub.f32 1.5, %v2245_v13 }
 0x182   :  { %v7791_v15 = vsel %vm2227_vm2, %v12829_v26, %v2226_v14  ;;  %v2234_v28 = vsub.f32 1.5, %v2233_v10  ;;  %v2293_v16 = vmul.f32 0.5, %v2292_v6  ;;  %v2264_v48 = vand.u32 2147483648, %v7610_v3  ;;  %v126_v26 = vld [vmem:[%s12692_s0 + $0x3a8] sm:$0xff] }
 0x183   :  { %v2280_v57 = vmul.f32 %v7758_v34, %v2279_v25  ;;  %v2268_v14 = vmul.f32 %v7763_v50, %v2267_v27  ;;  %v7805_v0 = vadd.f32 1e-20, %v7710_v40  ;;  %v5014_v58 = vperm.slane %v7791_v15, %v6356_v19 }
 0x184   :  { %v7807_v2 = vpop.eup %5574  ;;  %v5009_v60 = vsel %vm4895_vm8, %v5008_v1, %v5007_v24  ;;  %v2252_v61 = vand.u32 2147483648, %v7623_v7  ;;  %v7813_v13 = vadd.f32 1e-20, %v725_v23  ;;  %v5012_v6 = vperm.slane %v2217_v17, %v6378_v32  ;;  %v127_v24 = vld [vmem:[%s12692_s0 + $0x3b0] sm:$0xff] }
 0x185   :  { %v7815_v10 = vpop.eup %5576  ;;  %v5011_v42 = vsel %vm12737_vm10, %v5010_v5, %v5009_v60  ;;  %vm2263_vm1 = vcmp.eq.f32.partialorder %v7610_v3, 0.0  ;;  %vm2249_vm14 = vcmp.eq.f32.partialorder %v7623_v7, inf  ;;  %5578 = vrsqrt.f32 %v7795_v22 }
 0x186   :  { %v384_v40 = vmul.f32 %v128_v21, %v128_v21  ;;  %v2260_v36 = vmul.f32 %v2259_v18, %v7610_v3  ;;  %v2247_v25 = vmul.f32 %v7685_v8, %v2246_v43  ;;  %v2235_v27 = vmul.f32 %v7691_v62, %v2234_v28  ;;  %v731_v43 = vpop.xlane.xlu0 %730 }
 0x187   :  { %vm2237_vm4 = vcmp.eq.f32.partialorder %v7630_v33, inf  ;;  %v2294_v1 = vsub.f32 1.5, %v2293_v16  ;;  %v2281_v17 = vmul.f32 0.5, %v2280_v57  ;;  %v2269_v5 = vmul.f32 0.5, %v2268_v14 }
 0x188   :  { %5580 = vrsqrt.f32 %v7805_v0  ;;  %vm2251_vm12 = vcmp.eq.f32.partialorder %v7623_v7, 0.0  ;;  %v2327_v8 = vmul.f32 %v7807_v2, %v7756_v20  ;;  %v2315_v62 = vmul.f32 %v7815_v10, %v7760_v31 }
 0x189   :  { %v7839_v23 = vadd.f32 1e-20, %v728_v63  ;;  %5582 = vrsqrt.f32 %v7813_v13  ;;  %vm12830_vm11 = vcmask 523712   ;;  %v879_v28 = vsel %vm521_vm0, %v384_v40, 0.0  ;;  %v734_v40 = vpop.xlane.xlu1 %733 }
 0x18a   :  { %v5013_v18 = vsel %vm12830_vm11, %v5012_v6, %v5011_v42  ;;  %v383_v16 = vmul.f32 %v127_v24, %v127_v24  ;;  %v382_v21 = vmul.f32 %v126_v26, %v126_v26  ;;  %v2262_v57 = vsel %vm2261_vm6, %v7610_v3, %v2260_v36  ;;  %880 = vadd.xlane.f32.xlu2 %v879_v28 }
 0x18b   :  { %v2248_v14 = vmul.f32 %v2247_v25, %v7623_v7  ;;  %v2236_v60 = vmul.f32 %v2235_v27, %v7630_v33  ;;  %vm2239_vm9 = vcmp.eq.f32.partialorder %v7630_v33, 0.0  ;;  %v2295_v63 = vmul.f32 %v7728_v55, %v2294_v1  ;;  %v7851_v15 = vpop.eup %5578 }
 0x18c   :  { %v2282_v6 = vsub.f32 1.5, %v2281_v17  ;;  %v2270_v42 = vsub.f32 1.5, %v2269_v5  ;;  %v876_v24 = vsel %vm521_vm0, %v383_v16, 0.0  ;;  %v873_v26 = vsel %vm521_vm0, %v382_v21, 0.0 }
 0x18d   :  { %v2328_v36 = vmul.f32 %v7807_v2, %v2327_v8  ;;  %v2316_v25 = vmul.f32 %v7815_v10, %v2315_v62  ;;  %5584 = vrsqrt.f32 %v7839_v23  ;;  %v7858_v27 = vadd.f32 1e-20, %v731_v43  ;;  %877 = vadd.xlane.f32.xlu1 %v876_v24  ;;  %874 = vadd.xlane.f32.xlu0 %v873_v26  ;;  %v737_v8 = vpop.xlane.xlu2 %736 }
 0x18e   :  { %v7860_v55 = vpop.eup %5580  ;;  %vm12831_vm2 = vcmask 589312   ;;  %vm2297_vm5 = vcmp.eq.f32.partialorder %v7666_v39, inf  ;;  %v2300_v17 = vand.u32 2147483648, %v7666_v39  ;;  %v7874_v62 = vsel %vm2263_vm1, %v2264_v48, %v2262_v57  ;;  %v131_v57 = vld [vmem:[%s12692_s0 + $0x3d0] sm:$0xff] }
 0x18f   :  { %v7863_v1 = vsel %vm12831_vm2, %v5014_v58, %v5013_v18  ;;  %v7868_v28 = vpop.eup %5582  ;;  %12832 = vst [vmem:[#allocation25_spill] sm:$0xff] %v7874_v62  ;;  %v2250_v58 = vsel %vm2249_vm14, %v7623_v7, %v2248_v14  ;;  %vm2299_vm6 = vcmp.eq.f32.partialorder %v7666_v39, 0.0  ;;  %vm2285_vm11 = vcmp.eq.f32.partialorder %v7683_v54, inf  ;;  %v130_v14 = vld [vmem:[%s12692_s0 + $0x3c8] sm:$0xff]  ;;  %v129_v7 = vld [vmem:[%s12692_s0 + $0x3c0] sm:$0xff] }
 0x190   :  { %v2339_v18 = vmul.f32 %v7851_v15, %v7795_v22  ;;  %v7883_v43 = vadd.f32 1e-20, %v734_v40  ;;  %v2238_v16 = vsel %vm2237_vm4, %v7630_v33, %v2236_v60  ;;  %v2296_v3 = vmul.f32 %v2295_v63, %v7666_v39 }
 0x191   :  { %v2283_v48 = vmul.f32 %v7758_v34, %v2282_v6  ;;  %v2271_v21 = vmul.f32 %v7763_v50, %v2270_v42  ;;  %vm2273_vm1 = vcmp.eq.f32.partialorder %v7698_v4, inf  ;;  %v2329_v40 = vmul.f32 0.5, %v2328_v36 }
 0x192   :  { %v2317_v24 = vmul.f32 0.5, %v2316_v25  ;;  %v2303_v60 = vmul.f32 %v7860_v55, %v7805_v0  ;;  %5586 = vrsqrt.f32 %v7858_v27  ;;  %v7905_v34 = vsel %vm2251_vm12, %v2252_v61, %v2250_v58 }
 0x193   :  { %12833 = vst [vmem:[#allocation26_spill] sm:$0xff] %v7905_v34  ;;  %vm2287_vm14 = vcmp.eq.f32.partialorder %v7683_v54, 0.0  ;;  %v2276_v50 = vand.u32 2147483648, %v7698_v4  ;;  %v2351_v63 = vmul.f32 %v7868_v28, %v7813_v13  ;;  %v7911_v6 = vadd.f32 1e-20, %v737_v8  ;;  %v7913_v42 = vpop.eup %5584 }
 0x194   :  { %v2340_v26 = vmul.f32 %v7851_v15, %v2339_v18  ;;  %5588 = vrsqrt.f32 %v7883_v43  ;;  %v387_v36 = vmul.f32 %v131_v57, %v131_v57  ;;  %v386_v25 = vmul.f32 %v130_v14, %v130_v14 }
 0x195   :  { %v12834_v61 = vand.u32 2147483648, %v7630_v33  ;;  %v2298_v8 = vsel %vm2297_vm5, %v7666_v39, %v2296_v3  ;;  %v2284_v5 = vmul.f32 %v2283_v48, %v7683_v54  ;;  %vm2275_vm4 = vcmp.eq.f32.partialorder %v7698_v4, 0.0  ;;  %v746_v62 = vpop.xlane.xlu2 %745 }
 0x196   :  { %v2272_v18 = vmul.f32 %v2271_v21, %v7698_v4  ;;  %v2330_v57 = vsub.f32 1.5, %v2329_v40  ;;  %v2318_v14 = vsub.f32 1.5, %v2317_v24  ;;  %v2304_v52 = vmul.f32 %v7860_v55, %v2303_v60 }
 0x197   :  { %v2241_v58 = vsel %vm2239_vm9, %v12834_v61, %v2238_v16  ;;  %v2363_v16 = vmul.f32 %v7913_v42, %v7839_v23  ;;  %v2352_v3 = vmul.f32 %v7868_v28, %v2351_v63  ;;  %5590 = vrsqrt.f32 %v7911_v6 }
 0x198   :  { %v7939_v48 = vpop.eup %5586  ;;  %v5016_v21 = vperm.slane %v2241_v58, %v6551_v11  ;;  %v2341_v40 = vmul.f32 0.5, %v2340_v26  ;;  %v888_v24 = vsel %vm521_vm0, %v387_v36, 0.0  ;;  %v885_v60 = vsel %vm521_vm0, %v386_v25, 0.0 }
 0x199   :  { %v7946_v61 = vsel %vm2299_vm6, %v2300_v17, %v2298_v8  ;;  %v2286_v33 = vsel %vm2285_vm11, %v7683_v54, %v2284_v5  ;;  %vm2333_vm12 = vcmp.eq.f32.partialorder %v7756_v20, inf  ;;  %889 = vadd.xlane.f32.xlu2 %v888_v24  ;;  %886 = vadd.xlane.f32.xlu1 %v885_v60  ;;  %v385_v26 = vmul.f32 %v129_v7, %v129_v7  ;;  %v740_v24 = vpop.xlane.xlu0 %739 }
 0x19a   :  { %12835 = vst [vmem:[#allocation27_spill] sm:$0xff] %v7946_v61  ;;  %v7953_v58 = vpop.eup %5588  ;;  %v2274_v39 = vsel %vm2273_vm1, %v7698_v4, %v2272_v18  ;;  %v2331_v17 = vmul.f32 %v7807_v2, %v2330_v57  ;;  %v2319_v36 = vmul.f32 %v7815_v10, %v2318_v14  ;;  %v2305_v25 = vmul.f32 0.5, %v2304_v52 }
 0x19b   :  { %v2364_v5 = vmul.f32 %v7913_v42, %v2363_v16  ;;  %v2353_v8 = vmul.f32 0.5, %v2352_v3  ;;  %v2375_v63 = vmul.f32 %v7939_v48, %v7858_v27  ;;  %v882_v7 = vsel %vm521_vm0, %v385_v26, 0.0  ;;  %v134_v16 = vld [vmem:[%s12692_s0 + $0x3e8] sm:$0xff] }
 0x19c   :  { %v12836_v60 = vand.u32 2147483648, %v7683_v54  ;;  %vm2321_vm9 = vcmp.eq.f32.partialorder %v7760_v31, inf  ;;  %v2324_v2 = vand.u32 2147483648, %v7760_v31  ;;  %v2342_v52 = vsub.f32 1.5, %v2341_v40  ;;  %883 = vadd.xlane.f32.xlu0 %v882_v7 }
 0x19d   :  { %v7972_v10 = vpop.eup %5590  ;;  %vm12838_vm2 = vcmask 654912   ;;  %vm2335_vm5 = vcmp.eq.f32.partialorder %v7756_v20, 0.0  ;;  %v2387_v14 = vmul.f32 %v7953_v58, %v7883_v43  ;;  %v7989_v3 = vsel %vm2275_vm4, %v2276_v50, %v2274_v39  ;;  %v755_v26 = vpop.xlane.xlu2 %754 }
 0x19e   :  { %v7968_v34 = vsel %vm2287_vm14, %v12836_v60, %v2286_v33  ;;  %v7976_v18 = vsel %vm12838_vm2, %v5016_v21, %v7863_v1  ;;  %v743_v33 = vpop.xlane.xlu1 %742  ;;  %12840 = vst [vmem:[#allocation30_spill] sm:$0xff] %v7989_v3  ;;  %v2332_v1 = vmul.f32 %v2331_v17, %v7756_v20  ;;  %v2320_v21 = vmul.f32 %v2319_v36, %v7760_v31  ;;  %v133_v17 = vld [vmem:[%s12692_s0 + $0x3e0] sm:$0xff] }
 0x19f   :  { %12837 = vst [vmem:[#allocation28_spill] sm:$0xff] %v7968_v34  ;;  %vm2323_vm6 = vcmp.eq.f32.partialorder %v7760_v31, 0.0  ;;  %v2306_v40 = vsub.f32 1.5, %v2305_v25  ;;  %v2365_v7 = vmul.f32 0.5, %v2364_v5  ;;  %v2354_v60 = vsub.f32 1.5, %v2353_v8 }
 0x1a0   :  { %12839 = vst [vmem:[#allocation29_spill] sm:$0xff] %v7976_v18  ;;  %v2376_v57 = vmul.f32 %v7939_v48, %v2375_v63  ;;  %v2343_v54 = vmul.f32 %v7851_v15, %v2342_v52  ;;  %v2399_v4 = vmul.f32 %v7972_v10, %v7911_v6  ;;  %v8000_v50 = vadd.f32 1e-20, %v746_v62 }
 0x1a1   :  { %v390_v39 = vmul.f32 %v134_v16, %v134_v16  ;;  %v2388_v5 = vmul.f32 %v7953_v58, %v2387_v14  ;;  %v8009_v63 = vadd.f32 1e-20, %v743_v33  ;;  %v2334_v15 = vsel %vm2333_vm12, %v7756_v20, %v2332_v1  ;;  %v132_v14 = vld [vmem:[%s12692_s0 + $0x3d8] sm:$0xff] }
 0x1a2   :  { %v2322_v62 = vsel %vm2321_vm9, %v7760_v31, %v2320_v21  ;;  %v2307_v8 = vmul.f32 %v7860_v55, %v2306_v40  ;;  %vm2309_vm11 = vcmp.eq.f32.partialorder %v7805_v0, inf  ;;  %v8019_v52 = vadd.f32 1e-20, %v740_v24 }
 0x1a3   :  { %v2366_v33 = vsub.f32 1.5, %v2365_v7  ;;  %vm2357_vm1 = vcmp.eq.f32.partialorder %v7813_v13, inf  ;;  %v2377_v16 = vmul.f32 0.5, %v2376_v57  ;;  %v897_v1 = vsel %vm521_vm0, %v390_v39, 0.0  ;;  %v749_v7 = vpop.xlane.xlu0 %748 }
 0x1a4   :  { %v389_v36 = vmul.f32 %v133_v17, %v133_v17  ;;  %v2355_v21 = vmul.f32 %v7868_v28, %v2354_v60  ;;  %v2344_v55 = vmul.f32 %v2343_v54, %v7795_v22  ;;  %v2400_v40 = vmul.f32 %v7972_v10, %v2399_v4  ;;  %898 = vadd.xlane.f32.xlu2 %v897_v1 }
 0x1a5   :  { %5592 = vrsqrt.f32 %v8000_v50  ;;  %v2389_v24 = vmul.f32 0.5, %v2388_v5  ;;  %v388_v57 = vmul.f32 %v132_v14, %v132_v14  ;;  %v12841_v61 = vand.u32 2147483648, %v7756_v20  ;;  %v137_v14 = vld [vmem:[%s12692_s0 + $0x400] sm:$0xff] }
 0x1a6   :  { %5594 = vrsqrt.f32 %v8009_v63  ;;  %v894_v25 = vsel %vm521_vm0, %v389_v36, 0.0  ;;  %v2360_v28 = vand.u32 2147483648, %v7813_v13  ;;  %v8038_v54 = vadd.f32 1e-20, %v755_v26  ;;  %v752_v36 = vpop.xlane.xlu1 %751 }
 0x1a7   :  { %v2337_v39 = vsel %vm2335_vm5, %v12841_v61, %v2334_v15  ;;  %5596 = vrsqrt.f32 %v8019_v52  ;;  %895 = vadd.xlane.f32.xlu1 %v894_v25  ;;  %v2325_v60 = vsel %vm2323_vm6, %v2324_v2, %v2322_v62  ;;  %v2308_v4 = vmul.f32 %v2307_v8, %v7805_v0 }
 0x1a8   :  { %vm2369_vm14 = vcmp.eq.f32.partialorder %v7839_v23, inf  ;;  %vm2359_vm4 = vcmp.eq.f32.partialorder %v7813_v13, 0.0  ;;  %v2378_v17 = vsub.f32 1.5, %v2377_v16  ;;  %v891_v20 = vsel %vm521_vm0, %v388_v57, 0.0 }
 0x1a9   :  { %v2367_v61 = vmul.f32 %v7913_v42, %v2366_v33  ;;  %v2356_v5 = vmul.f32 %v2355_v21, %v7813_v13  ;;  %vm2345_vm12 = vcmp.eq.f32.partialorder %v7795_v22, inf  ;;  %v2401_v26 = vmul.f32 0.5, %v2400_v40  ;;  %892 = vadd.xlane.f32.xlu0 %v891_v20  ;;  %v136_v33 = vld [vmem:[%s12692_s0 + $0x3f8] sm:$0xff] }
 0x1aa   :  { %v2346_v31 = vsel %vm2345_vm12, %v7795_v22, %v2344_v55  ;;  %vm2347_vm9 = vcmp.eq.f32.partialorder %v7795_v22, 0.0  ;;  %v2348_v2 = vand.u32 2147483648, %v7795_v22  ;;  %v2390_v25 = vsub.f32 1.5, %v2389_v24  ;;  %v135_v24 = vld [vmem:[%s12692_s0 + $0x3f0] sm:$0xff] }
 0x1ab   :  { %v8052_v15 = vpop.eup %5592  ;;  %v5031_v62 = vperm.slane %v2337_v39, %v6333_v59  ;;  %v5030_v8 = vperm.slane %v2325_v60, %v6304_v35  ;;  %5598 = vrsqrt.f32 %v8038_v54  ;;  %v8057_v42 = vadd.f32 1e-20, %v752_v36 }
 0x1ac   :  { %v8065_v16 = vpop.eup %5594  ;;  %v8070_v1 = vsel %vm2309_vm11, %v7805_v0, %v2308_v4  ;;  %vm2371_vm2 = vcmp.eq.f32.partialorder %v7839_v23, 0.0  ;;  %v2379_v55 = vmul.f32 %v7939_v48, %v2378_v17  ;;  %v8075_v40 = vadd.f32 1e-20, %v749_v7  ;;  %v764_v17 = vpop.xlane.xlu2 %763 }
 0x1ad   :  { %v8080_v57 = vpop.eup %5596  ;;  %v2368_v39 = vmul.f32 %v2367_v61, %v7839_v23  ;;  %v2358_v60 = vsel %vm2357_vm1, %v7813_v13, %v2356_v5  ;;  %v2349_v4 = vsel %vm2347_vm9, %v2348_v2, %v2346_v31  ;;  %v2402_v36 = vsub.f32 1.5, %v2401_v26  ;;  %v8101_v26 = vpop.xlane.xlu0 %757 }
 0x1ae   :  { %v2391_v48 = vmul.f32 %v7953_v58, %v2390_v25  ;;  %v2435_v7 = vmul.f32 %v8052_v15, %v8000_v50  ;;  %v393_v20 = vmul.f32 %v137_v14, %v137_v14  ;;  %v392_v21 = vmul.f32 %v136_v33, %v136_v33 }
 0x1af   :  { %v5032_v34 = vsel %vm4879_vm7, %v5031_v62, %v5030_v8  ;;  %v2423_v61 = vmul.f32 %v8065_v16, %v8009_v63  ;;  %5600 = vrsqrt.f32 %v8057_v42  ;;  %v391_v5 = vmul.f32 %v135_v24, %v135_v24 }
 0x1b0   :  { %vm2405_vm5 = vcmp.eq.f32.partialorder %v7911_v6, inf  ;;  %vm2393_vm6 = vcmp.eq.f32.partialorder %v7883_v43, inf  ;;  %v2380_v22 = vmul.f32 %v2379_v55, %v7858_v27  ;;  %v2411_v58 = vmul.f32 %v8080_v57, %v8019_v52  ;;  %v761_v55 = vpop.xlane.xlu1 %760 }
 0x1b1   :  { %5602 = vrsqrt.f32 %v8075_v40  ;;  %v8103_v31 = vpop.eup %5598  ;;  %v2370_v2 = vsel %vm2369_vm14, %v7839_v23, %v2368_v39  ;;  %v2361_v25 = vsel %vm2359_vm4, %v2360_v28, %v2358_v60  ;;  %v5033_v62 = vperm.slane %v2349_v4, %v6317_v45  ;;  %v140_v60 = vld [vmem:[%s12692_s0 + $0x418] sm:$0xff] }
 0x1b2   :  { %v2403_v8 = vmul.f32 %v7972_v10, %v2402_v36  ;;  %v2392_v14 = vmul.f32 %v2391_v48, %v7883_v43  ;;  %v2436_v33 = vmul.f32 %v8052_v15, %v2435_v7  ;;  %v906_v24 = vsel %vm521_vm0, %v393_v20, 0.0 }
 0x1b3   :  { %v903_v3 = vsel %vm521_vm0, %v392_v21, 0.0  ;;  %vm2395_vm11 = vcmp.eq.f32.partialorder %v7883_v43, 0.0  ;;  %vm2381_vm1 = vcmp.eq.f32.partialorder %v7858_v27, inf  ;;  %v2424_v13 = vmul.f32 %v8065_v16, %v2423_v61  ;;  %907 = vadd.xlane.f32.xlu2 %v906_v24 }
 0x1b4   :  { %904 = vadd.xlane.f32.xlu1 %v903_v3  ;;  %v900_v28 = vsel %vm521_vm0, %v391_v5, 0.0  ;;  %vm2311_vm14 = vcmp.eq.f32.partialorder %v7805_v0, 0.0  ;;  %v2382_v10 = vsel %vm2381_vm1, %v7858_v27, %v2380_v22  ;;  %vm2383_vm4 = vcmp.eq.f32.partialorder %v7858_v27, 0.0  ;;  %v139_v3 = vld [vmem:[%s12692_s0 + $0x410] sm:$0xff] }
 0x1b5   :  { %v2412_v39 = vmul.f32 %v8080_v57, %v2411_v58  ;;  %v2471_v21 = vmul.f32 %v8103_v31, %v8038_v54  ;;  %901 = vadd.xlane.f32.xlu0 %v900_v28  ;;  %v8132_v4 = vpop.eup %5600  ;;  %v12842_v36 = vand.u32 2147483648, %v7839_v23  ;;  %v5035_v7 = vperm.slane %v2361_v25, %v6323_v49 }
 0x1b6   :  { %v2404_v20 = vmul.f32 %v2403_v8, %v7911_v6  ;;  %vm2407_vm12 = vcmp.eq.f32.partialorder %v7911_v6, 0.0  ;;  %v2384_v61 = vand.u32 2147483648, %v7858_v27  ;;  %v5034_v22 = vsel %vm4883_vm13, %v5033_v62, %v5032_v34  ;;  %v8156_v62 = vpop.xlane.xlu2 %772 }
 0x1b7   :  { %v2373_v48 = vsel %vm2371_vm2, %v12842_v36, %v2370_v2  ;;  %v8142_v5 = vpop.eup %5602  ;;  %v2394_v58 = vsel %vm2393_vm6, %v7883_v43, %v2392_v14  ;;  %v2437_v24 = vmul.f32 0.5, %v2436_v33  ;;  %v8148_v28 = vadd.f32 1e-20, %v764_v17  ;;  %v138_v17 = vld [vmem:[%s12692_s0 + $0x408] sm:$0xff] }
 0x1b8   :  { %v2385_v23 = vsel %vm2383_vm4, %v2384_v61, %v2382_v10  ;;  %v2425_v2 = vmul.f32 0.5, %v2424_v13  ;;  %v396_v25 = vmul.f32 %v140_v60, %v140_v60  ;;  %v395_v8 = vmul.f32 %v139_v3, %v139_v3  ;;  %v767_v60 = vpop.xlane.xlu0 %766 }
 0x1b9   :  { %v2396_v36 = vand.u32 2147483648, %v7883_v43  ;;  %v2413_v18 = vmul.f32 0.5, %v2412_v39  ;;  %v2472_v38 = vmul.f32 %v8103_v31, %v2471_v21  ;;  %v2459_v34 = vmul.f32 %v8132_v4, %v8057_v42  ;;  %v770_v43 = vpop.xlane.xlu1 %769 }
 0x1ba   :  { %v5037_v27 = vperm.slane %v2373_v48, %v6314_v44  ;;  %v5036_v14 = vsel %vm4887_vm15, %v5035_v7, %v5034_v22  ;;  %v2406_v33 = vsel %vm2405_vm5, %v7911_v6, %v2404_v20  ;;  %v2447_v13 = vmul.f32 %v8142_v5, %v8075_v40 }
 0x1bb   :  { %v2397_v10 = vsel %vm2395_vm11, %v2396_v36, %v2394_v58  ;;  %v5039_v39 = vperm.slane %v2385_v23, %v6320_v46  ;;  %v2438_v21 = vsub.f32 1.5, %v2437_v24  ;;  %5604 = vrsqrt.f32 %v8148_v28 }
 0x1bc   :  { %v2426_v3 = vsub.f32 1.5, %v2425_v2  ;;  %v915_v48 = vsel %vm521_vm0, %v396_v25, 0.0  ;;  %v912_v7 = vsel %vm521_vm0, %v395_v8, 0.0  ;;  %v394_v61 = vmul.f32 %v138_v17, %v138_v17 }
 0x1bd   :  { %v2414_v22 = vsub.f32 1.5, %v2413_v18  ;;  %v2473_v20 = vmul.f32 0.5, %v2472_v38  ;;  %v2460_v37 = vmul.f32 %v8132_v4, %v2459_v34  ;;  %v8175_v12 = vadd.f32 1e-20, %v761_v55  ;;  %916 = vadd.xlane.f32.xlu2 %v915_v48  ;;  %913 = vadd.xlane.f32.xlu1 %v912_v7 }
 0x1be   :  { %v12844_v58 = vand.u32 2147483648, %v7805_v0  ;;  %v2448_v23 = vmul.f32 %v8142_v5, %v2447_v13  ;;  %v8185_v2 = vadd.f32 1e-20, %v767_v60  ;;  %v909_v38 = vsel %vm521_vm0, %v394_v61, 0.0 }
 0x1bf   :  { %12843 = vst [vmem:[#allocation31_spill] sm:$0xff] %v8175_v12  ;;  %v12846_v18 = vand.u32 2147483648, %v7911_v6  ;;  %v5041_v25 = vperm.slane %v2397_v10, %v6382_v9  ;;  %v5038_v8 = vsel %vm4891_vm3, %v5037_v27, %v5036_v14  ;;  %vm2441_vm9 = vcmp.eq.f32.partialorder %v8000_v50, inf  ;;  %910 = vadd.xlane.f32.xlu0 %v909_v38 }
 0x1c0   :  { %v8182_v24 = vsel %vm2311_vm14, %v12844_v58, %v8070_v1  ;;  %v5040_v0 = vsel %vm4895_vm8, %v5039_v39, %v5038_v8  ;;  %v2439_v1 = vmul.f32 %v8052_v15, %v2438_v21  ;;  %v2427_v36 = vmul.f32 %v8065_v16, %v2426_v3 }
 0x1c1   :  { %12845 = vst [vmem:[#allocation32_spill] sm:$0xff] %v8182_v24  ;;  %v2409_v55 = vsel %vm2407_vm12, %v12846_v18, %v2406_v33  ;;  %v8198_v34 = vadd.f32 1e-20, %v770_v43  ;;  %v8200_v17 = vpop.eup %5604  ;;  %v2415_v6 = vmul.f32 %v8080_v57, %v2414_v22  ;;  %v2474_v33 = vsub.f32 1.5, %v2473_v20  ;;  %v782_v57 = vpop.xlane.xlu2 %781 }
 0x1c2   :  { %v2461_v13 = vmul.f32 0.5, %v2460_v37  ;;  %5606 = vrsqrt.f32 %v8175_v12  ;;  %v2444_v27 = vand.u32 2147483648, %v8000_v50  ;;  %vm2429_vm2 = vcmp.eq.f32.partialorder %v8009_v63, inf  ;;  %v143_v37 = vld [vmem:[%s12692_s0 + $0x430] sm:$0xff]  ;;  %v776_v22 = vpop.xlane.xlu0 %775 }
 0x1c3   :  { %v2449_v14 = vmul.f32 0.5, %v2448_v23  ;;  %5608 = vrsqrt.f32 %v8185_v2  ;;  %v5043_v15 = vperm.slane %v2409_v55, %v6378_v32  ;;  %v5042_v16 = vsel %vm12737_vm10, %v5041_v25, %v5040_v0  ;;  %v142_v55 = vld [vmem:[%s12692_s0 + $0x428] sm:$0xff] }
 0x1c4   :  { %v2432_v10 = vand.u32 2147483648, %v8009_v63  ;;  %vm2417_vm5 = vcmp.eq.f32.partialorder %v8019_v52, inf  ;;  %v2440_v39 = vmul.f32 %v2439_v1, %v8000_v50  ;;  %vm2443_vm6 = vcmp.eq.f32.partialorder %v8000_v50, 0.0 }
 0x1c5   :  { %v2507_v21 = vmul.f32 %v8200_v17, %v8148_v28  ;;  %v8219_v60 = vadd.f32 1e-20, %v8101_v26  ;;  %5610 = vrsqrt.f32 %v8198_v34  ;;  %v2428_v3 = vmul.f32 %v2427_v36, %v8009_v63 }
 0x1c6   :  { %vm2431_vm11 = vcmp.eq.f32.partialorder %v8009_v63, 0.0  ;;  %v2416_v48 = vmul.f32 %v2415_v6, %v8019_v52  ;;  %v2475_v7 = vmul.f32 %v8103_v31, %v2474_v33  ;;  %v2462_v61 = vsub.f32 1.5, %v2461_v13  ;;  %v779_v31 = vpop.xlane.xlu1 %778 }
 0x1c7   :  { %vm2419_vm1 = vcmp.eq.f32.partialorder %v8019_v52, 0.0  ;;  %v2420_v20 = vand.u32 2147483648, %v8019_v52  ;;  %v2450_v43 = vsub.f32 1.5, %v2449_v14  ;;  %v399_v58 = vmul.f32 %v143_v37, %v143_v37 }
 0x1c8   :  { %v8228_v26 = vpop.eup %5606  ;;  %vm12847_vm14 = vcmask 523712   ;;  %vm2477_vm4 = vcmp.eq.f32.partialorder %v8038_v54, inf  ;;  %v2480_v38 = vand.u32 2147483648, %v8038_v54  ;;  %v8236_v18 = vadd.f32 1e-20, %v8156_v62  ;;  %v141_v62 = vld [vmem:[%s12692_s0 + $0x420] sm:$0xff] }
 0x1c9   :  { %v8231_v23 = vsel %vm12847_vm14, %v5043_v15, %v5042_v16  ;;  %v8241_v25 = vpop.eup %5608  ;;  %v2442_v8 = vsel %vm2441_vm9, %v8000_v50, %v2440_v39  ;;  %v2508_v0 = vmul.f32 %v8200_v17, %v2507_v21  ;;  %5612 = vrsqrt.f32 %v8219_v60 }
 0x1ca   :  { %v8248_v1 = vadd.f32 1e-20, %v776_v22  ;;  %v2430_v36 = vsel %vm2429_vm2, %v8009_v63, %v2428_v3  ;;  %v2418_v6 = vsel %vm2417_vm5, %v8019_v52, %v2416_v48  ;;  %v2476_v33 = vmul.f32 %v2475_v7, %v8038_v54 }
 0x1cb   :  { %vm2479_vm12 = vcmp.eq.f32.partialorder %v8038_v54, 0.0  ;;  %v2463_v13 = vmul.f32 %v8132_v4, %v2462_v61  ;;  %vm2465_vm9 = vcmp.eq.f32.partialorder %v8057_v42, inf  ;;  %v8263_v14 = vpop.eup %5610  ;;  %v2451_v15 = vmul.f32 %v8142_v5, %v2450_v43 }
 0x1cc   :  { %v8266_v16 = vadd.f32 1e-20, %v779_v31  ;;  %v924_v37 = vsel %vm521_vm0, %v399_v58, 0.0  ;;  %v398_v39 = vmul.f32 %v142_v55, %v142_v55  ;;  %v2495_v21 = vmul.f32 %v8228_v26, %v8175_v12  ;;  %v791_v58 = vpop.xlane.xlu2 %790 }
 0x1cd   :  { %5614 = vrsqrt.f32 %v8236_v18  ;;  %v2519_v3 = vmul.f32 %v8241_v25, %v8185_v2  ;;  %925 = vadd.xlane.f32.xlu2 %v924_v37  ;;  %v397_v4 = vmul.f32 %v141_v62, %v141_v62  ;;  %v2468_v48 = vand.u32 2147483648, %v8057_v42  ;;  %v785_v37 = vpop.xlane.xlu0 %784 }
 0x1ce   :  { %v2509_v7 = vmul.f32 0.5, %v2508_v0  ;;  %5616 = vrsqrt.f32 %v8248_v1  ;;  %v921_v5 = vsel %vm521_vm0, %v398_v39, 0.0  ;;  %v8279_v61 = vsel %vm2443_vm6, %v2444_v27, %v2442_v8 }
 0x1cf   :  { %12848 = vst [vmem:[#allocation33_spill] sm:$0xff] %v8279_v61  ;;  %vm2467_vm2 = vcmp.eq.f32.partialorder %v8057_v42, 0.0  ;;  %v2531_v22 = vmul.f32 %v8263_v14, %v8198_v34  ;;  %v8284_v43 = vadd.f32 1e-20, %v782_v57  ;;  %922 = vadd.xlane.f32.xlu1 %v921_v5  ;;  %v918_v31 = vsel %vm521_vm0, %v397_v4, 0.0  ;;  %v8287_v55 = vpop.eup %5612 }
 0x1d0   :  { %v8291_v0 = vsel %vm2431_vm11, %v2432_v10, %v2430_v36  ;;  %v2421_v50 = vsel %vm2419_vm1, %v2420_v20, %v2418_v6  ;;  %v2464_v27 = vmul.f32 %v2463_v13, %v8057_v42  ;;  %5618 = vrsqrt.f32 %v8266_v16  ;;  %919 = vadd.xlane.f32.xlu0 %v918_v31  ;;  %v146_v20 = vld [vmem:[%s12692_s0 + $0x448] sm:$0xff] }
 0x1d1   :  { %12849 = vst [vmem:[#allocation34_spill] sm:$0xff] %v8291_v0  ;;  %v2478_v57 = vsel %vm2477_vm4, %v8038_v54, %v2476_v33  ;;  %v2452_v8 = vmul.f32 %v2451_v15, %v8075_v40  ;;  %v2496_v62 = vmul.f32 %v8228_v26, %v2495_v21  ;;  %v2520_v63 = vmul.f32 %v8241_v25, %v2519_v3  ;;  %v788_v15 = vpop.xlane.xlu1 %787 }
 0x1d2   :  { %vm2453_vm5 = vcmp.eq.f32.partialorder %v8075_v40, inf  ;;  %vm2455_vm6 = vcmp.eq.f32.partialorder %v8075_v40, 0.0  ;;  %v2510_v52 = vsub.f32 1.5, %v2509_v7  ;;  %v2456_v6 = vand.u32 2147483648, %v8075_v40 }
 0x1d3   :  { %v8310_v36 = vpop.eup %5614  ;;  %v2483_v33 = vmul.f32 %v8287_v55, %v8219_v60  ;;  %v2532_v13 = vmul.f32 %v8263_v14, %v2531_v22  ;;  %5620 = vrsqrt.f32 %v8284_v43  ;;  %v5045_v3 = vperm.slane %v2421_v50, %v6356_v19 }
 0x1d4   :  { %v8317_v39 = vpop.eup %5616  ;;  %v8326_v4 = vsel %vm2479_vm12, %v2480_v38, %v2478_v57  ;;  %v2466_v7 = vsel %vm2465_vm9, %v8057_v42, %v2464_v27  ;;  %v2454_v5 = vsel %vm2453_vm5, %v8075_v40, %v2452_v8  ;;  %v2497_v22 = vmul.f32 0.5, %v2496_v62 }
 0x1d5   :  { %12850 = vst [vmem:[#allocation35_spill] sm:$0xff] %v8326_v4  ;;  %v2521_v31 = vmul.f32 0.5, %v2520_v63  ;;  %v402_v10 = vmul.f32 %v146_v20, %v146_v20  ;;  %v2511_v50 = vmul.f32 %v8200_v17, %v2510_v52  ;;  %v2543_v38 = vmul.f32 %v8310_v36, %v8236_v18  ;;  %v145_v17 = vld [vmem:[%s12692_s0 + $0x440] sm:$0xff]  ;;  %v144_v63 = vld [vmem:[%s12692_s0 + $0x438] sm:$0xff] }
 0x1d6   :  { %v8334_v21 = vpop.eup %5618  ;;  %vm2513_vm11 = vcmp.eq.f32.partialorder %v8148_v28, inf  ;;  %v2484_v27 = vmul.f32 %v8287_v55, %v2483_v33  ;;  %v2533_v57 = vmul.f32 0.5, %v2532_v13  ;;  %v2555_v8 = vmul.f32 %v8317_v39, %v8248_v1 }
 0x1d7   :  { %v8345_v62 = vadd.f32 1e-20, %v791_v58  ;;  %vm12851_vm1 = vcmask 589312   ;;  %v8361_v33 = vsel %vm2467_vm2, %v2468_v48, %v2466_v7  ;;  %v8365_v58 = vsel %vm2455_vm6, %v2456_v6, %v2454_v5 }
 0x1d8   :  { %v8355_v52 = vsel %vm12851_vm1, %v5045_v3, %v8231_v23  ;;  %12853 = vst [vmem:[#allocation37_spill] sm:$0xff] %v8361_v33  ;;  %v2498_v54 = vsub.f32 1.5, %v2497_v22  ;;  %v2522_v61 = vsub.f32 1.5, %v2521_v31  ;;  %v2567_v24 = vmul.f32 %v8334_v21, %v8266_v16  ;;  %v8371_v23 = vpop.xlane.xlu2 %799 }
 0x1d9   :  { %12852 = vst [vmem:[#allocation36_spill] sm:$0xff] %v8355_v52  ;;  %v8367_v13 = vpop.eup %5620  ;;  %v933_v3 = vsel %vm521_vm0, %v402_v10, 0.0  ;;  %v2512_v20 = vmul.f32 %v2511_v50, %v8148_v28  ;;  %vm2515_vm14 = vcmp.eq.f32.partialorder %v8148_v28, 0.0  ;;  %v2544_v42 = vmul.f32 %v8310_v36, %v2543_v38  ;;  %v149_v38 = vld [vmem:[%s12692_s0 + $0x460] sm:$0xff] }
 0x1da   :  { %12854 = vst [vmem:[#allocation38_spill] sm:$0xff] %v8365_v58  ;;  %934 = vadd.xlane.f32.xlu2 %v933_v3  ;;  %v401_v40 = vmul.f32 %v145_v17, %v145_v17  ;;  %v400_v48 = vmul.f32 %v144_v63, %v144_v63  ;;  %v2485_v6 = vmul.f32 0.5, %v2484_v27  ;;  %v2534_v7 = vsub.f32 1.5, %v2533_v57  ;;  %v8390_v63 = vpop.xlane.xlu0 %793 }
 0x1db   :  { %v2556_v5 = vmul.f32 %v8317_v39, %v2555_v8  ;;  %5622 = vrsqrt.f32 %v8345_v62  ;;  %v2579_v22 = vmul.f32 %v8367_v13, %v8284_v43  ;;  %v8381_v31 = vadd.f32 1e-20, %v788_v15  ;;  %v797_v8 = vpop.xlane.xlu1 %796 }
 0x1dc   :  { %v930_v10 = vsel %vm521_vm0, %v401_v40, 0.0  ;;  %v927_v50 = vsel %vm521_vm0, %v400_v48, 0.0  ;;  %v2523_v27 = vmul.f32 %v8241_v25, %v2522_v61  ;;  %v2568_v57 = vmul.f32 %v8334_v21, %v2567_v24  ;;  %v148_v24 = vld [vmem:[%s12692_s0 + $0x458] sm:$0xff] }
 0x1dd   :  { %931 = vadd.xlane.f32.xlu1 %v930_v10  ;;  %928 = vadd.xlane.f32.xlu0 %v927_v50  ;;  %v2499_v15 = vmul.f32 %v8228_v26, %v2498_v54  ;;  %v2545_v3 = vmul.f32 0.5, %v2544_v42  ;;  %v8394_v48 = vadd.f32 1e-20, %v785_v37  ;;  %v2486_v61 = vsub.f32 1.5, %v2485_v6 }
 0x1de   :  { %v2535_v10 = vmul.f32 %v8263_v14, %v2534_v7  ;;  %v2557_v26 = vmul.f32 0.5, %v2556_v5  ;;  %v2514_v37 = vsel %vm2513_vm11, %v8148_v28, %v2512_v20  ;;  %vm2501_vm4 = vcmp.eq.f32.partialorder %v8175_v12, inf }
 0x1df   :  { %vm2537_vm12 = vcmp.eq.f32.partialorder %v8198_v34, inf  ;;  %v2580_v54 = vmul.f32 %v8367_v13, %v2579_v22  ;;  %5624 = vrsqrt.f32 %v8381_v31  ;;  %vm2539_vm9 = vcmp.eq.f32.partialorder %v8198_v34, 0.0 }
 0x1e0   :  { %v2524_v6 = vmul.f32 %v2523_v27, %v8185_v2  ;;  %v2569_v14 = vmul.f32 0.5, %v2568_v57  ;;  %v405_v7 = vmul.f32 %v149_v38, %v149_v38  ;;  %v404_v5 = vmul.f32 %v148_v24, %v148_v24  ;;  %v8428_v57 = vpop.xlane.xlu2 %808 }
 0x1e1   :  { %v8412_v42 = vpop.eup %5622  ;;  %v2500_v50 = vmul.f32 %v2499_v15, %v8175_v12  ;;  %v2546_v20 = vsub.f32 1.5, %v2545_v3  ;;  %v2540_v25 = vand.u32 2147483648, %v8198_v34  ;;  %5626 = vrsqrt.f32 %v8394_v48  ;;  %v147_v15 = vld [vmem:[%s12692_s0 + $0x450] sm:$0xff] }
 0x1e2   :  { %v12855_v22 = vand.u32 2147483648, %v8148_v28  ;;  %v2487_v40 = vmul.f32 %v8287_v55, %v2486_v61  ;;  %vm2489_vm2 = vcmp.eq.f32.partialorder %v8219_v60, inf  ;;  %v2536_v38 = vmul.f32 %v2535_v10, %v8198_v34 }
 0x1e3   :  { %v2558_v27 = vsub.f32 1.5, %v2557_v26  ;;  %vm2525_vm5 = vcmp.eq.f32.partialorder %v8185_v2, inf  ;;  %v2615_v28 = vmul.f32 %v8412_v42, %v8345_v62  ;;  %v942_v3 = vsel %vm521_vm0, %v405_v7, 0.0 }
 0x1e4   :  { %v8423_v17 = vsel %vm2515_vm14, %v12855_v22, %v2514_v37  ;;  %v939_v55 = vsel %vm521_vm0, %v404_v5, 0.0  ;;  %vm2549_vm6 = vcmp.eq.f32.partialorder %v8236_v18, inf  ;;  %v2526_v24 = vsel %vm2525_vm5, %v8185_v2, %v2524_v6  ;;  %943 = vadd.xlane.f32.xlu2 %v942_v3  ;;  %v8455_v3 = vpop.xlane.xlu1 %805 }
 0x1e5   :  { %vm2527_vm11 = vcmp.eq.f32.partialorder %v8185_v2, 0.0  ;;  %v2581_v61 = vmul.f32 0.5, %v2580_v54  ;;  %v2570_v10 = vsub.f32 1.5, %v2569_v14  ;;  %v8441_v26 = vpop.eup %5624  ;;  %v2547_v37 = vmul.f32 %v8310_v36, %v2546_v20  ;;  %940 = vadd.xlane.f32.xlu1 %v939_v55  ;;  %v8457_v36 = vpop.xlane.xlu0 %802 }
 0x1e6   :  { %v2528_v22 = vand.u32 2147483648, %v8185_v2  ;;  %v8446_v4 = vadd.f32 1e-20, %v8371_v23  ;;  %v403_v7 = vmul.f32 %v147_v15, %v147_v15  ;;  %v5061_v5 = vperm.slane %v8423_v17, %v6304_v35 }
 0x1e7   :  { %v2488_v6 = vmul.f32 %v2487_v40, %v8219_v60  ;;  %v2538_v54 = vsel %vm2537_vm12, %v8198_v34, %v2536_v38  ;;  %v2559_v14 = vmul.f32 %v8317_v39, %v2558_v27  ;;  %v8459_v20 = vpop.eup %5626  ;;  %vm2551_vm1 = vcmp.eq.f32.partialorder %v8236_v18, 0.0 }
 0x1e8   :  { %v2529_v23 = vsel %vm2527_vm11, %v2528_v22, %v2526_v24  ;;  %v2616_v17 = vmul.f32 %v8412_v42, %v2615_v28  ;;  %v8465_v40 = vadd.f32 1e-20, %v797_v8  ;;  %v936_v15 = vsel %vm521_vm0, %v403_v7, 0.0  ;;  %v8499_v22 = vpop.xlane.xlu2 %817  ;;  %v152_v7 = vld [vmem:[%s12692_s0 + $0x478] sm:$0xff] }
 0x1e9   :  { %v8471_v39 = vsel %vm2501_vm4, %v8175_v12, %v2500_v50  ;;  %v2582_v38 = vsub.f32 1.5, %v2581_v61  ;;  %v2571_v27 = vmul.f32 %v8334_v21, %v2570_v10  ;;  %v2603_v55 = vmul.f32 %v8441_v26, %v8381_v31  ;;  %937 = vadd.xlane.f32.xlu0 %v936_v15 }
 0x1ea   :  { %12856 = vst [vmem:[#allocation39_spill] sm:$0xff] %v8471_v39  ;;  %v2548_v2 = vmul.f32 %v2547_v37, %v8236_v18  ;;  %v2541_v8 = vsel %vm2539_vm9, %v2540_v25, %v2538_v54  ;;  %5628 = vrsqrt.f32 %v8446_v4  ;;  %vm2491_vm14 = vcmp.eq.f32.partialorder %v8219_v60, 0.0 }
 0x1eb   :  { %v5062_v50 = vperm.slane %v2529_v23, %v6333_v59  ;;  %v2560_v24 = vmul.f32 %v2559_v14, %v8248_v1  ;;  %v2591_v21 = vmul.f32 %v8459_v20, %v8394_v48  ;;  %v8487_v61 = vadd.f32 1e-20, %v8390_v63 }
 0x1ec   :  { %v2490_v34 = vsel %vm2489_vm2, %v8219_v60, %v2488_v6  ;;  %vm2573_vm4 = vcmp.eq.f32.partialorder %v8266_v16, inf  ;;  %v2617_v25 = vmul.f32 0.5, %v2616_v17  ;;  %5630 = vrsqrt.f32 %v8465_v40  ;;  %v151_v6 = vld [vmem:[%s12692_s0 + $0x470] sm:$0xff] }
 0x1ed   :  { %v2583_v10 = vmul.f32 %v8367_v13, %v2582_v38  ;;  %vm2585_vm12 = vcmp.eq.f32.partialorder %v8284_v43, inf  ;;  %v2572_v37 = vmul.f32 %v2571_v27, %v8266_v16  ;;  %vm2561_vm9 = vcmp.eq.f32.partialorder %v8248_v1, inf  ;;  %v150_v13 = vld [vmem:[%s12692_s0 + $0x468] sm:$0xff] }
 0x1ee   :  { %v2604_v63 = vmul.f32 %v8441_v26, %v2603_v55  ;;  %v2550_v54 = vsel %vm2549_vm6, %v8236_v18, %v2548_v2  ;;  %v5064_v14 = vperm.slane %v2541_v8, %v6317_v45  ;;  %vm2563_vm2 = vcmp.eq.f32.partialorder %v8248_v1, 0.0 }
 0x1ef   :  { %v2564_v23 = vand.u32 2147483648, %v8248_v1  ;;  %v5063_v17 = vsel %vm4879_vm7, %v5062_v50, %v5061_v5  ;;  %v2562_v15 = vsel %vm2561_vm9, %v8248_v1, %v2560_v24  ;;  %v2592_v38 = vmul.f32 %v8459_v20, %v2591_v21  ;;  %v815_v24 = vpop.xlane.xlu1 %814  ;;  %v812_v21 = vpop.xlane.xlu0 %811 }
 0x1f0   :  { %5632 = vrsqrt.f32 %v8487_v61  ;;  %v8520_v27 = vpop.eup %5628  ;;  %v2618_v55 = vsub.f32 1.5, %v2617_v25  ;;  %v408_v28 = vmul.f32 %v152_v7, %v152_v7  ;;  %v407_v33 = vmul.f32 %v151_v6, %v151_v6 }
 0x1f1   :  { %v406_v2 = vmul.f32 %v150_v13, %v150_v13  ;;  %v12857_v8 = vand.u32 2147483648, %v8236_v18  ;;  %v2584_v0 = vmul.f32 %v2583_v10, %v8284_v43  ;;  %v2574_v5 = vsel %vm2573_vm4, %v8266_v16, %v2572_v37 }
 0x1f2   :  { %v2605_v50 = vmul.f32 0.5, %v2604_v63  ;;  %v8530_v52 = vpop.eup %5630  ;;  %v2565_v25 = vsel %vm2563_vm2, %v2564_v23, %v2562_v15  ;;  %v951_v7 = vsel %vm521_vm0, %v408_v28, 0.0  ;;  %v948_v6 = vsel %vm521_vm0, %v407_v33, 0.0 }
 0x1f3   :  { %v2553_v58 = vsel %vm2551_vm1, %v12857_v8, %v2550_v54  ;;  %v945_v18 = vsel %vm521_vm0, %v406_v2, 0.0  ;;  %v5065_v10 = vsel %vm4883_vm13, %v5064_v14, %v5063_v17  ;;  %v2576_v13 = vand.u32 2147483648, %v8266_v16  ;;  %952 = vadd.xlane.f32.xlu2 %v951_v7  ;;  %949 = vadd.xlane.f32.xlu1 %v948_v6  ;;  %v155_v14 = vld [vmem:[%s12692_s0 + $0x490] sm:$0xff] }
 0x1f4   :  { %v2593_v54 = vmul.f32 0.5, %v2592_v38  ;;  %v2651_v37 = vmul.f32 %v8520_v27, %v8446_v4  ;;  %v12858_v63 = vand.u32 2147483648, %v8219_v60  ;;  %v5066_v33 = vperm.slane %v2553_v58, %v6323_v49  ;;  %946 = vadd.xlane.f32.xlu0 %v945_v18 }
 0x1f5   :  { %vm2587_vm5 = vcmp.eq.f32.partialorder %v8284_v43, 0.0  ;;  %vm2575_vm6 = vcmp.eq.f32.partialorder %v8266_v16, 0.0  ;;  %v2619_v28 = vmul.f32 %v8412_v42, %v2618_v55  ;;  %v5068_v60 = vperm.slane %v2565_v25, %v6314_v44  ;;  %v153_v25 = vld [vmem:[%s12692_s0 + $0x480] sm:$0xff] }
 0x1f6   :  { %v8545_v1 = vsel %vm2491_vm14, %v12858_v63, %v2490_v34  ;;  %v8554_v23 = vpop.eup %5632  ;;  %v2577_v17 = vsel %vm2575_vm6, %v2576_v13, %v2574_v5  ;;  %v2606_v34 = vsub.f32 1.5, %v2605_v50  ;;  %v2639_v58 = vmul.f32 %v8530_v52, %v8465_v40  ;;  %v827_v5 = vpop.xlane.xlu2 %826 }
 0x1f7   :  { %12859 = vst [vmem:[#allocation40_spill] sm:$0xff] %v8545_v1  ;;  %v2586_v16 = vsel %vm2585_vm12, %v8284_v43, %v2584_v0  ;;  %v5067_v42 = vsel %vm4887_vm15, %v5066_v33, %v5065_v10  ;;  %vm2621_vm11 = vcmp.eq.f32.partialorder %v8345_v62, inf  ;;  %v2624_v15 = vand.u32 2147483648, %v8345_v62  ;;  %v154_v0 = vld [vmem:[%s12692_s0 + $0x488] sm:$0xff] }
 0x1f8   :  { %v8566_v38 = vadd.f32 1e-20, %v8428_v57  ;;  %v2594_v55 = vsub.f32 1.5, %v2593_v54  ;;  %v2652_v2 = vmul.f32 %v8520_v27, %v2651_v37  ;;  %v8570_v8 = vadd.f32 1e-20, %v8455_v3 }
 0x1f9   :  { %v411_v50 = vmul.f32 %v155_v14, %v155_v14  ;;  %v5070_v7 = vperm.slane %v2577_v17, %v6320_v46  ;;  %v2620_v57 = vmul.f32 %v2619_v28, %v8345_v62  ;;  %v2627_v6 = vmul.f32 %v8554_v23, %v8487_v61  ;;  %v821_v17 = vpop.xlane.xlu0 %820 }
 0x1fa   :  { %12860 = vst [vmem:[#allocation41_spill] sm:$0xff] %v8566_v38  ;;  %v8582_v18 = vadd.f32 1e-20, %v815_v24  ;;  %v5069_v3 = vsel %vm4891_vm3, %v5068_v60, %v5067_v42  ;;  %vm2623_vm1 = vcmp.eq.f32.partialorder %v8345_v62, 0.0  ;;  %v2607_v10 = vmul.f32 %v8441_v26, %v2606_v34  ;;  %v824_v26 = vpop.xlane.xlu1 %823 }
 0x1fb   :  { %v2640_v13 = vmul.f32 %v8530_v52, %v2639_v58  ;;  %v8588_v54 = vadd.f32 1e-20, %v812_v21  ;;  %vm2609_vm14 = vcmp.eq.f32.partialorder %v8381_v31, inf  ;;  %5634 = vrsqrt.f32 %v8566_v38 }
 0x1fc   :  { %v960_v37 = vsel %vm521_vm0, %v411_v50, 0.0  ;;  %v410_v63 = vmul.f32 %v154_v0, %v154_v0  ;;  %v409_v33 = vmul.f32 %v153_v25, %v153_v25  ;;  %v2595_v24 = vmul.f32 %v8459_v20, %v2594_v55 }
 0x1fd   :  { %v2653_v28 = vmul.f32 0.5, %v2652_v2  ;;  %5636 = vrsqrt.f32 %v8570_v8  ;;  %v8596_v14 = vadd.f32 1e-20, %v8457_v36  ;;  %961 = vadd.xlane.f32.xlu2 %v960_v37  ;;  %v2628_v21 = vmul.f32 %v8554_v23, %v2627_v6 }
 0x1fe   :  { %5638 = vrsqrt.f32 %v8582_v18  ;;  %v957_v60 = vsel %vm521_vm0, %v410_v63, 0.0  ;;  %v954_v34 = vsel %vm521_vm0, %v409_v33, 0.0  ;;  %v12861_v58 = vand.u32 2147483648, %v8284_v43  ;;  %v8632_v63 = vpop.xlane.xlu2 %835  ;;  %v158_v33 = vld [vmem:[%s12692_s0 + $0x4a8] sm:$0xff] }
 0x1ff   :  { %vm2611_vm4 = vcmp.eq.f32.partialorder %v8381_v31, 0.0  ;;  %v2612_v36 = vand.u32 2147483648, %v8381_v31  ;;  %v2641_v42 = vmul.f32 0.5, %v2640_v13  ;;  %5640 = vrsqrt.f32 %v8588_v54  ;;  %958 = vadd.xlane.f32.xlu1 %v957_v60  ;;  %955 = vadd.xlane.f32.xlu0 %v954_v34 }
 0x200   :  { %v2589_v20 = vsel %vm2587_vm5, %v12861_v58, %v2586_v16  ;;  %v5071_v55 = vsel %vm4895_vm8, %v5070_v7, %v5069_v3  ;;  %vm2597_vm12 = vcmp.eq.f32.partialorder %v8394_v48, inf  ;;  %vm2599_vm9 = vcmp.eq.f32.partialorder %v8394_v48, 0.0 }
 0x201   :  { %v8613_v2 = vadd.f32 1e-20, %v8499_v22  ;;  %v2622_v43 = vsel %vm2621_vm11, %v8345_v62, %v2620_v57  ;;  %v2608_v16 = vmul.f32 %v2607_v10, %v8381_v31  ;;  %v2654_v50 = vsub.f32 1.5, %v2653_v28  ;;  %v8620_v0 = vpop.eup %5634 }
 0x202   :  { %5642 = vrsqrt.f32 %v8596_v14  ;;  %v5072_v25 = vperm.slane %v2589_v20, %v6382_v9  ;;  %v2596_v7 = vmul.f32 %v2595_v24, %v8394_v48  ;;  %v2629_v6 = vmul.f32 0.5, %v2628_v21 }
 0x203   :  { %v8624_v3 = vadd.f32 1e-20, %v821_v17  ;;  %v8626_v22 = vpop.eup %5636  ;;  %v2600_v13 = vand.u32 2147483648, %v8394_v48  ;;  %v2642_v37 = vsub.f32 1.5, %v2641_v42  ;;  %v8630_v10 = vadd.f32 1e-20, %v827_v5 }
 0x204   :  { %v8637_v28 = vpop.eup %5638  ;;  %v8643_v24 = vsel %vm2623_vm1, %v2624_v15, %v2622_v43  ;;  %v8646_v17 = vsel %vm12737_vm10, %v5072_v25, %v5071_v55  ;;  %vm2657_vm2 = vcmp.eq.f32.partialorder %v8446_v4, inf  ;;  %5644 = vrsqrt.f32 %v8613_v2 }
 0x205   :  { %12862 = vst [vmem:[#allocation42_spill] sm:$0xff] %v8643_v24  ;;  %v8650_v5 = vadd.f32 1e-20, %v824_v26  ;;  %v8652_v21 = vpop.eup %5640  ;;  %v2610_v60 = vsel %vm2609_vm14, %v8381_v31, %v2608_v16  ;;  %v2655_v34 = vmul.f32 %v8520_v27, %v2654_v50  ;;  %v2687_v15 = vmul.f32 %v8620_v0, %v8566_v38  ;;  %v8674_v16 = vpop.xlane.xlu1 %832 }
 0x206   :  { %v2598_v58 = vsel %vm2597_vm12, %v8394_v48, %v2596_v7  ;;  %vm2645_vm5 = vcmp.eq.f32.partialorder %v8465_v40, inf  ;;  %v2630_v26 = vsub.f32 1.5, %v2629_v6  ;;  %5646 = vrsqrt.f32 %v8624_v3  ;;  %v8676_v50 = vpop.xlane.xlu0 %829 }
 0x207   :  { %v414_v20 = vmul.f32 %v158_v33, %v158_v33  ;;  %v2643_v55 = vmul.f32 %v8530_v52, %v2642_v37  ;;  %v2675_v27 = vmul.f32 %v8626_v22, %v8570_v8  ;;  %v2711_v43 = vmul.f32 %v8637_v28, %v8582_v18  ;;  %v156_v33 = vld [vmem:[%s12692_s0 + $0x498] sm:$0xff] }
 0x208   :  { %v8666_v42 = vpop.eup %5642  ;;  %5648 = vrsqrt.f32 %v8630_v10  ;;  %v8682_v7 = vsel %vm2611_vm4, %v2612_v36, %v2610_v60  ;;  %vm2659_vm6 = vcmp.eq.f32.partialorder %v8446_v4, 0.0  ;;  %v2699_v52 = vmul.f32 %v8652_v21, %v8588_v54  ;;  %v157_v36 = vld [vmem:[%s12692_s0 + $0x4a0] sm:$0xff] }
 0x209   :  { %12863 = vst [vmem:[#allocation43_spill] sm:$0xff] %v8682_v7  ;;  %5650 = vrsqrt.f32 %v8650_v5  ;;  %v2601_v6 = vsel %vm2599_vm9, %v2600_v13, %v2598_v58  ;;  %v2656_v37 = vmul.f32 %v2655_v34, %v8446_v4  ;;  %vm2647_vm11 = vcmp.eq.f32.partialorder %v8465_v40, 0.0 }
 0x20a   :  { %vm2633_vm1 = vcmp.eq.f32.partialorder %v8487_v61, inf  ;;  %v2688_v31 = vmul.f32 %v8620_v0, %v2687_v15  ;;  %v8700_v60 = vpop.eup %5644  ;;  %v2631_v48 = vmul.f32 %v8554_v23, %v2630_v26  ;;  %v2636_v13 = vand.u32 2147483648, %v8487_v61 }
 0x20b   :  { %v2663_v34 = vmul.f32 %v8666_v42, %v8596_v14  ;;  %v969_v58 = vsel %vm521_vm0, %v414_v20, 0.0  ;;  %v2644_v25 = vmul.f32 %v2643_v55, %v8465_v40  ;;  %v2676_v62 = vmul.f32 %v8626_v22, %v2675_v27 }
 0x20c   :  { %v2712_v57 = vmul.f32 %v8637_v28, %v2711_v43  ;;  %970 = vadd.xlane.f32.xlu2 %v969_v58  ;;  %v8712_v24 = vpop.eup %5646  ;;  %v5074_v23 = vperm.slane %v2601_v6, %v6378_v32  ;;  %v2700_v26 = vmul.f32 %v8652_v21, %v2699_v52  ;;  %v413_v1 = vmul.f32 %v157_v36, %v157_v36  ;;  %v8725_v58 = vpop.xlane.xlu2 %844 }
 0x20d   :  { %v412_v30 = vmul.f32 %v156_v33, %v156_v33  ;;  %v2658_v20 = vsel %vm2657_vm2, %v8446_v4, %v2656_v37  ;;  %vm2635_vm14 = vcmp.eq.f32.partialorder %v8487_v61, 0.0  ;;  %v2689_v55 = vmul.f32 0.5, %v2688_v31 }
 0x20e   :  { %v8716_v39 = vpop.eup %5648  ;;  %v2723_v43 = vmul.f32 %v8700_v60, %v8613_v2  ;;  %v2632_v52 = vmul.f32 %v2631_v48, %v8487_v61  ;;  %v2664_v36 = vmul.f32 %v8666_v42, %v2663_v34  ;;  %v966_v33 = vsel %vm521_vm0, %v413_v1, 0.0 }
 0x20f   :  { %v8727_v6 = vpop.eup %5650  ;;  %v963_v37 = vsel %vm521_vm0, %v412_v30, 0.0  ;;  %v2646_v31 = vsel %vm2645_vm5, %v8465_v40, %v2644_v25  ;;  %v2677_v15 = vmul.f32 0.5, %v2676_v62  ;;  %v2713_v27 = vmul.f32 0.5, %v2712_v57  ;;  %967 = vadd.xlane.f32.xlu1 %v966_v33  ;;  %v8757_v33 = vpop.xlane.xlu0 %838 }
 0x210   :  { %v2735_v7 = vmul.f32 %v8712_v24, %v8624_v3  ;;  %964 = vadd.xlane.f32.xlu0 %v963_v37  ;;  %vm12864_vm4 = vcmask 523712   ;;  %v2701_v30 = vmul.f32 0.5, %v2700_v26  ;;  %v12866_v12 = vand.u32 2147483648, %v8446_v4  ;;  %v161_v26 = vld [vmem:[%s12692_s0 + $0x4c0] sm:$0xff] }
 0x211   :  { %v8740_v48 = vsel %vm12864_vm4, %v5074_v23, %v8646_v17  ;;  %v2724_v57 = vmul.f32 %v8700_v60, %v2723_v43  ;;  %v2759_v25 = vmul.f32 %v8716_v39, %v8630_v10  ;;  %v2747_v17 = vmul.f32 %v8727_v6, %v8650_v5  ;;  %v8755_v23 = vpop.xlane.xlu1 %841 }
 0x212   :  { %12865 = vst [vmem:[#allocation44_spill] sm:$0xff] %v8740_v48  ;;  %v8748_v62 = vsel %vm2659_vm6, %v12866_v12, %v2658_v20  ;;  %v160_v12 = vld [vmem:[%s12692_s0 + $0x4b8] sm:$0xff]  ;;  %v12868_v4 = vand.u32 2147483648, %v8465_v40  ;;  %v2634_v43 = vsel %vm2633_vm1, %v8487_v61, %v2632_v52  ;;  %v2690_v37 = vsub.f32 1.5, %v2689_v55 }
 0x213   :  { %12867 = vst [vmem:[#allocation45_spill] sm:$0xff] %v8748_v62  ;;  %v2665_v34 = vmul.f32 0.5, %v2664_v36  ;;  %v2678_v1 = vsub.f32 1.5, %v2677_v15  ;;  %v2714_v48 = vsub.f32 1.5, %v2713_v27  ;;  %v2736_v47 = vmul.f32 %v8712_v24, %v2735_v7  ;;  %v159_v7 = vld [vmem:[%s12692_s0 + $0x4b0] sm:$0xff] }
 0x214   :  { %v8769_v20 = vsel %vm2647_vm11, %v12868_v4, %v2646_v31  ;;  %v8776_v51 = vadd.f32 1e-20, %v8632_v63  ;;  %v2702_v11 = vsub.f32 1.5, %v2701_v30  ;;  %v417_v40 = vmul.f32 %v161_v26, %v161_v26 }
 0x215   :  { %12869 = vst [vmem:[#allocation46_spill] sm:$0xff] %v8769_v20  ;;  %v416_v31 = vmul.f32 %v160_v12, %v160_v12  ;;  %v2725_v32 = vmul.f32 0.5, %v2724_v57  ;;  %v2760_v55 = vmul.f32 %v8716_v39, %v2759_v25  ;;  %v2748_v15 = vmul.f32 %v8727_v6, %v2747_v17  ;;  %v8798_v17 = vpop.xlane.xlu2 %853 }
 0x216   :  { %v8789_v63 = vsel %vm2635_vm14, %v2636_v13, %v2634_v43  ;;  %v2691_v27 = vmul.f32 %v8620_v0, %v2690_v37  ;;  %vm2693_vm12 = vcmp.eq.f32.partialorder %v8566_v38, inf  ;;  %vm2681_vm9 = vcmp.eq.f32.partialorder %v8570_v8, inf }
 0x217   :  { %12870 = vst [vmem:[#allocation47_spill] sm:$0xff] %v8789_v63  ;;  %v2666_v52 = vsub.f32 1.5, %v2665_v34  ;;  %v2732_v36 = vand.u32 2147483648, %v8613_v2  ;;  %v2679_v30 = vmul.f32 %v8626_v22, %v2678_v1  ;;  %v2715_v57 = vmul.f32 %v8637_v28, %v2714_v48  ;;  %v8817_v37 = vpop.xlane.xlu0 %847 }
 0x218   :  { %v2737_v25 = vmul.f32 0.5, %v2736_v47  ;;  %5652 = vrsqrt.f32 %v8776_v51  ;;  %v2703_v61 = vmul.f32 %v8652_v21, %v2702_v11  ;;  %v978_v0 = vsel %vm521_vm0, %v417_v40, 0.0 }
 0x219   :  { %v975_v13 = vsel %vm521_vm0, %v416_v31, 0.0  ;;  %v415_v26 = vmul.f32 %v159_v7, %v159_v7  ;;  %vm2669_vm2 = vcmp.eq.f32.partialorder %v8596_v14, inf  ;;  %v2726_v22 = vsub.f32 1.5, %v2725_v32  ;;  %979 = vadd.xlane.f32.xlu2 %v978_v0  ;;  %v8815_v32 = vpop.xlane.xlu1 %850  ;;  %v163_v0 = vld [vmem:[%s12692_s0 + $0x4d0] sm:$0xff] }
 0x21a   :  { %v2761_v1 = vmul.f32 0.5, %v2760_v55  ;;  %v2749_v28 = vmul.f32 0.5, %v2748_v15  ;;  %976 = vadd.xlane.f32.xlu1 %v975_v13  ;;  %v2667_v47 = vmul.f32 %v8666_v42, %v2666_v52  ;;  %vm2717_vm5 = vcmp.eq.f32.partialorder %v8582_v18, inf  ;;  %v164_v42 = vld [vmem:[%s12692_s0 + $0x4d8] sm:$0xff]  ;;  %v162_v13 = vld [vmem:[%s12692_s0 + $0x4c8] sm:$0xff] }
 0x21b   :  { %vm2719_vm6 = vcmp.eq.f32.partialorder %v8582_v18, 0.0  ;;  %v972_v11 = vsel %vm521_vm0, %v415_v26, 0.0  ;;  %v2692_v21 = vmul.f32 %v2691_v27, %v8566_v38  ;;  %v2680_v48 = vmul.f32 %v2679_v30, %v8570_v8 }
 0x21c   :  { %v2738_v12 = vsub.f32 1.5, %v2737_v25  ;;  %v8813_v43 = vadd.f32 1e-20, %v8674_v16  ;;  %973 = vadd.xlane.f32.xlu0 %v972_v11  ;;  %vm2671_vm11 = vcmp.eq.f32.partialorder %v8596_v14, 0.0  ;;  %vm2729_vm1 = vcmp.eq.f32.partialorder %v8613_v2, inf }
 0x21d   :  { %v2716_v40 = vmul.f32 %v2715_v57, %v8582_v18  ;;  %v2720_v31 = vand.u32 2147483648, %v8582_v18  ;;  %v2704_v16 = vmul.f32 %v2703_v61, %v8588_v54  ;;  %v8828_v55 = vadd.f32 1e-20, %v8676_v50 }
 0x21e   :  { %v8830_v15 = vpop.eup %5652  ;;  %v2727_v7 = vmul.f32 %v8700_v60, %v2726_v22  ;;  %vm2705_vm14 = vcmp.eq.f32.partialorder %v8588_v54, inf  ;;  %v2762_v27 = vsub.f32 1.5, %v2761_v1  ;;  %v2750_v52 = vsub.f32 1.5, %v2749_v28 }
 0x21f   :  { %v2668_v30 = vmul.f32 %v2667_v47, %v8596_v14  ;;  %vm2707_vm4 = vcmp.eq.f32.partialorder %v8588_v54, 0.0  ;;  %v2708_v57 = vand.u32 2147483648, %v8588_v54  ;;  %v420_v25 = vmul.f32 %v164_v42, %v164_v42 }
 0x220   :  { %v8840_v50 = vsel %vm2693_vm12, %v8566_v38, %v2692_v21  ;;  %v8845_v60 = vsel %vm2681_vm9, %v8570_v8, %v2680_v48  ;;  %vm2731_vm10 = vcmp.eq.f32.partialorder %v8613_v2, 0.0  ;;  %v2739_v61 = vmul.f32 %v8712_v24, %v2738_v12  ;;  %v863_v21 = vpop.xlane.xlu2 %862 }
 0x221   :  { %12871 = vst [vmem:[#allocation48_spill] sm:$0xff] %v8840_v50  ;;  %5654 = vrsqrt.f32 %v8813_v43  ;;  %v2718_v26 = vsel %vm2717_vm5, %v8582_v18, %v2716_v40  ;;  %v2706_v22 = vsel %vm2705_vm14, %v8588_v54, %v2704_v16  ;;  %vm2765_vm12 = vcmp.eq.f32.partialorder %v8630_v10, inf }
 0x222   :  { %12872 = vst [vmem:[#allocation49_spill] sm:$0xff] %v8845_v60  ;;  %v2795_v24 = vmul.f32 %v8830_v15, %v8776_v51  ;;  %5656 = vrsqrt.f32 %v8828_v55  ;;  %v2728_v1 = vmul.f32 %v2727_v7, %v8613_v2  ;;  %v2763_v28 = vmul.f32 %v8716_v39, %v2762_v27 }
 0x223   :  { %v2768_v47 = vand.u32 2147483648, %v8630_v10  ;;  %v2751_v11 = vmul.f32 %v8727_v6, %v2750_v52  ;;  %v2670_v48 = vsel %vm2669_vm2, %v8596_v14, %v2668_v30  ;;  %v987_v12 = vsel %vm521_vm0, %v420_v25, 0.0 }
 0x224   :  { %v419_v42 = vmul.f32 %v163_v0, %v163_v0  ;;  %v418_v40 = vmul.f32 %v162_v13, %v162_v13  ;;  %v2721_v16 = vsel %vm2719_vm6, %v2720_v31, %v2718_v26  ;;  %v2709_v7 = vsel %vm2707_vm4, %v2708_v57, %v2706_v22  ;;  %988 = vadd.xlane.f32.xlu2 %v987_v12  ;;  %v860_v0 = vpop.xlane.xlu1 %859  ;;  %v8897_v13 = vpop.xlane.xlu0 %856 }
 0x225   :  { %vm2767_vm9 = vcmp.eq.f32.partialorder %v8630_v10, 0.0  ;;  %vm2753_vm5 = vcmp.eq.f32.partialorder %v8650_v5, inf  ;;  %v2740_v39 = vmul.f32 %v2739_v61, %v8624_v3  ;;  %v2796_v6 = vmul.f32 %v8830_v15, %v2795_v24 }
 0x226   :  { %v984_v27 = vsel %vm521_vm0, %v419_v42, 0.0  ;;  %v981_v52 = vsel %vm521_vm0, %v418_v40, 0.0  ;;  %v8882_v30 = vadd.f32 1e-20, %v863_v21  ;;  %v12873_v54 = vand.u32 2147483648, %v8596_v14 }
 0x227   :  { %v8884_v18 = vpop.eup %5654  ;;  %v2730_v57 = vsel %vm2729_vm1, %v8613_v2, %v2728_v1  ;;  %v2764_v25 = vmul.f32 %v2763_v28, %v8630_v10  ;;  %v2752_v61 = vmul.f32 %v2751_v11, %v8650_v5  ;;  %985 = vadd.xlane.f32.xlu1 %v984_v27  ;;  %vm2755_vm2 = vcmp.eq.f32.partialorder %v8650_v5, 0.0  ;;  %982 = vadd.xlane.f32.xlu0 %v981_v52  ;;  %v167_v28 = vld [vmem:[%s12692_s0 + $0x4f0] sm:$0xff]  ;;  %v166_v11 = vld [vmem:[%s12692_s0 + $0x4e8] sm:$0xff] }
 0x228   :  { %v8890_v31 = vsel %vm2671_vm11, %v12873_v54, %v2670_v48  ;;  %v8899_v26 = vpop.eup %5656  ;;  %v2756_v14 = vand.u32 2147483648, %v8650_v5  ;;  %vm2741_vm6 = vcmp.eq.f32.partialorder %v8624_v3, inf  ;;  %5658 = vrsqrt.f32 %v8882_v30 }
 0x229   :  { %12874 = vst [vmem:[#allocation50_spill] sm:$0xff] %v8890_v31  ;;  %v5093_v22 = vperm.slane %v2721_v16, %v6333_v59  ;;  %v5092_v24 = vperm.slane %v2709_v7, %v6304_v35  ;;  %v2742_v1 = vsel %vm2741_vm6, %v8624_v3, %v2740_v39  ;;  %vm2743_vm11 = vcmp.eq.f32.partialorder %v8624_v3, 0.0 }
 0x22a   :  { %v2733_v21 = vsel %vm2731_vm10, %v2732_v36, %v2730_v57  ;;  %v2744_v48 = vand.u32 2147483648, %v8624_v3  ;;  %v2797_v12 = vmul.f32 0.5, %v2796_v6  ;;  %v8920_v42 = vadd.f32 1e-20, %v860_v0  ;;  %v165_v57 = vld [vmem:[%s12692_s0 + $0x4e0] sm:$0xff] }
 0x22b   :  { %v2766_v40 = vsel %vm2765_vm12, %v8630_v10, %v2764_v25  ;;  %v2754_v16 = vsel %vm2753_vm5, %v8650_v5, %v2752_v61  ;;  %v2783_v7 = vmul.f32 %v8884_v18, %v8813_v43  ;;  %v2771_v2 = vmul.f32 %v8899_v26, %v8828_v55  ;;  %v872_v25 = vpop.xlane.xlu2 %871 }
 0x22c   :  { %v2745_v36 = vsel %vm2743_vm11, %v2744_v48, %v2742_v1  ;;  %5660 = vrsqrt.f32 %v8920_v42  ;;  %v423_v3 = vmul.f32 %v167_v28, %v167_v28  ;;  %v422_v39 = vmul.f32 %v166_v11, %v166_v11 }
 0x22d   :  { %v5095_v6 = vperm.slane %v2733_v21, %v6317_v45  ;;  %v5094_v27 = vsel %vm4879_vm7, %v5093_v22, %v5092_v24  ;;  %v8942_v0 = vsel %vm2767_vm9, %v2768_v47, %v2766_v40  ;;  %v2757_v1 = vsel %vm2755_vm2, %v2756_v14, %v2754_v16  ;;  %v869_v16 = vpop.xlane.xlu1 %868 }
 0x22e   :  { %v5659_v61 = vpop.eup %5658  ;;  %v2798_v28 = vsub.f32 1.5, %v2797_v12  ;;  %v8947_v22 = vadd.f32 1e-20, %v8725_v58  ;;  %v5097_v24 = vperm.slane %v2745_v36, %v6323_v49  ;;  %v2784_v11 = vmul.f32 %v8884_v18, %v2783_v7  ;;  %v866_v7 = vpop.xlane.xlu0 %865 }
 0x22f   :  { %v2772_v21 = vmul.f32 %v8899_v26, %v2771_v2  ;;  %v2903_v48 = vmul.f32 %v5659_v61, %v8882_v30  ;;  %v996_v53 = vsel %vm521_vm0, %v423_v3, 0.0  ;;  %v993_v10 = vsel %vm521_vm0, %v422_v39, 0.0 }
 0x230   :  { %v421_v47 = vmul.f32 %v165_v57, %v165_v57  ;;  %v8955_v40 = vadd.f32 1e-20, %v872_v25  ;;  %v5096_v58 = vsel %vm4883_vm13, %v5095_v6, %v5094_v27  ;;  %v8961_v14 = vadd.f32 1e-20, %v8755_v23  ;;  %997 = vadd.xlane.f32.xlu2 %v996_v53  ;;  %994 = vadd.xlane.f32.xlu1 %v993_v10  ;;  %v170_v53 = vld [vmem:[%s12692_s0 + $0x508] sm:$0xff] }
 0x231   :  { %v2904_v12 = vmul.f32 %v5659_v61, %v2903_v48  ;;  %v5099_v36 = vperm.slane %v2757_v1, %v6314_v44  ;;  %v2799_v3 = vmul.f32 %v8830_v15, %v2798_v28  ;;  %v8967_v57 = vmul.f32 0.5, %v2784_v11 }
 0x232   :  { %v5661_v2 = vpop.eup %5660  ;;  %v990_v39 = vsel %vm521_vm0, %v421_v47, 0.0  ;;  %5662 = vrsqrt.f32 %v8955_v40  ;;  %v5098_v27 = vsel %vm4887_vm15, %v5097_v24, %v5096_v58  ;;  %v2773_v15 = vmul.f32 0.5, %v2772_v21 }
 0x233   :  { %5664 = vrsqrt.f32 %v8947_v22  ;;  %v2905_v23 = vmul.f32 0.5, %v2904_v12  ;;  %v2891_v6 = vmul.f32 %v5661_v2, %v8920_v42  ;;  %991 = vadd.xlane.f32.xlu0 %v990_v39  ;;  %v8975_v25 = vadd.f32 1e-20, %v869_v16 }
 0x234   :  { %v8977_v1 = vadd.f32 1e-20, %v866_v7  ;;  %5666 = vrsqrt.f32 %v8961_v14  ;;  %v8982_v10 = vmul.f32 %v2799_v3, %v8776_v51  ;;  %v426_v12 = vmul.f32 %v170_v53, %v170_v53  ;;  %v169_v7 = vld [vmem:[%s12692_s0 + $0x500] sm:$0xff]  ;;  %v168_v3 = vld [vmem:[%s12692_s0 + $0x4f8] sm:$0xff] }
 0x235   :  { %v2906_v11 = vsub.f32 1.5, %v2905_v23  ;;  %v2892_v48 = vmul.f32 %v5661_v2, %v2891_v6  ;;  %5668 = vrsqrt.f32 %v8975_v25  ;;  %v8987_v24 = vsel %vm4891_vm3, %v5099_v36, %v5098_v27 }
 0x236   :  { %v2786_v21 = vsub.f32 1.5, %v8967_v57  ;;  %v2774_v23 = vsub.f32 1.5, %v2773_v15  ;;  %v8998_v53 = vadd.f32 1e-20, %v8757_v33  ;;  %5670 = vrsqrt.f32 %v8977_v1 }
 0x237   :  { %v2907_v58 = vmul.f32 %v5659_v61, %v2906_v11  ;;  %v2893_v16 = vmul.f32 0.5, %v2892_v48  ;;  %vm2909_vm10 = vcmp.eq.f32.partialorder %v8882_v30, inf  ;;  %v2912_v11 = vand.u32 2147483648, %v8882_v30 }
 0x238   :  { %v5663_v39 = vpop.eup %5662  ;;  %v1005_v15 = vsel %vm521_vm0, %v426_v12, 0.0  ;;  %v425_v48 = vmul.f32 %v169_v7, %v169_v7  ;;  %v424_v4 = vmul.f32 %v168_v3, %v168_v3  ;;  %vm2911_vm1 = vcmp.eq.f32.partialorder %v8882_v30, 0.0 }
 0x239   :  { %v9001_v36 = vpop.eup %5664  ;;  %v2908_v61 = vmul.f32 %v2907_v58, %v8882_v30  ;;  %v2894_v57 = vsub.f32 1.5, %v2893_v16  ;;  %v2939_v27 = vmul.f32 %v5663_v39, %v8955_v40  ;;  %1006 = vadd.xlane.f32.xlu2 %v1005_v15  ;;  %5672 = vrsqrt.f32 %v8998_v53 }
 0x23a   :  { %v9008_v34 = vpop.eup %5666  ;;  %v1002_v54 = vsel %vm521_vm0, %v425_v48, 0.0  ;;  %v999_v28 = vsel %vm521_vm0, %v424_v4, 0.0  ;;  %v2831_v12 = vmul.f32 %v9001_v36, %v8947_v22  ;;  %v9018_v7 = vadd.f32 1e-20, %v8798_v17 }
 0x23b   :  { %v2910_v33 = vsel %vm2909_vm10, %v8882_v30, %v2908_v61  ;;  %v2895_v6 = vmul.f32 %v5661_v2, %v2894_v57  ;;  %v2940_v47 = vmul.f32 %v5663_v39, %v2939_v27  ;;  %v5669_v58 = vpop.eup %5668  ;;  %1003 = vadd.xlane.f32.xlu1 %v1002_v54  ;;  %1000 = vadd.xlane.f32.xlu0 %v999_v28  ;;  %v875_v2 = vpop.xlane.xlu0 %874  ;;  %vm2897_vm14 = vcmp.eq.f32.partialorder %v8920_v42, inf }
 0x23c   :  { %v2913_v16 = vsel %vm2911_vm1, %v2912_v11, %v2910_v33  ;;  %12875 = vst [vmem:[#allocation51_spill] sm:$0xff] %v9018_v7  ;;  %v5671_v61 = vpop.eup %5670  ;;  %vm2899_vm4 = vcmp.eq.f32.partialorder %v8920_v42, 0.0  ;;  %v2900_v57 = vand.u32 2147483648, %v8920_v42  ;;  %v2927_v4 = vmul.f32 %v5669_v58, %v8975_v25  ;;  %v9025_v27 = vpop.xlane.xlu2 %880 }
 0x23d   :  { %v2896_v3 = vmul.f32 %v2895_v6, %v8920_v42  ;;  %v2941_v30 = vmul.f32 0.5, %v2940_v47  ;;  %v5124_v17 = vperm.slane %v2913_v16, %v6333_v59  ;;  %v2915_v54 = vmul.f32 %v5671_v61, %v8977_v1  ;;  %v9030_v28 = vpop.xlane.xlu1 %877  ;;  %v173_v47 = vld [vmem:[%s12692_s0 + $0x520] sm:$0xff] }
 0x23e   :  { %v2775_v15 = vmul.f32 %v8899_v26, %v2774_v23  ;;  %v2928_v33 = vmul.f32 %v5669_v58, %v2927_v4  ;;  %v9036_v52 = vadd.f32 1e-20, %v875_v2  ;;  %v9039_v5 = vadd.f32 1e-20, %v8815_v32 }
 0x23f   :  { %v2898_v11 = vsel %vm2897_vm14, %v8920_v42, %v2896_v3  ;;  %v2942_v6 = vsub.f32 1.5, %v2941_v30  ;;  %v2916_v3 = vmul.f32 %v5671_v61, %v2915_v54  ;;  %v9042_v30 = vpop.eup %5672  ;;  %v9045_v62 = vmul.f32 %v8884_v18, %v2786_v21 }
 0x240   :  { %v2901_v48 = vsel %vm2899_vm4, %v2900_v57, %v2898_v11  ;;  %12876 = vst [vmem:[#allocation52_spill] sm:$0xff] %v9039_v5  ;;  %v9048_v20 = vadd.f32 1e-20, %v8817_v37  ;;  %v2929_v26 = vmul.f32 0.5, %v2928_v33  ;;  %v429_v23 = vmul.f32 %v173_v47, %v173_v47  ;;  %v172_v37 = vld [vmem:[%s12692_s0 + $0x518] sm:$0xff]  ;;  %v171_v11 = vld [vmem:[%s12692_s0 + $0x510] sm:$0xff] }
 0x241   :  { %v5123_v42 = vperm.slane %v2901_v48, %v6304_v35  ;;  %v2943_v16 = vmul.f32 %v5663_v39, %v2942_v6  ;;  %v2832_v2 = vmul.f32 %v9001_v36, %v2831_v12  ;;  %5674 = vrsqrt.f32 %v9018_v7 }
 0x242   :  { %v2917_v57 = vmul.f32 0.5, %v2916_v3  ;;  %vm2801_vm12 = vcmp.eq.f32.partialorder %v8776_v51, inf  ;;  %v2776_v39 = vmul.f32 %v2775_v15, %v8828_v55  ;;  %v2819_v18 = vmul.f32 %v9008_v34, %v8961_v14 }
 0x243   :  { %v9053_v32 = vsel %vm4879_vm7, %v5124_v17, %v5123_v42  ;;  %v2930_v21 = vsub.f32 1.5, %v2929_v26  ;;  %5676 = vrsqrt.f32 %v9036_v52  ;;  %v2807_v12 = vmul.f32 %v9042_v30, %v8998_v53 }
 0x244   :  { %5678 = vrsqrt.f32 %v9039_v5  ;;  %v2944_v4 = vmul.f32 %v2943_v16, %v8955_v40  ;;  %v2918_v17 = vsub.f32 1.5, %v2917_v57  ;;  %vm2777_vm9 = vcmp.eq.f32.partialorder %v8828_v55, inf  ;;  %v9080_v16 = vpop.xlane.xlu2 %889 }
 0x245   :  { %5680 = vrsqrt.f32 %v9048_v20  ;;  %vm2945_vm5 = vcmp.eq.f32.partialorder %v8955_v40, inf  ;;  %v2931_v6 = vmul.f32 %v5669_v58, %v2930_v21  ;;  %v1014_v54 = vsel %vm521_vm0, %v429_v23, 0.0  ;;  %v9092_v57 = vpop.xlane.xlu1 %886 }
 0x246   :  { %vm2803_vm2 = vcmp.eq.f32.partialorder %v8776_v51, 0.0  ;;  %vm2947_vm6 = vcmp.eq.f32.partialorder %v8955_v40, 0.0  ;;  %v2948_v47 = vand.u32 2147483648, %v8955_v40  ;;  %v2919_v15 = vmul.f32 %v5671_v61, %v2918_v17  ;;  %1015 = vadd.xlane.f32.xlu2 %v1014_v54 }
 0x247   :  { %v428_v48 = vmul.f32 %v172_v37, %v172_v37  ;;  %v2932_v33 = vmul.f32 %v2931_v6, %v8975_v25  ;;  %vm2933_vm11 = vcmp.eq.f32.partialorder %v8975_v25, inf  ;;  %vm2935_vm10 = vcmp.eq.f32.partialorder %v8975_v25, 0.0  ;;  %v9082_v58 = vpop.eup %5674 }
 0x248   :  { %v427_v42 = vmul.f32 %v171_v11, %v171_v11  ;;  %vm2789_vm1 = vcmp.eq.f32.partialorder %v8813_v43, inf  ;;  %vm2779_vm14 = vcmp.eq.f32.partialorder %v8828_v55, 0.0  ;;  %v2946_v61 = vsel %vm2945_vm5, %v8955_v40, %v2944_v4 }
 0x249   :  { %v2936_v3 = vand.u32 2147483648, %v8975_v25  ;;  %v2920_v26 = vmul.f32 %v2919_v15, %v8977_v1  ;;  %v1011_v23 = vsel %vm521_vm0, %v428_v48, 0.0  ;;  %v5677_v21 = vpop.eup %5676  ;;  %v2934_v37 = vsel %vm2933_vm11, %v8975_v25, %v2932_v33 }
 0x24a   :  { %vm2921_vm4 = vcmp.eq.f32.partialorder %v8977_v1, inf  ;;  %v2924_v17 = vand.u32 2147483648, %v8977_v1  ;;  %1012 = vadd.xlane.f32.xlu1 %v1011_v23  ;;  %v1008_v11 = vsel %vm521_vm0, %v427_v42, 0.0  ;;  %v9098_v6 = vpop.eup %5678  ;;  %vm2923_vm5 = vcmp.eq.f32.partialorder %v8977_v1, 0.0 }
 0x24b   :  { %v2937_v4 = vsel %vm2935_vm10, %v2936_v3, %v2934_v37  ;;  %v2922_v54 = vsel %vm2921_vm4, %v8977_v1, %v2920_v26  ;;  %v9105_v15 = vadd.f32 1e-20, %v9025_v27  ;;  %1009 = vadd.xlane.f32.xlu0 %v1008_v11  ;;  %v9107_v48 = vpop.eup %5680  ;;  %v2949_v33 = vsel %vm2947_vm6, %v2948_v47, %v2946_v61 }
 0x24c   :  { %v5128_v42 = vperm.slane %v2937_v4, %v6323_v49  ;;  %v2925_v23 = vsel %vm2923_vm5, %v2924_v17, %v2922_v54  ;;  %v2951_v63 = vmul.f32 %v5677_v21, %v9036_v52  ;;  %v2802_v25 = vsel %vm2801_vm12, %v8776_v51, %v8982_v10  ;;  %v9137_v17 = vpop.xlane.xlu0 %883  ;;  %v175_v54 = vld [vmem:[%s12692_s0 + $0x530] sm:$0xff] }
 0x24d   :  { %v2833_v1 = vmul.f32 0.5, %v2832_v2  ;;  %v2820_v27 = vmul.f32 %v9008_v34, %v2819_v18  ;;  %v5126_v3 = vperm.slane %v2925_v23, %v6317_v45  ;;  %v2788_v26 = vmul.f32 %v9045_v62, %v8813_v43 }
 0x24e   :  { %v12877_v40 = vperm.slane %v8942_v0, %v6320_v46  ;;  %v2808_v61 = vmul.f32 %v9042_v30, %v2807_v12  ;;  %v2952_v37 = vmul.f32 %v5677_v21, %v2951_v63  ;;  %v2778_v10 = vsel %vm2777_vm9, %v8828_v55, %v2776_v39  ;;  %v176_v12 = vld [vmem:[%s12692_s0 + $0x538] sm:$0xff] }
 0x24f   :  { %v2843_v2 = vmul.f32 %v9107_v48, %v9048_v20  ;;  %v5130_v18 = vperm.slane %v2949_v33, %v6314_v44  ;;  %v5127_v62 = vsel %vm4883_vm13, %v5126_v3, %v9053_v32  ;;  %v12878_v0 = vand.u32 2147483648, %v8776_v51  ;;  %v174_v33 = vld [vmem:[%s12692_s0 + $0x528] sm:$0xff] }
 0x250   :  { %v9126_v47 = vsel %vm4895_vm8, %v12877_v40, %v8987_v24  ;;  %vm2791_vm12 = vcmp.eq.f32.partialorder %v8813_v43, 0.0  ;;  %v5129_v63 = vsel %vm4887_vm15, %v5128_v42, %v5127_v62  ;;  %5682 = vrsqrt.f32 %v9105_v15 }
 0x251   :  { %v9143_v24 = vsel %vm2803_vm2, %v12878_v0, %v2802_v25  ;;  %v2953_v39 = vmul.f32 0.5, %v2952_v37  ;;  %v2834_v32 = vsub.f32 1.5, %v2833_v1  ;;  %v2821_v11 = vmul.f32 0.5, %v2820_v27  ;;  %v9170_v27 = vpop.xlane.xlu2 %898 }
 0x252   :  { %12879 = vst [vmem:[#allocation53_spill] sm:$0xff] %v9143_v24  ;;  %v9152_v4 = vadd.f32 1e-20, %v8897_v13  ;;  %v5131_v51 = vsel %vm4891_vm3, %v5130_v18, %v5129_v63  ;;  %v2790_v42 = vsel %vm2789_vm1, %v8813_v43, %v2788_v26  ;;  %v12881_v23 = vand.u32 2147483648, %v8828_v55  ;;  %v9177_v26 = vpop.xlane.xlu1 %895  ;;  %v12885_v24 = vld [vmem:[#allocation5_spill] sm:$0xff] }
 0x253   :  { %v2809_v25 = vmul.f32 0.5, %v2808_v61  ;;  %v2954_v1 = vsub.f32 1.5, %v2953_v39  ;;  %v2867_v3 = vmul.f32 %v9082_v58, %v9018_v7  ;;  %v2855_v40 = vmul.f32 %v9098_v6, %v9039_v5 }
 0x254   :  { %12880 = vst [vmem:[#allocation54_spill] sm:$0xff] %v9152_v4  ;;  %v9168_v13 = vsel %vm2779_vm14, %v12881_v23, %v2778_v10  ;;  %v2844_v37 = vmul.f32 %v9107_v48, %v2843_v2  ;;  %v432_v18 = vmul.f32 %v176_v12, %v176_v12  ;;  %v9180_v62 = vadd.f32 1e-20, %v9030_v28 }
 0x255   :  { %v2955_v55 = vmul.f32 %v5677_v21, %v2954_v1  ;;  %v431_v10 = vmul.f32 %v175_v54, %v175_v54  ;;  %v430_v61 = vmul.f32 %v174_v33, %v174_v33  ;;  %v2835_v0 = vmul.f32 %v9001_v36, %v2834_v32 }
 0x256   :  { %v2822_v63 = vsub.f32 1.5, %v2821_v11  ;;  %5684 = vrsqrt.f32 %v9152_v4  ;;  %v1023_v39 = vsel %vm521_vm0, %v432_v18, 0.0  ;;  %v9185_v23 = vpop.eup %5682  ;;  %vm2837_vm9 = vcmp.eq.f32.partialorder %v8947_v22, inf }
 0x257   :  { %v2810_v2 = vsub.f32 1.5, %v2809_v25  ;;  %v2956_v12 = vmul.f32 %v2955_v55, %v9036_v52  ;;  %1024 = vadd.xlane.f32.xlu2 %v1023_v39  ;;  %v1020_v28 = vsel %vm521_vm0, %v431_v10, 0.0  ;;  %v1017_v21 = vsel %vm521_vm0, %v430_v61, 0.0  ;;  %v179_v55 = vld [vmem:[%s12692_s0 + $0x550] sm:$0xff] }
 0x258   :  { %v2868_v54 = vmul.f32 %v9082_v58, %v2867_v3  ;;  %v2856_v36 = vmul.f32 %v9098_v6, %v2855_v40  ;;  %vm2957_vm2 = vcmp.eq.f32.partialorder %v9036_v52, inf  ;;  %v2960_v32 = vand.u32 2147483648, %v9036_v52  ;;  %1021 = vadd.xlane.f32.xlu1 %v1020_v28  ;;  %1018 = vadd.xlane.f32.xlu0 %v1017_v21 }
 0x259   :  { %v2845_v11 = vmul.f32 0.5, %v2844_v37  ;;  %5686 = vrsqrt.f32 %v9180_v62  ;;  %v2958_v33 = vsel %vm2957_vm2, %v9036_v52, %v2956_v12  ;;  %vm2959_vm6 = vcmp.eq.f32.partialorder %v9036_v52, 0.0  ;;  %v9208_v37 = vpop.xlane.xlu0 %892  ;;  %v178_v52 = vld [vmem:[%s12692_s0 + $0x548] sm:$0xff]  ;;  %v908_v25 = vpop.xlane.xlu2 %907 }
 0x25a   :  { %v12882_v1 = vand.u32 2147483648, %v8813_v43  ;;  %v2975_v40 = vmul.f32 %v9185_v23, %v9105_v15  ;;  %v2961_v18 = vsel %vm2959_vm6, %v2960_v32, %v2958_v33  ;;  %v5103_v10 = vperm.slane %v9168_v13, %v6382_v9 }
 0x25b   :  { %v2836_v43 = vmul.f32 %v2835_v0, %v8947_v22  ;;  %vm2839_vm11 = vcmp.eq.f32.partialorder %v8947_v22, 0.0  ;;  %vm2825_vm10 = vcmp.eq.f32.partialorder %v8961_v14, inf  ;;  %v9223_v61 = vadd.f32 1e-20, %v9080_v16  ;;  %v9238_v16 = vpop.xlane.xlu1 %904 }
 0x25c   :  { %v9204_v3 = vsel %vm2791_vm12, %v12882_v1, %v2790_v42  ;;  %v5132_v42 = vperm.slane %v2961_v18, %v6320_v46  ;;  %v9225_v39 = vpop.eup %5684  ;;  %v2823_v12 = vmul.f32 %v9008_v34, %v2822_v63  ;;  %v2811_v28 = vmul.f32 %v9042_v30, %v2810_v2 }
 0x25d   :  { %12883 = vst [vmem:[#allocation55_spill] sm:$0xff] %v9204_v3  ;;  %v2869_v21 = vmul.f32 0.5, %v2868_v54  ;;  %v2857_v32 = vmul.f32 0.5, %v2856_v36  ;;  %v2846_v13 = vsub.f32 1.5, %v2845_v11  ;;  %v435_v33 = vmul.f32 %v179_v55, %v179_v55  ;;  %v177_v36 = vld [vmem:[%s12692_s0 + $0x540] sm:$0xff] }
 0x25e   :  { %v9230_v0 = vsel %vm4895_vm8, %v5132_v42, %v5131_v51  ;;  %v434_v1 = vmul.f32 %v178_v52, %v178_v52  ;;  %vm2827_vm1 = vcmp.eq.f32.partialorder %v8961_v14, 0.0  ;;  %vm2813_vm14 = vcmp.eq.f32.partialorder %v8998_v53, inf }
 0x25f   :  { %12884 = vst [vmem:[#allocation56_spill] sm:$0xff] %v9230_v0  ;;  %v2816_v34 = vand.u32 2147483648, %v8998_v53  ;;  %v2976_v30 = vmul.f32 %v9185_v23, %v2975_v40  ;;  %v9240_v63 = vpop.eup %5686  ;;  %vm12886_vm4 = vcmask 458112   ;;  %vm2815_vm5 = vcmp.eq.f32.partialorder %v8998_v53, 0.0 }
 0x260   :  { %v9244_v51 = vsel %vm12886_vm4, %v5103_v10, %v9126_v47  ;;  %v2879_v54 = vmul.f32 %v9225_v39, %v9152_v4  ;;  %5688 = vrsqrt.f32 %v9223_v61  ;;  %v2838_v11 = vsel %vm2837_vm9, %v8947_v22, %v2836_v43 }
 0x261   :  { %12887 = vst [vmem:[#allocation5_spill] sm:$0xff] %v9244_v51  ;;  %v2824_v47 = vmul.f32 %v2823_v12, %v8961_v14  ;;  %v2812_v40 = vmul.f32 %v2811_v28, %v8998_v53  ;;  %v2870_v55 = vsub.f32 1.5, %v2869_v21  ;;  %v2858_v52 = vsub.f32 1.5, %v2857_v32 }
 0x262   :  { %v2847_v10 = vmul.f32 %v9107_v48, %v2846_v13  ;;  %v1032_v42 = vsel %vm521_vm0, %v435_v33, 0.0  ;;  %v1029_v18 = vsel %vm521_vm0, %v434_v1, 0.0  ;;  %v2977_v2 = vmul.f32 0.5, %v2976_v30  ;;  %v9283_v1 = vpop.xlane.xlu0 %901 }
 0x263   :  { %v2963_v0 = vmul.f32 %v9240_v63, %v9180_v62  ;;  %1033 = vadd.xlane.f32.xlu2 %v1032_v42  ;;  %1030 = vadd.xlane.f32.xlu1 %v1029_v18  ;;  %v433_v3 = vmul.f32 %v177_v36, %v177_v36  ;;  %v9264_v43 = vadd.f32 1e-20, %v908_v25  ;;  %vm2849_vm12 = vcmp.eq.f32.partialorder %v9048_v20, inf  ;;  %v182_v36 = vld [vmem:[%s12692_s0 + $0x568] sm:$0xff] }
 0x264   :  { %v2880_v28 = vmul.f32 %v9225_v39, %v2879_v54  ;;  %v9270_v48 = vadd.f32 1e-20, %v9092_v57  ;;  %v12888_v21 = vand.u32 2147483648, %v8947_v22  ;;  %v2826_v25 = vsel %vm2825_vm10, %v8961_v14, %v2824_v47 }
 0x265   :  { %v2871_v13 = vmul.f32 %v9082_v58, %v2870_v55  ;;  %v1026_v33 = vsel %vm521_vm0, %v433_v3, 0.0  ;;  %v2814_v57 = vsel %vm2813_vm14, %v8998_v53, %v2812_v40  ;;  %vm2873_vm9 = vcmp.eq.f32.partialorder %v9018_v7, inf  ;;  %v917_v55 = vpop.xlane.xlu2 %916 }
 0x266   :  { %v9276_v32 = vsel %vm2839_vm11, %v12888_v21, %v2838_v11  ;;  %v9285_v18 = vpop.eup %5688  ;;  %v2859_v22 = vmul.f32 %v9098_v6, %v2858_v52  ;;  %v2848_v30 = vmul.f32 %v2847_v10, %v9048_v20  ;;  %1027 = vadd.xlane.f32.xlu0 %v1026_v33  ;;  %5690 = vrsqrt.f32 %v9264_v43  ;;  %v181_v6 = vld [vmem:[%s12692_s0 + $0x560] sm:$0xff] }
 0x267   :  { %12889 = vst [vmem:[#allocation57_spill] sm:$0xff] %v9276_v32  ;;  %vm2861_vm2 = vcmp.eq.f32.partialorder %v9039_v5, inf  ;;  %vm2851_vm6 = vcmp.eq.f32.partialorder %v9048_v20, 0.0  ;;  %v2852_v58 = vand.u32 2147483648, %v9048_v20  ;;  %v2978_v3 = vsub.f32 1.5, %v2977_v2 }
 0x268   :  { %v2964_v54 = vmul.f32 %v9240_v63, %v2963_v0  ;;  %v12890_v47 = vand.u32 2147483648, %v8961_v14  ;;  %v2881_v2 = vmul.f32 0.5, %v2880_v28  ;;  %5692 = vrsqrt.f32 %v9270_v48  ;;  %v180_v0 = vld [vmem:[%s12692_s0 + $0x558] sm:$0xff]  ;;  %v914_v28 = vpop.xlane.xlu1 %913 }
 0x269   :  { %v9318_v52 = vsel %vm2815_vm5, %v2816_v34, %v2814_v57  ;;  %v2872_v10 = vmul.f32 %v2871_v13, %v9018_v7  ;;  %v3011_v42 = vmul.f32 %v9285_v18, %v9223_v61  ;;  %v9324_v14 = vadd.f32 1e-20, %v9137_v17 }
 0x26a   :  { %v9310_v40 = vsel %vm2827_vm1, %v12890_v47, %v2826_v25  ;;  %12892 = vst [vmem:[#allocation59_spill] sm:$0xff] %v9318_v52  ;;  %v2860_v21 = vmul.f32 %v2859_v22, %v9039_v5  ;;  %v2850_v25 = vsel %vm2849_vm12, %v9048_v20, %v2848_v30  ;;  %v438_v33 = vmul.f32 %v182_v36, %v182_v36  ;;  %v12893_v36 = vld [vmem:[#allocation6_spill] sm:$0xff] }
 0x26b   :  { %12891 = vst [vmem:[#allocation58_spill] sm:$0xff] %v9310_v40  ;;  %v437_v47 = vmul.f32 %v181_v6, %v181_v6  ;;  %v2979_v53 = vmul.f32 %v9185_v23, %v2978_v3  ;;  %v2965_v34 = vmul.f32 0.5, %v2964_v54  ;;  %v436_v57 = vmul.f32 %v180_v0, %v180_v0 }
 0x26c   :  { %v9331_v13 = vadd.f32 1e-20, %v917_v55  ;;  %v9333_v11 = vpop.eup %5690  ;;  %v2882_v12 = vsub.f32 1.5, %v2881_v2  ;;  %v1041_v17 = vsel %vm521_vm0, %v438_v33, 0.0  ;;  %v9337_v22 = vadd.f32 1e-20, %v914_v28  ;;  %v911_v28 = vpop.xlane.xlu0 %910 }
 0x26d   :  { %v1038_v32 = vsel %vm521_vm0, %v437_v47, 0.0  ;;  %v3012_v51 = vmul.f32 %v9285_v18, %v3011_v42  ;;  %5694 = vrsqrt.f32 %v9324_v14  ;;  %v3083_v23 = vmul.f32 %v9333_v11, %v9264_v43  ;;  %1042 = vadd.xlane.f32.xlu2 %v1041_v17  ;;  %v185_v33 = vld [vmem:[%s12692_s0 + $0x580] sm:$0xff] }
 0x26e   :  { %1039 = vadd.xlane.f32.xlu1 %v1038_v32  ;;  %v1035_v30 = vsel %vm521_vm0, %v436_v57, 0.0  ;;  %v9344_v3 = vpop.eup %5692  ;;  %5696 = vrsqrt.f32 %v9331_v13  ;;  %v9355_v0 = vsel %vm2873_vm9, %v9018_v7, %v2872_v10  ;;  %v2980_v32 = vmul.f32 %v2979_v53, %v9105_v15  ;;  %v184_v53 = vld [vmem:[%s12692_s0 + $0x578] sm:$0xff] }
 0x26f   :  { %1036 = vadd.xlane.f32.xlu0 %v1035_v30  ;;  %12894 = vst [vmem:[#allocation6_spill] sm:$0xff] %v9355_v0  ;;  %v2966_v55 = vsub.f32 1.5, %v2965_v34  ;;  %v3084_v42 = vmul.f32 %v9333_v11, %v3083_v23  ;;  %v9365_v47 = vsel %vm2861_vm2, %v9039_v5, %v2860_v21  ;;  %v9369_v57 = vsel %vm2851_vm6, %v2852_v58, %v2850_v25 }
 0x270   :  { %12895 = vst [vmem:[#allocation60_spill] sm:$0xff] %v9365_v47  ;;  %v2883_v10 = vmul.f32 %v9225_v39, %v2882_v12  ;;  %5698 = vrsqrt.f32 %v9337_v22  ;;  %vm2981_vm11 = vcmp.eq.f32.partialorder %v9105_v15, inf  ;;  %v3013_v34 = vmul.f32 0.5, %v3012_v51 }
 0x271   :  { %12896 = vst [vmem:[#allocation61_spill] sm:$0xff] %v9369_v57  ;;  %v2999_v17 = vmul.f32 %v9344_v3, %v9270_v48  ;;  %v3085_v21 = vmul.f32 0.5, %v3084_v42  ;;  %vm2983_vm10 = vcmp.eq.f32.partialorder %v9105_v15, 0.0  ;;  %v2984_v20 = vand.u32 2147483648, %v9105_v15 }
 0x272   :  { %v9381_v58 = vadd.f32 1e-20, %v911_v28  ;;  %v441_v39 = vmul.f32 %v185_v33, %v185_v33  ;;  %v2982_v25 = vsel %vm2981_vm11, %v9105_v15, %v2980_v32  ;;  %v2967_v23 = vmul.f32 %v9240_v63, %v2966_v55  ;;  %v926_v55 = vpop.xlane.xlu2 %925 }
 0x273   :  { %v9383_v12 = vpop.eup %5694  ;;  %v9388_v30 = vadd.f32 1e-20, %v9170_v27  ;;  %v440_v51 = vmul.f32 %v184_v53, %v184_v53  ;;  %v9391_v42 = vmul.f32 %v2883_v10, %v9152_v4  ;;  %v3086_v2 = vsub.f32 1.5, %v3085_v21  ;;  %v183_v27 = vld [vmem:[%s12692_s0 + $0x570] sm:$0xff]  ;;  %v923_v53 = vpop.xlane.xlu1 %922 }
 0x274   :  { %v5697_v54 = vpop.eup %5696  ;;  %5700 = vrsqrt.f32 %v9381_v58  ;;  %v3014_v28 = vsub.f32 1.5, %v3013_v34  ;;  %v3000_v32 = vmul.f32 %v9344_v3, %v2999_v17  ;;  %v9403_v6 = vsel %vm2983_vm10, %v2984_v20, %v2982_v25 }
 0x275   :  { %12897 = vst [vmem:[#allocation62_spill] sm:$0xff] %v9388_v30  ;;  %v3119_v63 = vmul.f32 %v5697_v54, %v9331_v13  ;;  %v2987_v34 = vmul.f32 %v9383_v12, %v9324_v14  ;;  %v1050_v21 = vsel %vm521_vm0, %v441_v39, 0.0  ;;  %v1047_v17 = vsel %vm521_vm0, %v440_v51, 0.0 }
 0x276   :  { %12898 = vst [vmem:[#allocation63_spill] sm:$0xff] %v9391_v42  ;;  %v5699_v10 = vpop.eup %5698  ;;  %v9410_v33 = vmul.f32 %v2967_v23, %v9180_v62  ;;  %5702 = vrsqrt.f32 %v9388_v30  ;;  %1051 = vadd.xlane.f32.xlu2 %v1050_v21  ;;  %v3087_v15 = vmul.f32 %v9333_v11, %v3086_v2  ;;  %1048 = vadd.xlane.f32.xlu1 %v1047_v17  ;;  %v9415_v25 = vadd.f32 1e-20, %v926_v55 }
 0x277   :  { %12899 = vst [vmem:[#allocation64_spill] sm:$0xff] %v9403_v6  ;;  %v3120_v40 = vmul.f32 %v5697_v54, %v3119_v63  ;;  %v3107_v52 = vmul.f32 %v5699_v10, %v9337_v22  ;;  %v439_v20 = vmul.f32 %v183_v27, %v183_v27  ;;  %v9417_v57 = vadd.f32 1e-20, %v923_v53 }
 0x278   :  { %v9420_v39 = vmul.f32 %v9285_v18, %v3014_v28  ;;  %v9422_v51 = vmul.f32 0.5, %v3000_v32  ;;  %v9425_v63 = vmul.f32 %v9383_v12, %v2987_v34  ;;  %v9428_v21 = vadd.f32 1e-20, %v9177_v26 }
 0x279   :  { %v3121_v23 = vmul.f32 0.5, %v3120_v40  ;;  %v3108_v31 = vmul.f32 %v5699_v10, %v3107_v52  ;;  %v1044_v11 = vsel %vm521_vm0, %v439_v20, 0.0  ;;  %5704 = vrsqrt.f32 %v9415_v25  ;;  %v920_v40 = vpop.xlane.xlu0 %919  ;;  %v188_v52 = vld [vmem:[%s12692_s0 + $0x598] sm:$0xff] }
 0x27a   :  { %v5701_v42 = vpop.eup %5700  ;;  %12900 = vst [vmem:[#allocation65_spill] sm:$0xff] %v9428_v21  ;;  %vm3089_vm1 = vcmp.eq.f32.partialorder %v9264_v43, inf  ;;  %1045 = vadd.xlane.f32.xlu0 %v1044_v11  ;;  %v3088_v32 = vmul.f32 %v3087_v15, %v9264_v43  ;;  %vm3091_vm14 = vcmp.eq.f32.partialorder %v9264_v43, 0.0  ;;  %v3092_v26 = vand.u32 2147483648, %v9264_v43 }
 0x27b   :  { %v3122_v2 = vsub.f32 1.5, %v3121_v23  ;;  %v3109_v18 = vmul.f32 0.5, %v3108_v31  ;;  %v3095_v28 = vmul.f32 %v5701_v42, %v9381_v58  ;;  %5706 = vrsqrt.f32 %v9417_v57  ;;  %v187_v31 = vld [vmem:[%s12692_s0 + $0x590] sm:$0xff]  ;;  %v932_v4 = vpop.xlane.xlu1 %931 }
 0x27c   :  { %v9444_v27 = vpop.eup %5702  ;;  %vm3125_vm4 = vcmp.eq.f32.partialorder %v9331_v13, inf  ;;  %vm3127_vm5 = vcmp.eq.f32.partialorder %v9331_v13, 0.0  ;;  %v3128_v17 = vand.u32 2147483648, %v9331_v13  ;;  %vm3113_vm12 = vcmp.eq.f32.partialorder %v9337_v22, inf }
 0x27d   :  { %v3123_v55 = vmul.f32 %v5697_v54, %v3122_v2  ;;  %v3110_v53 = vsub.f32 1.5, %v3109_v18  ;;  %v3096_v34 = vmul.f32 %v5701_v42, %v3095_v28  ;;  %v9450_v15 = vadd.f32 1e-20, %v920_v40  ;;  %v186_v54 = vld [vmem:[%s12692_s0 + $0x588] sm:$0xff] }
 0x27e   :  { %v444_v20 = vmul.f32 %v188_v52, %v188_v52  ;;  %vm3115_vm9 = vcmp.eq.f32.partialorder %v9337_v22, 0.0  ;;  %v443_v0 = vmul.f32 %v187_v31, %v187_v31  ;;  %v3090_v18 = vsel %vm3089_vm1, %v9264_v43, %v3088_v32 }
 0x27f   :  { %v3111_v23 = vmul.f32 %v5699_v10, %v3110_v53  ;;  %v3097_v11 = vmul.f32 0.5, %v3096_v34  ;;  %v5705_v2 = vpop.eup %5704  ;;  %v3124_v28 = vmul.f32 %v3123_v55, %v9331_v13  ;;  %v3116_v40 = vand.u32 2147483648, %v9337_v22  ;;  %v935_v53 = vpop.xlane.xlu2 %934 }
 0x280   :  { %5708 = vrsqrt.f32 %v9450_v15  ;;  %vm3101_vm2 = vcmp.eq.f32.partialorder %v9381_v58, inf  ;;  %v3155_v31 = vmul.f32 %v5705_v2, %v9415_v25  ;;  %vm3103_vm6 = vcmp.eq.f32.partialorder %v9381_v58, 0.0 }
 0x281   :  { %v3112_v10 = vmul.f32 %v3111_v23, %v9337_v22  ;;  %v3098_v52 = vsub.f32 1.5, %v3097_v11  ;;  %v5707_v34 = vpop.eup %5706  ;;  %v1059_v47 = vsel %vm521_vm0, %v444_v20, 0.0  ;;  %v1056_v32 = vsel %vm521_vm0, %v443_v0, 0.0 }
 0x282   :  { %v442_v55 = vmul.f32 %v186_v54, %v186_v54  ;;  %v3093_v7 = vsel %vm3091_vm14, %v3092_v26, %v3090_v18  ;;  %v3156_v5 = vmul.f32 %v5705_v2, %v3155_v31  ;;  %1060 = vadd.xlane.f32.xlu2 %v1059_v47  ;;  %v3126_v50 = vsel %vm3125_vm4, %v9331_v13, %v3124_v28 }
 0x283   :  { %v3114_v23 = vsel %vm3113_vm12, %v9337_v22, %v3112_v10  ;;  %v3099_v11 = vmul.f32 %v5701_v42, %v3098_v52  ;;  %v3143_v20 = vmul.f32 %v5707_v34, %v9417_v57  ;;  %1057 = vadd.xlane.f32.xlu1 %v1056_v32  ;;  %v9478_v54 = vadd.f32 1e-20, %v935_v53 }
 0x284   :  { %v1053_v0 = vsel %vm521_vm0, %v442_v55, 0.0  ;;  %v3117_v43 = vsel %vm3115_vm9, %v3116_v40, %v3114_v23  ;;  %v3157_v18 = vmul.f32 0.5, %v3156_v5  ;;  %v9483_v42 = vadd.f32 1e-20, %v932_v4  ;;  %v929_v4 = vpop.xlane.xlu0 %928  ;;  %v190_v23 = vld [vmem:[%s12692_s0 + $0x5a8] sm:$0xff] }
 0x285   :  { %v3100_v26 = vmul.f32 %v3099_v11, %v9381_v58  ;;  %1054 = vadd.xlane.f32.xlu0 %v1053_v0  ;;  %v5154_v10 = vperm.slane %v3093_v7, %v6304_v35  ;;  %v3104_v28 = vand.u32 2147483648, %v9381_v58  ;;  %v3144_v52 = vmul.f32 %v5707_v34, %v3143_v20 }
 0x286   :  { %v5709_v47 = vpop.eup %5708  ;;  %5710 = vrsqrt.f32 %v9478_v54  ;;  %v3129_v31 = vsel %vm3127_vm5, %v3128_v17, %v3126_v50  ;;  %v3158_v40 = vsub.f32 1.5, %v3157_v18  ;;  %v5157_v53 = vperm.slane %v3117_v43, %v6317_v45  ;;  %v191_v50 = vld [vmem:[%s12692_s0 + $0x5b0] sm:$0xff] }
 0x287   :  { %v3102_v22 = vsel %vm3101_vm2, %v9381_v58, %v3100_v26  ;;  %v3131_v5 = vmul.f32 %v5709_v47, %v9450_v15  ;;  %v3145_v32 = vmul.f32 0.5, %v3144_v52  ;;  %5712 = vrsqrt.f32 %v9483_v42 }
 0x288   :  { %v3105_v7 = vsel %vm3103_vm6, %v3104_v28, %v3102_v22  ;;  %v3159_v17 = vmul.f32 %v5705_v2, %v3158_v40  ;;  %vm3161_vm11 = vcmp.eq.f32.partialorder %v9415_v25, inf  ;;  %v5159_v58 = vperm.slane %v3129_v31, %v6323_v49 }
 0x289   :  { %v5155_v13 = vperm.slane %v3105_v7, %v6333_v59  ;;  %v3132_v55 = vmul.f32 %v5709_v47, %v3131_v5  ;;  %v3164_v11 = vand.u32 2147483648, %v9415_v25  ;;  %v3146_v20 = vsub.f32 1.5, %v3145_v32 }
 0x28a   :  { %v9508_v0 = vadd.f32 1e-20, %v929_v4  ;;  %v3160_v26 = vmul.f32 %v3159_v17, %v9415_v25  ;;  %vm3163_vm10 = vcmp.eq.f32.partialorder %v9415_v25, 0.0  ;;  %v447_v18 = vmul.f32 %v191_v50, %v191_v50  ;;  %v189_v4 = vld [vmem:[%s12692_s0 + $0x5a0] sm:$0xff] }
 0x28b   :  { %v5156_v43 = vsel %vm4879_vm7, %v5155_v13, %v5154_v10  ;;  %v3133_v2 = vmul.f32 0.5, %v3132_v55  ;;  %v3147_v22 = vmul.f32 %v5707_v34, %v3146_v20  ;;  %v446_v31 = vmul.f32 %v190_v23, %v190_v23  ;;  %v941_v55 = vpop.xlane.xlu1 %940 }
 0x28c   :  { %v5711_v28 = vpop.eup %5710  ;;  %v5158_v52 = vsel %vm4883_vm13, %v5157_v53, %v5156_v43  ;;  %5714 = vrsqrt.f32 %v9508_v0  ;;  %vm3149_vm1 = vcmp.eq.f32.partialorder %v9417_v57, inf  ;;  %vm3151_vm14 = vcmp.eq.f32.partialorder %v9417_v57, 0.0 }
 0x28d   :  { %v5160_v40 = vsel %vm4887_vm15, %v5159_v58, %v5158_v52  ;;  %v3134_v5 = vsub.f32 1.5, %v3133_v2  ;;  %v3191_v10 = vmul.f32 %v5711_v28, %v9478_v54  ;;  %v5713_v7 = vpop.eup %5712  ;;  %v3148_v32 = vmul.f32 %v3147_v22, %v9417_v57 }
 0x28e   :  { %v3152_v34 = vand.u32 2147483648, %v9417_v57  ;;  %vm3137_vm4 = vcmp.eq.f32.partialorder %v9450_v15, inf  ;;  %v3162_v53 = vsel %vm3161_vm11, %v9415_v25, %v3160_v26  ;;  %v3179_v17 = vmul.f32 %v5713_v7, %v9483_v42 }
 0x28f   :  { %v3135_v50 = vmul.f32 %v5709_v47, %v3134_v5  ;;  %v3192_v13 = vmul.f32 %v5711_v28, %v3191_v10  ;;  %v3150_v23 = vsel %vm3149_vm1, %v9417_v57, %v3148_v32  ;;  %v1068_v58 = vsel %vm521_vm0, %v447_v18, 0.0 }
 0x290   :  { %v1065_v20 = vsel %vm521_vm0, %v446_v31, 0.0  ;;  %v445_v43 = vmul.f32 %v189_v4, %v189_v4  ;;  %v3153_v2 = vsel %vm3151_vm14, %v3152_v34, %v3150_v23  ;;  %v3180_v60 = vmul.f32 %v5713_v7, %v3179_v17  ;;  %1069 = vadd.xlane.f32.xlu2 %v1068_v58 }
 0x291   :  { %v3136_v52 = vmul.f32 %v3135_v50, %v9450_v15  ;;  %v3193_v22 = vmul.f32 0.5, %v3192_v13  ;;  %1066 = vadd.xlane.f32.xlu1 %v1065_v20  ;;  %vm3139_vm5 = vcmp.eq.f32.partialorder %v9450_v15, 0.0  ;;  %v3140_v47 = vand.u32 2147483648, %v9450_v15  ;;  %v194_v20 = vld [vmem:[%s12692_s0 + $0x5c8] sm:$0xff] }
 0x292   :  { %v5715_v26 = vpop.eup %5714  ;;  %v1062_v5 = vsel %vm521_vm0, %v445_v43, 0.0  ;;  %v9536_v57 = vadd.f32 1e-20, %v941_v55  ;;  %v3181_v10 = vmul.f32 0.5, %v3180_v60  ;;  %v9543_v32 = vadd.f32 1e-20, %v9208_v37  ;;  %v938_v60 = vpop.xlane.xlu0 %937 }
 0x293   :  { %v3138_v18 = vsel %vm3137_vm4, %v9450_v15, %v3136_v52  ;;  %v3194_v31 = vsub.f32 1.5, %v3193_v22  ;;  %v3167_v4 = vmul.f32 %v5715_v26, %v9508_v0  ;;  %1063 = vadd.xlane.f32.xlu0 %v1062_v5  ;;  %v3165_v34 = vsel %vm3163_vm10, %v3164_v11, %v3162_v53  ;;  %v9549_v15 = vpop.xlane.xlu2 %943 }
 0x294   :  { %v5163_v50 = vperm.slane %v3153_v2, %v6320_v46  ;;  %v3141_v13 = vsel %vm3139_vm5, %v3140_v47, %v3138_v18  ;;  %v3182_v23 = vsub.f32 1.5, %v3181_v10  ;;  %v9556_v37 = vmul.f32 %v9420_v39, %v9223_v61 }
 0x295   :  { %v5161_v17 = vperm.slane %v3141_v13, %v6314_v44  ;;  %v3195_v55 = vmul.f32 %v5711_v28, %v3194_v31  ;;  %v3168_v58 = vmul.f32 %v5715_v26, %v3167_v4  ;;  %v3002_v25 = vsub.f32 1.5, %v9422_v51 }
 0x296   :  { %v2989_v11 = vmul.f32 0.5, %v9425_v63  ;;  %5716 = vrsqrt.f32 %v9536_v57  ;;  %v5165_v28 = vperm.slane %v3165_v34, %v6382_v9  ;;  %v3183_v43 = vmul.f32 %v5713_v7, %v3182_v23  ;;  %v192_v34 = vld [vmem:[%s12692_s0 + $0x5b8] sm:$0xff] }
 0x297   :  { %v5162_v53 = vsel %vm4891_vm3, %v5161_v17, %v5160_v40  ;;  %v3169_v2 = vmul.f32 0.5, %v3168_v58  ;;  %5718 = vrsqrt.f32 %v9543_v32  ;;  %v9565_v22 = vadd.f32 1e-20, %v938_v60  ;;  %v193_v40 = vld [vmem:[%s12692_s0 + $0x5c0] sm:$0xff] }
 0x298   :  { %v5164_v52 = vsel %vm4895_vm8, %v5163_v50, %v5162_v53  ;;  %v450_v39 = vmul.f32 %v194_v20, %v194_v20  ;;  %v3196_v47 = vmul.f32 %v3195_v55, %v9478_v54  ;;  %v3184_v51 = vmul.f32 %v3183_v43, %v9483_v42 }
 0x299   :  { %vm12901_vm12 = vcmask 458112   ;;  %v3170_v5 = vsub.f32 1.5, %v3169_v2  ;;  %v2990_v7 = vsub.f32 1.5, %v2989_v11  ;;  %v3047_v18 = vmul.f32 %v9444_v27, %v9388_v30 }
 0x29a   :  { %v5166_v63 = vsel %vm12901_vm12, %v5165_v28, %v5164_v52  ;;  %vm3185_vm9 = vcmp.eq.f32.partialorder %v9483_v42, inf  ;;  %5720 = vrsqrt.f32 %v9565_v22  ;;  %vm2969_vm2 = vcmp.eq.f32.partialorder %v9180_v62, inf  ;;  %v9601_v52 = vpop.xlane.xlu1 %949 }
 0x29b   :  { %vm3017_vm6 = vcmp.eq.f32.partialorder %v9223_v61, inf  ;;  %vm3197_vm11 = vcmp.eq.f32.partialorder %v9478_v54, inf  ;;  %v3186_v31 = vsel %vm3185_vm9, %v9483_v42, %v3184_v51  ;;  %v3188_v10 = vand.u32 2147483648, %v9483_v42  ;;  %v9599_v2 = vpop.xlane.xlu2 %952 }
 0x29c   :  { %v3171_v4 = vmul.f32 %v5715_v26, %v3170_v5  ;;  %v5717_v50 = vpop.eup %5716  ;;  %v3200_v13 = vand.u32 2147483648, %v9478_v54  ;;  %vm3187_vm10 = vcmp.eq.f32.partialorder %v9483_v42, 0.0  ;;  %v1077_v17 = vsel %vm521_vm0, %v450_v39, 0.0 }
 0x29d   :  { %v449_v55 = vmul.f32 %v193_v40, %v193_v40  ;;  %v3198_v23 = vsel %vm3197_vm11, %v9478_v54, %v3196_v47  ;;  %v3189_v58 = vsel %vm3187_vm10, %v3188_v10, %v3186_v31  ;;  %v3215_v20 = vmul.f32 %v5717_v50, %v9536_v57  ;;  %1078 = vadd.xlane.f32.xlu2 %v1077_v17  ;;  %v9591_v26 = vpop.eup %5718  ;;  %v9608_v10 = vpop.xlane.xlu0 %946 }
 0x29e   :  { %v3172_v60 = vmul.f32 %v3171_v4, %v9508_v0  ;;  %vm3173_vm1 = vcmp.eq.f32.partialorder %v9508_v0, inf  ;;  %v3176_v11 = vand.u32 2147483648, %v9508_v0  ;;  %v448_v42 = vmul.f32 %v192_v34, %v192_v34 }
 0x29f   :  { %v1074_v28 = vsel %vm521_vm0, %v449_v55, 0.0  ;;  %vm3199_vm14 = vcmp.eq.f32.partialorder %v9478_v54, 0.0  ;;  %vm3175_vm4 = vcmp.eq.f32.partialorder %v9508_v0, 0.0  ;;  %v3216_v43 = vmul.f32 %v5717_v50, %v3215_v20  ;;  %v197_v20 = vld [vmem:[%s12692_s0 + $0x5e0] sm:$0xff] }
 0x2a0   :  { %v3174_v53 = vsel %vm3173_vm1, %v9508_v0, %v3172_v60  ;;  %1075 = vadd.xlane.f32.xlu1 %v1074_v28  ;;  %v5721_v39 = vpop.eup %5720  ;;  %v3201_v47 = vsel %vm3199_vm14, %v3200_v13, %v3198_v23  ;;  %v5169_v51 = vperm.slane %v3189_v58, %v6356_v19  ;;  %v1071_v40 = vsel %vm521_vm0, %v448_v42, 0.0 }
 0x2a1   :  { %v3177_v5 = vsel %vm3175_vm4, %v3176_v11, %v3174_v53  ;;  %5722 = vrsqrt.f32 %v9428_v21  ;;  %v3217_v31 = vmul.f32 0.5, %v3216_v43  ;;  %v3203_v0 = vmul.f32 %v5721_v39, %v9565_v22  ;;  %1072 = vadd.xlane.f32.xlu0 %v1071_v40 }
 0x2a2   :  { %v5167_v54 = vperm.slane %v3177_v5, %v12885_v24  ;;  %v3003_v4 = vmul.f32 %v9344_v3, %v3002_v25  ;;  %v3008_v34 = vand.u32 2147483648, %v9270_v48  ;;  %v2991_v13 = vmul.f32 %v9383_v12, %v2990_v7 }
 0x2a3   :  { %v3048_v17 = vmul.f32 %v9444_v27, %v3047_v18  ;;  %v5171_v55 = vperm.slane %v3201_v47, %v12893_v36  ;;  %vm12902_vm5 = vcmask 523712   ;;  %v3218_v58 = vsub.f32 1.5, %v3217_v31 }
 0x2a4   :  { %v5168_v23 = vsel %vm12902_vm5, %v5167_v54, %v5166_v63  ;;  %v3204_v60 = vmul.f32 %v5721_v39, %v3203_v0  ;;  %v2970_v3 = vsel %vm2969_vm2, %v9180_v62, %v9410_v33  ;;  %vm2971_vm12 = vcmp.eq.f32.partialorder %v9180_v62, 0.0  ;;  %v196_v33 = vld [vmem:[%s12692_s0 + $0x5d8] sm:$0xff] }
 0x2a5   :  { %v3018_v12 = vsel %vm3017_vm6, %v9223_v61, %v9556_v37  ;;  %vm3019_vm9 = vcmp.eq.f32.partialorder %v9223_v61, 0.0  ;;  %vm12903_vm11 = vcmask 589312   ;;  %v9633_v63 = vadd.f32 1e-20, %v9238_v16  ;;  %v195_v37 = vld [vmem:[%s12692_s0 + $0x5d0] sm:$0xff] }
 0x2a6   :  { %v5170_v25 = vsel %vm12903_vm11, %v5169_v51, %v5168_v23  ;;  %v3219_v7 = vmul.f32 %v5717_v50, %v3218_v58  ;;  %vm12905_vm10 = vcmask 654912   ;;  %v3205_v28 = vmul.f32 0.5, %v3204_v60 }
 0x2a7   :  { %12904 = vst [vmem:[#allocation66_spill] sm:$0xff] %v9633_v63  ;;  %v9636_v18 = vsel %vm12905_vm10, %v5171_v55, %v5170_v25  ;;  %v3004_v42 = vmul.f32 %v3003_v4, %v9270_v48  ;;  %vm3005_vm2 = vcmp.eq.f32.partialorder %v9270_v48, inf  ;;  %vm2993_vm6 = vcmp.eq.f32.partialorder %v9324_v14, inf  ;;  %v9652_v43 = vpop.eup %5722  ;;  %v959_v55 = vpop.xlane.xlu1 %958 }
 0x2a8   :  { %v9647_v16 = vmul.f32 0.5, %v3048_v17  ;;  %v9650_v50 = vadd.f32 1e-20, %v9283_v1  ;;  %v453_v53 = vmul.f32 %v197_v20, %v197_v20  ;;  %v2992_v47 = vmul.f32 %v2991_v13, %v9324_v14  ;;  %v962_v17 = vpop.xlane.xlu2 %961 }
 0x2a9   :  { %v3023_v51 = vmul.f32 %v9591_v26, %v9543_v32  ;;  %v3220_v5 = vmul.f32 %v3219_v7, %v9536_v57  ;;  %v3206_v40 = vsub.f32 1.5, %v3205_v28  ;;  %vm3221_vm1 = vcmp.eq.f32.partialorder %v9536_v57, inf  ;;  %v956_v7 = vpop.xlane.xlu0 %955 }
 0x2aa   :  { %12906 = vst [vmem:[#allocation67_spill] sm:$0xff] %v9650_v50  ;;  %v1086_v54 = vsel %vm521_vm0, %v453_v53, 0.0  ;;  %v452_v31 = vmul.f32 %v196_v33, %v196_v33  ;;  %v451_v0 = vmul.f32 %v195_v37, %v195_v37  ;;  %vm3007_vm14 = vcmp.eq.f32.partialorder %v9270_v48, 0.0 }
 0x2ab   :  { %5724 = vrsqrt.f32 %v9633_v63  ;;  %v3222_v1 = vsel %vm3221_vm1, %v9536_v57, %v3220_v5  ;;  %v3224_v4 = vand.u32 2147483648, %v9536_v57  ;;  %v3207_v13 = vmul.f32 %v5721_v39, %v3206_v40  ;;  %1087 = vadd.xlane.f32.xlu2 %v1086_v54  ;;  %v200_v54 = vld [vmem:[%s12692_s0 + $0x5f8] sm:$0xff] }
 0x2ac   :  { %vm2995_vm4 = vcmp.eq.f32.partialorder %v9324_v14, 0.0  ;;  %v3035_v23 = vmul.f32 %v9652_v43, %v9428_v21  ;;  %vm3223_vm5 = vcmp.eq.f32.partialorder %v9536_v57, 0.0  ;;  %v1083_v58 = vsel %vm521_vm0, %v452_v31, 0.0 }
 0x2ad   :  { %v1080_v60 = vsel %vm521_vm0, %v451_v0, 0.0  ;;  %v3024_v20 = vmul.f32 %v9591_v26, %v3023_v51  ;;  %5726 = vrsqrt.f32 %v9650_v50  ;;  %v3225_v25 = vsel %vm3223_vm5, %v3224_v4, %v3222_v1  ;;  %1084 = vadd.xlane.f32.xlu1 %v1083_v58 }
 0x2ae   :  { %v3208_v39 = vmul.f32 %v3207_v13, %v9565_v22  ;;  %1081 = vadd.xlane.f32.xlu0 %v1080_v60  ;;  %vm3209_vm11 = vcmp.eq.f32.partialorder %v9565_v22, inf  ;;  %v3212_v28 = vand.u32 2147483648, %v9565_v22  ;;  %v9675_v33 = vadd.f32 1e-20, %v962_v17 }
 0x2af   :  { %v9677_v57 = vadd.f32 1e-20, %v959_v55  ;;  %v12907_v37 = vand.u32 2147483648, %v9180_v62  ;;  %v12909_v51 = vand.u32 2147483648, %v9223_v61  ;;  %vm3211_vm10 = vcmp.eq.f32.partialorder %v9565_v22, 0.0 }
 0x2b0   :  { %v3210_v40 = vsel %vm3209_vm11, %v9565_v22, %v3208_v39  ;;  %v5175_v31 = vperm.slane %v3225_v25, %v6509_v29  ;;  %5728 = vrsqrt.f32 %v9675_v33  ;;  %v9698_v62 = vadd.f32 1e-20, %v956_v7  ;;  %v199_v25 = vld [vmem:[%s12692_s0 + $0x5f0] sm:$0xff]  ;;  %v198_v7 = vld [vmem:[%s12692_s0 + $0x5e8] sm:$0xff] }
 0x2b1   :  { %v9683_v53 = vsel %vm2971_vm12, %v12907_v37, %v2970_v3  ;;  %v9689_v5 = vsel %vm3019_vm9, %v12909_v51, %v3018_v12  ;;  %v3213_v0 = vsel %vm3211_vm10, %v3212_v28, %v3210_v40  ;;  %v9700_v3 = vpop.eup %5724  ;;  %v3006_v61 = vsel %vm3005_vm2, %v9270_v48, %v3004_v42  ;;  %v971_v28 = vpop.xlane.xlu2 %970 }
 0x2b2   :  { %12908 = vst [vmem:[#allocation68_spill] sm:$0xff] %v9683_v53  ;;  %v2994_v22 = vsel %vm2993_vm6, %v9324_v14, %v2992_v47  ;;  %v3050_v12 = vsub.f32 1.5, %v9647_v16  ;;  %v5173_v1 = vperm.slane %v3213_v0, %v6524_v41  ;;  %v3036_v4 = vmul.f32 %v9652_v43, %v3035_v23 }
 0x2b3   :  { %12910 = vst [vmem:[#allocation69_spill] sm:$0xff] %v9689_v5  ;;  %v3025_v13 = vmul.f32 0.5, %v3024_v20  ;;  %5730 = vrsqrt.f32 %v9677_v57  ;;  %v456_v17 = vmul.f32 %v200_v54, %v200_v54  ;;  %v9712_v55 = vpop.eup %5726  ;;  %v2996_v42 = vand.u32 2147483648, %v9324_v14  ;;  %v968_v14 = vpop.xlane.xlu1 %967 }
 0x2b4   :  { %vm12911_vm12 = vcmask 720512   ;;  %v9724_v47 = vsel %vm3007_vm14, %v3008_v34, %v3006_v61  ;;  %v3071_v23 = vmul.f32 %v9700_v3, %v9633_v63  ;;  %vm12913_vm9 = vcmask 786112  }
 0x2b5   :  { %v5174_v16 = vsel %vm12911_vm12, %v5173_v1, %v9636_v18  ;;  %12912 = vst [vmem:[#allocation70_spill] sm:$0xff] %v9724_v47  ;;  %5732 = vrsqrt.f32 %v9698_v62  ;;  %v9739_v48 = vsel %vm2995_vm4, %v2996_v42, %v2994_v22  ;;  %v3051_v34 = vmul.f32 %v9444_v27, %v3050_v12 }
 0x2b6   :  { %v9729_v20 = vsel %vm12913_vm9, %v5175_v31, %v5174_v16  ;;  %12915 = vst [vmem:[#allocation72_spill] sm:$0xff] %v9739_v48  ;;  %v5729_v37 = vpop.eup %5728  ;;  %v9746_v51 = vmul.f32 0.5, %v3036_v4  ;;  %v3026_v40 = vsub.f32 1.5, %v3025_v13  ;;  %v1095_v31 = vsel %vm521_vm0, %v456_v17, 0.0 }
 0x2b7   :  { %12914 = vst [vmem:[#allocation71_spill] sm:$0xff] %v9729_v20  ;;  %v3059_v27 = vmul.f32 %v9712_v55, %v9650_v50  ;;  %v3299_v61 = vmul.f32 %v5729_v37, %v9675_v33  ;;  %1096 = vadd.xlane.f32.xlu2 %v1095_v31  ;;  %v455_v22 = vmul.f32 %v199_v25, %v199_v25  ;;  %v9758_v42 = vadd.f32 1e-20, %v971_v28 }
 0x2b8   :  { %v3072_v4 = vmul.f32 %v9700_v3, %v3071_v23  ;;  %v454_v13 = vmul.f32 %v198_v7, %v198_v7  ;;  %v9761_v17 = vmul.f32 %v3051_v34, %v9388_v30  ;;  %v9764_v0 = vadd.f32 1e-20, %v968_v14  ;;  %v965_v14 = vpop.xlane.xlu0 %964 }
 0x2b9   :  { %v5731_v12 = vpop.eup %5730  ;;  %v3300_v16 = vmul.f32 %v5729_v37, %v3299_v61  ;;  %v9768_v31 = vmul.f32 %v9591_v26, %v3026_v40  ;;  %v1092_v1 = vsel %vm521_vm0, %v455_v22, 0.0  ;;  %v9773_v7 = vmul.f32 %v9712_v55, %v3059_v27  ;;  %v203_v26 = vld [vmem:[%s12692_s0 + $0x610] sm:$0xff] }
 0x2ba   :  { %v3287_v18 = vmul.f32 %v5731_v12, %v9677_v57  ;;  %v1089_v23 = vsel %vm521_vm0, %v454_v13, 0.0  ;;  %1093 = vadd.xlane.f32.xlu1 %v1092_v1  ;;  %v9776_v58 = vmul.f32 0.5, %v3072_v4  ;;  %v9779_v60 = vadd.f32 1e-20, %v9549_v15 }
 0x2bb   :  { %v5733_v11 = vpop.eup %5732  ;;  %v3301_v34 = vmul.f32 0.5, %v3300_v16  ;;  %1090 = vadd.xlane.f32.xlu0 %v1089_v23  ;;  %vm3305_vm2 = vcmp.eq.f32.partialorder %v9675_v33, inf  ;;  %5734 = vrsqrt.f32 %v9758_v42  ;;  %vm3307_vm6 = vcmp.eq.f32.partialorder %v9675_v33, 0.0  ;;  %v202_v23 = vld [vmem:[%s12692_s0 + $0x608] sm:$0xff] }
 0x2bc   :  { %v3288_v28 = vmul.f32 %v5731_v12, %v3287_v18  ;;  %v3275_v61 = vmul.f32 %v5733_v11, %v9698_v62  ;;  %5736 = vrsqrt.f32 %v9764_v0  ;;  %v3308_v22 = vand.u32 2147483648, %v9675_v33 }
 0x2bd   :  { %v3302_v40 = vsub.f32 1.5, %v3301_v34  ;;  %vm3293_vm1 = vcmp.eq.f32.partialorder %v9677_v57, inf  ;;  %v9790_v15 = vadd.f32 1e-20, %v965_v14  ;;  %v459_v16 = vmul.f32 %v203_v26, %v203_v26  ;;  %v201_v34 = vld [vmem:[%s12692_s0 + $0x600] sm:$0xff] }
 0x2be   :  { %v3289_v18 = vmul.f32 0.5, %v3288_v28  ;;  %v3276_v27 = vmul.f32 %v5733_v11, %v3275_v61  ;;  %v980_v28 = vpop.xlane.xlu2 %979  ;;  %vm3295_vm14 = vcmp.eq.f32.partialorder %v9677_v57, 0.0  ;;  %v3296_v61 = vand.u32 2147483648, %v9677_v57 }
 0x2bf   :  { %v3303_v1 = vmul.f32 %v5729_v37, %v3302_v40  ;;  %vm3281_vm4 = vcmp.eq.f32.partialorder %v9698_v62, inf  ;;  %5738 = vrsqrt.f32 %v9790_v15  ;;  %v1104_v40 = vsel %vm521_vm0, %v459_v16, 0.0 }
 0x2c0   :  { %v3290_v4 = vsub.f32 1.5, %v3289_v18  ;;  %v3277_v13 = vmul.f32 0.5, %v3276_v27  ;;  %v977_v18 = vpop.xlane.xlu1 %976  ;;  %vm3283_vm5 = vcmp.eq.f32.partialorder %v9698_v62, 0.0  ;;  %1105 = vadd.xlane.f32.xlu2 %v1104_v40  ;;  %v458_v39 = vmul.f32 %v202_v23, %v202_v23 }
 0x2c1   :  { %v3304_v37 = vmul.f32 %v3303_v1, %v9675_v33  ;;  %v5735_v27 = vpop.eup %5734  ;;  %v457_v54 = vmul.f32 %v201_v34, %v201_v34  ;;  %v9805_v25 = vadd.f32 1e-20, %v980_v28  ;;  %v9815_v23 = vadd.f32 1e-20, %v977_v18 }
 0x2c2   :  { %v3291_v14 = vmul.f32 %v5731_v12, %v3290_v4  ;;  %v3278_v26 = vsub.f32 1.5, %v3277_v13  ;;  %v5737_v20 = vpop.eup %5736  ;;  %v3335_v4 = vmul.f32 %v5735_v27, %v9758_v42  ;;  %v1101_v16 = vsel %vm521_vm0, %v458_v39, 0.0 }
 0x2c3   :  { %v3306_v5 = vsel %vm3305_vm2, %v9675_v33, %v3304_v37  ;;  %v3323_v13 = vmul.f32 %v5737_v20, %v9764_v0  ;;  %v1098_v40 = vsel %vm521_vm0, %v457_v54, 0.0  ;;  %1102 = vadd.xlane.f32.xlu1 %v1101_v16  ;;  %v3284_v39 = vand.u32 2147483648, %v9698_v62 }
 0x2c4   :  { %v3292_v1 = vmul.f32 %v3291_v14, %v9677_v57  ;;  %v3279_v12 = vmul.f32 %v5733_v11, %v3278_v26  ;;  %v3309_v34 = vsel %vm3307_vm6, %v3308_v22, %v3306_v5  ;;  %v3336_v11 = vmul.f32 %v5735_v27, %v3335_v4  ;;  %1099 = vadd.xlane.f32.xlu0 %v1098_v40  ;;  %v206_v40 = vld [vmem:[%s12692_s0 + $0x628] sm:$0xff] }
 0x2c5   :  { %v5739_v14 = vpop.eup %5738  ;;  %v3324_v54 = vmul.f32 %v5737_v20, %v3323_v13  ;;  %5740 = vrsqrt.f32 %v9805_v25  ;;  %vm3341_vm11 = vcmp.eq.f32.partialorder %v9758_v42, inf  ;;  %vm3343_vm10 = vcmp.eq.f32.partialorder %v9758_v42, 0.0 }
 0x2c6   :  { %v3294_v28 = vsel %vm3293_vm1, %v9677_v57, %v3292_v1  ;;  %v3280_v37 = vmul.f32 %v3279_v12, %v9698_v62  ;;  %v3337_v22 = vmul.f32 0.5, %v3336_v11  ;;  %v3311_v18 = vmul.f32 %v5739_v14, %v9790_v15  ;;  %v974_v12 = vpop.xlane.xlu0 %973 }
 0x2c7   :  { %v3297_v26 = vsel %vm3295_vm14, %v3296_v61, %v3294_v28  ;;  %v5188_v1 = vperm.slane %v3309_v34, %v6317_v45  ;;  %v3325_v61 = vmul.f32 0.5, %v3324_v54  ;;  %5742 = vrsqrt.f32 %v9815_v23  ;;  %v205_v34 = vld [vmem:[%s12692_s0 + $0x620] sm:$0xff] }
 0x2c8   :  { %v5186_v33 = vperm.slane %v3297_v26, %v6333_v59  ;;  %v3282_v5 = vsel %vm3281_vm4, %v9698_v62, %v3280_v37  ;;  %v3338_v13 = vsub.f32 1.5, %v3337_v22  ;;  %v3312_v16 = vmul.f32 %v5739_v14, %v3311_v18 }
 0x2c9   :  { %v3285_v57 = vsel %vm3283_vm5, %v3284_v39, %v3282_v5  ;;  %v3344_v62 = vand.u32 2147483648, %v9758_v42  ;;  %v3326_v28 = vsub.f32 1.5, %v3325_v61  ;;  %vm3329_vm12 = vcmp.eq.f32.partialorder %v9764_v0, inf }
 0x2ca   :  { %v5185_v4 = vperm.slane %v3285_v57, %v6304_v35  ;;  %v3339_v11 = vmul.f32 %v5735_v27, %v3338_v13  ;;  %v3313_v26 = vmul.f32 0.5, %v3312_v16  ;;  %v9848_v39 = vadd.f32 1e-20, %v974_v12  ;;  %v204_v13 = vld [vmem:[%s12692_s0 + $0x618] sm:$0xff]  ;;  %v989_v16 = vpop.xlane.xlu2 %988 }
 0x2cb   :  { %v5741_v54 = vpop.eup %5740  ;;  %v3327_v5 = vmul.f32 %v5737_v20, %v3326_v28  ;;  %v462_v18 = vmul.f32 %v206_v40, %v206_v40  ;;  %v461_v57 = vmul.f32 %v205_v34, %v205_v34  ;;  %vm3331_vm9 = vcmp.eq.f32.partialorder %v9764_v0, 0.0 }
 0x2cc   :  { %v5187_v37 = vsel %vm4879_vm7, %v5186_v33, %v5185_v4  ;;  %v3340_v47 = vmul.f32 %v3339_v11, %v9758_v42  ;;  %v3314_v48 = vsub.f32 1.5, %v3313_v26  ;;  %v3371_v6 = vmul.f32 %v5741_v54, %v9805_v25 }
 0x2cd   :  { %v5189_v22 = vsel %vm4883_vm13, %v5188_v1, %v5187_v37  ;;  %5744 = vrsqrt.f32 %v9848_v39  ;;  %v3328_v61 = vmul.f32 %v3327_v5, %v9764_v0  ;;  %v3332_v27 = vand.u32 2147483648, %v9764_v0  ;;  %v5743_v20 = vpop.eup %5742 }
 0x2ce   :  { %vm3317_vm2 = vcmp.eq.f32.partialorder %v9790_v15, inf  ;;  %v3342_v33 = vsel %vm3341_vm11, %v9758_v42, %v3340_v47  ;;  %v3315_v1 = vmul.f32 %v5739_v14, %v3314_v48  ;;  %v3372_v12 = vmul.f32 %v5741_v54, %v3371_v6  ;;  %v986_v48 = vpop.xlane.xlu1 %985 }
 0x2cf   :  { %v1113_v4 = vsel %vm521_vm0, %v462_v18, 0.0  ;;  %v3330_v40 = vsel %vm3329_vm12, %v9764_v0, %v3328_v61  ;;  %vm3319_vm6 = vcmp.eq.f32.partialorder %v9790_v15, 0.0  ;;  %v3359_v34 = vmul.f32 %v5743_v20, %v9815_v23  ;;  %v983_v61 = vpop.xlane.xlu0 %982 }
 0x2d0   :  { %1114 = vadd.xlane.f32.xlu2 %v1113_v4  ;;  %v1110_v47 = vsel %vm521_vm0, %v461_v57, 0.0  ;;  %v3333_v6 = vsel %vm3331_vm9, %v3332_v27, %v3330_v40  ;;  %v3316_v14 = vmul.f32 %v3315_v1, %v9790_v15  ;;  %v3320_v28 = vand.u32 2147483648, %v9790_v15 }
 0x2d1   :  { %v3373_v37 = vmul.f32 0.5, %v3372_v12  ;;  %1111 = vadd.xlane.f32.xlu1 %v1110_v47  ;;  %v3345_v11 = vsel %vm3343_vm10, %v3344_v62, %v3342_v33  ;;  %v3360_v26 = vmul.f32 %v5743_v20, %v3359_v34  ;;  %v460_v5 = vmul.f32 %v204_v13, %v204_v13 }
 0x2d2   :  { %v9877_v18 = vadd.f32 1e-20, %v989_v16  ;;  %v5192_v57 = vperm.slane %v3333_v6, %v6314_v44  ;;  %v3318_v0 = vsel %vm3317_vm2, %v9790_v15, %v3316_v14  ;;  %v9883_v1 = vadd.f32 1e-20, %v986_v48 }
 0x2d3   :  { %v5745_v4 = vpop.eup %5744  ;;  %v3374_v27 = vsub.f32 1.5, %v3373_v37  ;;  %v3321_v12 = vsel %vm3319_vm6, %v3320_v28, %v3318_v0  ;;  %v3361_v42 = vmul.f32 0.5, %v3360_v26  ;;  %v1107_v33 = vsel %vm521_vm0, %v460_v5, 0.0  ;;  %v209_v26 = vld [vmem:[%s12692_s0 + $0x640] sm:$0xff] }
 0x2d4   :  { %v3347_v62 = vmul.f32 %v5745_v4, %v9848_v39  ;;  %v5190_v13 = vperm.slane %v3321_v12, %v6323_v49  ;;  %1108 = vadd.xlane.f32.xlu0 %v1107_v33  ;;  %5746 = vrsqrt.f32 %v9877_v18  ;;  %v9891_v40 = vadd.f32 1e-20, %v983_v61  ;;  %v207_v61 = vld [vmem:[%s12692_s0 + $0x630] sm:$0xff] }
 0x2d5   :  { %v3375_v16 = vmul.f32 %v5741_v54, %v3374_v27  ;;  %v9894_v34 = vmul.f32 0.5, %v9773_v7  ;;  %5748 = vrsqrt.f32 %v9779_v60  ;;  %v3362_v15 = vsub.f32 1.5, %v3361_v42 }
 0x2d6   :  { %v3348_v47 = vmul.f32 %v5745_v4, %v3347_v62  ;;  %v5194_v48 = vperm.slane %v3345_v11, %v6320_v46  ;;  %v5191_v6 = vsel %vm4887_vm15, %v5190_v13, %v5189_v22  ;;  %5750 = vrsqrt.f32 %v9883_v1 }
 0x2d7   :  { %v3376_v14 = vmul.f32 %v3375_v16, %v9805_v25  ;;  %v9902_v54 = vadd.f32 1e-20, %v9599_v2  ;;  %v5193_v28 = vsel %vm4891_vm3, %v5192_v57, %v5191_v6  ;;  %v3363_v37 = vmul.f32 %v5743_v20, %v3362_v15  ;;  %v208_v2 = vld [vmem:[%s12692_s0 + $0x638] sm:$0xff] }
 0x2d8   :  { %v3349_v7 = vmul.f32 0.5, %v3348_v47  ;;  %vm3377_vm1 = vcmp.eq.f32.partialorder %v9805_v25, inf  ;;  %vm3379_vm14 = vcmp.eq.f32.partialorder %v9805_v25, 0.0  ;;  %v5195_v22 = vsel %vm4895_vm8, %v5194_v48, %v5193_v28 }
 0x2d9   :  { %5752 = vrsqrt.f32 %v9891_v40  ;;  %v3380_v11 = vand.u32 2147483648, %v9805_v25  ;;  %v3364_v20 = vmul.f32 %v3363_v37, %v9815_v23  ;;  %vm3365_vm4 = vcmp.eq.f32.partialorder %v9815_v23, inf }
 0x2da   :  { %v3350_v5 = vsub.f32 1.5, %v3349_v7  ;;  %v5747_v57 = vpop.eup %5746  ;;  %v3378_v0 = vsel %vm3377_vm1, %v9805_v25, %v3376_v14  ;;  %vm3367_vm5 = vcmp.eq.f32.partialorder %v9815_v23, 0.0  ;;  %v3368_v27 = vand.u32 2147483648, %v9815_v23 }
 0x2db   :  { %v465_v12 = vmul.f32 %v209_v26, %v209_v26  ;;  %v9924_v42 = vpop.eup %5748  ;;  %v3366_v62 = vsel %vm3365_vm4, %v9815_v23, %v3364_v20  ;;  %v3407_v13 = vmul.f32 %v5747_v57, %v9877_v18  ;;  %v464_v16 = vmul.f32 %v208_v2, %v208_v2  ;;  %v9933_v23 = vpop.xlane.xlu2 %997 }
 0x2dc   :  { %v3351_v33 = vmul.f32 %v5745_v4, %v3350_v5  ;;  %v5751_v15 = vpop.eup %5750  ;;  %vm3353_vm11 = vcmp.eq.f32.partialorder %v9848_v39, inf  ;;  %vm3355_vm10 = vcmp.eq.f32.partialorder %v9848_v39, 0.0  ;;  %v463_v48 = vmul.f32 %v207_v61, %v207_v61  ;;  %v9940_v5 = vpop.xlane.xlu1 %994 }
 0x2dd   :  { %v1122_v47 = vsel %vm521_vm0, %v465_v12, 0.0  ;;  %v3369_v6 = vsel %vm3367_vm5, %v3368_v27, %v3366_v62  ;;  %v3408_v28 = vmul.f32 %v5747_v57, %v3407_v13  ;;  %v3395_v37 = vmul.f32 %v5751_v15, %v9883_v1 }
 0x2de   :  { %v3352_v14 = vmul.f32 %v3351_v33, %v9848_v39  ;;  %1123 = vadd.xlane.f32.xlu2 %v1122_v47  ;;  %v3381_v7 = vsel %vm3379_vm14, %v3380_v11, %v3378_v0  ;;  %v3356_v26 = vand.u32 2147483648, %v9848_v39  ;;  %v1119_v2 = vsel %vm521_vm0, %v464_v16, 0.0 }
 0x2df   :  { %v5753_v4 = vpop.eup %5752  ;;  %v1116_v20 = vsel %vm521_vm0, %v463_v48, 0.0  ;;  %v3409_v27 = vmul.f32 0.5, %v3408_v28  ;;  %v3396_v12 = vmul.f32 %v5751_v15, %v3395_v37  ;;  %1120 = vadd.xlane.f32.xlu1 %v1119_v2  ;;  %v12916_v25 = vsub.f32 1.5, %v9746_v51  ;;  %v992_v28 = vpop.xlane.xlu0 %991  ;;  %v211_v51 = vld [vmem:[%s12692_s0 + $0x650] sm:$0xff] }
 0x2e0   :  { %v3354_v61 = vsel %vm3353_vm11, %v9848_v39, %v3352_v14  ;;  %v3383_v62 = vmul.f32 %v5753_v4, %v9891_v40  ;;  %1117 = vadd.xlane.f32.xlu0 %v1116_v20  ;;  %v9953_v0 = vmul.f32 %v9768_v31, %v9543_v32  ;;  %v5198_v33 = vperm.slane %v3369_v6, %v12885_v24 }
 0x2e1   :  { %v9949_v11 = vmul.f32 %v9652_v43, %v12916_v25  ;;  %v3357_v13 = vsel %vm3355_vm10, %v3356_v26, %v3354_v61  ;;  %v3410_v47 = vsub.f32 1.5, %v3409_v27  ;;  %v3397_v48 = vmul.f32 0.5, %v3396_v12  ;;  %v212_v43 = vld [vmem:[%s12692_s0 + $0x658] sm:$0xff] }
 0x2e2   :  { %v5196_v16 = vperm.slane %v3357_v13, %v6382_v9  ;;  %v3384_v14 = vmul.f32 %v5753_v4, %v3383_v62  ;;  %5754 = vrsqrt.f32 %v9902_v54  ;;  %v5200_v39 = vperm.slane %v3381_v7, %v6356_v19 }
 0x2e3   :  { %vm12917_vm12 = vcmask 458112   ;;  %v3411_v26 = vmul.f32 %v5747_v57, %v3410_v47  ;;  %v3398_v2 = vsub.f32 1.5, %v3397_v48  ;;  %vm12918_vm9 = vcmask 523712  }
 0x2e4   :  { %v5197_v37 = vsel %vm12917_vm12, %v5196_v16, %v5195_v22  ;;  %v3385_v20 = vmul.f32 0.5, %v3384_v14  ;;  %v9971_v27 = vadd.f32 1e-20, %v992_v28  ;;  %v468_v12 = vmul.f32 %v212_v43, %v212_v43  ;;  %v1007_v16 = vpop.xlane.xlu2 %1006 }
 0x2e5   :  { %v5199_v61 = vsel %vm12918_vm9, %v5198_v33, %v5197_v37  ;;  %v467_v62 = vmul.f32 %v211_v51, %v211_v51  ;;  %vm3053_vm2 = vcmp.eq.f32.partialorder %v9388_v30, inf  ;;  %v3412_v25 = vmul.f32 %v3411_v26, %v9877_v18  ;;  %v210_v33 = vld [vmem:[%s12692_s0 + $0x648] sm:$0xff]  ;;  %v1004_v51 = vpop.xlane.xlu1 %1003 }
 0x2e6   :  { %v3399_v13 = vmul.f32 %v5751_v15, %v3398_v2  ;;  %vm12919_vm6 = vcmask 589312   ;;  %v3386_v31 = vsub.f32 1.5, %v3385_v20  ;;  %v3227_v22 = vmul.f32 %v9924_v42, %v9779_v60 }
 0x2e7   :  { %v5201_v6 = vsel %vm12919_vm6, %v5200_v39, %v5199_v61  ;;  %vm3413_vm1 = vcmp.eq.f32.partialorder %v9877_v18, inf  ;;  %vm3415_vm14 = vcmp.eq.f32.partialorder %v9877_v18, 0.0  ;;  %5756 = vrsqrt.f32 %v9971_v27 }
 0x2e8   :  { %vm3029_vm4 = vcmp.eq.f32.partialorder %v9543_v32, inf  ;;  %v3416_v57 = vand.u32 2147483648, %v9877_v18  ;;  %v3400_v7 = vmul.f32 %v3399_v13, %v9883_v1  ;;  %vm3401_vm5 = vcmp.eq.f32.partialorder %v9883_v1, inf  ;;  %v9988_v47 = vpop.eup %5754 }
 0x2e9   :  { %v3387_v15 = vmul.f32 %v5753_v4, %v3386_v31  ;;  %vm3041_vm11 = vcmp.eq.f32.partialorder %v9428_v21, inf  ;;  %v3414_v48 = vsel %vm3413_vm1, %v9877_v18, %v3412_v25  ;;  %v3404_v14 = vand.u32 2147483648, %v9883_v1 }
 0x2ea   :  { %v1131_v28 = vsel %vm521_vm0, %v468_v12, 0.0  ;;  %v1128_v43 = vsel %vm521_vm0, %v467_v62, 0.0  ;;  %v3402_v4 = vsel %vm3401_vm5, %v9883_v1, %v3400_v7  ;;  %vm3403_vm10 = vcmp.eq.f32.partialorder %v9883_v1, 0.0 }
 0x2eb   :  { %v3388_v31 = vmul.f32 %v3387_v15, %v9891_v40  ;;  %vm3389_vm12 = vcmp.eq.f32.partialorder %v9891_v40, inf  ;;  %1132 = vadd.xlane.f32.xlu2 %v1131_v28  ;;  %vm3031_vm9 = vcmp.eq.f32.partialorder %v9543_v32, 0.0  ;;  %v3405_v39 = vsel %vm3403_vm10, %v3404_v14, %v3402_v4  ;;  %1129 = vadd.xlane.f32.xlu1 %v1128_v43  ;;  %v214_v43 = vld [vmem:[%s12692_s0 + $0x668] sm:$0xff] }
 0x2ec   :  { %v3392_v37 = vand.u32 2147483648, %v9891_v40  ;;  %v466_v26 = vmul.f32 %v210_v33, %v210_v33  ;;  %v10001_v2 = vadd.f32 1e-20, %v1007_v16  ;;  %v3417_v20 = vsel %vm3415_vm14, %v3416_v57, %v3414_v48 }
 0x2ed   :  { %v3390_v61 = vsel %vm3389_vm12, %v9891_v40, %v3388_v31  ;;  %vm3391_vm6 = vcmp.eq.f32.partialorder %v9891_v40, 0.0  ;;  %v10007_v1 = vadd.f32 1e-20, %v1004_v51  ;;  %v5757_v12 = vpop.eup %5756  ;;  %v5204_v62 = vperm.slane %v3405_v39, %v6524_v41  ;;  %v10017_v40 = vpop.xlane.xlu0 %1000 }
 0x2ee   :  { %v3393_v25 = vsel %vm3391_vm6, %v3392_v37, %v3390_v61  ;;  %v1125_v13 = vsel %vm521_vm0, %v466_v26, 0.0  ;;  %5758 = vrsqrt.f32 %v10001_v2  ;;  %v3040_v7 = vmul.f32 %v9949_v11, %v9428_v21 }
 0x2ef   :  { %v3228_v18 = vmul.f32 %v9924_v42, %v3227_v22  ;;  %v5202_v57 = vperm.slane %v3393_v25, %v12893_v36  ;;  %v3419_v15 = vmul.f32 %v5757_v12, %v9971_v27  ;;  %1126 = vadd.xlane.f32.xlu0 %v1125_v13  ;;  %v10023_v33 = vsel %vm3053_vm2, %v9388_v30, %v9761_v17  ;;  %v215_v17 = vld [vmem:[%s12692_s0 + $0x670] sm:$0xff] }
 0x2f0   :  { %12920 = vst [vmem:[#allocation73_spill] sm:$0xff] %v10023_v33  ;;  %v10027_v48 = vadd.f32 1e-20, %v9601_v52  ;;  %5760 = vrsqrt.f32 %v10007_v1  ;;  %v10031_v11 = vadd.f32 1e-20, %v9608_v10  ;;  %v5206_v22 = vperm.slane %v3417_v20, %v6509_v29 }
 0x2f1   :  { %vm12921_vm1 = vcmask 654912   ;;  %v3420_v28 = vmul.f32 %v5757_v12, %v3419_v15  ;;  %v3030_v52 = vsel %vm3029_vm4, %v9543_v32, %v9953_v0  ;;  %v12922_v10 = vsub.f32 1.5, %v9776_v58  ;;  %v213_v58 = vld [vmem:[%s12692_s0 + $0x660] sm:$0xff] }
 0x2f2   :  { %v5203_v14 = vsel %vm12921_vm1, %v5202_v57, %v5201_v6  ;;  %v12923_v6 = vsub.f32 1.5, %v9894_v34  ;;  %vm12924_vm2 = vcmask 720512   ;;  %v10055_v39 = vsel %vm3041_vm11, %v9428_v21, %v3040_v7 }
 0x2f3   :  { %v3075_v51 = vmul.f32 %v9700_v3, %v12922_v10  ;;  %v5205_v31 = vsel %vm12924_vm2, %v5204_v62, %v5203_v14  ;;  %12925 = vst [vmem:[#allocation74_spill] sm:$0xff] %v10055_v39  ;;  %v3229_v37 = vmul.f32 0.5, %v3228_v18  ;;  %vm12926_vm14 = vcmask 786112  }
 0x2f4   :  { %v3063_v4 = vmul.f32 %v9712_v55, %v12923_v6  ;;  %v5207_v26 = vsel %vm12926_vm14, %v5206_v22, %v5205_v31  ;;  %v3421_v20 = vmul.f32 0.5, %v3420_v28  ;;  %v5759_v3 = vpop.eup %5758  ;;  %v3263_v34 = vmul.f32 %v9988_v47, %v9902_v54 }
 0x2f5   :  { %5762 = vrsqrt.f32 %v10027_v48  ;;  %v471_v55 = vmul.f32 %v215_v17, %v215_v17  ;;  %v470_v0 = vmul.f32 %v214_v43, %v214_v43  ;;  %v12927_v61 = vand.u32 2147483648, %v9543_v32  ;;  %v1016_v43 = vpop.xlane.xlu2 %1015 }
 0x2f6   :  { %5764 = vrsqrt.f32 %v10031_v11  ;;  %v3422_v25 = vsub.f32 1.5, %v3421_v20  ;;  %v3479_v13 = vmul.f32 %v5759_v3, %v10001_v2  ;;  %v5761_v7 = vpop.eup %5760  ;;  %v10073_v18 = vmul.f32 %v3075_v51, %v9633_v63 }
 0x2f7   :  { %v10068_v62 = vsel %vm3031_vm9, %v12927_v61, %v3030_v52  ;;  %v10076_v57 = vmul.f32 %v3063_v4, %v9650_v50  ;;  %v469_v22 = vmul.f32 %v213_v58, %v213_v58  ;;  %v3230_v14 = vsub.f32 1.5, %v3229_v37  ;;  %v1013_v52 = vpop.xlane.xlu1 %1012 }
 0x2f8   :  { %12928 = vst [vmem:[#allocation75_spill] sm:$0xff] %v10068_v62  ;;  %v3423_v28 = vmul.f32 %v5757_v12, %v3422_v25  ;;  %v3480_v32 = vmul.f32 %v5759_v3, %v3479_v13  ;;  %v3467_v17 = vmul.f32 %v5761_v7, %v10007_v1  ;;  %v3264_v10 = vmul.f32 %v9988_v47, %v3263_v34  ;;  %v1010_v12 = vpop.xlane.xlu0 %1009 }
 0x2f9   :  { %12929 = vst [vmem:[#allocation76_spill] sm:$0xff] %v10073_v18  ;;  %v1140_v51 = vsel %vm521_vm0, %v471_v55, 0.0  ;;  %v1137_v31 = vsel %vm521_vm0, %v470_v0, 0.0  ;;  %vm3425_vm4 = vcmp.eq.f32.partialorder %v9971_v27, inf  ;;  %v3428_v61 = vand.u32 2147483648, %v9971_v27 }
 0x2fa   :  { %12930 = vst [vmem:[#allocation77_spill] sm:$0xff] %v10076_v57  ;;  %v3424_v4 = vmul.f32 %v3423_v28, %v9971_v27  ;;  %v3481_v20 = vmul.f32 0.5, %v3480_v32  ;;  %v3468_v37 = vmul.f32 %v5761_v7, %v3467_v17  ;;  %1141 = vadd.xlane.f32.xlu2 %v1140_v51  ;;  %1138 = vadd.xlane.f32.xlu1 %v1137_v31  ;;  %v1134_v34 = vsel %vm521_vm0, %v469_v22, 0.0  ;;  %v218_v17 = vld [vmem:[%s12692_s0 + $0x688] sm:$0xff] }
 0x2fb   :  { %v10086_v58 = vpop.eup %5762  ;;  %v10090_v25 = vadd.f32 1e-20, %v1016_v43  ;;  %v10092_v55 = vadd.f32 1e-20, %v1013_v52  ;;  %vm3427_vm5 = vcmp.eq.f32.partialorder %v9971_v27, 0.0  ;;  %1135 = vadd.xlane.f32.xlu0 %v1134_v34  ;;  %v3231_v51 = vmul.f32 %v9924_v42, %v3230_v14 }
 0x2fc   :  { %v10094_v0 = vpop.eup %5764  ;;  %v3426_v13 = vsel %vm3425_vm4, %v9971_v27, %v3424_v4  ;;  %v3482_v28 = vsub.f32 1.5, %v3481_v20  ;;  %v3469_v32 = vmul.f32 0.5, %v3468_v37  ;;  %v10103_v43 = vadd.f32 1e-20, %v1010_v12 }
 0x2fd   :  { %v3429_v22 = vsel %vm3427_vm5, %v3428_v61, %v3426_v13  ;;  %5766 = vrsqrt.f32 %v10090_v25  ;;  %v3251_v52 = vmul.f32 %v10086_v58, %v10027_v48  ;;  %v10108_v20 = vmul.f32 0.5, %v3264_v10  ;;  %v216_v10 = vld [vmem:[%s12692_s0 + $0x678] sm:$0xff] }
 0x2fe   :  { %v5208_v31 = vperm.slane %v3429_v22, %v6671_v56  ;;  %v3483_v27 = vmul.f32 %v5759_v3, %v3482_v28  ;;  %v3470_v4 = vsub.f32 1.5, %v3469_v32  ;;  %v3239_v37 = vmul.f32 %v10094_v0, %v10031_v11  ;;  %v217_v3 = vld [vmem:[%s12692_s0 + $0x680] sm:$0xff]  ;;  %v1025_v28 = vpop.xlane.xlu2 %1024 }
 0x2ff   :  { %5768 = vrsqrt.f32 %v10092_v55  ;;  %v474_v42 = vmul.f32 %v218_v17, %v218_v17  ;;  %v10114_v14 = vadd.f32 1e-20, %v9933_v23  ;;  %vm12931_vm11 = vcmask 851712  }
 0x300   :  { %v10117_v12 = vsel %vm12931_vm11, %v5208_v31, %v5207_v26  ;;  %v3484_v61 = vmul.f32 %v3483_v27, %v10001_v2  ;;  %v3471_v34 = vmul.f32 %v5761_v7, %v3470_v4  ;;  %vm3485_vm10 = vcmp.eq.f32.partialorder %v10001_v2, inf }
 0x301   :  { %12932 = vst [vmem:[#allocation78_spill] sm:$0xff] %v10117_v12  ;;  %vm3487_vm12 = vcmp.eq.f32.partialorder %v10001_v2, 0.0  ;;  %v3488_v23 = vand.u32 2147483648, %v10001_v2  ;;  %5770 = vrsqrt.f32 %v10103_v43  ;;  %vm3473_vm9 = vcmp.eq.f32.partialorder %v10007_v1, inf }
 0x302   :  { %v3486_v26 = vsel %vm3485_vm10, %v10001_v2, %v3484_v61  ;;  %v3472_v7 = vmul.f32 %v3471_v34, %v10007_v1  ;;  %v3476_v13 = vand.u32 2147483648, %v10007_v1  ;;  %v1149_v22 = vsel %vm521_vm0, %v474_v42, 0.0  ;;  %v1022_v42 = vpop.xlane.xlu1 %1021 }
 0x303   :  { %v5767_v32 = vpop.eup %5766  ;;  %v3489_v17 = vsel %vm3487_vm12, %v3488_v23, %v3486_v26  ;;  %v473_v31 = vmul.f32 %v217_v3, %v217_v3  ;;  %v472_v27 = vmul.f32 %v216_v10, %v216_v10  ;;  %vm3475_vm6 = vcmp.eq.f32.partialorder %v10007_v1, 0.0  ;;  %1150 = vadd.xlane.f32.xlu2 %v1149_v22 }
 0x304   :  { %v5217_v4 = vperm.slane %v3489_v17, %v6333_v59  ;;  %v3474_v16 = vsel %vm3473_vm9, %v10007_v1, %v3472_v7  ;;  %v3515_v2 = vmul.f32 %v5767_v32, %v10090_v25  ;;  %v10141_v23 = vadd.f32 1e-20, %v1025_v28  ;;  %v1019_v7 = vpop.xlane.xlu0 %1018 }
 0x305   :  { %v5769_v61 = vpop.eup %5768  ;;  %v3477_v34 = vsel %vm3475_vm6, %v3476_v13, %v3474_v16  ;;  %v1146_v6 = vsel %vm521_vm0, %v473_v31, 0.0  ;;  %v1143_v15 = vsel %vm521_vm0, %v472_v27, 0.0  ;;  %v10144_v3 = vadd.f32 1e-20, %v9940_v5 }
 0x306   :  { %v5216_v10 = vperm.slane %v3477_v34, %v6304_v35  ;;  %v3516_v26 = vmul.f32 %v5767_v32, %v3515_v2  ;;  %v3503_v1 = vmul.f32 %v5769_v61, %v10092_v55  ;;  %1147 = vadd.xlane.f32.xlu1 %v1146_v6  ;;  %v10149_v16 = vmul.f32 %v3231_v51, %v9779_v60  ;;  %v221_v51 = vld [vmem:[%s12692_s0 + $0x6a0] sm:$0xff] }
 0x307   :  { %v5771_v17 = vpop.eup %5770  ;;  %v10152_v13 = vmul.f32 %v10086_v58, %v3251_v52  ;;  %1144 = vadd.xlane.f32.xlu0 %v1143_v15  ;;  %5772 = vrsqrt.f32 %v10141_v23  ;;  %v220_v52 = vld [vmem:[%s12692_s0 + $0x698] sm:$0xff]  ;;  %v10168_v27 = vadd.f32 1e-20, %v1022_v42  ;;  %v10170_v2 = vadd.f32 1e-20, %v1019_v7 }
 0x308   :  { %v10158_v22 = vsel %vm4879_vm7, %v5217_v4, %v5216_v10  ;;  %v3517_v31 = vmul.f32 0.5, %v3516_v26  ;;  %v3504_v6 = vmul.f32 %v5769_v61, %v3503_v1  ;;  %5774 = vrsqrt.f32 %v10114_v14 }
 0x309   :  { %v3491_v15 = vmul.f32 %v5771_v17, %v10103_v43  ;;  %v10173_v4 = vmul.f32 %v10094_v0, %v3239_v37  ;;  %5776 = vrsqrt.f32 %v10144_v3  ;;  %v477_v1 = vmul.f32 %v221_v51, %v221_v51 }
 0x30a   :  { %v3518_v34 = vsub.f32 1.5, %v3517_v31  ;;  %v3505_v10 = vmul.f32 0.5, %v3504_v6  ;;  %5778 = vrsqrt.f32 %v10168_v27  ;;  %v476_v28 = vmul.f32 %v220_v52, %v220_v52  ;;  %v1034_v31 = vpop.xlane.xlu2 %1033 }
 0x30b   :  { %v3492_v26 = vmul.f32 %v5771_v17, %v3491_v15  ;;  %v10178_v5 = vadd.f32 1e-20, %v10017_v40  ;;  %vm3521_vm1 = vcmp.eq.f32.partialorder %v10090_v25, inf  ;;  %vm3523_vm2 = vcmp.eq.f32.partialorder %v10090_v25, 0.0 }
 0x30c   :  { %v3519_v12 = vmul.f32 %v5767_v32, %v3518_v34  ;;  %v3506_v42 = vsub.f32 1.5, %v3505_v10  ;;  %v3524_v37 = vand.u32 2147483648, %v10090_v25  ;;  %5780 = vrsqrt.f32 %v10170_v2  ;;  %v219_v32 = vld [vmem:[%s12692_s0 + $0x690] sm:$0xff] }
 0x30d   :  { %v5773_v7 = vpop.eup %5772  ;;  %v3493_v62 = vmul.f32 0.5, %v3492_v26  ;;  %vm3509_vm14 = vcmp.eq.f32.partialorder %v10092_v55, inf  ;;  %vm3511_vm4 = vcmp.eq.f32.partialorder %v10092_v55, 0.0  ;;  %v1158_v34 = vsel %vm521_vm0, %v477_v1, 0.0  ;;  %v1031_v26 = vpop.xlane.xlu1 %1030 }
 0x30e   :  { %v3520_v6 = vmul.f32 %v3519_v12, %v10090_v25  ;;  %v3507_v51 = vmul.f32 %v5769_v61, %v3506_v42  ;;  %v3551_v40 = vmul.f32 %v5773_v7, %v10141_v23  ;;  %v10190_v52 = vpop.eup %5774  ;;  %v1155_v10 = vsel %vm521_vm0, %v476_v28, 0.0  ;;  %1159 = vadd.xlane.f32.xlu2 %v1158_v34 }
 0x30f   :  { %v3494_v15 = vsub.f32 1.5, %v3493_v62  ;;  %v10195_v12 = vpop.eup %5776  ;;  %v3512_v42 = vand.u32 2147483648, %v10092_v55  ;;  %1156 = vadd.xlane.f32.xlu1 %v1155_v10  ;;  %v10199_v18 = vadd.f32 1e-20, %v1034_v31  ;;  %vm3497_vm5 = vcmp.eq.f32.partialorder %v10103_v43, inf }
 0x310   :  { %v3508_v61 = vmul.f32 %v3507_v51, %v10092_v55  ;;  %v3552_v53 = vmul.f32 %v5773_v7, %v3551_v40  ;;  %v5779_v63 = vpop.eup %5778  ;;  %v3522_v62 = vsel %vm3521_vm1, %v10090_v25, %v3520_v6  ;;  %v475_v28 = vmul.f32 %v219_v32, %v219_v32 }
 0x311   :  { %v3495_v1 = vmul.f32 %v5771_v17, %v3494_v15  ;;  %v3539_v40 = vmul.f32 %v5779_v63, %v10168_v27  ;;  %v10209_v34 = vadd.f32 1e-20, %v1031_v26  ;;  %5782 = vrsqrt.f32 %v10199_v18 }
 0x312   :  { %v3510_v51 = vsel %vm3509_vm14, %v10092_v55, %v3508_v61  ;;  %v3553_v57 = vmul.f32 0.5, %v3552_v53  ;;  %v5781_v31 = vpop.eup %5780  ;;  %v1152_v17 = vsel %vm521_vm0, %v475_v28, 0.0  ;;  %v3500_v6 = vand.u32 2147483648, %v10103_v43 }
 0x313   :  { %v3513_v10 = vsel %vm3511_vm4, %v3512_v42, %v3510_v51  ;;  %v3496_v33 = vmul.f32 %v3495_v1, %v10103_v43  ;;  %v3540_v15 = vmul.f32 %v5779_v63, %v3539_v40  ;;  %v3527_v53 = vmul.f32 %v5781_v31, %v10170_v2  ;;  %1153 = vadd.xlane.f32.xlu0 %v1152_v17  ;;  %v224_v40 = vld [vmem:[%s12692_s0 + $0x6b8] sm:$0xff] }
 0x314   :  { %v3554_v32 = vsub.f32 1.5, %v3553_v57  ;;  %v3525_v26 = vsel %vm3523_vm2, %v3524_v37, %v3522_v62  ;;  %v5221_v61 = vperm.slane %v3513_v10, %v6323_v49  ;;  %vm3499_vm11 = vcmp.eq.f32.partialorder %v10103_v43, 0.0  ;;  %v1028_v57 = vpop.xlane.xlu0 %1027 }
 0x315   :  { %v3498_v55 = vsel %vm3497_vm5, %v10103_v43, %v3496_v33  ;;  %v3541_v28 = vmul.f32 0.5, %v3540_v15  ;;  %v3528_v51 = vmul.f32 %v5781_v31, %v3527_v53  ;;  %vm3557_vm10 = vcmp.eq.f32.partialorder %v10141_v23, inf  ;;  %v223_v33 = vld [vmem:[%s12692_s0 + $0x6b0] sm:$0xff] }
 0x316   :  { %v3501_v42 = vsel %vm3499_vm11, %v3500_v6, %v3498_v55  ;;  %v3555_v1 = vmul.f32 %v5773_v7, %v3554_v32  ;;  %vm3559_vm12 = vcmp.eq.f32.partialorder %v10141_v23, 0.0  ;;  %5784 = vrsqrt.f32 %v10209_v34 }
 0x317   :  { %v5219_v25 = vperm.slane %v3501_v42, %v6317_v45  ;;  %v5223_v43 = vperm.slane %v3525_v26, %v6314_v44  ;;  %v3560_v7 = vand.u32 2147483648, %v10141_v23  ;;  %v3542_v37 = vsub.f32 1.5, %v3541_v28  ;;  %v5783_v10 = vpop.eup %5782 }
 0x318   :  { %v3529_v62 = vmul.f32 0.5, %v3528_v51  ;;  %vm3233_vm9 = vcmp.eq.f32.partialorder %v9779_v60, inf  ;;  %v3556_v6 = vmul.f32 %v3555_v1, %v10141_v23  ;;  %v10241_v32 = vadd.f32 1e-20, %v1028_v57 }
 0x319   :  { %v5220_v17 = vsel %vm4883_vm13, %v5219_v25, %v10158_v22  ;;  %v480_v15 = vmul.f32 %v224_v40, %v224_v40  ;;  %v3543_v55 = vmul.f32 %v5779_v63, %v3542_v37  ;;  %v479_v26 = vmul.f32 %v223_v33, %v223_v33  ;;  %v222_v63 = vld [vmem:[%s12692_s0 + $0x6a8] sm:$0xff] }
 0x31a   :  { %v5222_v53 = vsel %vm4887_vm15, %v5221_v61, %v5220_v17  ;;  %v3530_v42 = vsub.f32 1.5, %v3529_v62  ;;  %vm3545_vm6 = vcmp.eq.f32.partialorder %v10168_v27, inf  ;;  %v3587_v51 = vmul.f32 %v5783_v10, %v10199_v18 }
 0x31b   :  { %v5224_v28 = vsel %vm4891_vm3, %v5223_v43, %v5222_v53  ;;  %5786 = vrsqrt.f32 %v10241_v32  ;;  %vm3235_vm1 = vcmp.eq.f32.partialorder %v9779_v60, 0.0  ;;  %v3544_v22 = vmul.f32 %v3543_v55, %v10168_v27 }
 0x31c   :  { %vm3547_vm2 = vcmp.eq.f32.partialorder %v10168_v27, 0.0  ;;  %v3548_v1 = vand.u32 2147483648, %v10168_v27  ;;  %v3531_v61 = vmul.f32 %v5781_v31, %v3530_v42  ;;  %v5785_v57 = vpop.eup %5784  ;;  %v3558_v40 = vsel %vm3557_vm10, %v10141_v23, %v3556_v6 }
 0x31d   :  { %vm3533_vm14 = vcmp.eq.f32.partialorder %v10170_v2, inf  ;;  %v3588_v25 = vmul.f32 %v5783_v10, %v3587_v51  ;;  %v1167_v33 = vsel %vm521_vm0, %v480_v15, 0.0  ;;  %v3546_v43 = vsel %vm3545_vm6, %v10168_v27, %v3544_v22  ;;  %v10269_v51 = vpop.xlane.xlu2 %1042 }
 0x31e   :  { %v3532_v37 = vmul.f32 %v3531_v61, %v10170_v2  ;;  %v3575_v31 = vmul.f32 %v5785_v57, %v10209_v34  ;;  %1168 = vadd.xlane.f32.xlu2 %v1167_v33  ;;  %v1164_v62 = vsel %vm521_vm0, %v479_v26, 0.0  ;;  %v3549_v17 = vsel %vm3547_vm2, %v3548_v1, %v3546_v43 }
 0x31f   :  { %v3536_v53 = vand.u32 2147483648, %v10170_v2  ;;  %v3589_v55 = vmul.f32 0.5, %v3588_v25  ;;  %1165 = vadd.xlane.f32.xlu1 %v1164_v62  ;;  %v478_v6 = vmul.f32 %v222_v63, %v222_v63  ;;  %v3561_v42 = vsel %vm3559_vm12, %v3560_v7, %v3558_v40  ;;  %v1037_v62 = vpop.xlane.xlu0 %1036 }
 0x320   :  { %v3534_v15 = vsel %vm3533_vm14, %v10170_v2, %v3532_v37  ;;  %vm3535_vm4 = vcmp.eq.f32.partialorder %v10170_v2, 0.0  ;;  %v3576_v27 = vmul.f32 %v5785_v57, %v3575_v31  ;;  %v5227_v61 = vperm.slane %v3549_v17, %v6382_v9 }
 0x321   :  { %v5787_v22 = vpop.eup %5786  ;;  %v3537_v26 = vsel %vm3535_vm4, %v3536_v53, %v3534_v15  ;;  %v3590_v1 = vsub.f32 1.5, %v3589_v55  ;;  %v1161_v33 = vsel %vm521_vm0, %v478_v6, 0.0  ;;  %v3234_v23 = vsel %vm3233_vm9, %v9779_v60, %v10149_v16  ;;  %v10290_v6 = vpop.xlane.xlu1 %1039 }
 0x322   :  { %v5225_v7 = vperm.slane %v3537_v26, %v6320_v46  ;;  %v3577_v63 = vmul.f32 0.5, %v3576_v27  ;;  %v3563_v2 = vmul.f32 %v5787_v22, %v10241_v32  ;;  %1162 = vadd.xlane.f32.xlu0 %v1161_v33  ;;  %v12933_v40 = vsub.f32 1.5, %v10108_v20  ;;  %v226_v20 = vld [vmem:[%s12692_s0 + $0x6c8] sm:$0xff] }
 0x323   :  { %v10283_v43 = vmul.f32 0.5, %v10152_v13  ;;  %v10286_v37 = vmul.f32 0.5, %v10173_v4  ;;  %v5229_v31 = vperm.slane %v3561_v42, %v12885_v24  ;;  %v3591_v17 = vmul.f32 %v5783_v10, %v3590_v1 }
 0x324   :  { %v3267_v25 = vmul.f32 %v9988_v47, %v12933_v40  ;;  %v5226_v16 = vsel %vm4895_vm8, %v5225_v7, %v5224_v28  ;;  %v3578_v53 = vsub.f32 1.5, %v3577_v63  ;;  %v3564_v55 = vmul.f32 %v5787_v22, %v3563_v2  ;;  %v227_v47 = vld [vmem:[%s12692_s0 + $0x6d0] sm:$0xff] }
 0x325   :  { %v12934_v13 = vand.u32 2147483648, %v9779_v60  ;;  %v3443_v10 = vmul.f32 %v10190_v52, %v10114_v14  ;;  %5788 = vrsqrt.f32 %v10178_v5  ;;  %vm12936_vm5 = vcmask 458112   ;;  %v225_v60 = vld [vmem:[%s12692_s0 + $0x6c0] sm:$0xff] }
 0x326   :  { %v5228_v28 = vsel %vm12936_vm5, %v5227_v61, %v5226_v16  ;;  %v3579_v42 = vmul.f32 %v5785_v57, %v3578_v53  ;;  %vm12937_vm11 = vcmask 523712   ;;  %v3565_v27 = vmul.f32 0.5, %v3564_v55  ;;  %v1052_v16 = vpop.xlane.xlu2 %1051 }
 0x327   :  { %v10302_v4 = vsel %vm3235_vm1, %v12934_v13, %v3234_v23  ;;  %v10309_v15 = vsel %vm12937_vm11, %v5229_v31, %v5228_v28  ;;  %v10311_v26 = vadd.f32 1e-20, %v1037_v62  ;;  %v3268_v1 = vmul.f32 %v3267_v25, %v9902_v54 }
 0x328   :  { %12935 = vst [vmem:[#allocation79_spill] sm:$0xff] %v10302_v4  ;;  %v3254_v33 = vsub.f32 1.5, %v10283_v43  ;;  %v483_v23 = vmul.f32 %v227_v47, %v227_v47  ;;  %v482_v7 = vmul.f32 %v226_v20, %v226_v20  ;;  %vm3269_vm10 = vcmp.eq.f32.partialorder %v9902_v54, inf }
 0x329   :  { %v3242_v57 = vsub.f32 1.5, %v10286_v37  ;;  %v3592_v61 = vmul.f32 %v3591_v17, %v10199_v18  ;;  %v3580_v63 = vmul.f32 %v3579_v42, %v10209_v34  ;;  %v3566_v2 = vsub.f32 1.5, %v3565_v27 }
 0x32a   :  { %v3444_v40 = vmul.f32 %v10190_v52, %v3443_v10  ;;  %vm3581_vm12 = vcmp.eq.f32.partialorder %v10209_v34, inf  ;;  %5790 = vrsqrt.f32 %v10311_v26  ;;  %v481_v25 = vmul.f32 %v225_v60, %v225_v60  ;;  %v10349_v60 = vpop.xlane.xlu1 %1048 }
 0x32b   :  { %v3431_v43 = vmul.f32 %v10195_v12, %v10144_v3  ;;  %v3582_v31 = vsel %vm3581_vm12, %v10209_v34, %v3580_v63  ;;  %v3584_v62 = vand.u32 2147483648, %v10209_v34  ;;  %v3567_v37 = vmul.f32 %v5787_v22, %v3566_v2  ;;  %v10329_v17 = vpop.eup %5788 }
 0x32c   :  { %vm3593_vm9 = vcmp.eq.f32.partialorder %v10199_v18, inf  ;;  %vm3583_vm6 = vcmp.eq.f32.partialorder %v10209_v34, 0.0  ;;  %v1176_v53 = vsel %vm521_vm0, %v483_v23, 0.0  ;;  %v1173_v55 = vsel %vm521_vm0, %v482_v7, 0.0  ;;  %v10351_v23 = vpop.xlane.xlu0 %1045  ;;  %v230_v7 = vld [vmem:[%s12692_s0 + $0x6e8] sm:$0xff] }
 0x32d   :  { %vm3271_vm1 = vcmp.eq.f32.partialorder %v9902_v54, 0.0  ;;  %v3594_v47 = vsel %vm3593_vm9, %v10199_v18, %v3592_v61  ;;  %v3596_v20 = vand.u32 2147483648, %v10199_v18  ;;  %v3585_v13 = vsel %vm3583_vm6, %v3584_v62, %v3582_v31  ;;  %1177 = vadd.xlane.f32.xlu2 %v1176_v53  ;;  %1174 = vadd.xlane.f32.xlu1 %v1173_v55 }
 0x32e   :  { %v3568_v22 = vmul.f32 %v3567_v37, %v10241_v32  ;;  %vm3569_vm2 = vcmp.eq.f32.partialorder %v10241_v32, inf  ;;  %v3572_v10 = vand.u32 2147483648, %v10241_v32  ;;  %v1170_v34 = vsel %vm521_vm0, %v481_v25, 0.0 }
 0x32f   :  { %v10342_v28 = vadd.f32 1e-20, %v1052_v16  ;;  %v3455_v42 = vmul.f32 %v10329_v17, %v10178_v5  ;;  %vm3595_vm14 = vcmp.eq.f32.partialorder %v10199_v18, 0.0  ;;  %vm3571_vm4 = vcmp.eq.f32.partialorder %v10241_v32, 0.0  ;;  %1171 = vadd.xlane.f32.xlu0 %v1170_v34 }
 0x330   :  { %v3570_v27 = vsel %vm3569_vm2, %v10241_v32, %v3568_v22  ;;  %v5791_v61 = vpop.eup %5790  ;;  %v3597_v63 = vsel %vm3595_vm14, %v3596_v20, %v3594_v47  ;;  %v5233_v2 = vperm.slane %v3585_v13, %v12893_v36  ;;  %v3255_v18 = vmul.f32 %v10086_v58, %v3254_v33  ;;  %v229_v22 = vld [vmem:[%s12692_s0 + $0x6e0] sm:$0xff] }
 0x331   :  { %v3573_v25 = vsel %vm3571_vm4, %v3572_v10, %v3570_v27  ;;  %5792 = vrsqrt.f32 %v10342_v28  ;;  %vm3257_vm5 = vcmp.eq.f32.partialorder %v10027_v48, inf  ;;  %v3445_v32 = vmul.f32 0.5, %v3444_v40  ;;  %v1061_v10 = vpop.xlane.xlu2 %1060 }
 0x332   :  { %v5231_v31 = vperm.slane %v3573_v25, %v6356_v19  ;;  %v3599_v62 = vmul.f32 %v5791_v61, %v10311_v26  ;;  %v3270_v37 = vsel %vm3269_vm10, %v9902_v54, %v3268_v1  ;;  %v3243_v16 = vmul.f32 %v10094_v0, %v3242_v57 }
 0x333   :  { %v3432_v53 = vmul.f32 %v10195_v12, %v3431_v43  ;;  %v486_v55 = vmul.f32 %v230_v7, %v230_v7  ;;  %v3456_v47 = vmul.f32 %v10329_v17, %v3455_v42  ;;  %v5235_v58 = vperm.slane %v3597_v63, %v6524_v41 }
 0x334   :  { %vm12938_vm11 = vcmask 589312   ;;  %v3600_v40 = vmul.f32 %v5791_v61, %v3599_v62  ;;  %vm3245_vm12 = vcmp.eq.f32.partialorder %v10031_v11, inf  ;;  %v3248_v20 = vand.u32 2147483648, %v10031_v11 }
 0x335   :  { %v5232_v33 = vsel %vm12938_vm11, %v5231_v31, %v10309_v15  ;;  %vm12939_vm9 = vcmask 654912   ;;  %v10375_v1 = vadd.f32 1e-20, %v10269_v51  ;;  %vm3259_vm10 = vcmp.eq.f32.partialorder %v10027_v48, 0.0  ;;  %v228_v51 = vld [vmem:[%s12692_s0 + $0x6d8] sm:$0xff] }
 0x336   :  { %v5234_v13 = vsel %vm12939_vm9, %v5233_v2, %v5232_v33  ;;  %vm3247_vm6 = vcmp.eq.f32.partialorder %v10031_v11, 0.0  ;;  %v3446_v57 = vsub.f32 1.5, %v3445_v32  ;;  %vm12940_vm2 = vcmask 720512  }
 0x337   :  { %v10382_v15 = vsel %vm12940_vm2, %v5235_v58, %v5234_v13  ;;  %v3601_v43 = vmul.f32 0.5, %v3600_v40  ;;  %v10390_v34 = vpop.eup %5792  ;;  %v12941_v42 = vand.u32 2147483648, %v9902_v54  ;;  %v3256_v7 = vmul.f32 %v3255_v18, %v10027_v48 }
 0x338   :  { %v3244_v63 = vmul.f32 %v3243_v16, %v10031_v11  ;;  %v1185_v2 = vsel %vm521_vm0, %v486_v55, 0.0  ;;  %v3433_v25 = vmul.f32 0.5, %v3432_v53  ;;  %v3457_v32 = vmul.f32 0.5, %v3456_v47  ;;  %v1058_v55 = vpop.xlane.xlu1 %1057  ;;  %v1055_v47 = vpop.xlane.xlu0 %1054 }
 0x339   :  { %v10396_v27 = vsel %vm3271_vm1, %v12941_v42, %v3270_v37  ;;  %v3602_v31 = vsub.f32 1.5, %v3601_v43  ;;  %v3659_v62 = vmul.f32 %v10390_v34, %v10342_v28  ;;  %1186 = vadd.xlane.f32.xlu2 %v1185_v2  ;;  %5794 = vrsqrt.f32 %v10375_v1  ;;  %v12943_v37 = vld [vmem:[#allocation10_spill] sm:$0xff] }
 0x33a   :  { %12942 = vst [vmem:[#allocation80_spill] sm:$0xff] %v10396_v27  ;;  %v485_v58 = vmul.f32 %v229_v22, %v229_v22  ;;  %v484_v33 = vmul.f32 %v228_v51, %v228_v51  ;;  %v10404_v54 = vadd.f32 1e-20, %v1061_v10  ;;  %v3447_v16 = vmul.f32 %v10190_v52, %v3446_v57 }
 0x33b   :  { %v3603_v40 = vmul.f32 %v5791_v61, %v3602_v31  ;;  %v3660_v53 = vmul.f32 %v10390_v34, %v3659_v62  ;;  %v3258_v13 = vsel %vm3257_vm5, %v10027_v48, %v3256_v7  ;;  %v3246_v51 = vsel %vm3245_vm12, %v10031_v11, %v3244_v63  ;;  %v232_v11 = vld [vmem:[%s12692_s0 + $0x6f8] sm:$0xff] }
 0x33c   :  { %v1182_v43 = vsel %vm521_vm0, %v485_v58, 0.0  ;;  %v1179_v22 = vsel %vm521_vm0, %v484_v33, 0.0  ;;  %5796 = vrsqrt.f32 %v10404_v54  ;;  %v3434_v52 = vsub.f32 1.5, %v3433_v25 }
 0x33d   :  { %v3458_v61 = vsub.f32 1.5, %v3457_v32  ;;  %v3604_v57 = vmul.f32 %v3603_v40, %v10311_v26  ;;  %1183 = vadd.xlane.f32.xlu1 %v1182_v43  ;;  %1180 = vadd.xlane.f32.xlu0 %v1179_v22  ;;  %vm3605_vm1 = vcmp.eq.f32.partialorder %v10311_v26, inf  ;;  %v3608_v10 = vand.u32 2147483648, %v10311_v26 }
 0x33e   :  { %v10422_v42 = vadd.f32 1e-20, %v1058_v55  ;;  %v10424_v7 = vadd.f32 1e-20, %v1055_v47  ;;  %v3448_v2 = vmul.f32 %v3447_v16, %v10114_v14  ;;  %vm3607_vm14 = vcmp.eq.f32.partialorder %v10311_v26, 0.0 }
 0x33f   :  { %v3606_v31 = vsel %vm3605_vm1, %v10311_v26, %v3604_v57  ;;  %v3661_v63 = vmul.f32 0.5, %v3660_v53  ;;  %v10429_v25 = vpop.eup %5794  ;;  %v12944_v32 = vand.u32 2147483648, %v10027_v48  ;;  %v10439_v58 = vsel %vm3247_vm6, %v3248_v20, %v3246_v51  ;;  %v233_v48 = vld [vmem:[%s12692_s0 + $0x700] sm:$0xff] }
 0x340   :  { %12946 = vst [vmem:[#allocation81_spill] sm:$0xff] %v10439_v58  ;;  %v3609_v33 = vsel %vm3607_vm14, %v3608_v10, %v3606_v31  ;;  %5798 = vrsqrt.f32 %v10422_v42  ;;  %vm3449_vm4 = vcmp.eq.f32.partialorder %v10114_v14, inf  ;;  %v3435_v26 = vmul.f32 %v10195_v12, %v3434_v52  ;;  %v231_v12 = vld [vmem:[%s12692_s0 + $0x6f0] sm:$0xff] }
 0x341   :  { %v10435_v62 = vsel %vm3259_vm10, %v12944_v32, %v3258_v13  ;;  %v3459_v16 = vmul.f32 %v10329_v17, %v3458_v61  ;;  %v5237_v40 = vperm.slane %v3609_v33, %v6509_v29  ;;  %v10455_v47 = vadd.f32 1e-20, %v10290_v6 }
 0x342   :  { %12945 = vst [vmem:[#allocation10_spill] sm:$0xff] %v10435_v62  ;;  %v5797_v20 = vpop.eup %5796  ;;  %5800 = vrsqrt.f32 %v10424_v7  ;;  %v10462_v17 = vsel %vm3449_vm4, %v10114_v14, %v3448_v2  ;;  %v3623_v13 = vmul.f32 %v10429_v25, %v10375_v1  ;;  %vm12947_vm5 = vcmask 786112  }
 0x343   :  { %v10468_v43 = vsel %vm12947_vm5, %v5237_v40, %v10382_v15  ;;  %v3662_v22 = vsub.f32 1.5, %v3661_v63  ;;  %v10471_v6 = vadd.f32 1e-20, %v10349_v60  ;;  %v3695_v51 = vmul.f32 %v5797_v20, %v10404_v54  ;;  %v1070_v15 = vpop.xlane.xlu2 %1069 }
 0x344   :  { %12948 = vst [vmem:[#allocation82_spill] sm:$0xff] %v10468_v43  ;;  %v489_v52 = vmul.f32 %v233_v48, %v233_v48  ;;  %v488_v61 = vmul.f32 %v232_v11, %v232_v11  ;;  %v10475_v57 = vmul.f32 %v3435_v26, %v10144_v3  ;;  %v10478_v10 = vmul.f32 %v3459_v16, %v10178_v5  ;;  %v1067_v16 = vpop.xlane.xlu1 %1066 }
 0x345   :  { %v10481_v2 = vadd.f32 1e-20, %v10351_v23  ;;  %v487_v31 = vmul.f32 %v231_v12, %v231_v12  ;;  %5802 = vrsqrt.f32 %v10455_v47  ;;  %v3696_v60 = vmul.f32 %v5797_v20, %v3695_v51 }
 0x346   :  { %v5799_v32 = vpop.eup %5798  ;;  %v1194_v63 = vsel %vm521_vm0, %v489_v52, 0.0  ;;  %v1191_v33 = vsel %vm521_vm0, %v488_v61, 0.0  ;;  %v10487_v40 = vmul.f32 %v10429_v25, %v3623_v13  ;;  %v3663_v26 = vmul.f32 %v10390_v34, %v3662_v22  ;;  %v1064_v52 = vpop.xlane.xlu0 %1063 }
 0x347   :  { %vm3665_vm11 = vcmp.eq.f32.partialorder %v10342_v28, inf  ;;  %v3683_v23 = vmul.f32 %v5799_v32, %v10422_v42  ;;  %1195 = vadd.xlane.f32.xlu2 %v1194_v63  ;;  %5804 = vrsqrt.f32 %v10471_v6  ;;  %v3697_v11 = vmul.f32 0.5, %v3696_v60  ;;  %1192 = vadd.xlane.f32.xlu1 %v1191_v33  ;;  %v236_v63 = vld [vmem:[%s12692_s0 + $0x718] sm:$0xff]  ;;  %v235_v33 = vld [vmem:[%s12692_s0 + $0x710] sm:$0xff] }
 0x348   :  { %v5801_v48 = vpop.eup %5800  ;;  %v1188_v12 = vsel %vm521_vm0, %v487_v31, 0.0  ;;  %v10494_v51 = vadd.f32 1e-20, %v1070_v15  ;;  %vm3667_vm12 = vcmp.eq.f32.partialorder %v10342_v28, 0.0  ;;  %5806 = vrsqrt.f32 %v10481_v2 }
 0x349   :  { %v3684_v34 = vmul.f32 %v5799_v32, %v3683_v23  ;;  %v3671_v13 = vmul.f32 %v5801_v48, %v10424_v7  ;;  %1189 = vadd.xlane.f32.xlu0 %v1188_v12  ;;  %v3668_v22 = vand.u32 2147483648, %v10342_v28  ;;  %v3698_v61 = vsub.f32 1.5, %v3697_v11 }
 0x34a   :  { %vm3701_vm9 = vcmp.eq.f32.partialorder %v10404_v54, inf  ;;  %5808 = vrsqrt.f32 %v10494_v51  ;;  %v3664_v31 = vmul.f32 %v3663_v26, %v10342_v28  ;;  %vm3703_vm10 = vcmp.eq.f32.partialorder %v10404_v54, 0.0 }
 0x34b   :  { %v3685_v15 = vmul.f32 0.5, %v3684_v34  ;;  %v3672_v60 = vmul.f32 %v5801_v48, %v3671_v13  ;;  %v10510_v23 = vpop.eup %5802  ;;  %v3699_v11 = vmul.f32 %v5797_v20, %v3698_v61  ;;  %v3704_v12 = vand.u32 2147483648, %v10404_v54 }
 0x34c   :  { %v10513_v18 = vadd.f32 1e-20, %v1067_v16  ;;  %v10515_v26 = vadd.f32 1e-20, %v1064_v52  ;;  %vm3689_vm6 = vcmp.eq.f32.partialorder %v10422_v42, inf  ;;  %vm3691_vm2 = vcmp.eq.f32.partialorder %v10422_v42, 0.0  ;;  %v1076_v43 = vpop.xlane.xlu1 %1075 }
 0x34d   :  { %v3686_v0 = vsub.f32 1.5, %v3685_v15  ;;  %v3673_v34 = vmul.f32 0.5, %v3672_v60  ;;  %v10519_v13 = vpop.eup %5804  ;;  %v3700_v55 = vmul.f32 %v3699_v11, %v10404_v54  ;;  %v492_v53 = vmul.f32 %v236_v63, %v236_v63  ;;  %v234_v60 = vld [vmem:[%s12692_s0 + $0x708] sm:$0xff] }
 0x34e   :  { %5810 = vrsqrt.f32 %v10513_v18  ;;  %v491_v20 = vmul.f32 %v235_v33, %v235_v33  ;;  %v10523_v61 = vpop.eup %5806  ;;  %v3666_v16 = vsel %vm3665_vm11, %v10342_v28, %v3664_v31  ;;  %v3692_v11 = vand.u32 2147483648, %v10422_v42  ;;  %v1079_v33 = vpop.xlane.xlu2 %1078 }
 0x34f   :  { %v3687_v52 = vmul.f32 %v5799_v32, %v3686_v0  ;;  %v3674_v15 = vsub.f32 1.5, %v3673_v34  ;;  %5812 = vrsqrt.f32 %v10515_v26  ;;  %vm3677_vm1 = vcmp.eq.f32.partialorder %v10424_v7, inf  ;;  %v1073_v21 = vpop.xlane.xlu0 %1072 }
 0x350   :  { %v5809_v27 = vpop.eup %5808  ;;  %vm3679_vm14 = vcmp.eq.f32.partialorder %v10424_v7, 0.0  ;;  %v3680_v63 = vand.u32 2147483648, %v10424_v7  ;;  %v3702_v0 = vsel %vm3701_vm9, %v10404_v54, %v3700_v55  ;;  %v3669_v4 = vsel %vm3667_vm12, %v3668_v22, %v3666_v16 }
 0x351   :  { %v3688_v32 = vmul.f32 %v3687_v52, %v10422_v42  ;;  %v3675_v31 = vmul.f32 %v5801_v48, %v3674_v15  ;;  %v3731_v34 = vmul.f32 %v5809_v27, %v10494_v51  ;;  %v1203_v39 = vsel %vm521_vm0, %v492_v53, 0.0 }
 0x352   :  { %v1200_v50 = vsel %vm521_vm0, %v491_v20, 0.0  ;;  %v490_v30 = vmul.f32 %v234_v60, %v234_v60  ;;  %1204 = vadd.xlane.f32.xlu2 %v1203_v39  ;;  %v10549_v48 = vadd.f32 1e-20, %v1079_v33  ;;  %v3705_v28 = vsel %vm3703_vm10, %v3704_v12, %v3702_v0 }
 0x353   :  { %v3690_v38 = vsel %vm3689_vm6, %v10422_v42, %v3688_v32  ;;  %v3676_v55 = vmul.f32 %v3675_v31, %v10424_v7  ;;  %v3732_v52 = vmul.f32 %v5809_v27, %v3731_v34  ;;  %1201 = vadd.xlane.f32.xlu1 %v1200_v50  ;;  %v10556_v20 = vadd.f32 1e-20, %v1076_v43 }
 0x354   :  { %v5811_v15 = vpop.eup %5810  ;;  %v3693_v53 = vsel %vm3691_vm2, %v3692_v11, %v3690_v38  ;;  %v1197_v22 = vsel %vm521_vm0, %v490_v30, 0.0  ;;  %v10562_v33 = vadd.f32 1e-20, %v1073_v21  ;;  %5814 = vrsqrt.f32 %v10549_v48 }
 0x355   :  { %v5813_v16 = vpop.eup %5812  ;;  %v3678_v60 = vsel %vm3677_vm1, %v10424_v7, %v3676_v55  ;;  %v3733_v39 = vmul.f32 0.5, %v3732_v52  ;;  %v3719_v50 = vmul.f32 %v5811_v15, %v10513_v18  ;;  %1198 = vadd.xlane.f32.xlu0 %v1197_v22  ;;  %v5250_v54 = vperm.slane %v3693_v53, %v6317_v45  ;;  %v249_v52 = vld [vmem:[%s12692_s0 + $0x780] sm:$0xff] }
 0x356   :  { %v3681_v38 = vsel %vm3679_vm14, %v3680_v63, %v3678_v60  ;;  %v3707_v30 = vmul.f32 %v5813_v16, %v10515_v26  ;;  %v5247_v42 = vperm.slane %v3669_v4, %v6304_v35  ;;  %v10573_v0 = vmul.f32 %v10510_v23, %v10455_v47  ;;  %v250_v4 = vld [vmem:[%s12692_s0 + $0x788] sm:$0xff]  ;;  %v237_v60 = vld [vmem:[%s12692_s0 + $0x720] sm:$0xff] }
 0x357   :  { %v5248_v43 = vperm.slane %v3681_v38, %v6333_v59  ;;  %v3734_v12 = vsub.f32 1.5, %v3733_v39  ;;  %v3720_v11 = vmul.f32 %v5811_v15, %v3719_v50  ;;  %vm3737_vm4 = vcmp.eq.f32.partialorder %v10494_v51, inf }
 0x358   :  { %v3708_v21 = vmul.f32 %v5813_v16, %v3707_v30  ;;  %5816 = vrsqrt.f32 %v10556_v20  ;;  %v5252_v7 = vperm.slane %v3705_v28, %v6323_v49  ;;  %vm3739_vm5 = vcmp.eq.f32.partialorder %v10494_v51, 0.0 }
 0x359   :  { %v5249_v63 = vsel %vm4879_vm7, %v5248_v43, %v5247_v42  ;;  %v3735_v32 = vmul.f32 %v5809_v27, %v3734_v12  ;;  %v3721_v31 = vmul.f32 0.5, %v3720_v11  ;;  %5818 = vrsqrt.f32 %v10562_v33 }
 0x35a   :  { %v5251_v34 = vsel %vm4883_vm13, %v5250_v54, %v5249_v63  ;;  %v3709_v55 = vmul.f32 0.5, %v3708_v21  ;;  %vm3437_vm11 = vcmp.eq.f32.partialorder %v10144_v3, inf  ;;  %v3740_v28 = vand.u32 2147483648, %v10494_v51  ;;  %v5815_v39 = vpop.eup %5814 }
 0x35b   :  { %v3736_v27 = vmul.f32 %v3735_v32, %v10494_v51  ;;  %v3722_v53 = vsub.f32 1.5, %v3721_v31  ;;  %v5253_v22 = vsel %vm4887_vm15, %v5252_v7, %v5251_v34  ;;  %vm3461_vm12 = vcmp.eq.f32.partialorder %v10178_v5, inf }
 0x35c   :  { %vm3725_vm9 = vcmp.eq.f32.partialorder %v10513_v18, inf  ;;  %vm3727_vm10 = vcmp.eq.f32.partialorder %v10513_v18, 0.0  ;;  %v3710_v50 = vsub.f32 1.5, %v3709_v55  ;;  %v506_v54 = vmul.f32 %v250_v4, %v250_v4 }
 0x35d   :  { %v3723_v38 = vmul.f32 %v5811_v15, %v3722_v53  ;;  %v3728_v30 = vand.u32 2147483648, %v10513_v18  ;;  %v3767_v42 = vmul.f32 %v5815_v39, %v10549_v48  ;;  %v505_v43 = vmul.f32 %v249_v52, %v249_v52 }
 0x35e   :  { %v5817_v12 = vpop.eup %5816  ;;  %v3711_v11 = vmul.f32 %v5813_v16, %v3710_v50  ;;  %vm3713_vm6 = vcmp.eq.f32.partialorder %v10515_v26, inf  ;;  %v1245_v21 = vsel %vm521_vm0, %v506_v54, 0.0  ;;  %v493_v7 = vmul.f32 %v237_v60, %v237_v60  ;;  %v10615_v54 = vpop.xlane.xlu2 %1087 }
 0x35f   :  { %v3738_v63 = vsel %vm3737_vm4, %v10494_v51, %v3736_v27  ;;  %v3724_v32 = vmul.f32 %v3723_v38, %v10513_v18  ;;  %v3768_v31 = vmul.f32 %v5815_v39, %v3767_v42  ;;  %v3755_v15 = vmul.f32 %v5817_v12, %v10556_v20  ;;  %1246 = vadd.xlane.f32.xlu2 %v1245_v21  ;;  %v5819_v4 = vpop.eup %5818 }
 0x360   :  { %v3712_v34 = vmul.f32 %v3711_v11, %v10515_v26  ;;  %v3716_v16 = vand.u32 2147483648, %v10515_v26  ;;  %v1242_v55 = vsel %vm521_vm0, %v505_v43, 0.0  ;;  %v1206_v52 = vsel %vm521_vm0, %v493_v7, 0.0 }
 0x361   :  { %v3726_v53 = vsel %vm3725_vm9, %v10513_v18, %v3724_v32  ;;  %v3769_v27 = vmul.f32 0.5, %v3768_v31  ;;  %v3756_v60 = vmul.f32 %v5817_v12, %v3755_v15  ;;  %v3743_v50 = vmul.f32 %v5819_v4, %v10562_v33  ;;  %1243 = vadd.xlane.f32.xlu1 %v1242_v55  ;;  %1207 = vadd.xlane.f32.xlu0 %v1206_v52  ;;  %v1082_v31 = vpop.xlane.xlu0 %1081 }
 0x362   :  { %v3741_v38 = vsel %vm3739_vm5, %v3740_v28, %v3738_v63  ;;  %v3729_v42 = vsel %vm3727_vm10, %v3728_v30, %v3726_v53  ;;  %v3714_v43 = vsel %vm3713_vm6, %v10515_v26, %v3712_v34  ;;  %vm3715_vm2 = vcmp.eq.f32.partialorder %v10515_v26, 0.0  ;;  %v10645_v53 = vpop.xlane.xlu1 %1084 }
 0x363   :  { %v5256_v11 = vperm.slane %v3729_v42, %v6320_v46  ;;  %v3717_v21 = vsel %vm3715_vm2, %v3716_v16, %v3714_v43  ;;  %v3770_v7 = vsub.f32 1.5, %v3769_v27  ;;  %v3757_v32 = vmul.f32 0.5, %v3756_v60 }
 0x364   :  { %v10630_v51 = vsel %vm3437_vm11, %v10144_v3, %v10475_v57  ;;  %v3464_v18 = vand.u32 2147483648, %v10178_v5  ;;  %v5254_v28 = vperm.slane %v3717_v21, %v6314_v44  ;;  %v3744_v30 = vmul.f32 %v5819_v4, %v3743_v50  ;;  %v238_v57 = vld [vmem:[%s12692_s0 + $0x728] sm:$0xff] }
 0x365   :  { %v3462_v26 = vsel %vm3461_vm12, %v10178_v5, %v10478_v10  ;;  %v3647_v63 = vmul.f32 %v10519_v13, %v10471_v6  ;;  %v3771_v15 = vmul.f32 %v5815_v39, %v3770_v7  ;;  %v3758_v34 = vsub.f32 1.5, %v3757_v32  ;;  %v252_v10 = vld [vmem:[%s12692_s0 + $0x798] sm:$0xff] }
 0x366   :  { %v5258_v16 = vperm.slane %v3741_v38, %v6382_v9  ;;  %v5255_v55 = vsel %vm4891_vm3, %v5254_v28, %v5253_v22  ;;  %v3745_v52 = vmul.f32 0.5, %v3744_v30  ;;  %v10647_v27 = vadd.f32 1e-20, %v1082_v31 }
 0x367   :  { %vm3451_vm1 = vcmp.eq.f32.partialorder %v10114_v14, 0.0  ;;  %v10654_v39 = vmul.f32 0.5, %v10487_v40  ;;  %v3612_v60 = vmul.f32 %v10510_v23, %v10573_v0  ;;  %v5257_v50 = vsel %vm4895_vm8, %v5256_v11, %v5255_v55  ;;  %v251_v11 = vld [vmem:[%s12692_s0 + $0x790] sm:$0xff] }
 0x368   :  { %v3759_v22 = vmul.f32 %v5817_v12, %v3758_v34  ;;  %vm3439_vm14 = vcmp.eq.f32.partialorder %v10144_v3, 0.0  ;;  %v3772_v38 = vmul.f32 %v3771_v15, %v10549_v48  ;;  %vm12949_vm4 = vcmask 458112  }
 0x369   :  { %v5259_v42 = vsel %vm12949_vm4, %v5258_v16, %v5257_v50  ;;  %v3746_v43 = vsub.f32 1.5, %v3745_v52  ;;  %v494_v21 = vmul.f32 %v238_v57, %v238_v57  ;;  %v3648_v7 = vmul.f32 %v10519_v13, %v3647_v63  ;;  %v10676_v63 = vpop.xlane.xlu2 %1096 }
 0x36a   :  { %v3635_v40 = vmul.f32 %v10523_v61, %v10481_v2  ;;  %v3760_v32 = vmul.f32 %v3759_v22, %v10556_v20  ;;  %v508_v31 = vmul.f32 %v252_v10, %v252_v10  ;;  %vm3761_vm5 = vcmp.eq.f32.partialorder %v10556_v20, inf }
 0x36b   :  { %v3764_v0 = vand.u32 2147483648, %v10556_v20  ;;  %v3747_v12 = vmul.f32 %v5819_v4, %v3746_v43  ;;  %5820 = vrsqrt.f32 %v10647_v27  ;;  %vm3773_vm11 = vcmp.eq.f32.partialorder %v10549_v48, inf }
 0x36c   :  { %v3776_v28 = vand.u32 2147483648, %v10549_v48  ;;  %v3762_v30 = vsel %vm3761_vm5, %v10556_v20, %v3760_v32  ;;  %vm3763_vm12 = vcmp.eq.f32.partialorder %v10556_v20, 0.0  ;;  %v3774_v15 = vsel %vm3773_vm11, %v10549_v48, %v3772_v38 }
 0x36d   :  { %v3765_v34 = vsel %vm3763_vm12, %v3764_v0, %v3762_v30  ;;  %v3748_v4 = vmul.f32 %v3747_v12, %v10562_v33  ;;  %v1209_v57 = vsel %vm521_vm0, %v494_v21, 0.0  ;;  %vm3749_vm9 = vcmp.eq.f32.partialorder %v10562_v33, inf }
 0x36e   :  { %v3752_v16 = vand.u32 2147483648, %v10562_v33  ;;  %1210 = vadd.xlane.f32.xlu2 %v1209_v57  ;;  %v1251_v55 = vsel %vm521_vm0, %v508_v31, 0.0  ;;  %v507_v52 = vmul.f32 %v251_v11, %v251_v11  ;;  %v3636_v10 = vmul.f32 %v10523_v61, %v3635_v40  ;;  %v10699_v31 = vpop.xlane.xlu1 %1093  ;;  %v10714_v11 = vpop.xlane.xlu0 %1090 }
 0x36f   :  { %vm3775_vm10 = vcmp.eq.f32.partialorder %v10549_v48, 0.0  ;;  %v3750_v20 = vsel %vm3749_vm9, %v10562_v33, %v3748_v4  ;;  %vm3751_vm6 = vcmp.eq.f32.partialorder %v10562_v33, 0.0  ;;  %1252 = vadd.xlane.f32.xlu1 %v1251_v55  ;;  %v5262_v22 = vperm.slane %v3765_v34, %v6356_v19  ;;  %v12956_v4 = vld [vmem:[#allocation7_spill] sm:$0xff] }
 0x370   :  { %v3777_v50 = vsel %vm3775_vm10, %v3776_v28, %v3774_v15  ;;  %v3753_v38 = vsel %vm3751_vm6, %v3752_v16, %v3750_v20  ;;  %v1248_v43 = vsel %vm521_vm0, %v507_v52, 0.0  ;;  %v12950_v32 = vand.u32 2147483648, %v10114_v14  ;;  %v253_v20 = vld [vmem:[%s12692_s0 + $0x7a0] sm:$0xff] }
 0x371   :  { %v5821_v21 = vpop.eup %5820  ;;  %vm3463_vm2 = vcmp.eq.f32.partialorder %v10178_v5, 0.0  ;;  %v3613_v48 = vmul.f32 0.5, %v3612_v60  ;;  %v5260_v33 = vperm.slane %v3753_v38, %v12885_v24  ;;  %1249 = vadd.xlane.f32.xlu0 %v1248_v43  ;;  %v12952_v0 = vand.u32 2147483648, %v10144_v3 }
 0x372   :  { %v10695_v40 = vsel %vm3451_vm1, %v12950_v32, %v10462_v17  ;;  %v10710_v14 = vsel %vm3463_vm2, %v3464_v18, %v3462_v26  ;;  %v3626_v17 = vsub.f32 1.5, %v10654_v39  ;;  %v3779_v60 = vmul.f32 %v5821_v21, %v10647_v27  ;;  %v254_v26 = vld [vmem:[%s12692_s0 + $0x7a8] sm:$0xff] }
 0x373   :  { %12951 = vst [vmem:[#allocation83_spill] sm:$0xff] %v10695_v40  ;;  %v10706_v12 = vsel %vm3439_vm14, %v12952_v0, %v10630_v51  ;;  %v3649_v28 = vmul.f32 0.5, %v3648_v7  ;;  %v3637_v30 = vmul.f32 0.5, %v3636_v10  ;;  %v5264_v15 = vperm.slane %v3777_v50, %v12893_v36  ;;  %v12958_v39 = vld [vmem:[#allocation8_spill] sm:$0xff]  ;;  %v1106_v50 = vpop.xlane.xlu2 %1105 }
 0x374   :  { %12953 = vst [vmem:[#allocation84_spill] sm:$0xff] %v10706_v12  ;;  %vm12955_vm1 = vcmask 523712   ;;  %vm12957_vm14 = vcmask 589312   ;;  %v10722_v5 = vadd.f32 1e-20, %v10615_v54  ;;  %v3780_v18 = vmul.f32 %v5821_v21, %v3779_v60  ;;  %v239_v54 = vld [vmem:[%s12692_s0 + $0x730] sm:$0xff] }
 0x375   :  { %12954 = vst [vmem:[#allocation85_spill] sm:$0xff] %v10710_v14  ;;  %v5261_v34 = vsel %vm12955_vm1, %v5260_v33, %v5259_v42  ;;  %v3614_v42 = vsub.f32 1.5, %v3613_v48  ;;  %vm12959_vm4 = vcmask 654912   ;;  %vm3629_vm5 = vcmp.eq.f32.partialorder %v10375_v1, inf }
 0x376   :  { %v5263_v51 = vsel %vm12957_vm14, %v5262_v22, %v5261_v34  ;;  %v3781_v10 = vmul.f32 0.5, %v3780_v18  ;;  %v3627_v22 = vmul.f32 %v10429_v25, %v3626_v17  ;;  %v3650_v38 = vsub.f32 1.5, %v3649_v28 }
 0x377   :  { %v10732_v16 = vsel %vm12959_vm4, %v5264_v15, %v5263_v51  ;;  %v3638_v43 = vsub.f32 1.5, %v3637_v30  ;;  %v510_v32 = vmul.f32 %v254_v26, %v254_v26  ;;  %5822 = vrsqrt.f32 %v10722_v5  ;;  %v1103_v30 = vpop.xlane.xlu1 %1102 }
 0x378   :  { %v10748_v48 = vadd.f32 1e-20, %v10645_v53  ;;  %v3782_v33 = vsub.f32 1.5, %v3781_v10  ;;  %v495_v0 = vmul.f32 %v239_v54, %v239_v54  ;;  %v3615_v60 = vmul.f32 %v10510_v23, %v3614_v42  ;;  %v1100_v42 = vpop.xlane.xlu0 %1099 }
 0x379   :  { %v1257_v15 = vsel %vm521_vm0, %v510_v32, 0.0  ;;  %v509_v34 = vmul.f32 %v253_v20, %v253_v20  ;;  %v10752_v51 = vadd.f32 1e-20, %v1106_v50  ;;  %vm3631_vm11 = vcmp.eq.f32.partialorder %v10375_v1, 0.0 }
 0x37a   :  { %v3632_v25 = vand.u32 2147483648, %v10375_v1  ;;  %vm3617_vm12 = vcmp.eq.f32.partialorder %v10455_v47, inf  ;;  %v3783_v17 = vmul.f32 %v5821_v21, %v3782_v33  ;;  %1258 = vadd.xlane.f32.xlu2 %v1257_v15  ;;  %v1212_v53 = vsel %vm521_vm0, %v495_v0, 0.0 }
 0x37b   :  { %v3628_v28 = vmul.f32 %v3627_v22, %v10375_v1  ;;  %vm3619_vm9 = vcmp.eq.f32.partialorder %v10455_v47, 0.0  ;;  %1213 = vadd.xlane.f32.xlu1 %v1212_v53  ;;  %v1254_v23 = vsel %vm521_vm0, %v509_v34, 0.0  ;;  %5824 = vrsqrt.f32 %v10752_v51 }
 0x37c   :  { %v3651_v18 = vmul.f32 %v10519_v13, %v3650_v38  ;;  %v3639_v26 = vmul.f32 %v10523_v61, %v3638_v43  ;;  %5826 = vrsqrt.f32 %v10748_v48  ;;  %v3784_v21 = vmul.f32 %v3783_v17, %v10647_v27  ;;  %1255 = vadd.xlane.f32.xlu0 %v1254_v23  ;;  %v241_v38 = vld [vmem:[%s12692_s0 + $0x740] sm:$0xff] }
 0x37d   :  { %v3616_v54 = vmul.f32 %v3615_v60, %v10455_v47  ;;  %v3620_v10 = vand.u32 2147483648, %v10455_v47  ;;  %vm3785_vm10 = vcmp.eq.f32.partialorder %v10647_v27, inf  ;;  %v3788_v20 = vand.u32 2147483648, %v10647_v27  ;;  %v10770_v50 = vpop.eup %5822 }
 0x37e   :  { %v3786_v13 = vsel %vm3785_vm10, %v10647_v27, %v3784_v21  ;;  %vm3787_vm6 = vcmp.eq.f32.partialorder %v10647_v27, 0.0  ;;  %v10775_v61 = vadd.f32 1e-20, %v10699_v31  ;;  %v10777_v22 = vadd.f32 1e-20, %v1103_v30 }
 0x37f   :  { %v3630_v43 = vsel %vm3629_vm5, %v10375_v1, %v3628_v28  ;;  %vm3653_vm2 = vcmp.eq.f32.partialorder %v10471_v6, inf  ;;  %v3789_v32 = vsel %vm3787_vm6, %v3788_v20, %v3786_v13  ;;  %v10786_v33 = vadd.f32 1e-20, %v1100_v42  ;;  %v1115_v42 = vpop.xlane.xlu2 %1114 }
 0x380   :  { %v3652_v27 = vmul.f32 %v3651_v18, %v10471_v6  ;;  %vm3655_vm1 = vcmp.eq.f32.partialorder %v10471_v6, 0.0  ;;  %v3640_v31 = vmul.f32 %v3639_v26, %v10481_v2  ;;  %v5266_v0 = vperm.slane %v3789_v32, %v6524_v41  ;;  %v255_v18 = vld [vmem:[%s12692_s0 + $0x7b0] sm:$0xff] }
 0x381   :  { %5828 = vrsqrt.f32 %v10777_v22  ;;  %v5825_v60 = vpop.eup %5824  ;;  %v3618_v15 = vsel %vm3617_vm12, %v10455_v47, %v3616_v54  ;;  %v3656_v34 = vand.u32 2147483648, %v10471_v6  ;;  %v3803_v17 = vmul.f32 %v10770_v50, %v10722_v5 }
 0x382   :  { %v497_v53 = vmul.f32 %v241_v38, %v241_v38  ;;  %v10799_v28 = vpop.eup %5826  ;;  %vm3641_vm14 = vcmp.eq.f32.partialorder %v10481_v2, inf  ;;  %vm12960_vm4 = vcmask 720512   ;;  %5830 = vrsqrt.f32 %v10775_v61 }
 0x383   :  { %v10804_v23 = vsel %vm12960_vm4, %v5266_v0, %v10732_v16  ;;  %v3875_v30 = vmul.f32 %v5825_v60, %v10752_v51  ;;  %v10813_v26 = vsel %vm3631_vm11, %v3632_v25, %v3630_v43  ;;  %vm3643_vm5 = vcmp.eq.f32.partialorder %v10481_v2, 0.0  ;;  %v240_v16 = vld [vmem:[%s12692_s0 + $0x738] sm:$0xff] }
 0x384   :  { %12961 = vst [vmem:[#allocation7_spill] sm:$0xff] %v10804_v23  ;;  %v3644_v21 = vand.u32 2147483648, %v10481_v2  ;;  %5832 = vrsqrt.f32 %v10786_v33  ;;  %v10823_v54 = vsel %vm3619_vm9, %v3620_v10, %v3618_v15  ;;  %v3654_v1 = vsel %vm3653_vm2, %v10471_v6, %v3652_v27  ;;  %v1112_v27 = vpop.xlane.xlu1 %1111  ;;  %v257_v6 = vld [vmem:[%s12692_s0 + $0x7c0] sm:$0xff] }
 0x385   :  { %12962 = vst [vmem:[#allocation8_spill] sm:$0xff] %v10813_v26  ;;  %v3642_v25 = vsel %vm3641_vm14, %v10481_v2, %v3640_v31  ;;  %v3876_v20 = vmul.f32 %v5825_v60, %v3875_v30  ;;  %v3804_v13 = vmul.f32 %v10770_v50, %v3803_v17  ;;  %v3791_v38 = vmul.f32 %v10799_v28, %v10748_v48  ;;  %v242_v2 = vld [vmem:[%s12692_s0 + $0x748] sm:$0xff] }
 0x386   :  { %12963 = vst [vmem:[#allocation86_spill] sm:$0xff] %v10823_v54  ;;  %v1218_v43 = vsel %vm521_vm0, %v497_v53, 0.0  ;;  %v511_v32 = vmul.f32 %v255_v18, %v255_v18  ;;  %v10834_v47 = vadd.f32 1e-20, %v10676_v63  ;;  %v496_v15 = vmul.f32 %v240_v16, %v240_v16 }
 0x387   :  { %v5829_v0 = vpop.eup %5828  ;;  %v3877_v10 = vmul.f32 0.5, %v3876_v20  ;;  %1219 = vadd.xlane.f32.xlu2 %v1218_v43  ;;  %v10836_v52 = vadd.f32 1e-20, %v1115_v42  ;;  %v10841_v17 = vadd.f32 1e-20, %v10714_v11  ;;  %v1109_v42 = vpop.xlane.xlu0 %1108  ;;  %v10853_v11 = vsel %vm3655_vm1, %v3656_v34, %v3654_v1 }
 0x388   :  { %v3863_v30 = vmul.f32 %v5829_v0, %v10777_v22  ;;  %v1260_v53 = vsel %vm521_vm0, %v511_v32, 0.0  ;;  %v10845_v18 = vpop.eup %5830  ;;  %v1215_v16 = vsel %vm521_vm0, %v496_v15, 0.0  ;;  %12964 = vst [vmem:[#allocation87_spill] sm:$0xff] %v10853_v11  ;;  %v10857_v32 = vsel %vm3643_vm5, %v3644_v21, %v3642_v25 }
 0x389   :  { %v3878_v20 = vsub.f32 1.5, %v3877_v10  ;;  %1261 = vadd.xlane.f32.xlu1 %v1260_v53  ;;  %5834 = vrsqrt.f32 %v10836_v52  ;;  %12965 = vst [vmem:[#allocation88_spill] sm:$0xff] %v10857_v32  ;;  %v10859_v31 = vmul.f32 0.5, %v3804_v13  ;;  %1216 = vadd.xlane.f32.xlu0 %v1215_v16  ;;  %v10862_v10 = vmul.f32 %v10799_v28, %v3791_v38 }
 0x38a   :  { %v5833_v43 = vpop.eup %5832  ;;  %v3864_v57 = vmul.f32 %v5829_v0, %v3863_v30  ;;  %5836 = vrsqrt.f32 %v10834_v47  ;;  %v10873_v21 = vadd.f32 1e-20, %v1112_v27  ;;  %v10875_v1 = vadd.f32 1e-20, %v1109_v42 }
 0x38b   :  { %v3879_v15 = vmul.f32 %v5825_v60, %v3878_v20  ;;  %v3851_v53 = vmul.f32 %v5833_v43, %v10786_v33  ;;  %5838 = vrsqrt.f32 %v10841_v17  ;;  %v10879_v60 = vmul.f32 %v10845_v18, %v10775_v61 }
 0x38c   :  { %v3865_v34 = vmul.f32 0.5, %v3864_v57  ;;  %vm3881_vm11 = vcmp.eq.f32.partialorder %v10752_v51, inf  ;;  %5840 = vrsqrt.f32 %v10873_v21  ;;  %v513_v30 = vmul.f32 %v257_v6, %v257_v6  ;;  %v1124_v6 = vpop.xlane.xlu2 %1123 }
 0x38d   :  { %v3880_v25 = vmul.f32 %v3879_v15, %v10752_v51  ;;  %v3852_v13 = vmul.f32 %v5833_v43, %v3851_v53  ;;  %v498_v20 = vmul.f32 %v242_v2, %v242_v2  ;;  %vm3883_vm12 = vcmp.eq.f32.partialorder %v10752_v51, 0.0  ;;  %v256_v53 = vld [vmem:[%s12692_s0 + $0x7b8] sm:$0xff] }
 0x38e   :  { %v3866_v38 = vsub.f32 1.5, %v3865_v34  ;;  %v3884_v57 = vand.u32 2147483648, %v10752_v51  ;;  %5842 = vrsqrt.f32 %v10875_v1  ;;  %vm3869_vm9 = vcmp.eq.f32.partialorder %v10777_v22, inf }
 0x38f   :  { %v5835_v16 = vpop.eup %5834  ;;  %v3853_v27 = vmul.f32 0.5, %v3852_v13  ;;  %vm3871_vm10 = vcmp.eq.f32.partialorder %v10777_v22, 0.0  ;;  %v3882_v34 = vsel %vm3881_vm11, %v10752_v51, %v3880_v25  ;;  %v3872_v13 = vand.u32 2147483648, %v10777_v22 }
 0x390   :  { %v3867_v42 = vmul.f32 %v5829_v0, %v3866_v38  ;;  %v3911_v15 = vmul.f32 %v5835_v16, %v10836_v52  ;;  %v10893_v2 = vpop.eup %5836  ;;  %vm3857_vm6 = vcmp.eq.f32.partialorder %v10786_v33, inf  ;;  %v1121_v38 = vpop.xlane.xlu1 %1120  ;;  %v1266_v7 = vsel %vm521_vm0, %v513_v30, 0.0 }
 0x391   :  { %v3854_v0 = vsub.f32 1.5, %v3853_v27  ;;  %v10900_v63 = vpop.eup %5838  ;;  %v1221_v23 = vsel %vm521_vm0, %v498_v20, 0.0  ;;  %vm3859_vm2 = vcmp.eq.f32.partialorder %v10786_v33, 0.0  ;;  %1267 = vadd.xlane.f32.xlu2 %v1266_v7  ;;  %v512_v25 = vmul.f32 %v256_v53, %v256_v53  ;;  %v1118_v20 = vpop.xlane.xlu0 %1117 }
 0x392   :  { %v3868_v3 = vmul.f32 %v3867_v42, %v10777_v22  ;;  %v3912_v55 = vmul.f32 %v5835_v16, %v3911_v15  ;;  %1222 = vadd.xlane.f32.xlu1 %v1221_v23  ;;  %v10906_v14 = vadd.f32 1e-20, %v1124_v6  ;;  %v5841_v27 = vpop.eup %5840  ;;  %v3885_v54 = vsel %vm3883_vm12, %v3884_v57, %v3882_v34 }
 0x393   :  { %v3855_v26 = vmul.f32 %v5833_v43, %v3854_v0  ;;  %v10913_v30 = vadd.f32 1e-20, %v1121_v38  ;;  %v3899_v53 = vmul.f32 %v5841_v27, %v10873_v21  ;;  %v1263_v6 = vsel %vm521_vm0, %v512_v25, 0.0 }
 0x394   :  { %v3870_v42 = vsel %vm3869_vm9, %v10777_v22, %v3868_v3  ;;  %v3913_v15 = vmul.f32 0.5, %v3912_v55  ;;  %v5843_v43 = vpop.eup %5842  ;;  %v3860_v51 = vand.u32 2147483648, %v10786_v33  ;;  %1264 = vadd.xlane.f32.xlu0 %v1263_v6  ;;  %5844 = vrsqrt.f32 %v10906_v14  ;;  %v258_v6 = vld [vmem:[%s12692_s0 + $0x7c8] sm:$0xff]  ;;  %v1133_v40 = vpop.xlane.xlu2 %1132 }
 0x395   :  { %v3873_v7 = vsel %vm3871_vm10, %v3872_v13, %v3870_v42  ;;  %v3856_v23 = vmul.f32 %v3855_v26, %v10786_v33  ;;  %v3887_v34 = vmul.f32 %v5843_v43, %v10875_v1  ;;  %v3900_v22 = vmul.f32 %v5841_v27, %v3899_v53  ;;  %v244_v13 = vld [vmem:[%s12692_s0 + $0x758] sm:$0xff] }
 0x396   :  { %v3914_v57 = vsub.f32 1.5, %v3913_v15  ;;  %v5279_v3 = vperm.slane %v3873_v7, %v6333_v59  ;;  %v10927_v26 = vadd.f32 1e-20, %v1118_v20  ;;  %v5281_v0 = vperm.slane %v3885_v54, %v6317_v45 }
 0x397   :  { %v3858_v55 = vsel %vm3857_vm6, %v10786_v33, %v3856_v23  ;;  %v3888_v42 = vmul.f32 %v5843_v43, %v3887_v34  ;;  %v10937_v15 = vmul.f32 %v10900_v63, %v10841_v17  ;;  %v3901_v23 = vmul.f32 0.5, %v3900_v22 }
 0x398   :  { %v3861_v38 = vsel %vm3859_vm2, %v3860_v51, %v3858_v55  ;;  %v3915_v25 = vmul.f32 %v5835_v16, %v3914_v57  ;;  %5846 = vrsqrt.f32 %v10913_v30  ;;  %vm3917_vm1 = vcmp.eq.f32.partialorder %v10836_v52, inf }
 0x399   :  { %v5278_v7 = vperm.slane %v3861_v38, %v6304_v35  ;;  %vm3919_vm14 = vcmp.eq.f32.partialorder %v10836_v52, 0.0  ;;  %v3889_v20 = vmul.f32 0.5, %v3888_v42  ;;  %v500_v54 = vmul.f32 %v244_v13, %v244_v13  ;;  %v1127_v62 = vpop.xlane.xlu0 %1126 }
 0x39a   :  { %v3920_v16 = vand.u32 2147483648, %v10836_v52  ;;  %v3902_v53 = vsub.f32 1.5, %v3901_v23  ;;  %5848 = vrsqrt.f32 %v10927_v26  ;;  %v5845_v51 = vpop.eup %5844  ;;  %v3916_v57 = vmul.f32 %v3915_v25, %v10836_v52 }
 0x39b   :  { %v5280_v33 = vsel %vm4879_vm7, %v5279_v3, %v5278_v7  ;;  %vm3905_vm4 = vcmp.eq.f32.partialorder %v10873_v21, inf  ;;  %v3890_v55 = vsub.f32 1.5, %v3889_v20  ;;  %v243_v3 = vld [vmem:[%s12692_s0 + $0x750] sm:$0xff]  ;;  %vm3907_vm5 = vcmp.eq.f32.partialorder %v10873_v21, 0.0 }
 0x39c   :  { %v5282_v34 = vsel %vm4883_vm13, %v5281_v0, %v5280_v33  ;;  %v3903_v22 = vmul.f32 %v5841_v27, %v3902_v53  ;;  %v3908_v13 = vand.u32 2147483648, %v10873_v21  ;;  %v3947_v38 = vmul.f32 %v5845_v51, %v10906_v14 }
 0x39d   :  { %v3891_v42 = vmul.f32 %v5843_v43, %v3890_v55  ;;  %vm3893_vm11 = vcmp.eq.f32.partialorder %v10875_v1, inf  ;;  %v1227_v25 = vsel %vm521_vm0, %v500_v54, 0.0  ;;  %v514_v7 = vmul.f32 %v258_v6, %v258_v6 }
 0x39e   :  { %v5847_v23 = vpop.eup %5846  ;;  %v3904_v0 = vmul.f32 %v3903_v22, %v10873_v21  ;;  %vm3895_vm12 = vcmp.eq.f32.partialorder %v10875_v1, 0.0  ;;  %v3948_v20 = vmul.f32 %v5845_v51, %v3947_v38  ;;  %1228 = vadd.xlane.f32.xlu2 %v1227_v25  ;;  %v499_v27 = vmul.f32 %v243_v3, %v243_v3 }
 0x39f   :  { %v3918_v33 = vsel %vm3917_vm1, %v10836_v52, %v3916_v57  ;;  %v3892_v53 = vmul.f32 %v3891_v42, %v10875_v1  ;;  %v3935_v43 = vmul.f32 %v5847_v23, %v10913_v30  ;;  %v1269_v55 = vsel %vm521_vm0, %v514_v7, 0.0 }
 0x3a0   :  { %v5849_v54 = vpop.eup %5848  ;;  %v3906_v6 = vsel %vm3905_vm4, %v10873_v21, %v3904_v0  ;;  %v3896_v22 = vand.u32 2147483648, %v10875_v1  ;;  %v3949_v38 = vmul.f32 0.5, %v3948_v20  ;;  %1270 = vadd.xlane.f32.xlu1 %v1269_v55  ;;  %v1224_v3 = vsel %vm521_vm0, %v499_v27, 0.0 }
 0x3a1   :  { %v3909_v57 = vsel %vm3907_vm5, %v3908_v13, %v3906_v6  ;;  %v3894_v42 = vsel %vm3893_vm11, %v10875_v1, %v3892_v53  ;;  %v3936_v25 = vmul.f32 %v5847_v23, %v3935_v43  ;;  %v3923_v7 = vmul.f32 %v5849_v54, %v10927_v26  ;;  %1225 = vadd.xlane.f32.xlu0 %v1224_v3  ;;  %v1130_v43 = vpop.xlane.xlu1 %1129 }
 0x3a2   :  { %v3921_v0 = vsel %vm3919_vm14, %v3920_v16, %v3918_v33  ;;  %v5285_v20 = vperm.slane %v3909_v57, %v6314_v44  ;;  %v3897_v27 = vsel %vm3895_vm12, %v3896_v22, %v3894_v42  ;;  %v3950_v55 = vsub.f32 1.5, %v3949_v38 }
 0x3a3   :  { %v5283_v13 = vperm.slane %v3897_v27, %v6323_v49  ;;  %v3937_v6 = vmul.f32 0.5, %v3936_v25  ;;  %v3924_v53 = vmul.f32 %v5849_v54, %v3923_v7  ;;  %v10987_v3 = vmul.f32 0.5, %v10862_v10 }
 0x3a4   :  { %v3839_v52 = vmul.f32 %v10893_v2, %v10834_v47  ;;  %v3828_v16 = vmul.f32 %v10845_v18, %v10879_v60  ;;  %v3951_v1 = vmul.f32 %v5845_v51, %v3950_v55  ;;  %v5287_v33 = vperm.slane %v3921_v0, %v6320_v46 }
 0x3a5   :  { %v5284_v22 = vsel %vm4887_vm15, %v5283_v13, %v5282_v34  ;;  %v3938_v38 = vsub.f32 1.5, %v3937_v6  ;;  %v3925_v57 = vmul.f32 0.5, %v3924_v53  ;;  %v3816_v42 = vmul.f32 %v10900_v63, %v10937_v15  ;;  %v260_v34 = vld [vmem:[%s12692_s0 + $0x7d8] sm:$0xff]  ;;  %v245_v15 = vld [vmem:[%s12692_s0 + $0x760] sm:$0xff] }
 0x3a6   :  { %v5286_v25 = vsel %vm4891_vm3, %v5285_v20, %v5284_v22  ;;  %v10998_v10 = vadd.f32 1e-20, %v1133_v40  ;;  %v11000_v7 = vadd.f32 1e-20, %v1127_v62  ;;  %v3952_v27 = vmul.f32 %v3951_v1, %v10906_v14  ;;  %v259_v20 = vld [vmem:[%s12692_s0 + $0x7d0] sm:$0xff] }
 0x3a7   :  { %v3939_v21 = vmul.f32 %v5847_v23, %v3938_v38  ;;  %v5288_v60 = vsel %vm4895_vm8, %v5287_v33, %v5286_v25  ;;  %v3926_v51 = vsub.f32 1.5, %v3925_v57  ;;  %vm3953_vm9 = vcmp.eq.f32.partialorder %v10906_v14, inf  ;;  %v11026_v33 = vpop.xlane.xlu2 %1141 }
 0x3a8   :  { %v3956_v40 = vand.u32 2147483648, %v10906_v14  ;;  %vm3941_vm10 = vcmp.eq.f32.partialorder %v10913_v30, inf  ;;  %5850 = vrsqrt.f32 %v11000_v7  ;;  %vm3943_vm6 = vcmp.eq.f32.partialorder %v10913_v30, 0.0 }
 0x3a9   :  { %v3940_v62 = vmul.f32 %v3939_v21, %v10913_v30  ;;  %v3944_v23 = vand.u32 2147483648, %v10913_v30  ;;  %v3927_v0 = vmul.f32 %v5849_v54, %v3926_v51  ;;  %vm3929_vm2 = vcmp.eq.f32.partialorder %v10927_v26, inf }
 0x3aa   :  { %v3932_v55 = vand.u32 2147483648, %v10927_v26  ;;  %v516_v13 = vmul.f32 %v260_v34, %v260_v34  ;;  %v501_v6 = vmul.f32 %v245_v15, %v245_v15  ;;  %v3954_v53 = vsel %vm3953_vm9, %v10906_v14, %v3952_v27 }
 0x3ab   :  { %v3942_v1 = vsel %vm3941_vm10, %v10913_v30, %v3940_v62  ;;  %v3928_v21 = vmul.f32 %v3927_v0, %v10927_v26  ;;  %5852 = vrsqrt.f32 %v10998_v10  ;;  %v515_v57 = vmul.f32 %v259_v20, %v259_v20  ;;  %v11034_v30 = vpop.xlane.xlu1 %1138 }
 0x3ac   :  { %v3945_v54 = vsel %vm3943_vm6, %v3944_v23, %v3942_v1  ;;  %v1275_v22 = vsel %vm521_vm0, %v516_v13, 0.0  ;;  %v1230_v38 = vsel %vm521_vm0, %v501_v6, 0.0  ;;  %v3840_v25 = vmul.f32 %v10893_v2, %v3839_v52 }
 0x3ad   :  { %vm3955_vm1 = vcmp.eq.f32.partialorder %v10906_v14, 0.0  ;;  %v3930_v27 = vsel %vm3929_vm2, %v10927_v26, %v3928_v21  ;;  %vm3931_vm14 = vcmp.eq.f32.partialorder %v10927_v26, 0.0  ;;  %1276 = vadd.xlane.f32.xlu2 %v1275_v22  ;;  %1231 = vadd.xlane.f32.xlu1 %v1230_v38  ;;  %v5291_v15 = vperm.slane %v3945_v54, %v12885_v24  ;;  %v11052_v54 = vpop.xlane.xlu0 %1135 }
 0x3ae   :  { %v5851_v51 = vpop.eup %5850  ;;  %v3957_v34 = vsel %vm3955_vm1, %v3956_v40, %v3954_v53  ;;  %v3933_v62 = vsel %vm3931_vm14, %v3932_v55, %v3930_v27  ;;  %v1272_v23 = vsel %vm521_vm0, %v515_v57, 0.0  ;;  %v3829_v0 = vmul.f32 0.5, %v3828_v16 }
 0x3af   :  { %v3817_v20 = vmul.f32 0.5, %v3816_v42  ;;  %v5289_v52 = vperm.slane %v3933_v62, %v6382_v9  ;;  %v3959_v14 = vmul.f32 %v5851_v51, %v11000_v7  ;;  %1273 = vadd.xlane.f32.xlu0 %v1272_v23  ;;  %v12966_v13 = vsub.f32 1.5, %v10859_v31  ;;  %v247_v31 = vld [vmem:[%s12692_s0 + $0x770] sm:$0xff] }
 0x3b0   :  { %v3794_v40 = vsub.f32 1.5, %v10987_v3  ;;  %v11046_v53 = vadd.f32 1e-20, %v1130_v43  ;;  %v3841_v16 = vmul.f32 0.5, %v3840_v25  ;;  %v5293_v42 = vperm.slane %v3957_v34, %v6356_v19 }
 0x3b1   :  { %v3807_v6 = vmul.f32 %v10770_v50, %v12966_v13  ;;  %v11048_v55 = vpop.eup %5852  ;;  %vm12967_vm4 = vcmask 458112   ;;  %v3960_v21 = vmul.f32 %v5851_v51, %v3959_v14  ;;  %vm3809_vm5 = vcmp.eq.f32.partialorder %v10722_v5, inf  ;;  %v1151_v14 = vpop.xlane.xlu2 %1150 }
 0x3b2   :  { %v5290_v1 = vsel %vm12967_vm4, %v5289_v52, %v5288_v60  ;;  %v3812_v43 = vand.u32 2147483648, %v10722_v5  ;;  %vm12968_vm11 = vcmask 523712   ;;  %v261_v60 = vld [vmem:[%s12692_s0 + $0x7e0] sm:$0xff]  ;;  %v3830_v22 = vsub.f32 1.5, %v3829_v0 }
 0x3b3   :  { %v5292_v3 = vsel %vm12968_vm11, %v5291_v15, %v5290_v1  ;;  %v3818_v38 = vsub.f32 1.5, %v3817_v20  ;;  %vm12969_vm12 = vcmask 589312   ;;  %v3961_v25 = vmul.f32 0.5, %v3960_v21  ;;  %v246_v20 = vld [vmem:[%s12692_s0 + $0x768] sm:$0xff]  ;;  %v1148_v21 = vpop.xlane.xlu1 %1147 }
 0x3b4   :  { %v11066_v57 = vsel %vm12969_vm12, %v5293_v42, %v5292_v3  ;;  %v3808_v27 = vmul.f32 %v3807_v6, %v10722_v5  ;;  %v3983_v34 = vmul.f32 %v11048_v55, %v10998_v10  ;;  %5854 = vrsqrt.f32 %v11046_v53 }
 0x3b5   :  { %v503_v62 = vmul.f32 %v247_v31, %v247_v31  ;;  %vm3811_vm9 = vcmp.eq.f32.partialorder %v10722_v5, 0.0  ;;  %v3795_v15 = vmul.f32 %v10799_v28, %v3794_v40  ;;  %v3842_v23 = vsub.f32 1.5, %v3841_v16 }
 0x3b6   :  { %v3962_v52 = vsub.f32 1.5, %v3961_v25  ;;  %v517_v0 = vmul.f32 %v261_v60, %v261_v60  ;;  %vm3797_vm10 = vcmp.eq.f32.partialorder %v10748_v48, inf  ;;  %v3800_v13 = vand.u32 2147483648, %v10748_v48 }
 0x3b7   :  { %v3848_v6 = vand.u32 2147483648, %v10834_v47  ;;  %v3836_v42 = vand.u32 2147483648, %v10775_v61  ;;  %v3831_v1 = vmul.f32 %v10845_v18, %v3830_v22  ;;  %vm3833_vm6 = vcmp.eq.f32.partialorder %v10775_v61, inf }
 0x3b8   :  { %v3819_v28 = vmul.f32 %v10900_v63, %v3818_v38  ;;  %v3963_v40 = vmul.f32 %v5851_v51, %v3962_v52  ;;  %v1236_v16 = vsel %vm521_vm0, %v503_v62, 0.0  ;;  %v3984_v31 = vmul.f32 %v11048_v55, %v3983_v34  ;;  %v263_v52 = vld [vmem:[%s12692_s0 + $0x7f0] sm:$0xff] }
 0x3b9   :  { %1237 = vadd.xlane.f32.xlu2 %v1236_v16  ;;  %v1278_v3 = vsel %vm521_vm0, %v517_v0, 0.0  ;;  %v502_v60 = vmul.f32 %v246_v20, %v246_v20  ;;  %v11087_v25 = vadd.f32 1e-20, %v1151_v14  ;;  %v3810_v18 = vsel %vm3809_vm5, %v10722_v5, %v3808_v27  ;;  %v248_v5 = vld [vmem:[%s12692_s0 + $0x778] sm:$0xff] }
 0x3ba   :  { %v3796_v22 = vmul.f32 %v3795_v15, %v10748_v48  ;;  %v3843_v63 = vmul.f32 %v10893_v2, %v3842_v23  ;;  %v3964_v51 = vmul.f32 %v3963_v40, %v11000_v7  ;;  %1279 = vadd.xlane.f32.xlu1 %v1278_v3  ;;  %v11095_v38 = vpop.eup %5854  ;;  %vm3799_vm2 = vcmp.eq.f32.partialorder %v10748_v48, 0.0  ;;  %v11108_v23 = vpop.xlane.xlu0 %1144 }
 0x3bb   :  { %vm3845_vm1 = vcmp.eq.f32.partialorder %v10834_v47, inf  ;;  %vm3835_vm14 = vcmp.eq.f32.partialorder %v10775_v61, 0.0  ;;  %vm3965_vm4 = vcmp.eq.f32.partialorder %v11000_v7, inf  ;;  %v3968_v34 = vand.u32 2147483648, %v11000_v7 }
 0x3bc   :  { %v1233_v27 = vsel %vm521_vm0, %v502_v60, 0.0  ;;  %5856 = vrsqrt.f32 %v11087_v25  ;;  %v3832_v2 = vmul.f32 %v3831_v1, %v10775_v61  ;;  %v3820_v62 = vmul.f32 %v3819_v28, %v10841_v17  ;;  %v1160_v60 = vpop.xlane.xlu2 %1159 }
 0x3bd   :  { %v3966_v15 = vsel %vm3965_vm4, %v11000_v7, %v3964_v51  ;;  %vm3967_vm5 = vcmp.eq.f32.partialorder %v11000_v7, 0.0  ;;  %1234 = vadd.xlane.f32.xlu0 %v1233_v27  ;;  %v3985_v0 = vmul.f32 0.5, %v3984_v31  ;;  %v11114_v14 = vadd.f32 1e-20, %v11026_v33 }
 0x3be   :  { %v3969_v20 = vsel %vm3967_vm5, %v3968_v34, %v3966_v15  ;;  %v11116_v40 = vadd.f32 1e-20, %v1148_v21  ;;  %vm3821_vm11 = vcmp.eq.f32.partialorder %v10841_v17, inf  ;;  %v3971_v1 = vmul.f32 %v11095_v38, %v11046_v53  ;;  %v1157_v15 = vpop.xlane.xlu1 %1156 }
 0x3bf   :  { %v5295_v7 = vperm.slane %v3969_v20, %v12893_v36  ;;  %v11123_v28 = vadd.f32 1e-20, %v11034_v30  ;;  %v11127_v16 = vsel %vm3811_vm9, %v3812_v43, %v3810_v18  ;;  %vm3823_vm12 = vcmp.eq.f32.partialorder %v10841_v17, 0.0  ;;  %v262_v43 = vld [vmem:[%s12692_s0 + $0x7e8] sm:$0xff] }
 0x3c0   :  { %12970 = vst [vmem:[#allocation89_spill] sm:$0xff] %v11127_v16  ;;  %5858 = vrsqrt.f32 %v11116_v40  ;;  %v519_v33 = vmul.f32 %v263_v52, %v263_v52  ;;  %v3798_v21 = vsel %vm3797_vm10, %v10748_v48, %v3796_v22  ;;  %v3844_v31 = vmul.f32 %v3843_v63, %v10834_v47 }
 0x3c1   :  { %v3824_v3 = vand.u32 2147483648, %v10841_v17  ;;  %vm12971_vm4 = vcmask 654912   ;;  %v3834_v22 = vsel %vm3833_vm6, %v10775_v61, %v3832_v2  ;;  %v3822_v63 = vsel %vm3821_vm11, %v10841_v17, %v3820_v62 }
 0x3c2   :  { %v11138_v30 = vsel %vm12971_vm4, %v5295_v7, %v11066_v57  ;;  %v5857_v18 = vpop.eup %5856  ;;  %v3986_v57 = vsub.f32 1.5, %v3985_v0  ;;  %5860 = vrsqrt.f32 %v11114_v14  ;;  %v3972_v51 = vmul.f32 %v11095_v38, %v3971_v1 }
 0x3c3   :  { %12972 = vst [vmem:[#allocation90_spill] sm:$0xff] %v11138_v30  ;;  %5862 = vrsqrt.f32 %v11123_v28  ;;  %v11156_v34 = vadd.f32 1e-20, %v11052_v54  ;;  %v4055_v27 = vmul.f32 %v5857_v18, %v11087_v25  ;;  %v1284_v52 = vsel %vm521_vm0, %v519_v33, 0.0 }
 0x3c4   :  { %v504_v2 = vmul.f32 %v248_v5, %v248_v5  ;;  %v518_v20 = vmul.f32 %v262_v43, %v262_v43  ;;  %v11160_v7 = vadd.f32 1e-20, %v1160_v60  ;;  %v11166_v62 = vsel %vm3799_vm2, %v3800_v13, %v3798_v21  ;;  %1285 = vadd.xlane.f32.xlu2 %v1284_v52 }
 0x3c5   :  { %12973 = vst [vmem:[#allocation91_spill] sm:$0xff] %v11166_v62  ;;  %v3846_v54 = vsel %vm3845_vm1, %v10834_v47, %v3844_v31  ;;  %v11175_v0 = vsel %vm3835_vm14, %v3836_v42, %v3834_v22  ;;  %v4056_v1 = vmul.f32 %v5857_v18, %v4055_v27  ;;  %v11179_v5 = vsel %vm3823_vm12, %v3824_v3, %v3822_v63  ;;  %v1154_v31 = vpop.xlane.xlu0 %1153 }
 0x3c6   :  { %12974 = vst [vmem:[#allocation92_spill] sm:$0xff] %v11175_v0  ;;  %v5859_v33 = vpop.eup %5858  ;;  %v1239_v48 = vsel %vm521_vm0, %v504_v2, 0.0  ;;  %v1281_v13 = vsel %vm521_vm0, %v518_v20, 0.0  ;;  %5864 = vrsqrt.f32 %v11160_v7  ;;  %v3987_v21 = vmul.f32 %v11048_v55, %v3986_v57 }
 0x3c7   :  { %12975 = vst [vmem:[#allocation93_spill] sm:$0xff] %v11179_v5  ;;  %5866 = vrsqrt.f32 %v11156_v34  ;;  %v4057_v61 = vmul.f32 0.5, %v4056_v1  ;;  %v4043_v42 = vmul.f32 %v5859_v33, %v11116_v40  ;;  %1240 = vadd.xlane.f32.xlu1 %v1239_v48  ;;  %1282 = vadd.xlane.f32.xlu0 %v1281_v13  ;;  %vm3847_vm9 = vcmp.eq.f32.partialorder %v10834_v47, 0.0  ;;  %v264_v47 = vld [vmem:[%s12692_s0 + $0x7f8] sm:$0xff]  ;;  %v1169_v13 = vpop.xlane.xlu2 %1168  ;;  %s5986_s0 = smov [#allocation2]  }
 0x3c8   :  { %v11187_v43 = vpop.eup %5860  ;;  %v3973_v60 = vmul.f32 0.5, %v3972_v51  ;;  %v11198_v22 = vsel %vm3847_vm9, %v3848_v6, %v3846_v54  ;;  %v11205_v20 = vadd.f32 1e-20, %v1157_v15  ;;  %v11207_v1 = vadd.f32 1e-20, %v1154_v31  ;;  %s5431_s25 = sshll.u32 %s5986_s0, 4  ;;  %s5432_s25 = int_to_ptr.vmem [resolvable:$true] %s5431_s25 }
 0x3c9   :  { %v11194_v55 = vpop.eup %5862  ;;  %12976 = vst [vmem:[#allocation94_spill] sm:$0xff] %v11198_v22  ;;  %v4058_v57 = vsub.f32 1.5, %v4057_v61  ;;  %v4044_v27 = vmul.f32 %v5859_v33, %v4043_v42  ;;  %v3988_v6 = vmul.f32 %v3987_v21, %v10998_v10  ;;  %v4019_v63 = vmul.f32 %v11187_v43, %v11114_v14 }
 0x3ca   :  { %v3974_v42 = vsub.f32 1.5, %v3973_v60  ;;  %v4007_v15 = vmul.f32 %v11194_v55, %v11123_v28  ;;  %5868 = vrsqrt.f32 %v11205_v20  ;;  %vm3989_vm10 = vcmp.eq.f32.partialorder %v10998_v10, inf }
 0x3cb   :  { %v4059_v54 = vmul.f32 %v5857_v18, %v4058_v57  ;;  %v4045_v48 = vmul.f32 0.5, %v4044_v27  ;;  %v520_v57 = vmul.f32 %v264_v47, %v264_v47  ;;  %v1166_v27 = vpop.xlane.xlu1 %1165  ;;  %vm4061_vm6 = vcmp.eq.f32.partialorder %v11087_v25, inf }
 0x3cc   :  { %v5865_v61 = vpop.eup %5864  ;;  %v4064_v60 = vand.u32 2147483648, %v11087_v25  ;;  %5870 = vrsqrt.f32 %v11207_v1  ;;  %v11227_v17 = vadd.f32 1e-20, %v1169_v13  ;;  %vm4063_vm2 = vcmp.eq.f32.partialorder %v11087_v25, 0.0 }
 0x3cd   :  { %v11219_v31 = vpop.eup %5866  ;;  %v4060_v21 = vmul.f32 %v4059_v54, %v11087_v25  ;;  %v4046_v52 = vsub.f32 1.5, %v4045_v48  ;;  %v4091_v18 = vmul.f32 %v5865_v61, %v11160_v7  ;;  %v3975_v54 = vmul.f32 %v11095_v38, %v3974_v42 }
 0x3ce   :  { %v4020_v48 = vmul.f32 %v11187_v43, %v4019_v63  ;;  %v3995_v47 = vmul.f32 %v11219_v31, %v11156_v34  ;;  %v4008_v2 = vmul.f32 %v11194_v55, %v4007_v15  ;;  %v1287_v5 = vsel %vm521_vm0, %v520_v57, 0.0 }
 0x3cf   :  { %v4062_v26 = vsel %vm4061_vm6, %v11087_v25, %v4060_v21  ;;  %v4047_v3 = vmul.f32 %v5859_v33, %v4046_v52  ;;  %v4092_v50 = vmul.f32 %v5865_v61, %v4091_v18  ;;  %v1163_v21 = vpop.xlane.xlu0 %1162  ;;  %vm4049_vm1 = vcmp.eq.f32.partialorder %v11116_v40, inf  ;;  %1288 = vadd.xlane.f32.xlu0 %v1287_v5 }
 0x3d0   :  { %v4065_v51 = vsel %vm4063_vm2, %v4064_v60, %v4062_v26  ;;  %v5869_v30 = vpop.eup %5868  ;;  %vm4051_vm14 = vcmp.eq.f32.partialorder %v11116_v40, 0.0  ;;  %v4052_v25 = vand.u32 2147483648, %v11116_v40  ;;  %5872 = vrsqrt.f32 %v11227_v17  ;;  %v1178_v60 = vpop.xlane.xlu2 %1177 }
 0x3d1   :  { %v4048_v0 = vmul.f32 %v4047_v3, %v11116_v40  ;;  %v4093_v13 = vmul.f32 0.5, %v4092_v50  ;;  %v5310_v26 = vperm.slane %v4065_v51, %v6333_v59  ;;  %v4079_v50 = vmul.f32 %v5869_v30, %v11205_v20 }
 0x3d2   :  { %v5871_v3 = vpop.eup %5870  ;;  %v3996_v63 = vmul.f32 %v11219_v31, %v3995_v47  ;;  %v11246_v42 = vadd.f32 1e-20, %v1166_v27  ;;  %v11248_v15 = vadd.f32 1e-20, %v1163_v21  ;;  %v11262_v47 = vmul.f32 0.5, %v4020_v48 }
 0x3d3   :  { %v4050_v38 = vsel %vm4049_vm1, %v11116_v40, %v4048_v0  ;;  %v4094_v33 = vsub.f32 1.5, %v4093_v13  ;;  %v4080_v57 = vmul.f32 %v5869_v30, %v4079_v50  ;;  %v4067_v51 = vmul.f32 %v5871_v3, %v11207_v1 }
 0x3d4   :  { %v4053_v52 = vsel %vm4051_vm14, %v4052_v25, %v4050_v38  ;;  %v11256_v40 = vsel %vm3989_vm10, %v10998_v10, %v3988_v6  ;;  %v11259_v0 = vmul.f32 %v3975_v54, %v11046_v53  ;;  %5874 = vrsqrt.f32 %v11246_v42  ;;  %v1175_v38 = vpop.xlane.xlu1 %1174 }
 0x3d5   :  { %v5309_v5 = vperm.slane %v4053_v52, %v6304_v35  ;;  %v4095_v27 = vmul.f32 %v5865_v61, %v4094_v33  ;;  %v4081_v21 = vmul.f32 0.5, %v4080_v57  ;;  %v4068_v25 = vmul.f32 %v5871_v3, %v4067_v51 }
 0x3d6   :  { %v5873_v50 = vpop.eup %5872  ;;  %v11267_v52 = vmul.f32 0.5, %v4008_v2  ;;  %v11269_v18 = vmul.f32 0.5, %v3996_v63  ;;  %v11272_v6 = vadd.f32 1e-20, %v11108_v23  ;;  %5876 = vrsqrt.f32 %v11248_v15 }
 0x3d7   :  { %v11265_v13 = vsel %vm4879_vm7, %v5310_v26, %v5309_v5  ;;  %vm4097_vm0 = vcmp.eq.f32.partialorder %v11160_v7, inf  ;;  %v4082_v61 = vsub.f32 1.5, %v4081_v21  ;;  %v4069_v54 = vmul.f32 0.5, %v4068_v25  ;;  %v1172_v16 = vpop.xlane.xlu0 %1171 }
 0x3d8   :  { %v4127_v48 = vmul.f32 %v5873_v50, %v11227_v17  ;;  %v4096_v26 = vmul.f32 %v4095_v27, %v11160_v7  ;;  %vm4099_vm5 = vcmp.eq.f32.partialorder %v11160_v7, 0.0  ;;  %v11279_v33 = vadd.f32 1e-20, %v1178_v60 }
 0x3d9   :  { %v11281_v2 = vadd.f32 1e-20, %v1175_v38  ;;  %v4100_v63 = vand.u32 2147483648, %v11160_v7  ;;  %v4083_v23 = vmul.f32 %v5869_v30, %v4082_v61  ;;  %v4070_v5 = vsub.f32 1.5, %v4069_v54 }
 0x3da   :  { %v4128_v57 = vmul.f32 %v5873_v50, %v4127_v48  ;;  %v5875_v51 = vpop.eup %5874  ;;  %vm4085_vm11 = vcmp.eq.f32.partialorder %v11205_v20, inf  ;;  %vm4087_vm12 = vcmp.eq.f32.partialorder %v11205_v20, 0.0  ;;  %v4088_v21 = vand.u32 2147483648, %v11205_v20 }
 0x3db   :  { %5878 = vrsqrt.f32 %v11279_v33  ;;  %v4084_v27 = vmul.f32 %v4083_v23, %v11205_v20  ;;  %v4071_v60 = vmul.f32 %v5871_v3, %v4070_v5  ;;  %v4115_v38 = vmul.f32 %v5875_v51, %v11246_v42  ;;  %v1187_v23 = vpop.xlane.xlu2 %1186 }
 0x3dc   :  { %v4129_v25 = vmul.f32 0.5, %v4128_v57  ;;  %v5877_v11 = vpop.eup %5876  ;;  %v4098_v30 = vsel %vm4097_vm0, %v11160_v7, %v4096_v26  ;;  %vm4073_vm4 = vcmp.eq.f32.partialorder %v11207_v1, inf  ;;  %vm4075_vm9 = vcmp.eq.f32.partialorder %v11207_v1, 0.0 }
 0x3dd   :  { %5880 = vrsqrt.f32 %v11281_v2  ;;  %v4086_v61 = vsel %vm4085_vm11, %v11205_v20, %v4084_v27  ;;  %v4072_v54 = vmul.f32 %v4071_v60, %v11207_v1  ;;  %v4116_v48 = vmul.f32 %v5875_v51, %v4115_v38 }
 0x3de   :  { %v4130_v3 = vsub.f32 1.5, %v4129_v25  ;;  %v4089_v5 = vsel %vm4087_vm12, %v4088_v21, %v4086_v61  ;;  %v4076_v57 = vand.u32 2147483648, %v11207_v1  ;;  %v4103_v26 = vmul.f32 %v5877_v11, %v11248_v15 }
 0x3df   :  { %v11302_v22 = vadd.f32 1e-20, %v1172_v16  ;;  %v4101_v62 = vsel %vm4099_vm5, %v4100_v63, %v4098_v30  ;;  %v4074_v32 = vsel %vm4073_vm4, %v11207_v1, %v4072_v54  ;;  %v4117_v12 = vmul.f32 0.5, %v4116_v48 }
 0x3e0   :  { %v4131_v27 = vmul.f32 %v5873_v50, %v4130_v3  ;;  %v5314_v25 = vperm.slane %v4089_v5, %v6323_v49  ;;  %v4077_v20 = vsel %vm4075_vm9, %v4076_v57, %v4074_v32  ;;  %v4104_v21 = vmul.f32 %v5877_v11, %v4103_v26 }
 0x3e1   :  { %v11307_v60 = vpop.eup %5878  ;;  %5882 = vrsqrt.f32 %v11302_v22  ;;  %v4010_v16 = vsub.f32 1.5, %v11267_v52  ;;  %v5312_v38 = vperm.slane %v4077_v20, %v6317_v45  ;;  %v4118_v7 = vsub.f32 1.5, %v4117_v12  ;;  %v1184_v12 = vpop.xlane.xlu1 %1183 }
 0x3e2   :  { %v11315_v63 = vadd.f32 1e-20, %v1187_v23  ;;  %v3998_v50 = vsub.f32 1.5, %v11269_v18  ;;  %5884 = vrsqrt.f32 %v11272_v6  ;;  %v4132_v61 = vmul.f32 %v4131_v27, %v11227_v17 }
 0x3e3   :  { %v11317_v30 = vpop.eup %5880  ;;  %v4105_v1 = vmul.f32 0.5, %v4104_v21  ;;  %v5316_v32 = vperm.slane %v4101_v62, %v6314_v44  ;;  %v5313_v54 = vsel %vm4883_vm13, %v5312_v38, %v11265_v13  ;;  %vm4133_vm10 = vcmp.eq.f32.partialorder %v11227_v17, inf  ;;  %v1181_v13 = vpop.xlane.xlu0 %1180 }
 0x3e4   :  { %v4119_v52 = vmul.f32 %v5875_v51, %v4118_v7  ;;  %v5315_v3 = vsel %vm4887_vm15, %v5314_v25, %v5313_v54  ;;  %vm4135_vm6 = vcmp.eq.f32.partialorder %v11227_v17, 0.0  ;;  %v4163_v18 = vmul.f32 %v11307_v60, %v11279_v33  ;;  %v1196_v38 = vpop.xlane.xlu2 %1195 }
 0x3e5   :  { %v4106_v48 = vsub.f32 1.5, %v4105_v1  ;;  %v5317_v5 = vsel %vm4891_vm3, %v5316_v32, %v5315_v3  ;;  %v4151_v62 = vmul.f32 %v11317_v30, %v11281_v2  ;;  %5886 = vrsqrt.f32 %v11315_v63 }
 0x3e6   :  { %v4120_v23 = vmul.f32 %v4119_v52, %v11246_v42  ;;  %vm3977_vm2 = vcmp.eq.f32.partialorder %v11046_v53, inf  ;;  %v4134_v57 = vsel %vm4133_vm10, %v11227_v17, %v4132_v61  ;;  %vm4121_vm1 = vcmp.eq.f32.partialorder %v11246_v42, inf }
 0x3e7   :  { %v5883_v51 = vpop.eup %5882  ;;  %v4124_v26 = vand.u32 2147483648, %v11246_v42  ;;  %v4107_v27 = vmul.f32 %v5877_v11, %v4106_v48  ;;  %v4136_v25 = vand.u32 2147483648, %v11227_v17  ;;  %vm4123_vm14 = vcmp.eq.f32.partialorder %v11246_v42, 0.0 }
 0x3e8   :  { %v4122_v20 = vsel %vm4121_vm1, %v11246_v42, %v4120_v23  ;;  %v4139_v21 = vmul.f32 %v5883_v51, %v11302_v22  ;;  %v11343_v7 = vpop.eup %5884  ;;  %vm4109_vm0 = vcmp.eq.f32.partialorder %v11248_v15, inf  ;;  %v4112_v61 = vand.u32 2147483648, %v11248_v15 }
 0x3e9   :  { %v4125_v1 = vsel %vm4123_vm14, %v4124_v26, %v4122_v20  ;;  %v4108_v32 = vmul.f32 %v4107_v27, %v11248_v15  ;;  %v4137_v11 = vsel %vm4135_vm6, %v4136_v25, %v4134_v57  ;;  %v4164_v54 = vmul.f32 %v11307_v60, %v4163_v18 }
 0x3ea   :  { %v4152_v52 = vmul.f32 %v11317_v30, %v4151_v62  ;;  %v4140_v42 = vmul.f32 %v5883_v51, %v4139_v21  ;;  %vm3991_vm5 = vcmp.eq.f32.partialorder %v10998_v10, 0.0  ;;  %v4022_v3 = vsub.f32 1.5, %v11262_v47  ;;  %v1193_v21 = vpop.xlane.xlu1 %1192 }
 0x3eb   :  { %v4110_v48 = vsel %vm4109_vm0, %v11248_v15, %v4108_v32  ;;  %vm4111_vm11 = vcmp.eq.f32.partialorder %v11248_v15, 0.0  ;;  %v11356_v23 = vadd.f32 1e-20, %v1184_v12  ;;  %v11358_v26 = vpop.eup %5886  ;;  %v4011_v17 = vmul.f32 %v11194_v55, %v4010_v16 }
 0x3ec   :  { %v5320_v57 = vperm.slane %v4125_v1, %v6382_v9  ;;  %v4113_v18 = vsel %vm4111_vm11, %v4112_v61, %v4110_v48  ;;  %v4141_v27 = vmul.f32 0.5, %v4140_v42  ;;  %vm3979_vm12 = vcmp.eq.f32.partialorder %v11046_v53, 0.0 }
 0x3ed   :  { %vm4013_vm4 = vcmp.eq.f32.partialorder %v11123_v28, inf  ;;  %v3999_v47 = vmul.f32 %v11219_v31, %v3998_v50  ;;  %v4031_v62 = vmul.f32 %v11343_v7, %v11272_v6  ;;  %v5322_v15 = vperm.slane %v4137_v11, %v12885_v24  ;;  %v1190_v11 = vpop.xlane.xlu0 %1189 }
 0x3ee   :  { %v5318_v12 = vperm.slane %v4113_v18, %v6320_v46  ;;  %v4165_v25 = vmul.f32 0.5, %v4164_v54  ;;  %v4153_v20 = vmul.f32 0.5, %v4152_v52  ;;  %v4142_v55 = vsub.f32 1.5, %v4141_v27 }
 0x3ef   :  { %v11369_v16 = vadd.f32 1e-20, %v1181_v13  ;;  %v4199_v32 = vmul.f32 %v11358_v26, %v11315_v63  ;;  %5888 = vrsqrt.f32 %v11356_v23  ;;  %v11375_v31 = vadd.f32 1e-20, %v1196_v38 }
 0x3f0   :  { %v5319_v1 = vsel %vm4895_vm8, %v5318_v12, %v5317_v5  ;;  %v3978_v50 = vsel %vm3977_vm2, %v11046_v53, %v11259_v0  ;;  %v4023_v61 = vmul.f32 %v11187_v43, %v4022_v3  ;;  %vm4025_vm9 = vcmp.eq.f32.partialorder %v11114_v14, inf  ;;  %v1205_v43 = vpop.xlane.xlu2 %1204 }
 0x3f1   :  { %vm4015_vm10 = vcmp.eq.f32.partialorder %v11123_v28, 0.0  ;;  %vm12977_vm6 = vcmask 458112   ;;  %v4143_v13 = vmul.f32 %v5883_v51, %v4142_v55  ;;  %v4012_v54 = vmul.f32 %v4011_v17, %v11123_v28 }
 0x3f2   :  { %v5321_v5 = vsel %vm12977_vm6, %v5320_v57, %v5319_v1  ;;  %v4000_v38 = vmul.f32 %v3999_v47, %v11156_v34  ;;  %v4032_v52 = vmul.f32 %v11343_v7, %v4031_v62  ;;  %vm12978_vm1 = vcmask 523712  }
 0x3f3   :  { %v5323_v42 = vsel %vm12978_vm1, %v5322_v15, %v5321_v5  ;;  %v4166_v48 = vsub.f32 1.5, %v4165_v25  ;;  %v4144_v0 = vmul.f32 %v4143_v13, %v11302_v22  ;;  %vm4145_vm2 = vcmp.eq.f32.partialorder %v11302_v22, inf }
 0x3f4   :  { %5890 = vrsqrt.f32 %v11369_v16  ;;  %v4154_v3 = vsub.f32 1.5, %v4153_v20  ;;  %v4148_v51 = vand.u32 2147483648, %v11302_v22  ;;  %v4200_v57 = vmul.f32 %v11358_v26, %v4199_v32 }
 0x3f5   :  { %5892 = vrsqrt.f32 %v11375_v31  ;;  %v12979_v17 = vand.u32 2147483648, %v10998_v10  ;;  %v4016_v27 = vand.u32 2147483648, %v11123_v28  ;;  %v4146_v47 = vsel %vm4145_vm2, %v11302_v22, %v4144_v0  ;;  %v11405_v62 = vpop.eup %5888 }
 0x3f6   :  { %vm4147_vm14 = vcmp.eq.f32.partialorder %v11302_v22, 0.0  ;;  %v4024_v15 = vmul.f32 %v4023_v61, %v11114_v14  ;;  %vm4001_vm0 = vcmp.eq.f32.partialorder %v11156_v34, inf  ;;  %v4033_v12 = vmul.f32 0.5, %v4032_v52 }
 0x3f7   :  { %v11400_v18 = vsel %vm3991_vm5, %v12979_v17, %v11256_v40  ;;  %v4149_v25 = vsel %vm4147_vm14, %v4148_v51, %v4146_v47  ;;  %v12981_v20 = vand.u32 2147483648, %v11046_v53  ;;  %v4014_v40 = vsel %vm4013_vm4, %v11123_v28, %v4012_v54  ;;  %v1202_v54 = vpop.xlane.xlu1 %1201 }
 0x3f8   :  { %12980 = vst [vmem:[#allocation95_spill] sm:$0xff] %v11400_v18  ;;  %v4167_v22 = vmul.f32 %v11307_v60, %v4166_v48  ;;  %v5324_v55 = vperm.slane %v4149_v25, %v6356_v19  ;;  %v4002_v32 = vsel %vm4001_vm0, %v11156_v34, %v4000_v38  ;;  %v4155_v61 = vmul.f32 %v11317_v30, %v4154_v3 }
 0x3f9   :  { %v11413_v10 = vsel %vm3979_vm12, %v12981_v20, %v3978_v50  ;;  %v4201_v5 = vmul.f32 0.5, %v4200_v57  ;;  %vm4003_vm5 = vcmp.eq.f32.partialorder %v11156_v34, 0.0  ;;  %v4004_v53 = vand.u32 2147483648, %v11156_v34  ;;  %v1199_v57 = vpop.xlane.xlu0 %1198 }
 0x3fa   :  { %12982 = vst [vmem:[#allocation96_spill] sm:$0xff] %v11413_v10  ;;  %v11424_v13 = vpop.eup %5890  ;;  %vm12983_vm11 = vcmask 589312   ;;  %v4187_v60 = vmul.f32 %v11405_v62, %v11356_v23  ;;  %v4026_v30 = vsel %vm4025_vm9, %v11114_v14, %v4024_v15  ;;  %vm4027_vm12 = vcmp.eq.f32.partialorder %v11114_v14, 0.0 }
 0x3fb   :  { %v11429_v50 = vsel %vm12983_vm11, %v5324_v55, %v5323_v42  ;;  %v11433_v52 = vpop.eup %5892  ;;  %v11443_v34 = vsel %vm4015_vm10, %v4016_v27, %v4014_v40  ;;  %v4034_v42 = vsub.f32 1.5, %v4033_v12  ;;  %v11445_v48 = vsel %vm4003_vm5, %v4004_v53, %v4002_v32 }
 0x3fc   :  { %12984 = vst [vmem:[#allocation97_spill] sm:$0xff] %v11429_v50  ;;  %v4168_v0 = vmul.f32 %v4167_v22, %v11279_v33  ;;  %v4235_v3 = vmul.f32 %v11433_v52, %v11375_v31  ;;  %v11450_v51 = vadd.f32 1e-20, %v1205_v43  ;;  %v4156_v17 = vmul.f32 %v4155_v61, %v11281_v2  ;;  %v1247_v43 = vpop.xlane.xlu2 %1246 }
 0x3fd   :  { %12985 = vst [vmem:[#allocation98_spill] sm:$0xff] %v11443_v34  ;;  %v4202_v47 = vsub.f32 1.5, %v4201_v5  ;;  %v11453_v15 = vadd.f32 1e-20, %v1193_v21  ;;  %v11455_v25 = vadd.f32 1e-20, %v1202_v54  ;;  %v4188_v28 = vmul.f32 %v11405_v62, %v4187_v60 }
 0x3fe   :  { %12986 = vst [vmem:[#allocation99_spill] sm:$0xff] %v11445_v48  ;;  %vm4037_vm4 = vcmp.eq.f32.partialorder %v11272_v6, inf  ;;  %v4175_v27 = vmul.f32 %v11424_v13, %v11369_v16  ;;  %v4236_v12 = vmul.f32 %v11433_v52, %v4235_v3  ;;  %v11462_v20 = vadd.f32 1e-20, %v1190_v11 }
 0x3ff   :  { %v4035_v40 = vmul.f32 %v11343_v7, %v4034_v42  ;;  %vm4169_vm9 = vcmp.eq.f32.partialorder %v11279_v33, inf  ;;  %5894 = vrsqrt.f32 %v11450_v51  ;;  %v11467_v21 = vadd.f32 1e-20, %v1199_v57 }
 0x400   :  { %v4170_v22 = vsel %vm4169_vm9, %v11279_v33, %v4168_v0  ;;  %v4172_v55 = vand.u32 2147483648, %v11279_v33  ;;  %vm4157_vm10 = vcmp.eq.f32.partialorder %v11281_v2, inf  ;;  %5896 = vrsqrt.f32 %v11455_v25 }
 0x401   :  { %v4203_v11 = vmul.f32 %v11358_v26, %v4202_v47  ;;  %v4237_v32 = vmul.f32 0.5, %v4236_v12  ;;  %5898 = vrsqrt.f32 %v11453_v15  ;;  %v11475_v7 = vadd.f32 1e-20, %v1247_v43  ;;  %v1208_v43 = vpop.xlane.xlu0 %1207 }
 0x402   :  { %v4158_v61 = vsel %vm4157_vm10, %v11281_v2, %v4156_v17  ;;  %v4189_v5 = vmul.f32 0.5, %v4188_v28  ;;  %v4176_v53 = vmul.f32 %v11424_v13, %v4175_v27  ;;  %5900 = vrsqrt.f32 %v11462_v20 }
 0x403   :  { %v4036_v60 = vmul.f32 %v4035_v40, %v11272_v6  ;;  %vm4171_vm6 = vcmp.eq.f32.partialorder %v11279_v33, 0.0  ;;  %v4160_v54 = vand.u32 2147483648, %v11281_v2  ;;  %5902 = vrsqrt.f32 %v11467_v21 }
 0x404   :  { %v12987_v26 = vand.u32 2147483648, %v11114_v14  ;;  %v11491_v3 = vsel %vm4171_vm6, %v4172_v55, %v4170_v22  ;;  %vm4159_vm1 = vcmp.eq.f32.partialorder %v11281_v2, 0.0  ;;  %v4204_v33 = vmul.f32 %v4203_v11, %v11315_v63  ;;  %v1244_v2 = vpop.xlane.xlu1 %1243  ;;  %v12991_v22 = vld [vmem:[#allocation31_spill] sm:$0xff] }
 0x405   :  { %12989 = vst [vmem:[#allocation101_spill] sm:$0xff] %v11491_v3  ;;  %v11494_v57 = vpop.eup %5894  ;;  %v11496_v17 = vsel %vm4159_vm1, %v4160_v54, %v4158_v61  ;;  %v4238_v47 = vsub.f32 1.5, %v4237_v32  ;;  %5904 = vrsqrt.f32 %v11475_v7  ;;  %v4190_v27 = vsub.f32 1.5, %v4189_v5  ;;  %v1211_v3 = vpop.xlane.xlu2 %1210 }
 0x406   :  { %v11488_v42 = vsel %vm4027_vm12, %v12987_v26, %v4026_v30  ;;  %12990 = vst [vmem:[#allocation102_spill] sm:$0xff] %v11496_v17  ;;  %v11500_v28 = vpop.eup %5896  ;;  %v4177_v12 = vmul.f32 0.5, %v4176_v53  ;;  %vm2503_vm2 = vcmp.eq.f32.partialorder %v12991_v22, 0.0  ;;  %v11512_v55 = vsel %vm4037_vm4, %v11272_v6, %v4036_v60 }
 0x407   :  { %12988 = vst [vmem:[#allocation100_spill] sm:$0xff] %v11488_v42  ;;  %v11506_v40 = vpop.eup %5898  ;;  %vm4205_vm14 = vcmp.eq.f32.partialorder %v11315_v63, inf  ;;  %vm4207_vm0 = vcmp.eq.f32.partialorder %v11315_v63, 0.0  ;;  %v4208_v11 = vand.u32 2147483648, %v11315_v63  ;;  %v4271_v60 = vmul.f32 %v11494_v57, %v11450_v51 }
 0x408   :  { %v11517_v32 = vpop.eup %5900  ;;  %v4206_v26 = vsel %vm4205_vm14, %v11315_v63, %v4204_v33  ;;  %vm4193_vm5 = vcmp.eq.f32.partialorder %v11356_v23, inf  ;;  %v4239_v30 = vmul.f32 %v11433_v52, %v4238_v47  ;;  %v4259_v61 = vmul.f32 %v11500_v28, %v11455_v25 }
 0x409   :  { %v5903_v54 = vpop.eup %5902  ;;  %v4191_v1 = vmul.f32 %v11405_v62, %v4190_v27  ;;  %v4178_v5 = vsub.f32 1.5, %v4177_v12  ;;  %vm4241_vm11 = vcmp.eq.f32.partialorder %v11375_v31, inf  ;;  %vm4243_vm12 = vcmp.eq.f32.partialorder %v11375_v31, 0.0  ;;  %v1250_v48 = vpop.xlane.xlu0 %1249 }
 0x40a   :  { %v4247_v38 = vmul.f32 %v5903_v54, %v11467_v21  ;;  %v4223_v33 = vmul.f32 %v11506_v40, %v11453_v15  ;;  %v4211_v52 = vmul.f32 %v11517_v32, %v11462_v20  ;;  %v11542_v47 = vadd.f32 1e-20, %v1244_v2 }
 0x40b   :  { %v11535_v0 = vpop.eup %5904  ;;  %v11544_v14 = vadd.f32 1e-20, %v1208_v43  ;;  %v11548_v62 = vsel %vm4207_vm0, %v4208_v11, %v4206_v26  ;;  %v4244_v27 = vand.u32 2147483648, %v11375_v31  ;;  %v4272_v12 = vmul.f32 %v11494_v57, %v4271_v60 }
 0x40c   :  { %12992 = vst [vmem:[#allocation31_spill] sm:$0xff] %v11548_v62  ;;  %v4248_v53 = vmul.f32 %v5903_v54, %v4247_v38  ;;  %v4240_v34 = vmul.f32 %v4239_v30, %v11375_v31  ;;  %v4260_v17 = vmul.f32 %v11500_v28, %v4259_v61  ;;  %v4439_v2 = vmul.f32 %v11535_v0, %v11475_v7 }
 0x40d   :  { %5906 = vrsqrt.f32 %v11542_v47  ;;  %v4192_v43 = vmul.f32 %v4191_v1, %v11356_v23  ;;  %v4179_v63 = vmul.f32 %v11424_v13, %v4178_v5  ;;  %v4224_v60 = vmul.f32 %v11506_v40, %v4223_v33  ;;  %v1253_v1 = vpop.xlane.xlu1 %1252  ;;  %v12993_v13 = vld [vmem:[#allocation39_spill] sm:$0xff] }
 0x40e   :  { %v4249_v26 = vmul.f32 0.5, %v4248_v53  ;;  %v4212_v38 = vmul.f32 %v11517_v32, %v4211_v52  ;;  %5908 = vrsqrt.f32 %v11544_v14  ;;  %vm4181_vm4 = vcmp.eq.f32.partialorder %v11369_v16, inf }
 0x40f   :  { %v4273_v61 = vmul.f32 0.5, %v4272_v12  ;;  %v12994_v5 = vand.u32 2147483648, %v12991_v22  ;;  %vm4195_vm9 = vcmp.eq.f32.partialorder %v11356_v23, 0.0  ;;  %v4242_v33 = vsel %vm4241_vm11, %v11375_v31, %v4240_v34 }
 0x410   :  { %v4250_v50 = vsub.f32 1.5, %v4249_v26  ;;  %v4261_v52 = vmul.f32 0.5, %v4260_v17  ;;  %v4440_v12 = vmul.f32 %v11535_v0, %v4439_v2  ;;  %v11578_v11 = vadd.f32 1e-20, %v1211_v3 }
 0x411   :  { %v11571_v53 = vsel %vm2503_vm2, %v12994_v5, %v12993_v13  ;;  %v4194_v26 = vsel %vm4193_vm5, %v11356_v23, %v4192_v43  ;;  %v4180_v30 = vmul.f32 %v4179_v63, %v11369_v16  ;;  %vm4253_vm10 = vcmp.eq.f32.partialorder %v11467_v21, inf }
 0x412   :  { %12995 = vst [vmem:[#allocation39_spill] sm:$0xff] %v11571_v53  ;;  %v4251_v22 = vmul.f32 %v5903_v54, %v4250_v50  ;;  %vm4183_vm6 = vcmp.eq.f32.partialorder %v11369_v16, 0.0  ;;  %v4225_v5 = vmul.f32 0.5, %v4224_v60  ;;  %v4213_v34 = vmul.f32 0.5, %v4212_v38 }
 0x413   :  { %v11585_v13 = vpop.eup %5906  ;;  %v4256_v17 = vand.u32 2147483648, %v11467_v21  ;;  %5910 = vrsqrt.f32 %v11578_v11  ;;  %v4245_v3 = vsel %vm4243_vm12, %v4244_v27, %v4242_v33  ;;  %v4274_v2 = vsub.f32 1.5, %v4273_v61  ;;  %v1259_v61 = vpop.xlane.xlu2 %1258 }
 0x414   :  { %v4252_v43 = vmul.f32 %v4251_v22, %v11467_v21  ;;  %v4427_v50 = vmul.f32 %v11585_v13, %v11542_v47  ;;  %v11595_v54 = vpop.eup %5908  ;;  %v4262_v63 = vsub.f32 1.5, %v4261_v52  ;;  %v4441_v62 = vmul.f32 0.5, %v4440_v12 }
 0x415   :  { %v11597_v42 = vadd.f32 1e-20, %v1253_v1  ;;  %v11599_v60 = vadd.f32 1e-20, %v1250_v48  ;;  %vm4255_vm1 = vcmp.eq.f32.partialorder %v11467_v21, 0.0  ;;  %v4283_v27 = vmul.f32 %v11595_v54, %v11544_v14 }
 0x416   :  { %v4254_v38 = vsel %vm4253_vm10, %v11467_v21, %v4252_v43  ;;  %v4428_v31 = vmul.f32 %v11585_v13, %v4427_v50  ;;  %v4226_v33 = vsub.f32 1.5, %v4225_v5  ;;  %v4214_v22 = vsub.f32 1.5, %v4213_v34 }
 0x417   :  { %vm4277_vm2 = vcmp.eq.f32.partialorder %v11450_v51, inf  ;;  %v4257_v1 = vsel %vm4255_vm1, %v4256_v17, %v4254_v38  ;;  %5912 = vrsqrt.f32 %v11597_v42  ;;  %v5340_v48 = vperm.slane %v4245_v3, %v6304_v35 }
 0x418   :  { %v4275_v52 = vmul.f32 %v11494_v57, %v4274_v2  ;;  %v5341_v12 = vperm.slane %v4257_v1, %v6333_v59  ;;  %v4284_v21 = vmul.f32 %v11595_v54, %v4283_v27  ;;  %v4182_v5 = vsel %vm4181_vm4, %v11369_v16, %v4180_v30  ;;  %v1214_v27 = vpop.xlane.xlu1 %1213  ;;  %v1256_v30 = vpop.xlane.xlu0 %1255 }
 0x419   :  { %v11614_v43 = vpop.eup %5910  ;;  %v4263_v34 = vmul.f32 %v11500_v28, %v4262_v63  ;;  %v4442_v50 = vsub.f32 1.5, %v4441_v62  ;;  %5914 = vrsqrt.f32 %v11599_v60  ;;  %v12996_v17 = vand.u32 2147483648, %v11356_v23 }
 0x41a   :  { %vm4229_vm14 = vcmp.eq.f32.partialorder %v11453_v15, inf  ;;  %v11629_v3 = vsel %vm4879_vm7, %v5341_v12, %v5340_v48  ;;  %v4429_v2 = vmul.f32 0.5, %v4428_v31  ;;  %v4285_v38 = vmul.f32 0.5, %v4284_v21 }
 0x41b   :  { %v11625_v57 = vsel %vm4195_vm9, %v12996_v17, %v4194_v26  ;;  %v4227_v28 = vmul.f32 %v11506_v40, %v4226_v33  ;;  %vm4217_vm0 = vcmp.eq.f32.partialorder %v11462_v20, inf  ;;  %vm4265_vm5 = vcmp.eq.f32.partialorder %v11455_v25, inf }
 0x41c   :  { %12997 = vst [vmem:[#allocation103_spill] sm:$0xff] %v11625_v57  ;;  %v4268_v62 = vand.u32 2147483648, %v11455_v25  ;;  %v4295_v23 = vmul.f32 %v11614_v43, %v11578_v11  ;;  %v12998_v26 = vand.u32 2147483648, %v11369_v16  ;;  %v4215_v31 = vmul.f32 %v11517_v32, %v4214_v22 }
 0x41d   :  { %v4276_v1 = vmul.f32 %v4275_v52, %v11450_v51  ;;  %vm4279_vm11 = vcmp.eq.f32.partialorder %v11450_v51, 0.0  ;;  %vm4267_vm12 = vcmp.eq.f32.partialorder %v11455_v25, 0.0  ;;  %v11647_v40 = vadd.f32 1e-20, %v1259_v61  ;;  %v11649_v33 = vpop.eup %5912 }
 0x41e   :  { %v11641_v63 = vsel %vm4183_vm6, %v12998_v26, %v4182_v5  ;;  %v4264_v12 = vmul.f32 %v4263_v34, %v11455_v25  ;;  %v4443_v16 = vmul.f32 %v11535_v0, %v4442_v50  ;;  %v11655_v21 = vadd.f32 1e-20, %v1214_v27  ;;  %v1220_v27 = vpop.xlane.xlu2 %1219 }
 0x41f   :  { %12999 = vst [vmem:[#allocation104_spill] sm:$0xff] %v11641_v63  ;;  %v4430_v32 = vsub.f32 1.5, %v4429_v2  ;;  %v4286_v22 = vsub.f32 1.5, %v4285_v38  ;;  %v4296_v52 = vmul.f32 %v11614_v43, %v4295_v23  ;;  %5916 = vrsqrt.f32 %v11647_v40  ;;  %v5915_v5 = vpop.eup %5914 }
 0x420   :  { %v4228_v17 = vmul.f32 %v4227_v28, %v11453_v15  ;;  %vm4445_vm4 = vcmp.eq.f32.partialorder %v11475_v7, inf  ;;  %v4463_v34 = vmul.f32 %v11649_v33, %v11597_v42  ;;  %v4216_v0 = vmul.f32 %v4215_v31, %v11462_v20 }
 0x421   :  { %v4278_v50 = vsel %vm4277_vm2, %v11450_v51, %v4276_v1  ;;  %vm4447_vm9 = vcmp.eq.f32.partialorder %v11475_v7, 0.0  ;;  %v4448_v2 = vand.u32 2147483648, %v11475_v7  ;;  %v4451_v38 = vmul.f32 %v5915_v5, %v11599_v60 }
 0x422   :  { %v4266_v28 = vsel %vm4265_vm5, %v11455_v25, %v4264_v12  ;;  %v4444_v23 = vmul.f32 %v4443_v16, %v11475_v7  ;;  %5918 = vrsqrt.f32 %v11655_v21  ;;  %v11677_v26 = vadd.f32 1e-20, %v1256_v30 }
 0x423   :  { %v4431_v31 = vmul.f32 %v11585_v13, %v4430_v32  ;;  %v4287_v1 = vmul.f32 %v11595_v54, %v4286_v22  ;;  %v4297_v48 = vmul.f32 0.5, %v4296_v52  ;;  %v4452_v61 = vmul.f32 %v5915_v5, %v4451_v38  ;;  %v1217_v32 = vpop.xlane.xlu0 %1216 }
 0x424   :  { %v11684_v57 = vsel %vm4229_vm14, %v11453_v15, %v4228_v17  ;;  %vm4433_vm10 = vcmp.eq.f32.partialorder %v11542_v47, inf  ;;  %v4464_v12 = vmul.f32 %v11649_v33, %v4463_v34  ;;  %v11688_v16 = vadd.f32 1e-20, %v1220_v27 }
 0x425   :  { %v11690_v63 = vpop.eup %5916  ;;  %v11695_v13 = vsel %vm4217_vm0, %v11462_v20, %v4216_v0  ;;  %vm4435_vm6 = vcmp.eq.f32.partialorder %v11542_v47, 0.0  ;;  %v4436_v54 = vand.u32 2147483648, %v11542_v47  ;;  %vm4289_vm1 = vcmp.eq.f32.partialorder %v11544_v14, inf }
 0x426   :  { %v4453_v30 = vmul.f32 0.5, %v4452_v61  ;;  %v13000_v22 = vand.u32 2147483648, %v11450_v51  ;;  %v4269_v17 = vsel %vm4267_vm12, %v4268_v62, %v4266_v28  ;;  %v4487_v34 = vmul.f32 %v11690_v63, %v11647_v40 }
 0x427   :  { %5920 = vrsqrt.f32 %v11677_v26  ;;  %v4446_v0 = vsel %vm4445_vm4, %v11475_v7, %v4444_v23  ;;  %v4432_v61 = vmul.f32 %v4431_v31, %v11542_v47  ;;  %v4288_v38 = vmul.f32 %v4287_v1, %v11544_v14  ;;  %v1262_v31 = vpop.xlane.xlu1 %1261 }
 0x428   :  { %v4281_v52 = vsel %vm4279_vm11, %v13000_v22, %v4278_v50  ;;  %v4298_v27 = vsub.f32 1.5, %v4297_v48  ;;  %v11714_v18 = vpop.eup %5918  ;;  %v4465_v51 = vmul.f32 0.5, %v4464_v12  ;;  %v4454_v50 = vsub.f32 1.5, %v4453_v30 }
 0x429   :  { %v4488_v25 = vmul.f32 %v11690_v63, %v4487_v34  ;;  %5922 = vrsqrt.f32 %v11688_v16  ;;  %v5345_v62 = vperm.slane %v4281_v52, %v6323_v49  ;;  %vm4291_vm2 = vcmp.eq.f32.partialorder %v11544_v14, 0.0 }
 0x42a   :  { %v4292_v28 = vand.u32 2147483648, %v11544_v14  ;;  %v4307_v23 = vmul.f32 %v11714_v18, %v11655_v21  ;;  %v5343_v48 = vperm.slane %v4269_v17, %v6317_v45  ;;  %v4449_v1 = vsel %vm4447_vm9, %v4448_v2, %v4446_v0 }
 0x42b   :  { %vm4301_vm14 = vcmp.eq.f32.partialorder %v11578_v11, inf  ;;  %v4434_v22 = vsel %vm4433_vm10, %v11542_v47, %v4432_v61  ;;  %v4290_v52 = vsel %vm4289_vm1, %v11544_v14, %v4288_v38  ;;  %v4299_v34 = vmul.f32 %v11614_v43, %v4298_v27  ;;  %v1265_v47 = vpop.xlane.xlu0 %1264 }
 0x42c   :  { %v4308_v17 = vmul.f32 %v11714_v18, %v4307_v23  ;;  %v4466_v2 = vsub.f32 1.5, %v4465_v51  ;;  %v4455_v0 = vmul.f32 %v5915_v5, %v4454_v50  ;;  %v4489_v10 = vmul.f32 0.5, %v4488_v25 }
 0x42d   :  { %v5921_v7 = vpop.eup %5920  ;;  %v11737_v58 = vadd.f32 1e-20, %v1262_v31  ;;  %v5372_v30 = vperm.slane %v4449_v1, %v6333_v59  ;;  %vm4457_vm0 = vcmp.eq.f32.partialorder %v11599_v60, inf  ;;  %v5344_v38 = vsel %vm4883_vm13, %v5343_v48, %v11629_v3  ;;  %v1268_v1 = vpop.xlane.xlu2 %1267 }
 0x42e   :  { %v4309_v12 = vmul.f32 0.5, %v4308_v17  ;;  %v4475_v61 = vmul.f32 %v5921_v7, %v11677_v26  ;;  %v4437_v43 = vsel %vm4435_vm6, %v4436_v54, %v4434_v22  ;;  %vm4303_vm5 = vcmp.eq.f32.partialorder %v11578_v11, 0.0 }
 0x42f   :  { %v5923_v53 = vpop.eup %5922  ;;  %v4460_v5 = vand.u32 2147483648, %v11599_v60  ;;  %5924 = vrsqrt.f32 %v11737_v58  ;;  %v4293_v59 = vsel %vm4291_vm2, %v4292_v28, %v4290_v52  ;;  %v4300_v27 = vmul.f32 %v4299_v34, %v11578_v11 }
 0x430   :  { %vm4469_vm11 = vcmp.eq.f32.partialorder %v11597_v42, inf  ;;  %vm4459_vm12 = vcmp.eq.f32.partialorder %v11599_v60, 0.0  ;;  %v4476_v51 = vmul.f32 %v5921_v7, %v4475_v61  ;;  %v4331_v3 = vmul.f32 %v5923_v53, %v11688_v16 }
 0x431   :  { %v4467_v54 = vmul.f32 %v11649_v33, %v4466_v2  ;;  %v4456_v50 = vmul.f32 %v4455_v0, %v11599_v60  ;;  %v4490_v25 = vsub.f32 1.5, %v4489_v10  ;;  %v11757_v23 = vadd.f32 1e-20, %v1217_v32 }
 0x432   :  { %v5346_v14 = vsel %vm4887_vm15, %v5345_v62, %v5344_v38  ;;  %v4310_v28 = vsub.f32 1.5, %v4309_v12  ;;  %v4477_v31 = vmul.f32 0.5, %v4476_v51  ;;  %v4332_v48 = vmul.f32 %v5923_v53, %v4331_v3  ;;  %v1223_v12 = vpop.xlane.xlu1 %1222 }
 0x433   :  { %v5371_v22 = vperm.slane %v4437_v43, %v6304_v35  ;;  %v5347_v52 = vperm.slane %v4293_v59, %v6314_v44  ;;  %v4496_v34 = vand.u32 2147483648, %v11647_v40  ;;  %5926 = vrsqrt.f32 %v11757_v23 }
 0x434   :  { %v4302_v10 = vsel %vm4301_vm14, %v11578_v11, %v4300_v27  ;;  %vm4471_vm4 = vcmp.eq.f32.partialorder %v11597_v42, 0.0  ;;  %v4316_v33 = vand.u32 2147483648, %v11655_v21  ;;  %v4478_v32 = vsub.f32 1.5, %v4477_v31 }
 0x435   :  { %v4333_v62 = vmul.f32 0.5, %v4332_v48  ;;  %v5925_v17 = vpop.eup %5924  ;;  %v4468_v35 = vmul.f32 %v4467_v54, %v11597_v42  ;;  %v4458_v2 = vsel %vm4457_vm0, %v11599_v60, %v4456_v50  ;;  %v4491_v0 = vmul.f32 %v11690_v63, %v4490_v25 }
 0x436   :  { %vm4493_vm9 = vcmp.eq.f32.partialorder %v11647_v40, inf  ;;  %vm4313_vm10 = vcmp.eq.f32.partialorder %v11655_v21, inf  ;;  %v11776_v61 = vadd.f32 1e-20, %v1268_v1  ;;  %v4311_v38 = vmul.f32 %v11714_v18, %v4310_v28 }
 0x437   :  { %v4479_v43 = vmul.f32 %v5921_v7, %v4478_v32  ;;  %v4334_v59 = vsub.f32 1.5, %v4333_v62  ;;  %v4499_v27 = vmul.f32 %v5925_v17, %v11737_v58  ;;  %v5373_v51 = vsel %vm4879_vm7, %v5372_v30, %v5371_v22  ;;  %v1226_v22 = vpop.xlane.xlu0 %1225 }
 0x438   :  { %v5348_v3 = vsel %vm4891_vm3, %v5347_v52, %v5346_v14  ;;  %vm4481_vm6 = vcmp.eq.f32.partialorder %v11677_v26, inf  ;;  %5928 = vrsqrt.f32 %v11776_v61  ;;  %v13001_v63 = vand.u32 2147483648, %v11578_v11 }
 0x439   :  { %vm4495_vm1 = vcmp.eq.f32.partialorder %v11647_v40, 0.0  ;;  %vm4315_vm2 = vcmp.eq.f32.partialorder %v11655_v21, 0.0  ;;  %v4480_v18 = vmul.f32 %v4479_v43, %v11677_v26  ;;  %vm4483_vm14 = vcmp.eq.f32.partialorder %v11677_v26, 0.0  ;;  %v11792_v7 = vpop.eup %5926 }
 0x43a   :  { %v4305_v54 = vsel %vm4303_vm5, %v13001_v63, %v4302_v10  ;;  %v4500_v30 = vmul.f32 %v5925_v17, %v4499_v27  ;;  %v4470_v50 = vsel %vm4469_vm11, %v11597_v42, %v4468_v35  ;;  %v4461_v25 = vsel %vm4459_vm12, %v4460_v5, %v4458_v2 }
 0x43b   :  { %v11799_v11 = vadd.f32 1e-20, %v1223_v12  ;;  %v11801_v14 = vadd.f32 1e-20, %v1265_v47  ;;  %v4492_v28 = vmul.f32 %v4491_v0, %v11647_v40  ;;  %v4312_v31 = vmul.f32 %v4311_v38, %v11655_v21  ;;  %v1229_v47 = vpop.xlane.xlu2 %1228 }
 0x43c   :  { %v4335_v48 = vmul.f32 %v5923_v53, %v4334_v59  ;;  %v4501_v1 = vmul.f32 0.5, %v4500_v30  ;;  %v5349_v52 = vperm.slane %v4305_v54, %v6320_v46  ;;  %v4484_v10 = vand.u32 2147483648, %v11677_v26 }
 0x43d   :  { %v4319_v32 = vmul.f32 %v11792_v7, %v11757_v23  ;;  %5930 = vrsqrt.f32 %v11799_v11  ;;  %v4482_v60 = vsel %vm4481_vm6, %v11677_v26, %v4480_v18  ;;  %vm4337_vm7 = vcmp.eq.f32.partialorder %v11688_v16, inf }
 0x43e   :  { %v4340_v5 = vand.u32 2147483648, %v11688_v16  ;;  %v4502_v53 = vsub.f32 1.5, %v4501_v1  ;;  %v11815_v62 = vpop.eup %5928  ;;  %v13002_v12 = vand.u32 2147483648, %v11597_v42  ;;  %v5374_v2 = vperm.slane %v4461_v25, %v6317_v45  ;;  %v1271_v45 = vpop.xlane.xlu1 %1270 }
 0x43f   :  { %vm4339_vm0 = vcmp.eq.f32.partialorder %v11688_v16, 0.0  ;;  %v4320_v0 = vmul.f32 %v11792_v7, %v4319_v32  ;;  %5932 = vrsqrt.f32 %v11801_v14  ;;  %v4494_v38 = vsel %vm4493_vm9, %v11647_v40, %v4492_v28  ;;  %v11866_v32 = vpop.xlane.xlu0 %1273 }
 0x440   :  { %v4473_v35 = vsel %vm4471_vm4, %v13002_v12, %v4470_v50  ;;  %v4314_v43 = vsel %vm4313_vm10, %v11655_v21, %v4312_v31  ;;  %v4336_v59 = vmul.f32 %v4335_v48, %v11688_v16  ;;  %v4523_v42 = vmul.f32 %v11815_v62, %v11776_v61 }
 0x441   :  { %v5350_v27 = vsel %vm4895_vm8, %v5349_v52, %v5348_v3  ;;  %v4485_v63 = vsel %vm4483_vm14, %v4484_v10, %v4482_v60  ;;  %v4503_v54 = vmul.f32 %v5925_v17, %v4502_v53  ;;  %v4321_v18 = vmul.f32 0.5, %v4320_v0  ;;  %v13003_v60 = vld [vmem:[#allocation41_spill] sm:$0xff] }
 0x442   :  { %vm2683_vm5 = vcmp.eq.f32.partialorder %v8570_v8, 0.0  ;;  %v5376_v30 = vperm.slane %v4473_v35, %v6323_v49  ;;  %vm4505_vm11 = vcmp.eq.f32.partialorder %v11737_v58, inf  ;;  %v4524_v50 = vmul.f32 %v11815_v62, %v4523_v42 }
 0x443   :  { %v11841_v25 = vadd.f32 1e-20, %v1229_v47  ;;  %v5931_v28 = vpop.eup %5930  ;;  %v5375_v31 = vsel %vm4883_vm13, %v5374_v2, %v5373_v51  ;;  %v4497_v26 = vsel %vm4495_vm1, %v4496_v34, %v4494_v38  ;;  %v4317_v17 = vsel %vm4315_vm2, %v4316_v33, %v4314_v43  ;;  %v1277_v38 = vpop.xlane.xlu2 %1276 }
 0x444   :  { %v11852_v49 = vadd.f32 1e-20, %v1271_v45  ;;  %v5378_v3 = vperm.slane %v4485_v63, %v6314_v44  ;;  %v4338_v48 = vsel %vm4337_vm7, %v11688_v16, %v4336_v59  ;;  %v4343_v51 = vmul.f32 %v5931_v28, %v11799_v11 }
 0x445   :  { %5934 = vrsqrt.f32 %v11841_v25  ;;  %v5933_v1 = vpop.eup %5932  ;;  %v4504_v40 = vmul.f32 %v4503_v54, %v11737_v58  ;;  %v4322_v34 = vsub.f32 1.5, %v4321_v18  ;;  %v4525_v52 = vmul.f32 0.5, %v4524_v50  ;;  %v13005_v50 = vld [vmem:[#allocation49_spill] sm:$0xff] }
 0x446   :  { %v11861_v10 = vadd.f32 1e-20, %v1226_v22  ;;  %vm4507_vm13 = vcmp.eq.f32.partialorder %v11737_v58, 0.0  ;;  %v4508_v21 = vand.u32 2147483648, %v11737_v58  ;;  %v4344_v44 = vmul.f32 %v5931_v28, %v4343_v51  ;;  %v1232_v54 = vpop.xlane.xlu1 %1231 }
 0x447   :  { %v4511_v33 = vmul.f32 %v5933_v1, %v11801_v14  ;;  %vm2695_vm12 = vcmp.eq.f32.partialorder %v13003_v60, 0.0  ;;  %v5380_v53 = vperm.slane %v4497_v26, %v6320_v46  ;;  %v5351_v47 = vperm.slane %v4317_v17, %v6382_v9  ;;  %v13018_v17 = vld [vmem:[#allocation67_spill] sm:$0xff] }
 0x448   :  { %v5377_v12 = vsel %vm4887_vm15, %v5376_v30, %v5375_v31  ;;  %5936 = vrsqrt.f32 %v11852_v49  ;;  %v11876_v35 = vsel %vm4339_vm0, %v4340_v5, %v4338_v48  ;;  %vm4325_vm4 = vcmp.eq.f32.partialorder %v11757_v23, inf }
 0x449   :  { %v5379_v22 = vsel %vm4891_vm3, %v5378_v3, %v5377_v12  ;;  %v4345_v2 = vmul.f32 0.5, %v4344_v44  ;;  %v4512_v0 = vmul.f32 %v5933_v1, %v4511_v33  ;;  %v4506_v46 = vsel %vm4505_vm11, %v11737_v58, %v4504_v40 }
 0x44a   :  { %v4323_v43 = vmul.f32 %v11792_v7, %v4322_v34  ;;  %v4526_v59 = vsub.f32 1.5, %v4525_v52  ;;  %5938 = vrsqrt.f32 %v11861_v10  ;;  %v4328_v45 = vand.u32 2147483648, %v11757_v23 }
 0x44b   :  { %v5935_v42 = vpop.eup %5934  ;;  %v4532_v16 = vand.u32 2147483648, %v11776_v61  ;;  %v4346_v5 = vsub.f32 1.5, %v4345_v2  ;;  %v4513_v63 = vmul.f32 0.5, %v4512_v0  ;;  %vm13004_vm15 = vcmask 458112   ;;  %v13007_v2 = vld [vmem:[#allocation48_spill] sm:$0xff] }
 0x44c   :  { %v11887_v18 = vsel %vm13004_vm15, %v5351_v47, %v5350_v27  ;;  %vm4327_vm3 = vcmp.eq.f32.partialorder %v11757_v23, 0.0  ;;  %v4352_v30 = vand.u32 2147483648, %v11799_v11  ;;  %v4367_v7 = vmul.f32 %v5935_v42, %v11841_v25  ;;  %vm13009_vm7 = vmmov %vm13004_vm15 }
 0x44d   :  { %v13006_v31 = vand.u32 2147483648, %v8570_v8  ;;  %v4509_v27 = vsel %vm4507_vm13, %v4508_v21, %v4506_v46  ;;  %v5381_v3 = vsel %vm4895_vm8, %v5380_v53, %v5379_v22  ;;  %vm4529_vm9 = vcmp.eq.f32.partialorder %v11776_v61, inf  ;;  %v11919_v22 = vpop.xlane.xlu0 %1234 }
 0x44e   :  { %v4514_v48 = vsub.f32 1.5, %v4513_v63  ;;  %v5937_v51 = vpop.eup %5936  ;;  %v4324_v40 = vmul.f32 %v4323_v43, %v11757_v23  ;;  %v4527_v34 = vmul.f32 %v11815_v62, %v4526_v59  ;;  %vm4349_vm10 = vcmp.eq.f32.partialorder %v11799_v11, inf }
 0x44f   :  { %v11897_v26 = vsel %vm2683_vm5, %v13006_v31, %v13005_v50  ;;  %v4368_v8 = vmul.f32 %v5935_v42, %v4367_v7  ;;  %v11908_v52 = vadd.f32 1e-20, %v1277_v38  ;;  %v4347_v44 = vmul.f32 %v5931_v28, %v4346_v5 }
 0x450   :  { %vm4517_vm6 = vcmp.eq.f32.partialorder %v11801_v14, inf  ;;  %v4520_v58 = vand.u32 2147483648, %v11801_v14  ;;  %v4535_v21 = vmul.f32 %v5937_v51, %v11852_v49  ;;  %v5939_v33 = vpop.eup %5938  ;;  %v5382_v53 = vperm.slane %v4509_v27, %v6382_v9 }
 0x451   :  { %vm4531_vm8 = vcmp.eq.f32.partialorder %v11776_v61, 0.0  ;;  %v4515_v47 = vmul.f32 %v5933_v1, %v4514_v48  ;;  %v4369_v12 = vmul.f32 0.5, %v4368_v8  ;;  %5940 = vrsqrt.f32 %v11908_v52 }
 0x452   :  { %vm4351_vm1 = vcmp.eq.f32.partialorder %v11799_v11, 0.0  ;;  %vm4373_vm2 = vcmp.eq.f32.partialorder %v11841_v25, inf  ;;  %v4536_v62 = vmul.f32 %v5937_v51, %v4535_v21  ;;  %v4355_v28 = vmul.f32 %v5939_v33, %v11861_v10 }
 0x453   :  { %v13008_v0 = vand.u32 2147483648, %v13003_v60  ;;  %v4326_v1 = vsel %vm4325_vm4, %v11757_v23, %v4324_v40  ;;  %v4528_v46 = vmul.f32 %v4527_v34, %v11776_v61  ;;  %vm4519_vm14 = vcmp.eq.f32.partialorder %v11801_v14, 0.0  ;;  %v1238_v60 = vpop.xlane.xlu2 %1237 }
 0x454   :  { %v4370_v43 = vsub.f32 1.5, %v4369_v12  ;;  %v11933_v59 = vadd.f32 1e-20, %v1232_v54  ;;  %v4348_v5 = vmul.f32 %v4347_v44, %v11799_v11  ;;  %v4376_v63 = vand.u32 2147483648, %v11841_v25  ;;  %v1280_v44 = vpop.xlane.xlu1 %1279 }
 0x455   :  { %v11926_v38 = vsel %vm2695_vm12, %v13008_v0, %v13007_v2  ;;  %v4537_v7 = vmul.f32 0.5, %v4536_v62  ;;  %v4356_v50 = vmul.f32 %v5939_v33, %v4355_v28  ;;  %v11938_v31 = vsel %vm13009_vm7, %v5382_v53, %v5381_v3 }
 0x456   :  { %v4516_v27 = vmul.f32 %v4515_v47, %v11801_v14  ;;  %v4371_v48 = vmul.f32 %v5935_v42, %v4370_v43  ;;  %vm4375_vm0 = vcmp.eq.f32.partialorder %v11841_v25, 0.0  ;;  %5942 = vrsqrt.f32 %v11933_v59 }
 0x457   :  { %v4329_v54 = vsel %vm4327_vm3, %v4328_v45, %v4326_v1  ;;  %v4538_v40 = vsub.f32 1.5, %v4537_v7  ;;  %vm4541_vm5 = vcmp.eq.f32.partialorder %v11852_v49, inf  ;;  %v4544_v34 = vand.u32 2147483648, %v11852_v49  ;;  %v5941_v21 = vpop.eup %5940 }
 0x458   :  { %v4357_v8 = vmul.f32 0.5, %v4356_v50  ;;  %v4530_v3 = vsel %vm4529_vm9, %v11776_v61, %v4528_v46  ;;  %v4372_v42 = vmul.f32 %v4371_v48, %v11841_v25  ;;  %v11952_v53 = vadd.f32 1e-20, %v11866_v32 }
 0x459   :  { %v11954_v47 = vadd.f32 1e-20, %v1238_v60  ;;  %v4350_v23 = vsel %vm4349_vm10, %v11799_v11, %v4348_v5  ;;  %v4539_v45 = vmul.f32 %v5937_v51, %v4538_v40  ;;  %v4559_v62 = vmul.f32 %v5941_v21, %v11908_v52  ;;  %v11992_v11 = vpop.xlane.xlu0 %1282 }
 0x45a   :  { %v4358_v12 = vsub.f32 1.5, %v4357_v8  ;;  %v5353_v28 = vperm.slane %v4329_v54, %v12885_v24  ;;  %v4518_v2 = vsel %vm4517_vm6, %v11801_v14, %v4516_v27  ;;  %vm4543_vm11 = vcmp.eq.f32.partialorder %v11852_v49, 0.0  ;;  %v13011_v14 = vld [vmem:[#allocation52_spill] sm:$0xff]  ;;  %v13017_v8 = vld [vmem:[#allocation62_spill] sm:$0xff] }
 0x45b   :  { %5944 = vrsqrt.f32 %v11952_v53  ;;  %v11966_v32 = vadd.f32 1e-20, %v1280_v44  ;;  %v11972_v51 = vsel %vm4531_vm8, %v4532_v16, %v4530_v3  ;;  %vm4361_vm13 = vcmp.eq.f32.partialorder %v11861_v10, inf  ;;  %v1286_v40 = vpop.xlane.xlu2 %1285 }
 0x45c   :  { %v4359_v0 = vmul.f32 %v5939_v33, %v4358_v12  ;;  %v4560_v1 = vmul.f32 %v5941_v21, %v4559_v62  ;;  %v5943_v46 = vpop.eup %5942  ;;  %v11979_v43 = vsel %vm4351_vm1, %v4352_v30, %v4350_v23  ;;  %v4374_v5 = vsel %vm4373_vm2, %v11841_v25, %v4372_v42  ;;  %v1241_v12 = vpop.xlane.xlu1 %1240 }
 0x45d   :  { %v4540_v7 = vmul.f32 %v4539_v45, %v11852_v49  ;;  %5946 = vrsqrt.f32 %v11954_v47  ;;  %v11988_v61 = vsel %vm4519_vm14, %v4520_v58, %v4518_v2  ;;  %v4379_v50 = vmul.f32 %v5943_v46, %v11933_v59 }
 0x45e   :  { %v4360_v16 = vmul.f32 %v4359_v0, %v11861_v10  ;;  %v4561_v33 = vmul.f32 0.5, %v4560_v1  ;;  %vm13010_vm12 = vcmask 523712   ;;  %vm4363_vm4 = vcmp.eq.f32.partialorder %v11861_v10, 0.0 }
 0x45f   :  { %v11996_v30 = vsel %vm13010_vm12, %v5353_v28, %v11887_v18  ;;  %v4364_v60 = vand.u32 2147483648, %v11861_v10  ;;  %5948 = vrsqrt.f32 %v11966_v32  ;;  %vm2863_vm15 = vcmp.eq.f32.partialorder %v13011_v14, 0.0 }
 0x460   :  { %v12006_v27 = vsel %vm4375_vm0, %v4376_v63, %v4374_v5  ;;  %v4562_v48 = vsub.f32 1.5, %v4561_v33  ;;  %v4380_v54 = vmul.f32 %v5943_v46, %v4379_v50  ;;  %v4542_v3 = vsel %vm4541_vm5, %v11852_v49, %v4540_v7 }
 0x461   :  { %v5945_v18 = vpop.eup %5944  ;;  %vm4565_vm3 = vcmp.eq.f32.partialorder %v11908_v52, inf  ;;  %v4568_v25 = vand.u32 2147483648, %v11908_v52  ;;  %v4362_v63 = vsel %vm4361_vm13, %v11861_v10, %v4360_v16  ;;  %vm4385_vm9 = vcmp.eq.f32.partialorder %v11933_v59, inf  ;;  %v13012_v10 = vld [vmem:[#allocation51_spill] sm:$0xff] }
 0x462   :  { %v4563_v42 = vmul.f32 %v5941_v21, %v4562_v48  ;;  %v4381_v23 = vmul.f32 0.5, %v4380_v54  ;;  %v4547_v45 = vmul.f32 %v5945_v18, %v11952_v53  ;;  %v4388_v2 = vand.u32 2147483648, %v11933_v59 }
 0x463   :  { %v5947_v62 = vpop.eup %5946  ;;  %v12026_v0 = vadd.f32 1e-20, %v11919_v22  ;;  %v12028_v1 = vadd.f32 1e-20, %v1286_v40  ;;  %v12032_v21 = vsel %vm4543_vm11, %v4544_v34, %v4542_v3  ;;  %vm4567_vm10 = vcmp.eq.f32.partialorder %v11908_v52, 0.0  ;;  %v13014_v3 = vld [vmem:[#allocation60_spill] sm:$0xff] }
 0x464   :  { %v4382_v5 = vsub.f32 1.5, %v4381_v23  ;;  %v4548_v7 = vmul.f32 %v5945_v18, %v4547_v45  ;;  %v4403_v16 = vmul.f32 %v5947_v62, %v11954_v47  ;;  %v12038_v50 = vsel %vm4363_vm4, %v4364_v60, %v4362_v63  ;;  %v13013_v60 = vld [vmem:[#allocation54_spill] sm:$0xff] }
 0x465   :  { %v5949_v33 = vpop.eup %5948  ;;  %vm4553_vm6 = vcmp.eq.f32.partialorder %v11952_v53, inf  ;;  %v4556_v22 = vand.u32 2147483648, %v11952_v53  ;;  %5950 = vrsqrt.f32 %v12026_v0  ;;  %v12043_v49 = vadd.f32 1e-20, %v1241_v12 }
 0x466   :  { %v4564_v34 = vmul.f32 %v4563_v42, %v11908_v52  ;;  %v4383_v48 = vmul.f32 %v5943_v46, %v4382_v5  ;;  %vm4387_vm8 = vcmp.eq.f32.partialorder %v11933_v59, 0.0  ;;  %v4549_v54 = vmul.f32 0.5, %v4548_v7  ;;  %v1289_v5 = vpop.xlane.xlu0 %1288 }
 0x467   :  { %vm4555_vm1 = vcmp.eq.f32.partialorder %v11952_v53, 0.0  ;;  %v4404_v40 = vmul.f32 %v5947_v62, %v4403_v16  ;;  %vm2875_vm2 = vcmp.eq.f32.partialorder %v13012_v10, 0.0  ;;  %vm2885_vm14 = vcmp.eq.f32.partialorder %v13013_v60, inf }
 0x468   :  { %v4571_v23 = vmul.f32 %v5949_v33, %v11966_v32  ;;  %5952 = vrsqrt.f32 %v12028_v1  ;;  %v4384_v46 = vmul.f32 %v4383_v48, %v11933_v59  ;;  %v4550_v42 = vsub.f32 1.5, %v4549_v54  ;;  %v13016_v48 = vld [vmem:[#allocation65_spill] sm:$0xff] }
 0x469   :  { %v4405_v45 = vmul.f32 0.5, %v4404_v40  ;;  %vm4409_vm7 = vcmp.eq.f32.partialorder %v11954_v47, inf  ;;  %5954 = vrsqrt.f32 %v12043_v49  ;;  %v13015_v58 = vand.u32 2147483648, %v13011_v14 }
 0x46a   :  { %v4572_v16 = vmul.f32 %v5949_v33, %v4571_v23  ;;  %vm3043_vm0 = vcmp.eq.f32.partialorder %v13016_v48, 0.0  ;;  %v4566_v54 = vsel %vm4565_vm3, %v11908_v52, %v4564_v34  ;;  %v4551_v40 = vmul.f32 %v5945_v18, %v4550_v42 }
 0x46b   :  { %v12066_v28 = vsel %vm2863_vm15, %v13015_v58, %v13014_v3  ;;  %v4406_v44 = vsub.f32 1.5, %v4405_v45  ;;  %v12073_v7 = vadd.f32 1e-20, %v11992_v11  ;;  %v5951_v23 = vpop.eup %5950  ;;  %vm3055_vm5 = vcmp.eq.f32.partialorder %v13017_v8, 0.0 }
 0x46c   :  { %vm3065_vm11 = vcmp.eq.f32.partialorder %v13018_v17, inf  ;;  %v4386_v14 = vsel %vm4385_vm9, %v11933_v59, %v4384_v46  ;;  %v4573_v58 = vmul.f32 0.5, %v4572_v16  ;;  %v12081_v12 = vadd.f32 1e-20, %v1289_v5  ;;  %v13026_v16 = vld [vmem:[#allocation73_spill] sm:$0xff] }
 0x46d   :  { %v4552_v18 = vmul.f32 %v4551_v40, %v11952_v53  ;;  %v4407_v34 = vmul.f32 %v5947_v62, %v4406_v44  ;;  %vm4577_vm13 = vcmp.eq.f32.partialorder %v11966_v32, inf  ;;  %v4391_v11 = vmul.f32 %v5951_v23, %v12026_v0 }
 0x46e   :  { %5956 = vrsqrt.f32 %v12073_v7  ;;  %v5953_v42 = vpop.eup %5952  ;;  %v12091_v46 = vsel %vm4567_vm10, %v4568_v25, %v4566_v54  ;;  %v4574_v45 = vsub.f32 1.5, %v4573_v58  ;;  %v12104_v52 = vsel %vm4387_vm8, %v4388_v2, %v4386_v14  ;;  %v13022_v2 = vld [vmem:[#allocation63_spill] sm:$0xff] }
 0x46f   :  { %v4554_v44 = vsel %vm4553_vm6, %v11952_v53, %v4552_v18  ;;  %v4408_v62 = vmul.f32 %v4407_v34, %v11954_v47  ;;  %v4392_v40 = vmul.f32 %v5951_v23, %v4391_v11  ;;  %v4595_v63 = vmul.f32 %v5953_v42, %v12028_v1  ;;  %v5955_v3 = vpop.eup %5954  ;;  %v13020_v34 = vld [vmem:[#allocation6_spill] sm:$0xff] }
 0x470   :  { %v12108_v25 = vsel %vm4555_vm1, %v4556_v22, %v4554_v44  ;;  %v4575_v54 = vmul.f32 %v5949_v33, %v4574_v45  ;;  %vm4397_vm12 = vcmp.eq.f32.partialorder %v12026_v0, inf  ;;  %5958 = vrsqrt.f32 %v12081_v12 }
 0x471   :  { %13019 = vst [vmem:[#allocation41_spill] sm:$0xff] %v12108_v25  ;;  %vm4039_vm4 = vcmp.eq.f32.partialorder %v11272_v6, 0.0  ;;  %v4393_v58 = vmul.f32 0.5, %v4392_v40  ;;  %v4596_v18 = vmul.f32 %v5953_v42, %v4595_v63  ;;  %v13021_v11 = vand.u32 2147483648, %v13012_v10  ;;  %v13028_v25 = vld [vmem:[#allocation77_spill] sm:$0xff] }
 0x472   :  { %v2886_v53 = vsel %vm2885_vm14, %v13013_v60, %v13022_v2  ;;  %vm4231_vm15 = vcmp.eq.f32.partialorder %v11453_v15, 0.0  ;;  %vm4219_vm3 = vcmp.eq.f32.partialorder %v11462_v20, 0.0  ;;  %v4576_v22 = vmul.f32 %v4575_v54, %v11966_v32 }
 0x473   :  { %v12118_v59 = vsel %vm2875_vm2, %v13021_v11, %v13020_v34  ;;  %v4415_v63 = vmul.f32 %v5955_v3, %v12043_v49  ;;  %v4410_v45 = vsel %vm4409_vm7, %v11954_v47, %v4408_v62  ;;  %v4394_v44 = vsub.f32 1.5, %v4393_v58  ;;  %v13024_v62 = vld [vmem:[#allocation74_spill] sm:$0xff] }
 0x474   :  { %v5957_v14 = vpop.eup %5956  ;;  %vm4399_vm9 = vcmp.eq.f32.partialorder %v12026_v0, 0.0  ;;  %v4597_v40 = vmul.f32 0.5, %v4596_v18  ;;  %vm4601_vm10 = vcmp.eq.f32.partialorder %v12028_v1, inf  ;;  %vm2887_vm6 = vcmp.eq.f32.partialorder %v13013_v60, 0.0 }
 0x475   :  { %vm4411_vm8 = vcmp.eq.f32.partialorder %v11954_v47, 0.0  ;;  %vm4579_vm1 = vcmp.eq.f32.partialorder %v11966_v32, 0.0  ;;  %v4416_v54 = vmul.f32 %v5955_v3, %v4415_v63  ;;  %v4583_v34 = vmul.f32 %v5957_v14, %v12073_v7 }
 0x476   :  { %v13023_v11 = vand.u32 2147483648, %v13013_v60  ;;  %v13025_v58 = vand.u32 2147483648, %v13016_v48  ;;  %v4395_v33 = vmul.f32 %v5951_v23, %v4394_v44  ;;  %v4598_v10 = vsub.f32 1.5, %v4597_v40  ;;  %v13029_v44 = vld [vmem:[#allocation66_spill] sm:$0xff] }
 0x477   :  { %v13027_v5 = vand.u32 2147483648, %v13017_v8  ;;  %v3066_v60 = vsel %vm3065_vm11, %v13018_v17, %v13028_v25  ;;  %v4578_v48 = vsel %vm4577_vm13, %v11966_v32, %v4576_v22  ;;  %vm4421_vm2 = vcmp.eq.f32.partialorder %v12043_v49, inf }
 0x478   :  { %v12142_v2 = vsel %vm2887_vm6, %v13023_v11, %v2886_v53  ;;  %v12149_v18 = vsel %vm3043_vm0, %v13025_v58, %v13024_v62  ;;  %v5959_v53 = vpop.eup %5958  ;;  %v4417_v11 = vmul.f32 0.5, %v4416_v54  ;;  %v4584_v23 = vmul.f32 %v5957_v14, %v4583_v34  ;;  %v13031_v54 = vld [vmem:[#allocation76_spill] sm:$0xff] }
 0x479   :  { %v12156_v63 = vsel %vm3055_vm5, %v13027_v5, %v13026_v16  ;;  %vm3067_vm14 = vcmp.eq.f32.partialorder %v13018_v17, 0.0  ;;  %v4396_v8 = vmul.f32 %v4395_v33, %v12026_v0  ;;  %v4599_v5 = vmul.f32 %v5953_v42, %v4598_v10 }
 0x47a   :  { %v4607_v16 = vmul.f32 %v5959_v53, %v12081_v12  ;;  %vm3077_vm7 = vcmp.eq.f32.partialorder %v13029_v44, inf  ;;  %v4418_v40 = vsub.f32 1.5, %v4417_v11  ;;  %v4585_v25 = vmul.f32 0.5, %v4584_v23 }
 0x47b   :  { %vm4589_vm0 = vcmp.eq.f32.partialorder %v12073_v7, inf  ;;  %v13030_v62 = vand.u32 2147483648, %v13018_v17  ;;  %v3078_v34 = vsel %vm3077_vm7, %v13029_v44, %v13031_v54  ;;  %v4398_v33 = vsel %vm4397_vm12, %v12026_v0, %v4396_v8 }
 0x47c   :  { %v4600_v42 = vmul.f32 %v4599_v5, %v12028_v1  ;;  %v4608_v10 = vmul.f32 %v5959_v53, %v4607_v16  ;;  %v3080_v58 = vand.u32 2147483648, %v13029_v44  ;;  %v4419_v11 = vmul.f32 %v5955_v3, %v4418_v40 }
 0x47d   :  { %v12173_v22 = vsel %vm3067_vm14, %v13030_v62, %v3066_v60  ;;  %v4586_v23 = vsub.f32 1.5, %v4585_v25  ;;  %vm3079_vm5 = vcmp.eq.f32.partialorder %v13029_v44, 0.0  ;;  %v13032_v17 = vand.u32 2147483648, %v11272_v6 }
 0x47e   :  { %vm4591_vm11 = vcmp.eq.f32.partialorder %v12073_v7, 0.0  ;;  %v4609_v62 = vmul.f32 0.5, %v4608_v10  ;;  %v12191_v8 = vsel %vm3079_vm5, %v3080_v58, %v3078_v34  ;;  %v13033_v5 = vand.u32 2147483648, %v11462_v20 }
 0x47f   :  { %v12188_v60 = vsel %vm4039_vm4, %v13032_v17, %v11512_v55  ;;  %v13034_v16 = vand.u32 2147483648, %v11453_v15  ;;  %v4420_v55 = vmul.f32 %v4419_v11, %v12043_v49  ;;  %v4587_v44 = vmul.f32 %v5957_v14, %v4586_v23  ;;  %v13042_v11 = vld [vmem:[#allocation16_spill] sm:$0xff] }
 0x480   :  { %v12198_v3 = vsel %vm4219_vm3, %v13033_v5, %v11695_v13  ;;  %v13035_v40 = vand.u32 2147483648, %v12026_v0  ;;  %v4602_v20 = vsel %vm4601_vm10, %v12028_v1, %v4600_v42  ;;  %v4610_v13 = vsub.f32 1.5, %v4609_v62  ;;  %v13040_v42 = vld [vmem:[#allocation11_spill] sm:$0xff]  ;;  %v13046_v5 = vld [vmem:[#allocation14_spill] sm:$0xff] }
 0x481   :  { %v12205_v6 = vsel %vm4231_vm15, %v13034_v16, %v11684_v57  ;;  %v13036_v54 = vand.u32 2147483648, %v11954_v47  ;;  %vm4423_vm13 = vcmp.eq.f32.partialorder %v12043_v49, 0.0  ;;  %v13037_v57 = vand.u32 2147483648, %v11966_v32 }
 0x482   :  { %v12212_v25 = vsel %vm4399_vm9, %v13035_v40, %v4398_v33  ;;  %v4588_v14 = vmul.f32 %v4587_v44, %v12073_v7  ;;  %vm4603_vm12 = vcmp.eq.f32.partialorder %v12028_v1, 0.0  ;;  %vm4613_vm4 = vcmp.eq.f32.partialorder %v12081_v12, inf }
 0x483   :  { %v12221_v15 = vsel %vm4411_vm8, %v13036_v54, %v4410_v45  ;;  %v12228_v0 = vsel %vm4579_vm1, %v13037_v57, %v4578_v48  ;;  %vm4615_vm15 = vcmp.eq.f32.partialorder %v12081_v12, 0.0  ;;  %v4611_v34 = vmul.f32 %v5959_v53, %v4610_v13  ;;  %v13039_v48 = vld [vmem:[#allocation12_spill] sm:$0xff]  ;;  %v13043_v53 = vld [vmem:[#allocation15_spill] sm:$0xff]  ;;  %v13051_v57 = vld [vmem:[#allocation22_spill] sm:$0xff] }
 0x484   :  { %v4422_v47 = vsel %vm4421_vm2, %v12043_v49, %v4420_v55  ;;  %v13038_v45 = vand.u32 2147483648, %v12028_v1  ;;  %vm4927_vm3 = vcmask 917312   ;;  %v4616_v32 = vand.u32 2147483648, %v12081_v12 }
 0x485   :  { %v13041_v10 = vperm.slane %v13040_v42, %v12958_v39  ;;  %vm4931_vm9 = vcmask 982912   ;;  %v13044_v23 = vperm.slane %v13043_v53, %v6671_v56  ;;  %vm13045_vm10 = vcmask 851712   ;;  %v13056_v42 = vld [vmem:[#allocation26_spill] sm:$0xff] }
 0x486   :  { %v12239_v33 = vsel %vm4603_vm12, %v13038_v45, %v4602_v20  ;;  %v4590_v1 = vsel %vm4589_vm0, %v12073_v7, %v4588_v14  ;;  %v4612_v62 = vmul.f32 %v4611_v34, %v12081_v12  ;;  %vm4935_vm6 = vcmask 1048512   ;;  %v13049_v20 = vld [vmem:[#allocation18_spill] sm:$0xff]  ;;  %v13052_v14 = vld [vmem:[#allocation20_spill] sm:$0xff]  ;;  %vm13063_vm2 = vmmov %vm13045_vm10 }
 0x487   :  { %v4928_v58 = vsel %vm4927_vm3, %v13041_v10, %v13039_v48  ;;  %v4961_v17 = vsel %vm13045_vm10, %v13044_v23, %v13042_v11  ;;  %v13047_v16 = vperm.slane %v13046_v5, %v12958_v39  ;;  %v13048_v44 = vand.u32 2147483648, %v12043_v49  ;;  %v13055_v48 = vld [vmem:[#allocation29_spill] sm:$0xff]  ;;  %vm13074_vm7 = vmmov %vm13063_vm2 }
 0x488   :  { %v13050_v13 = vperm.slane %v13049_v20, %v12956_v4  ;;  %v13053_v34 = vperm.slane %v13052_v14, %v6509_v29  ;;  %vm13054_vm8 = vcmask 786112   ;;  %v13057_v10 = vperm.slane %v13056_v42, %v6524_v41  ;;  %v13072_v42 = vld [vmem:[#allocation30_spill] sm:$0xff]  ;;  %vm13103_vm12 = vmmov %vm13063_vm2 }
 0x489   :  { %v4963_v55 = vsel %vm4927_vm3, %v13047_v16, %v4961_v17  ;;  %v12264_v40 = vsel %vm4423_vm13, %v13048_v44, %v4422_v47  ;;  %vm13058_vm1 = vcmask 720512   ;;  %v4614_v49 = vsel %vm4613_vm4, %v12081_v12, %v4612_v62  ;;  %v13059_v47 = vld [vmem:[#allocation9_spill] sm:$0xff]  ;;  %v13061_v17 = vld [vmem:[#allocation19_spill] sm:$0xff]  ;;  %vm13066_vm14 = vmmov %vm13054_vm8 }
 0x48a   :  { %v4965_v54 = vsel %vm4931_vm9, %v13050_v13, %v4963_v55  ;;  %v4990_v45 = vsel %vm13054_vm8, %v13053_v34, %v13051_v57  ;;  %v5019_v11 = vsel %vm13058_vm1, %v13057_v10, %v13055_v48  ;;  %v13060_v53 = vperm.slane %v13059_v47, %v12956_v4  ;;  %v13064_v55 = vld [vmem:[#allocation25_spill] sm:$0xff]  ;;  %v13070_v34 = vld [vmem:[#allocation24_spill] sm:$0xff]  ;;  %vm13088_vm5 = vmmov %vm13058_vm1 }
 0x48b   :  { %v13062_v5 = vperm.slane %v13061_v17, %v6671_v56  ;;  %v13065_v44 = vperm.slane %v13064_v55, %v6509_v29  ;;  %v13067_v13 = vand.u32 2147483648, %v12073_v7  ;;  %v13068_v57 = vld [vmem:[#allocation13_spill] sm:$0xff]  ;;  %v13073_v10 = vperm.slane %v13072_v42, %v6671_v56  ;;  %v13092_v12 = vld [vmem:[#allocation27_spill] sm:$0xff] }
 0x48c   :  { %v4932_v23 = vsel %vm4931_vm9, %v13060_v53, %v4928_v58  ;;  %v13069_v14 = vperm.slane %v13068_v57, %v12943_v37  ;;  %v13075_v47 = vld [vmem:[#allocation17_spill] sm:$0xff]  ;;  %v13077_v53 = vld [vmem:[#allocation23_spill] sm:$0xff]  ;;  %vm13084_vm0 = vcmask 654912   ;;  %vm13100_vm13 = vcmask 589312  }
 0x48d   :  { %v4992_v16 = vsel %vm13063_vm2, %v13062_v5, %v4990_v45  ;;  %v5021_v20 = vsel %vm13066_vm14, %v13065_v44, %v5019_v11  ;;  %v12299_v62 = vsel %vm4591_vm11, %v13067_v13, %v4590_v1  ;;  %v13071_v45 = vperm.slane %v13070_v34, %v12958_v39  ;;  %v13079_v5 = vld [vmem:[#allocation28_spill] sm:$0xff]  ;;  %v13082_v13 = vld [vmem:[#allocation34_spill] sm:$0xff]  ;;  %vm13096_vm11 = vmmov %vm13054_vm8 }
 0x48e   :  { %v12305_v58 = vsel %vm4935_vm6, %v13069_v14, %v4932_v23  ;;  %v5023_v11 = vsel %vm13074_vm7, %v13073_v10, %v5021_v20  ;;  %v13076_v7 = vperm.slane %v13075_v47, %v12943_v37  ;;  %v13078_v23 = vperm.slane %v13077_v53, %v12956_v4  ;;  %v13081_v44 = vld [vmem:[#allocation36_spill] sm:$0xff]  ;;  %v13090_v47 = vld [vmem:[#allocation21_spill] sm:$0xff]  ;;  %vm13107_vm4 = vmmov %vm13084_vm0 }
 0x48f   :  { %v4994_v48 = vsel %vm4927_vm3, %v13071_v45, %v4992_v16  ;;  %v13080_v55 = vperm.slane %v13079_v5, %v12958_v39  ;;  %v13083_v20 = vperm.slane %v13082_v13, %v12893_v36  ;;  %v13085_v14 = vld [vmem:[#allocation32_spill] sm:$0xff]  ;;  %v13086_v45 = vld [vmem:[#allocation33_spill] sm:$0xff]  ;;  %v13098_v13 = vld [vmem:[#allocation43_spill] sm:$0xff]  ;;  %vm13115_vm10 = vcmask 523712  }
 0x490   :  { %v12319_v1 = vsel %vm4935_vm6, %v13076_v7, %v4965_v54  ;;  %v4996_v17 = vsel %vm4931_vm9, %v13078_v23, %v4994_v48  ;;  %v12336_v54 = vsel %vm4615_vm15, %v4616_v32, %v4614_v49  ;;  %v13087_v48 = vperm.slane %v13086_v45, %v6524_v41  ;;  %v13089_v10 = vld [vmem:[#allocation40_spill] sm:$0xff]  ;;  %v13094_v23 = vld [vmem:[#allocation38_spill] sm:$0xff]  ;;  %v13101_v45 = vld [vmem:[#allocation37_spill] sm:$0xff] }
 0x491   :  { %v5025_v16 = vsel %vm4927_vm3, %v13080_v55, %v5023_v11  ;;  %v5048_v57 = vsel %vm13084_vm0, %v13083_v20, %v13081_v44  ;;  %v5057_v11 = vperm.slane %v13089_v10, %v12956_v4  ;;  %v13091_v7 = vperm.slane %v13090_v47, %v12943_v37  ;;  %v13097_v44 = vld [vmem:[#allocation44_spill] sm:$0xff]  ;;  %v13104_v10 = vld [vmem:[#allocation39_spill] sm:$0xff]  ;;  %v13105_v47 = vld [vmem:[#allocation42_spill] sm:$0xff] }
 0x492   :  { %v5050_v42 = vsel %vm13088_vm5, %v13087_v48, %v5048_v57  ;;  %v13093_v32 = vperm.slane %v13092_v12, %v12956_v4  ;;  %v13095_v5 = vperm.slane %v13094_v23, %v6509_v29  ;;  %v13099_v20 = vperm.slane %v13098_v13, %v6356_v19  ;;  %v13109_v23 = vld [vmem:[#allocation47_spill] sm:$0xff]  ;;  %vm13111_vm15 = vmmov %vm13058_vm1  ;;  %v13123_v34 = vld [vmem:[#allocation61_spill] sm:$0xff] }
 0x493   :  { %v12350_v53 = vsel %vm4935_vm6, %v13091_v7, %v4996_v17  ;;  %v13102_v17 = vperm.slane %v13101_v45, %v6671_v56  ;;  %v13106_v7 = vperm.slane %v13105_v47, %v12893_v36  ;;  %v5088_v13 = vperm.slane %v11897_v26, %v12956_v4  ;;  %v13113_v45 = vld [vmem:[#allocation55_spill] sm:$0xff]  ;;  %v13120_v26 = vld [vmem:[#allocation53_spill] sm:$0xff]  ;;  %vm13122_vm1 = vmmov %vm13100_vm13 }
 0x494   :  { %v12356_v49 = vsel %vm4931_vm9, %v13093_v32, %v5025_v16  ;;  %v5052_v55 = vsel %vm13096_vm11, %v13095_v5, %v5050_v42  ;;  %v5077_v57 = vsel %vm13100_vm13, %v13099_v20, %v13097_v44  ;;  %v13108_v42 = vld [vmem:[#allocation50_spill] sm:$0xff]  ;;  %v13110_v5 = vperm.slane %v13109_v23, %v6524_v41  ;;  %v13112_v20 = vld [vmem:[#allocation5_spill] sm:$0xff]  ;;  %v13116_v47 = vld [vmem:[#allocation35_spill] sm:$0xff] }
 0x495   :  { %v5054_v48 = vsel %vm13103_vm12, %v13102_v17, %v5052_v55  ;;  %v5079_v12 = vsel %vm13107_vm4, %v13106_v7, %v5077_v57  ;;  %v5086_v32 = vperm.slane %v13108_v42, %v12958_v39  ;;  %v13114_v17 = vperm.slane %v13113_v45, %v12885_v24  ;;  %v13118_v23 = vld [vmem:[#allocation46_spill] sm:$0xff]  ;;  %vm13128_vm14 = vmmov %vm13084_vm0 }
 0x496   :  { %v5081_v44 = vsel %vm13111_vm15, %v13110_v5, %v5079_v12  ;;  %v13117_v7 = vperm.slane %v13116_v47, %v12958_v39  ;;  %v13119_v12 = vperm.slane %v13118_v23, %v6509_v29  ;;  %v13121_v16 = vperm.slane %v13120_v26, %v6356_v19  ;;  %vm13131_vm7 = vmmov %vm13088_vm5  ;;  %v13132_v26 = vld [vmem:[#allocation56_spill] sm:$0xff] }
 0x497   :  { %v5106_v57 = vsel %vm13115_vm10, %v13114_v17, %v13112_v20  ;;  %v5115_v45 = vperm.slane %v13123_v34, %v6671_v56  ;;  %v13124_v17 = vld [vmem:[#allocation45_spill] sm:$0xff]  ;;  %vm13135_vm0 = vcmask 458112   ;;  %vm13138_vm5 = vmmov %vm13054_vm8 }
 0x498   :  { %v5056_v42 = vsel %vm4927_vm3, %v13117_v7, %v5054_v48  ;;  %v5083_v5 = vsel %vm13054_vm8, %v13119_v12, %v5081_v44  ;;  %v5108_v55 = vsel %vm13122_vm1, %v13121_v16, %v5106_v57  ;;  %v13125_v47 = vperm.slane %v13124_v17, %v6671_v56  ;;  %v13126_v7 = vld [vmem:[#allocation59_spill] sm:$0xff]  ;;  %v13129_v57 = vld [vmem:[#allocation58_spill] sm:$0xff]  ;;  %vm13141_vm11 = vmmov %vm13115_vm10 }
 0x499   :  { %v12407_v20 = vsel %vm4931_vm9, %v5057_v11, %v5056_v42  ;;  %v13127_v23 = vperm.slane %v13126_v7, %v12893_v36  ;;  %v5117_v12 = vperm.slane %v12066_v28, %v12958_v39  ;;  %v13130_v34 = vperm.slane %v13129_v57, %v6524_v41  ;;  %vm13143_vm13 = vmmov %vm13063_vm2 }
 0x49a   :  { %v5085_v48 = vsel %vm13063_vm2, %v13125_v47, %v5083_v5  ;;  %v5119_v42 = vperm.slane %v12118_v59, %v12956_v4  ;;  %v13133_v5 = vld [vmem:[#allocation68_spill] sm:$0xff]  ;;  %v13142_v59 = vld [vmem:[#allocation75_spill] sm:$0xff]  ;;  %vm13146_vm12 = vmmov %vm13122_vm1 }
 0x49b   :  { %v5110_v44 = vsel %vm13128_vm14, %v13127_v23, %v5108_v55  ;;  %v5087_v16 = vsel %vm4927_vm3, %v5086_v32, %v5085_v48  ;;  %v13134_v17 = vperm.slane %v13133_v5, %v6382_v9  ;;  %v13136_v55 = vld [vmem:[#allocation57_spill] sm:$0xff]  ;;  %v5121_v32 = vperm.slane %v12142_v2, %v12943_v37  ;;  %v13139_v48 = vld [vmem:[#allocation64_spill] sm:$0xff]  ;;  %vm13151_vm15 = vmmov %vm13131_vm7 }
 0x49c   :  { %v5112_v11 = vsel %vm13131_vm7, %v13130_v34, %v5110_v44  ;;  %v13137_v7 = vperm.slane %v13136_v55, %v6509_v29  ;;  %v13140_v23 = vperm.slane %v13139_v48, %v12885_v24  ;;  %v5144_v57 = vperm.slane %v13142_v59, %v6509_v29  ;;  %v13147_v55 = vld [vmem:[#allocation70_spill] sm:$0xff]  ;;  %vm13155_vm10 = vmmov %vm13063_vm2 }
 0x49d   :  { %v5135_v47 = vsel %vm13135_vm0, %v13134_v17, %v13132_v26  ;;  %v5089_v9 = vsel %vm4931_vm9, %v5088_v13, %v5087_v16  ;;  %v13144_v26 = vld [vmem:[#allocation72_spill] sm:$0xff]  ;;  %v5146_v2 = vperm.slane %v12149_v18, %v6671_v56  ;;  %v5148_v13 = vperm.slane %v12156_v63, %v12958_v39  ;;  %vm13156_vm8 = vmmov %vm13138_vm5 }
 0x49e   :  { %v5114_v28 = vsel %vm13138_vm5, %v13137_v7, %v5112_v11  ;;  %v5137_v44 = vsel %vm13141_vm11, %v13140_v23, %v5135_v47  ;;  %v13145_v5 = vperm.slane %v13144_v26, %v6356_v19  ;;  %v13148_v47 = vperm.slane %v13147_v55, %v12893_v36  ;;  %v13152_v23 = vld [vmem:[#allocation71_spill] sm:$0xff]  ;;  %vm13162_vm1 = vmmov %vm13063_vm2 }
 0x49f   :  { %v5116_v34 = vsel %vm13143_vm13, %v5115_v45, %v5114_v28  ;;  %v5150_v45 = vperm.slane %v12173_v22, %v12956_v4  ;;  %v13149_v28 = vld [vmem:[#allocation69_spill] sm:$0xff]  ;;  %vm13170_vm2 = vmmov %vm13162_vm1 }
 0x4a0   :  { %v5139_v11 = vsel %vm13146_vm12, %v13145_v5, %v5137_v44  ;;  %v5118_v17 = vsel %vm4927_vm3, %v5117_v12, %v5116_v34  ;;  %v13150_v48 = vperm.slane %v13149_v28, %v6524_v41  ;;  %v5152_v12 = vperm.slane %v12191_v8, %v12943_v37  ;;  %v13153_v44 = vld [vmem:[#allocation79_spill] sm:$0xff]  ;;  %vm13182_vm14 = vmmov %vm13138_vm5 }
 0x4a1   :  { %v5141_v7 = vsel %vm13107_vm4, %v13148_v47, %v5139_v11  ;;  %v5120_v16 = vsel %vm4931_vm9, %v5119_v42, %v5118_v17  ;;  %v13154_v59 = vperm.slane %v13153_v44, %v6671_v56  ;;  %v13157_v42 = vld [vmem:[#allocation81_spill] sm:$0xff]  ;;  %v13159_v11 = vld [vmem:[#allocation78_spill] sm:$0xff]  ;;  %v13160_v17 = vld [vmem:[#allocation84_spill] sm:$0xff] }
 0x4a2   :  { %v5143_v18 = vsel %vm13151_vm15, %v13150_v48, %v5141_v7  ;;  %v12473_v63 = vsel %vm4935_vm6, %v5121_v32, %v5120_v16  ;;  %v13158_v26 = vperm.slane %v13157_v42, %v12958_v39  ;;  %v13161_v8 = vperm.slane %v13160_v17, %v12958_v39  ;;  %v13163_v7 = vld [vmem:[#allocation10_spill] sm:$0xff]  ;;  %v13165_v16 = vld [vmem:[#allocation83_spill] sm:$0xff]  ;;  %v13171_v42 = vld [vmem:[#allocation80_spill] sm:$0xff] }
 0x4a3   :  { %v5178_v34 = vsel %vm13155_vm10, %v13154_v59, %v13152_v23  ;;  %v5145_v22 = vsel %vm13156_vm8, %v5144_v57, %v5143_v18  ;;  %v13164_v28 = vperm.slane %v13163_v7, %v12956_v4  ;;  %v13166_v57 = vperm.slane %v13165_v16, %v12956_v4  ;;  %v13167_v18 = vld [vmem:[#allocation82_spill] sm:$0xff]  ;;  %v13175_v17 = vld [vmem:[#allocation8_spill] sm:$0xff]  ;;  %v13180_v16 = vld [vmem:[#allocation91_spill] sm:$0xff] }
 0x4a4   :  { %v5180_v5 = vsel %vm4927_vm3, %v13158_v26, %v5178_v34  ;;  %v5211_v55 = vsel %vm4927_vm3, %v13161_v8, %v13159_v11  ;;  %v5147_v47 = vsel %vm13162_vm1, %v5146_v2, %v5145_v22  ;;  %v13168_v23 = vld [vmem:[#allocation86_spill] sm:$0xff]  ;;  %v13172_v2 = vperm.slane %v13171_v42, %v12943_v37  ;;  %v13173_v26 = vld [vmem:[#allocation85_spill] sm:$0xff]  ;;  %vm13188_vm7 = vmmov %vm13162_vm1 }
 0x4a5   :  { %v5182_v32 = vsel %vm4931_vm9, %v13164_v28, %v5180_v5  ;;  %v5213_v48 = vsel %vm4931_vm9, %v13166_v57, %v5211_v55  ;;  %v13169_v44 = vperm.slane %v13168_v23, %v6671_v56  ;;  %v5149_v34 = vsel %vm4927_vm3, %v5148_v13, %v5147_v47  ;;  %v13177_v13 = vld [vmem:[#allocation88_spill] sm:$0xff]  ;;  %v13186_v42 = vld [vmem:[#allocation89_spill] sm:$0xff]  ;;  %vm13192_vm0 = vmmov %vm13151_vm15 }
 0x4a6   :  { %v12504_v22 = vsel %vm4935_vm6, %v13172_v2, %v5182_v32  ;;  %v13174_v5 = vperm.slane %v13173_v26, %v12943_v37  ;;  %v13176_v8 = vperm.slane %v13175_v17, %v12958_v39  ;;  %v5151_v7 = vsel %vm4931_vm9, %v5150_v45, %v5149_v34  ;;  %v13179_v32 = vld [vmem:[#allocation7_spill] sm:$0xff]  ;;  %v13190_v17 = vld [vmem:[#allocation96_spill] sm:$0xff]  ;;  %vm13202_vm11 = vmmov %vm13162_vm1 }
 0x4a7   :  { %v5240_v59 = vsel %vm13170_vm2, %v13169_v44, %v13167_v18  ;;  %v13178_v47 = vperm.slane %v13177_v13, %v12956_v4  ;;  %v13181_v57 = vperm.slane %v13180_v16, %v6509_v29  ;;  %v12529_v44 = vsel %vm4935_vm6, %v5152_v12, %v5151_v7  ;;  %v13193_v13 = vld [vmem:[#allocation93_spill] sm:$0xff]  ;;  %v13197_v16 = vld [vmem:[#allocation100_spill] sm:$0xff]  ;;  %vm13206_vm13 = vmmov %vm13107_vm4 }
 0x4a8   :  { %v12510_v11 = vsel %vm4935_vm6, %v13174_v5, %v5213_v48  ;;  %v5242_v55 = vsel %vm4927_vm3, %v13176_v8, %v5240_v59  ;;  %v13183_v48 = vld [vmem:[#allocation94_spill] sm:$0xff]  ;;  %v13184_v59 = vld [vmem:[#allocation87_spill] sm:$0xff]  ;;  %v13187_v2 = vperm.slane %v13186_v42, %v6671_v56  ;;  %v13191_v8 = vperm.slane %v13190_v17, %v6524_v41  ;;  %vm13212_vm12 = vmmov %vm13192_vm0 }
 0x4a9   :  { %v5244_v28 = vsel %vm4931_vm9, %v13178_v47, %v5242_v55  ;;  %v5269_v18 = vsel %vm13182_vm14, %v13181_v57, %v13179_v32  ;;  %v5276_v23 = vperm.slane %v13183_v48, %v12943_v37  ;;  %v13185_v45 = vperm.slane %v13184_v59, %v12943_v37  ;;  %v13189_v5 = vld [vmem:[#allocation90_spill] sm:$0xff]  ;;  %v13195_v47 = vld [vmem:[#allocation95_spill] sm:$0xff]  ;;  %v13198_v48 = vld [vmem:[#allocation92_spill] sm:$0xff] }
 0x4aa   :  { %v5271_v26 = vsel %vm13188_vm7, %v13187_v2, %v5269_v18  ;;  %v5298_v55 = vsel %vm13192_vm0, %v13191_v8, %v13189_v5  ;;  %v13194_v12 = vperm.slane %v13193_v13, %v12958_v39  ;;  %v13196_v32 = vperm.slane %v13195_v47, %v6509_v29  ;;  %v13200_v42 = vld [vmem:[#allocation99_spill] sm:$0xff]  ;;  %v13203_v5 = vld [vmem:[#allocation97_spill] sm:$0xff]  ;;  %v13204_v17 = vld [vmem:[#allocation102_spill] sm:$0xff] }
 0x4ab   :  { %v5246_v34 = vsel %vm4935_vm6, %v13185_v45, %v5244_v28  ;;  %v5305_v57 = vperm.slane %v13197_v16, %v12956_v4  ;;  %v5307_v18 = vperm.slane %v12188_v60, %v12943_v37  ;;  %v13199_v59 = vperm.slane %v13198_v48, %v12956_v4  ;;  %v13207_v13 = vld [vmem:[#allocation31_spill] sm:$0xff]  ;;  %v13208_v47 = vld [vmem:[#allocation98_spill] sm:$0xff]  ;;  %v13210_v16 = vld [vmem:[#allocation101_spill] sm:$0xff] }
 0x4ac   :  { %v5273_v7 = vsel %vm4927_vm3, %v13194_v12, %v5271_v26  ;;  %v5300_v28 = vsel %vm13138_vm5, %v13196_v32, %v5298_v55  ;;  %v13201_v2 = vperm.slane %v13200_v42, %v6671_v56  ;;  %v13205_v8 = vperm.slane %v13204_v17, %v12893_v36  ;;  %vm13215_vm4 = vmmov %vm13138_vm5 }
 0x4ad   :  { %v5275_v45 = vsel %vm4931_vm9, %v13199_v59, %v5273_v7  ;;  %v5334_v12 = vperm.slane %v13207_v13, %v12958_v39  ;;  %v13209_v32 = vperm.slane %v13208_v47, %v12958_v39  ;;  %v13211_v48 = vperm.slane %v13210_v16, %v6524_v41  ;;  %vm13220_vm10 = vmmov %vm13162_vm1 }
 0x4ae   :  { %v5302_v26 = vsel %vm13202_vm11, %v13201_v2, %v5300_v28  ;;  %v5327_v55 = vsel %vm13206_vm13, %v13205_v8, %v13203_v5  ;;  %v5277_v60 = vsel %vm4935_vm6, %v5276_v23, %v5275_v45  ;;  %v5336_v59 = vperm.slane %v12198_v3, %v12956_v4  ;;  %v13213_v2 = vld [vmem:[#allocation104_spill] sm:$0xff]  ;;  %vm13222_vm8 = vmmov %vm13206_vm13 }
 0x4af   :  { %v5304_v7 = vsel %vm4927_vm3, %v13209_v32, %v5302_v26  ;;  %v5329_v28 = vsel %vm13212_vm12, %v13211_v48, %v5327_v55  ;;  %v13214_v5 = vperm.slane %v13213_v2, %v6509_v29  ;;  %v5338_v45 = vperm.slane %v12205_v6, %v12943_v37  ;;  %v13218_v55 = vld [vmem:[#allocation103_spill] sm:$0xff]  ;;  %vm13225_vm1 = vmmov %vm13192_vm0 }
 0x4b0   :  { %v5306_v42 = vsel %vm4931_vm9, %v5305_v57, %v5304_v7  ;;  %v13216_v26 = vperm.slane %v11876_v35, %v6356_v19  ;;  %vm13217_vm15 = vcmask 589312   ;;  %v13219_v3 = vperm.slane %v13218_v55, %v6671_v56  ;;  %vm13231_vm14 = vmmov %vm13215_vm4 }
 0x4b1   :  { %v5331_v23 = vsel %vm13215_vm4, %v13214_v5, %v5329_v28  ;;  %v5308_v8 = vsel %vm4935_vm6, %v5307_v18, %v5306_v42  ;;  %v13221_v13 = vperm.slane %v11979_v43, %v12893_v36  ;;  %v5363_v6 = vperm.slane %v12104_v52, %v6671_v56  ;;  %vm13233_vm7 = vmmov %vm13217_vm15 }
 0x4b2   :  { %v5356_v17 = vsel %vm13217_vm15, %v13216_v26, %v11996_v30  ;;  %v5333_v57 = vsel %vm13220_vm10, %v13219_v3, %v5331_v23  ;;  %v13223_v35 = vperm.slane %v13085_v14, %v12943_v37  ;;  %v13224_v32 = vperm.slane %v12038_v50, %v6524_v41  ;;  %vm13234_vm0 = vmmov %vm13220_vm10 }
 0x4b3   :  { %v5358_v47 = vsel %vm13222_vm8, %v13221_v13, %v5356_v17  ;;  %v5335_v18 = vsel %vm4927_vm3, %v5334_v12, %v5333_v57  ;;  %v5365_v43 = vperm.slane %v12212_v25, %v12958_v39  ;;  %v13226_v52 = vperm.slane %v13104_v10, %v12943_v37  ;;  %vm13236_vm5 = vmmov %vm13222_vm8 }
 0x4b4   :  { %v5029_v30 = vsel %vm4935_vm6, %v13223_v35, %v12356_v49  ;;  %v5360_v7 = vsel %vm13225_vm1, %v13224_v32, %v5358_v47  ;;  %v13227_v14 = vperm.slane %v11926_v38, %v12943_v37  ;;  %v5337_v12 = vsel %vm4931_vm9, %v5336_v59, %v5335_v18  ;;  %vm13239_vm11 = vmmov %vm13225_vm1 }
 0x4b5   :  { %v5060_v16 = vsel %vm4935_vm6, %v13226_v52, %v12407_v20  ;;  %v13228_v50 = vperm.slane %v11988_v61, %v12885_v24  ;;  %vm13229_vm2 = vcmask 523712   ;;  %v5339_v25 = vsel %vm4935_vm6, %v5338_v45, %v5337_v12  ;;  %vm13240_vm13 = vmmov %vm13215_vm4 }
 0x4b6   :  { %v5091_v49 = vsel %vm4935_vm6, %v13227_v14, %v5089_v9  ;;  %v13230_v10 = vperm.slane %v12006_v27, %v6509_v29  ;;  %v13232_v38 = vperm.slane %v11972_v51, %v6356_v19  ;;  %v5392_v28 = vperm.slane %v12091_v46, %v6509_v29  ;;  %v13237_v46 = vld [vmem:[#allocation41_spill] sm:$0xff]  ;;  %vm13241_vm15 = vmmov %vm13234_vm0 }
 0x4b7   :  { %v5385_v48 = vsel %vm13229_vm2, %v13228_v50, %v11938_v31  ;;  %v13235_v24 = vperm.slane %v12032_v21, %v12893_v36  ;;  %v5394_v61 = vperm.slane %v12228_v0, %v6671_v56  ;;  %v5396_v27 = vperm.slane %v12299_v62, %v12958_v39 }
 0x4b8   :  { %v5362_v20 = vsel %vm13231_vm14, %v13230_v10, %v5360_v7  ;;  %v5387_v9 = vsel %vm13233_vm7, %v13232_v38, %v5385_v48  ;;  %v5367_v51 = vperm.slane %v12221_v15, %v12956_v4  ;;  %v5369_v29 = vperm.slane %v12264_v40, %v12943_v37 }
 0x4b9   :  { %v5364_v59 = vsel %vm13234_vm0, %v5363_v6, %v5362_v20  ;;  %v5389_v31 = vsel %vm13236_vm5, %v13235_v24, %v5387_v9  ;;  %v13238_v42 = vperm.slane %v13237_v46, %v6524_v41  ;;  %v5398_v56 = vperm.slane %v12239_v33, %v12956_v4 }
 0x4ba   :  { %v5366_v19 = vsel %vm4927_vm3, %v5365_v43, %v5364_v59  ;;  %vm5402_vm12 = vcmask 1041409   ;;  %vm5404_vm4 = vcmask 1042434   ;;  %vm5406_vm10 = vcmask 1043459  }
 0x4bb   :  { %v5391_v36 = vsel %vm13239_vm11, %v13238_v42, %v5389_v31  ;;  %v5403_v15 = vsel %vm5402_vm12, %v12319_v1, %v12305_v58  ;;  %vm5408_vm8 = vcmask 1044484   ;;  %v5400_v41 = vperm.slane %v12336_v54, %v12943_v37 }
 0x4bc   :  { %v5393_v21 = vsel %vm13240_vm13, %v5392_v28, %v5391_v36  ;;  %v5405_v40 = vsel %vm5404_vm4, %v12350_v53, %v5403_v15  ;;  %vm5410_vm1 = vcmask 1045509   ;;  %vm5412_vm2 = vcmask 1046534  }
 0x4bd   :  { %v5395_v39 = vsel %vm13241_vm15, %v5394_v61, %v5393_v21  ;;  %v5407_v62 = vsel %vm5406_vm10, %v5029_v30, %v5405_v40  ;;  %v5416_v4 = vsel %vm5402_vm12, %v12510_v11, %v12504_v22  ;;  %v5368_v33 = vsel %vm4931_vm9, %v5367_v51, %v5366_v19 }
 0x4be   :  { %v5397_v0 = vsel %vm4927_vm3, %v5396_v27, %v5395_v39  ;;  %v5409_v58 = vsel %vm5408_vm8, %v5060_v16, %v5407_v62  ;;  %vm5414_vm14 = vcmask 1047559   ;;  %v5417_v1 = vsel %vm5404_vm4, %v5246_v34, %v5416_v4 }
 0x4bf   :  { %v5370_v37 = vsel %vm4935_vm6, %v5369_v29, %v5368_v33  ;;  %v5399_v54 = vsel %vm4931_vm9, %v5398_v56, %v5397_v0  ;;  %v5411_v53 = vsel %vm5410_vm1, %v5091_v49, %v5409_v58  ;;  %v5418_v22 = vsel %vm5406_vm10, %v5277_v60, %v5417_v1 }
 0x4c0   :  { %v5401_v11 = vsel %vm4935_vm6, %v5400_v41, %v5399_v54  ;;  %v5413_v2 = vsel %vm5412_vm2, %v12473_v63, %v5411_v53  ;;  %v5419_v34 = vsel %vm5408_vm8, %v5308_v8, %v5418_v22 }
 0x4c1   :  { %v5415_v5 = vsel %vm5414_vm14, %v12529_v44, %v5413_v2  ;;  %v5420_v23 = vsel %vm5410_vm1, %v5339_v25, %v5419_v34 }
 0x4c2   :  { %v5421_v45 = vsel %vm5412_vm2, %v5370_v37, %v5420_v23  ;;  %5425 = vst [vmem:[#allocation2] sm:$0xff] %v5415_v5 }
 0x4c3   :  { %v5422_v26 = vsel %vm5414_vm14, %v5401_v11, %v5421_v45 }
 0x4c4   :  { %5426 = vst [vmem:[#allocation2 + $0x8] sm:$0xff] %v5422_v26 }
 0x4c5   :  { %5439 = dma.vmem_to_hbm [thread:$0]  %s5432_s25, 256, %s5434_s28, [#allocation3], %s5987_s1, %s5987_s1, %s5988_s29  }
 0x4c6   :  { %5984 = dma.done.wait [#allocation3], 256  }
 0x4c7   :  { %5985 = vsyncadd [#allocation3], 4294967040 }
 0x4c8   :  { %5444 = vsyncpa [#allocation3], 1 }

</bundles_post_ra>
